<compile_context>
chip_gen: v5e
topology: v5e:2x2
jax: 0.10.0
libtpu: 0.0.40
codegen_flags: <defaults>
</compile_context>

<pallas_src>
import functools

import numpy as np
import jax
import jax.numpy as jnp
from jax.experimental import pallas as pl
from jax.experimental.pallas import tpu as pltpu

EPS = 1e-4                     # eps used by edm2-style normalize()
INV_MP_SILU = 1.0 / 0.596      # mp_silu(x) = silu(x) / 0.596


def _reflect_w_taps(v, W):
    """Width taps (dw = 0, 1, 2) of a 3-wide conv with 1-px reflect padding.

    v: (..., W, C).  Tap dw at output col w reads input col w-1+dw, with
    reflection at the edges (col -1 -> col 1, col W -> col W-2).  Built as
    f32 values (sublane concat) so no masked sub-word stores are needed.
    """
    left = jnp.concatenate([v[..., 1:2, :], v[..., 0:W - 1, :]], axis=-2)
    right = jnp.concatenate([v[..., 1:W, :], v[..., W - 2:W - 1, :]], axis=-2)
    return left, v, right


def _block_kernel(*refs, B, H, W, Th, Cin, Cmid, Cout, wa, wb, clip_act,
                  has_skip, inv_sqrt_cin, mxu_dtype, approx_recip):
    if has_skip:
        (x_ref, c_ref, w0_ref, w1_ref, wskip_ref, out_ref,
         col0_ref, col1_ref) = refs
    else:
        x_ref, c_ref, w0_ref, w1_ref, out_ref, col0_ref, col1_ref = refs
        wskip_ref = None

    hb = pl.program_id(1)                      # row-band index
    r0 = pl.multiple_of(hb * Th, Th)           # first output row of this band

    # ---- band slice of the (2+2 zero-row padded) input; pixel-norm + mp_silu -
    # x_ref holds (B, H+4, W, Cin); padded row q <-> image row q-2, so the band
    # [r0, r0+Th) needs padded rows [r0, r0+Th+4) (2-row halo each side).
    xb = x_ref[:, pl.ds(r0, Th + 4), :, :].astype(jnp.float32)
    ss = jnp.sum(xb * xb, axis=-1, keepdims=True)
    denom = EPS + jnp.sqrt(ss) * inv_sqrt_cin          # normalize(x, dim=1)
    nx = xb * pl.reciprocal(denom, approx=approx_recip)
    sx = nx * jax.nn.sigmoid(nx) * INV_MP_SILU         # mp_silu(normalize(x))

    # ---- conv_res0: ONE (M0, 9*Cin) @ (9*Cin, Cmid) MXU matmul ---------------
    # im2col staged directly in mxu_dtype; all scratch stores are full on the
    # sublane dim (lane-masked only).
    sx_taps = [t.astype(mxu_dtype) for t in _reflect_w_taps(sx, W)]
    for dh in range(3):
        for dw in range(3):
            k = dh * 3 + dw
            col0_ref[:, :, :, k * Cin:(k + 1) * Cin] = \
                sx_taps[dw][:, dh:dh + Th + 2, :, :]
    M0 = B * (Th + 2) * W
    y0 = jnp.dot(col0_ref[...].reshape(M0, 9 * Cin), w0_ref[...],
                 preferred_element_type=jnp.float32)            # (M0, Cmid)

    # ---- emb modulation (c = emb_linear(emb)*gain + 1, precomputed) ----------
    c = c_ref[...].astype(jnp.float32)[:, :, None, :]           # (B,1,1,Cmid)
    y0 = y0.reshape(B, Th + 2, W, Cmid) * c
    y = y0 * jax.nn.sigmoid(y0) * INV_MP_SILU                    # mp_silu(y*c)

    # conv_res1's zero height padding: extended-band rows that fall outside
    # [0, H) are zeroed (only ever hits the first / last band).
    j = jax.lax.broadcasted_iota(jnp.int32, (Th + 2, 1), 0)
    h_ext = r0 - 1 + j
    row_ok = jnp.logical_and(h_ext >= 0, h_ext < H)
    y = jnp.where(row_ok[None, :, :, None], y, 0.0)

    # ---- conv_res1: ONE (M1, 9*Cmid) @ (9*Cmid, Cout) MXU matmul -------------
    y_taps = [t.astype(mxu_dtype) for t in _reflect_w_taps(y, W)]
    for dh in range(3):
        for dw in range(3):
            k = dh * 3 + dw
            col1_ref[:, :, :, k * Cmid:(k + 1) * Cmid] = \
                y_taps[dw][:, dh:dh + Th, :, :]
    M1 = B * Th * W
    y1 = jnp.dot(col1_ref[...].reshape(M1, 9 * Cmid), w1_ref[...],
                 preferred_element_type=jnp.float32)             # (M1, Cout)

    # ---- skip path: 1x1 conv on normalize(x) (identity when conv_skip=None) --
    nx_int = nx[:, 2:Th + 2, :, :]                               # (B, Th, W, Cin)
    if has_skip:
        skip = jnp.dot(nx_int.reshape(M1, Cin).astype(mxu_dtype), wskip_ref[...],
                       preferred_element_type=jnp.float32)
    else:
        skip = nx_int.reshape(M1, Cout)

    # ---- mp_sum + clip, single lane-dense (W*Cout)-wide store -----------------
    out = jnp.clip(wa * skip + wb * y1, -clip_act, clip_act)
    out4 = out.reshape(B, Th, W, Cout)
    packed = jnp.concatenate([out4[:, :, wi, :] for wi in range(W)], axis=-1)
    out_ref[...] = packed[:, None].astype(out_ref.dtype)         # (B,1,Th,W*Cout)


def _mp_weight(w, gain=1.0):
    """MPConv2D_E training-mode weight: normalize(w, dim=1) * gain / sqrt(fan_in)."""
    w = w.astype(jnp.float32)
    norm = jnp.sqrt(jnp.sum(w * w, axis=1, keepdims=True))
    norm = EPS + norm * (1.0 / np.sqrt(w.shape[1]))      # alpha = 1/sqrt(I)
    w = w / norm
    fan_in = int(np.prod(w.shape[1:]))                   # w[0].numel()
    return w * (gain / np.sqrt(fan_in))


def _pick_tiles(N, H, W, target_rows=1024):
    """Batch block B (keep the batch grid >= 2) and band height Th (divisor of H)."""
    B = 1
    for d in range(1, N + 1):
        if N % d == 0 and N // d >= 2:
            B = d
    cands = [d for d in range(1, H + 1) if H % d == 0 and B * d * W <= target_rows]
    if not cands:
        cands = [1]
    two_plus = [d for d in cands if H // d >= 2]          # prefer >= 2 bands
    Th = max(two_plus) if two_plus else max(cands)
    return B, Th


def block_forward(x_nchw, emb, params, *, res_balance=0.3, clip_act=256.0,
                  mxu_dtype=jnp.bfloat16, approx_recip=True):
    """x_nchw: (N, Cin, H, W) float32;  emb: (N, E, 1, 1) float32."""
    N, Cin, H, W = x_nchw.shape

    w_res0 = _mp_weight(params["conv_res0"])                 # (Cmid, Cin, 3, 3)
    w_res1 = _mp_weight(params["conv_res1"])                 # (Cout, Cmid, 3, 3)
    Cmid, Cout = int(w_res0.shape[0]), int(w_res1.shape[0])
    has_skip = params.get("conv_skip", None) is not None
    if not has_skip:
        assert Cin == Cout, "identity skip path requires in_channels == out_channels"

    # (O, I, 3, 3) -> (9*I, O): row k*I+ci is tap k = dh*3+dw, input channel ci.
    w0 = jnp.transpose(w_res0, (2, 3, 1, 0)).reshape(9 * Cin, Cmid).astype(mxu_dtype)
    w1 = jnp.transpose(w_res1, (2, 3, 1, 0)).reshape(9 * Cmid, Cout).astype(mxu_dtype)

    # Hoisted emb modulation: one tiny XLA GEMM for the whole batch.
    w_emb = _mp_weight(params["emb_linear"], gain=params["emb_gain"])   # (Cmid,E,1,1)
    E = w_emb.shape[1]
    c_all = emb.reshape(N, E).astype(jnp.float32) @ w_emb.reshape(Cmid, E).T + 1.0
    c_all = c_all.reshape(N, 1, Cmid)     # (N,1,Cmid): tiling-legal for any B

    # resample_2d(mode='keep') is the identity.  Height gets 2 zero rows per
    # side (conv_res0's zero pad + band halo); width reflect is in the kernel.
    x = jnp.transpose(x_nchw, (0, 2, 3, 1)).astype(jnp.float32)         # NHWC
    x_pad = jnp.pad(x, ((0, 0), (2, 2), (0, 0), (0, 0)))                # (N,H+4,W,Cin)

    inputs = [x_pad, c_all, w0, w1]
    if has_skip:
        w_skip = jnp.transpose(_mp_weight(params["conv_skip"]).reshape(Cout, Cin))
        inputs.append(w_skip.astype(mxu_dtype))

    B, Th = _pick_tiles(N, H, W)
    n_bands = H // Th
    assert N % B == 0 and H % Th == 0

    t = float(res_balance)
    inv = 1.0 / float(np.sqrt((1.0 - t) ** 2 + t ** 2))
    kernel = functools.partial(
        _block_kernel, B=B, H=H, W=W, Th=Th, Cin=Cin, Cmid=Cmid, Cout=Cout,
        wa=(1.0 - t) * inv, wb=t * inv, clip_act=float(clip_act),
        has_skip=has_skip, inv_sqrt_cin=float(1.0 / np.sqrt(Cin)),
        mxu_dtype=mxu_dtype, approx_recip=approx_recip)

    # VMEM budget: double-buffered activations/output + single-buffered weights
    # + bf16 im2col scratches, plus headroom; capped at 64 MiB (v7x per-core).
    nb = int(jnp.dtype(mxu_dtype).itemsize)
    est = (2 * B * (H + 4) * W * Cin * 4 + 2 * B * Cmid * 4
           + (9 * Cin * Cmid + 9 * Cmid * Cout + (Cin * Cout if has_skip else 0)) * nb
           + 2 * B * Th * W * Cout * 4
           + B * (Th + 2) * W * 9 * Cin * nb
           + B * Th * W * 9 * Cmid * nb)
    vmem_limit = int(min(64 << 20, max(24 << 20, 2 * est + (8 << 20))))

    def build(buffered_weights):
        wkw = {"pipeline_mode": pl.Buffered(1)} if buffered_weights else {}
        in_specs = [
            pl.BlockSpec((B, H + 4, W, Cin), lambda n, hb: (n, 0, 0, 0)),
            pl.BlockSpec((B, 1, Cmid), lambda n, hb: (n, 0, 0)),
            pl.BlockSpec((9 * Cin, Cmid), lambda n, hb: (0, 0), **wkw),
            pl.BlockSpec((9 * Cmid, Cout), lambda n, hb: (0, 0), **wkw),
        ]
        if has_skip:
            in_specs.append(pl.BlockSpec((Cin, Cout), lambda n, hb: (0, 0), **wkw))
        return pl.pallas_call(
            kernel,
            out_shape=jax.ShapeDtypeStruct((N, n_bands, Th, W * Cout), jnp.float32),
            grid=(N // B, n_bands),
            in_specs=in_specs,
            out_specs=pl.BlockSpec((B, 1, Th, W * Cout), lambda n, hb: (n, hb, 0, 0)),
            scratch_shapes=[
                pltpu.VMEM((B, Th + 2, W, 9 * Cin), mxu_dtype),   # conv_res0 im2col
                pltpu.VMEM((B, Th, W, 9 * Cmid), mxu_dtype),      # conv_res1 im2col
            ],
            compiler_params=pltpu.CompilerParams(
                dimension_semantics=("parallel", "arbitrary"),
                vmem_limit_bytes=vmem_limit),
        )

    try:
        out_flat = build(True)(*inputs)      # single-buffered constant weights
    except Exception:
        out_flat = build(False)(*inputs)     # fallback if pipeline_mode unsupported

    out_nhwc = out_flat.reshape(N, H, W, Cout)
    return jnp.transpose(out_nhwc, (0, 3, 1, 2))                 # back to NCHW


def _reference_block(x_nchw, emb, params, *, res_balance=0.3, clip_act=256.0):
    """Pure-JAX/XLA reference of Block.forward (training-mode weight norm)."""
    N = x_nchw.shape[0]
    w0 = _mp_weight(params["conv_res0"])
    w1 = _mp_weight(params["conv_res1"])
    Cmid = w0.shape[0]

    def norm_act(v):                                  # normalize(v, dim=1)
        n = jnp.sqrt(jnp.sum(v * v, axis=1, keepdims=True))
        return v / (EPS + n / np.sqrt(v.shape[1]))

    def mp_silu(v):
        return jax.nn.silu(v) * INV_MP_SILU

    def conv3x3(v, w):                                # reflect W pad 1, zero H pad 1
        v = jnp.pad(v, ((0, 0), (0, 0), (0, 0), (1, 1)), mode="reflect")
        v = jnp.pad(v, ((0, 0), (0, 0), (1, 1), (0, 0)))
        return jax.lax.conv_general_dilated(
            v, w, (1, 1), "VALID", dimension_numbers=("NCHW", "OIHW", "NCHW"))

    x = norm_act(x_nchw.astype(jnp.float32))
    y = conv3x3(mp_silu(x), w0)
    w_emb = _mp_weight(params["emb_linear"], gain=params["emb_gain"])
    c = emb.reshape(N, -1).astype(jnp.float32) @ w_emb.reshape(Cmid, -1).T + 1.0
    y = mp_silu(y * c[:, :, None, None])
    y = conv3x3(y, w1)
    if params.get("conv_skip", None) is not None:
        wsk = _mp_weight(params["conv_skip"])
        x = jax.lax.conv_general_dilated(
            x, wsk, (1, 1), "VALID", dimension_numbers=("NCHW", "OIHW", "NCHW"))
    t = res_balance
    out = ((1.0 - t) * x + t * y) / np.sqrt((1.0 - t) ** 2 + t ** 2)
    return jnp.clip(out, -clip_act, clip_act)


if __name__ == "__main__":
    jax.config.update("jax_default_matmul_precision", "highest")

    # Block(level=0, in_channels=8, out_channels=16, emb_channels=16,
    #       flavor='enc', resample_mode='keep', mlp_multiplier=2, mlp_groups=1)
    N, Cin, Cout, E, H, W = 2, 8, 16, 16, 8, 8
    Cmid = Cout * 2     # mlp_multiplier = 2

    ks = jax.random.split(jax.random.PRNGKey(0), 6)
    x = jax.random.normal(ks[0], (N, Cin, H, W), jnp.float32)
    emb = jax.random.normal(ks[1], (N, E, 1, 1), jnp.float32)
    params = {
        "conv_res0": jax.random.normal(ks[2], (Cmid, Cin, 3, 3), jnp.float32),
        "conv_res1": jax.random.normal(ks[3], (Cout, Cmid, 3, 3), jnp.float32),
        "conv_skip": jax.random.normal(ks[4], (Cout, Cin, 1, 1), jnp.float32),  # in != out
        "emb_linear": jax.random.normal(ks[5], (Cmid, E, 1, 1), jnp.float32),
        "emb_gain": jnp.zeros((), jnp.float32),   # torch.nn.Parameter(torch.zeros([]))
    }

    ref = jax.block_until_ready(_reference_block(x, emb, params))

    # Structural-correctness check: f32 MXU operands + exact reciprocal.
    out_f32 = jax.block_until_ready(
        block_forward(x, emb, params, mxu_dtype=jnp.float32, approx_recip=False))
    np.testing.assert_allclose(np.asarray(out_f32), np.asarray(ref),
                               rtol=0.1, atol=0.1)

    # Production path: bf16 MXU operands + EUP approx reciprocal.
    out = jax.block_until_ready(block_forward(x, emb, params,
                                              res_balance=0.3, clip_act=256.0))
    assert out.shape == (N, Cout, H, W) and out.dtype == jnp.float32
    assert bool(jnp.all(jnp.isfinite(out)))
    np.testing.assert_allclose(np.asarray(out), np.asarray(ref), rtol=0.1, atol=0.35)
    print("KERNEL_OK")
</pallas_src>

<mosaic_0001>
module attributes {stable_mosaic.version = 11 : i64} {
  func.func @_block_kernel(%arg0: i32, %arg1: i32, %arg2: memref<1x12x8x8xf32, #tpu.memory_space<vmem>>, %arg3: memref<1x1x32xf32, #tpu.memory_space<vmem>>, %arg4: memref<72x32xf32, #tpu.memory_space<vmem>>, %arg5: memref<288x16xf32, #tpu.memory_space<vmem>>, %arg6: memref<8x16xf32, #tpu.memory_space<vmem>>, %arg7: memref<1x1x4x128xf32, #tpu.memory_space<vmem>>, %arg8: memref<1x6x8x72xf32, #tpu.memory_space<vmem>>, %arg9: memref<1x4x8x288xf32, #tpu.memory_space<vmem>>) attributes {dimension_semantics = [#tpu.dimension_semantics<parallel>, #tpu.dimension_semantics<arbitrary>], iteration_bounds = array<i64: 2, 2>, scalar_prefetch = 0 : i64, scratch_operands = 2 : i64, tpu.core_type = #tpu.core_type<tc>, window_params = [{transform_indices = @transform_0, window_bounds = array<i64: 1, 12, 8, 8>}, {transform_indices = @transform_1, window_bounds = array<i64: 1, 1, 32>}, {pipeline_mode = #tpu.pipeline_mode<synchronous>, transform_indices = @transform_2, window_bounds = array<i64: 72, 32>}, {pipeline_mode = #tpu.pipeline_mode<synchronous>, transform_indices = @transform_3, window_bounds = array<i64: 288, 16>}, {pipeline_mode = #tpu.pipeline_mode<synchronous>, transform_indices = @transform_4, window_bounds = array<i64: 8, 16>}, {transform_indices = @transform_5, window_bounds = array<i64: 1, 1, 4, 128>}]} {
    %c4_i32 = arith.constant 4 : i32
    %0 = arith.muli %arg1, %c4_i32 : i32
    %1 = tpu.assume_multiple %0, 4 : i32
    %c0 = arith.constant 0 : index
    %2 = arith.index_cast %1 : i32 to index
    %c0_0 = arith.constant 0 : index
    %c0_1 = arith.constant 0 : index
    %3 = vector.load %arg2[%c0, %2, %c0_0, %c0_1] : memref<1x12x8x8xf32, #tpu.memory_space<vmem>>, vector<1x8x8x8xf32>
    %4 = arith.mulf %3, %3 : vector<1x8x8x8xf32>
    %cst = arith.constant dense<0.000000e+00> : vector<1x8x8xf32>
    %5 = vector.multi_reduction <add>, %4, %cst [3] : vector<1x8x8x8xf32> to vector<1x8x8xf32>
    %6 = vector.shape_cast %5 : vector<1x8x8xf32> to vector<1x8x8x1xf32>
    %7 = math.sqrt %6 : vector<1x8x8x1xf32>
    %cst_2 = arith.constant 0.353553385 : f32
    %8 = vector.broadcast %cst_2 : f32 to vector<1x8x8x1xf32>
    %9 = arith.mulf %7, %8 : vector<1x8x8x1xf32>
    %cst_3 = arith.constant 9.99999974E-5 : f32
    %10 = vector.broadcast %cst_3 : f32 to vector<1x8x8x1xf32>
    %11 = arith.addf %10, %9 : vector<1x8x8x1xf32>
    %12 = tpu.reciprocal %11 : vector<1x8x8x1xf32> -> vector<1x8x8x1xf32>
    %13 = vector.broadcast %12 : vector<1x8x8x1xf32> to vector<1x8x8x8xf32>
    %14 = arith.mulf %3, %13 : vector<1x8x8x8xf32>
    %15 = arith.negf %14 : vector<1x8x8x8xf32>
    %16 = math.exp %15 : vector<1x8x8x8xf32>
    %cst_4 = arith.constant 1.000000e+00 : f32
    %17 = vector.broadcast %cst_4 : f32 to vector<1x8x8x8xf32>
    %18 = arith.addf %17, %16 : vector<1x8x8x8xf32>
    %19 = arith.divf %17, %18 : vector<1x8x8x8xf32>
    %20 = arith.mulf %14, %19 : vector<1x8x8x8xf32>
    %cst_5 = arith.constant 1.67785239 : f32
    %21 = vector.broadcast %cst_5 : f32 to vector<1x8x8x8xf32>
    %22 = arith.mulf %20, %21 : vector<1x8x8x8xf32>
    %23 = vector.extract_strided_slice %22 {offsets = [0, 0, 1, 0], sizes = [1, 8, 1, 8], strides = [1, 1, 1, 1]} : vector<1x8x8x8xf32> to vector<1x8x1x8xf32>
    %24 = vector.extract_strided_slice %22 {offsets = [0, 0, 0, 0], sizes = [1, 8, 7, 8], strides = [1, 1, 1, 1]} : vector<1x8x8x8xf32> to vector<1x8x7x8xf32>
    %25 = tpu.concatenate %23, %24 in 2 : vector<1x8x1x8xf32>, vector<1x8x7x8xf32> -> vector<1x8x8x8xf32>
    %26 = vector.extract_strided_slice %22 {offsets = [0, 0, 1, 0], sizes = [1, 8, 7, 8], strides = [1, 1, 1, 1]} : vector<1x8x8x8xf32> to vector<1x8x7x8xf32>
    %27 = vector.extract_strided_slice %22 {offsets = [0, 0, 6, 0], sizes = [1, 8, 1, 8], strides = [1, 1, 1, 1]} : vector<1x8x8x8xf32> to vector<1x8x1x8xf32>
    %28 = tpu.concatenate %26, %27 in 2 : vector<1x8x7x8xf32>, vector<1x8x1x8xf32> -> vector<1x8x8x8xf32>
    %29 = vector.extract_strided_slice %25 {offsets = [0, 0, 0, 0], sizes = [1, 6, 8, 8], strides = [1, 1, 1, 1]} : vector<1x8x8x8xf32> to vector<1x6x8x8xf32>
    %c0_6 = arith.constant 0 : index
    %c0_7 = arith.constant 0 : index
    %c0_8 = arith.constant 0 : index
    %c0_9 = arith.constant 0 : index
    %30 = vector.load %arg8[%c0_6, %c0_7, %c0_8, %c0_9] : memref<1x6x8x72xf32, #tpu.memory_space<vmem>>, vector<1x6x8x8xf32>
    tpu.vector_store %arg8[%c0_6, %c0_7, %c0_8, %c0_9], %29 {strides = array<i32>} : memref<1x6x8x72xf32, #tpu.memory_space<vmem>>, vector<1x6x8x8xf32>,
    %31 = vector.extract_strided_slice %22 {offsets = [0, 0, 0, 0], sizes = [1, 6, 8, 8], strides = [1, 1, 1, 1]} : vector<1x8x8x8xf32> to vector<1x6x8x8xf32>
    %c0_10 = arith.constant 0 : index
    %c0_11 = arith.constant 0 : index
    %c0_12 = arith.constant 0 : index
    %c8 = arith.constant 8 : index
    %32 = vector.load %arg8[%c0_10, %c0_11, %c0_12, %c8] : memref<1x6x8x72xf32, #tpu.memory_space<vmem>>, vector<1x6x8x8xf32>
    tpu.vector_store %arg8[%c0_10, %c0_11, %c0_12, %c8], %31 {strides = array<i32>} : memref<1x6x8x72xf32, #tpu.memory_space<vmem>>, vector<1x6x8x8xf32>,
    %33 = vector.extract_strided_slice %28 {offsets = [0, 0, 0, 0], sizes = [1, 6, 8, 8], strides = [1, 1, 1, 1]} : vector<1x8x8x8xf32> to vector<1x6x8x8xf32>
    %c0_13 = arith.constant 0 : index
    %c0_14 = arith.constant 0 : index
    %c0_15 = arith.constant 0 : index
    %c16 = arith.constant 16 : index
    %34 = vector.load %arg8[%c0_13, %c0_14, %c0_15, %c16] : memref<1x6x8x72xf32, #tpu.memory_space<vmem>>, vector<1x6x8x8xf32>
    tpu.vector_store %arg8[%c0_13, %c0_14, %c0_15, %c16], %33 {strides = array<i32>} : memref<1x6x8x72xf32, #tpu.memory_space<vmem>>, vector<1x6x8x8xf32>,
    %35 = vector.extract_strided_slice %25 {offsets = [0, 1, 0, 0], sizes = [1, 6, 8, 8], strides = [1, 1, 1, 1]} : vector<1x8x8x8xf32> to vector<1x6x8x8xf32>
    %c0_16 = arith.constant 0 : index
    %c0_17 = arith.constant 0 : index
    %c0_18 = arith.constant 0 : index
    %c24 = arith.constant 24 : index
    %36 = vector.load %arg8[%c0_16, %c0_17, %c0_18, %c24] : memref<1x6x8x72xf32, #tpu.memory_space<vmem>>, vector<1x6x8x8xf32>
    tpu.vector_store %arg8[%c0_16, %c0_17, %c0_18, %c24], %35 {strides = array<i32>} : memref<1x6x8x72xf32, #tpu.memory_space<vmem>>, vector<1x6x8x8xf32>,
    %37 = vector.extract_strided_slice %22 {offsets = [0, 1, 0, 0], sizes = [1, 6, 8, 8], strides = [1, 1, 1, 1]} : vector<1x8x8x8xf32> to vector<1x6x8x8xf32>
    %c0_19 = arith.constant 0 : index
    %c0_20 = arith.constant 0 : index
    %c0_21 = arith.constant 0 : index
    %c32 = arith.constant 32 : index
    %38 = vector.load %arg8[%c0_19, %c0_20, %c0_21, %c32] : memref<1x6x8x72xf32, #tpu.memory_space<vmem>>, vector<1x6x8x8xf32>
    tpu.vector_store %arg8[%c0_19, %c0_20, %c0_21, %c32], %37 {strides = array<i32>} : memref<1x6x8x72xf32, #tpu.memory_space<vmem>>, vector<1x6x8x8xf32>,
    %39 = vector.extract_strided_slice %28 {offsets = [0, 1, 0, 0], sizes = [1, 6, 8, 8], strides = [1, 1, 1, 1]} : vector<1x8x8x8xf32> to vector<1x6x8x8xf32>
    %c0_22 = arith.constant 0 : index
    %c0_23 = arith.constant 0 : index
    %c0_24 = arith.constant 0 : index
    %c40 = arith.constant 40 : index
    %40 = vector.load %arg8[%c0_22, %c0_23, %c0_24, %c40] : memref<1x6x8x72xf32, #tpu.memory_space<vmem>>, vector<1x6x8x8xf32>
    tpu.vector_store %arg8[%c0_22, %c0_23, %c0_24, %c40], %39 {strides = array<i32>} : memref<1x6x8x72xf32, #tpu.memory_space<vmem>>, vector<1x6x8x8xf32>,
    %41 = vector.extract_strided_slice %25 {offsets = [0, 2, 0, 0], sizes = [1, 6, 8, 8], strides = [1, 1, 1, 1]} : vector<1x8x8x8xf32> to vector<1x6x8x8xf32>
    %c0_25 = arith.constant 0 : index
    %c0_26 = arith.constant 0 : index
    %c0_27 = arith.constant 0 : index
    %c48 = arith.constant 48 : index
    %42 = vector.load %arg8[%c0_25, %c0_26, %c0_27, %c48] : memref<1x6x8x72xf32, #tpu.memory_space<vmem>>, vector<1x6x8x8xf32>
    tpu.vector_store %arg8[%c0_25, %c0_26, %c0_27, %c48], %41 {strides = array<i32>} : memref<1x6x8x72xf32, #tpu.memory_space<vmem>>, vector<1x6x8x8xf32>,
    %43 = vector.extract_strided_slice %22 {offsets = [0, 2, 0, 0], sizes = [1, 6, 8, 8], strides = [1, 1, 1, 1]} : vector<1x8x8x8xf32> to vector<1x6x8x8xf32>
    %c0_28 = arith.constant 0 : index
    %c0_29 = arith.constant 0 : index
    %c0_30 = arith.constant 0 : index
    %c56 = arith.constant 56 : index
    %44 = vector.load %arg8[%c0_28, %c0_29, %c0_30, %c56] : memref<1x6x8x72xf32, #tpu.memory_space<vmem>>, vector<1x6x8x8xf32>
    tpu.vector_store %arg8[%c0_28, %c0_29, %c0_30, %c56], %43 {strides = array<i32>} : memref<1x6x8x72xf32, #tpu.memory_space<vmem>>, vector<1x6x8x8xf32>,
    %45 = vector.extract_strided_slice %28 {offsets = [0, 2, 0, 0], sizes = [1, 6, 8, 8], strides = [1, 1, 1, 1]} : vector<1x8x8x8xf32> to vector<1x6x8x8xf32>
    %c0_31 = arith.constant 0 : index
    %c0_32 = arith.constant 0 : index
    %c0_33 = arith.constant 0 : index
    %c64 = arith.constant 64 : index
    %46 = vector.load %arg8[%c0_31, %c0_32, %c0_33, %c64] : memref<1x6x8x72xf32, #tpu.memory_space<vmem>>, vector<1x6x8x8xf32>
    tpu.vector_store %arg8[%c0_31, %c0_32, %c0_33, %c64], %45 {strides = array<i32>} : memref<1x6x8x72xf32, #tpu.memory_space<vmem>>, vector<1x6x8x8xf32>,
    %c0_34 = arith.constant 0 : index
    %c0_35 = arith.constant 0 : index
    %c0_36 = arith.constant 0 : index
    %c0_37 = arith.constant 0 : index
    %47 = vector.load %arg8[%c0_34, %c0_35, %c0_36, %c0_37] : memref<1x6x8x72xf32, #tpu.memory_space<vmem>>, vector<1x6x8x72xf32>
    %48 = vector.shape_cast %47 : vector<1x6x8x72xf32> to vector<48x72xf32>
    %c0_38 = arith.constant 0 : index
    %c0_39 = arith.constant 0 : index
    %49 = vector.load %arg4[%c0_38, %c0_39] : memref<72x32xf32, #tpu.memory_space<vmem>>, vector<72x32xf32>
    %cst_40 = arith.constant dense<0.000000e+00> : vector<48x32xf32>
    %50 = tpu.matmul %48, %49, %cst_40 {dimension_numbers = #tpu.dot_dimension_numbers<[1], [0], [0], [1], [0, 0, 1, 1], [], []>, precision = #tpu.contract_precision<fp32>} : vector<48x72xf32>, vector<72x32xf32>, vector<48x32xf32> -> vector<48x32xf32>
    %c0_41 = arith.constant 0 : index
    %c0_42 = arith.constant 0 : index
    %c0_43 = arith.constant 0 : index
    %51 = vector.load %arg3[%c0_41, %c0_42, %c0_43] : memref<1x1x32xf32, #tpu.memory_space<vmem>>, vector<1x1x32xf32>
    %52 = vector.shape_cast %51 : vector<1x1x32xf32> to vector<1x1x1x32xf32>
    %53 = vector.shape_cast %50 : vector<48x32xf32> to vector<1x6x8x32xf32>
    %54 = vector.broadcast %52 : vector<1x1x1x32xf32> to vector<1x6x8x32xf32>
    %55 = arith.mulf %53, %54 : vector<1x6x8x32xf32>
    %56 = arith.negf %55 : vector<1x6x8x32xf32>
    %57 = math.exp %56 : vector<1x6x8x32xf32>
    %cst_44 = arith.constant 1.000000e+00 : f32
    %58 = vector.broadcast %cst_44 : f32 to vector<1x6x8x32xf32>
    %59 = arith.addf %58, %57 : vector<1x6x8x32xf32>
    %60 = arith.divf %58, %59 : vector<1x6x8x32xf32>
    %61 = arith.mulf %55, %60 : vector<1x6x8x32xf32>
    %cst_45 = arith.constant 1.67785239 : f32
    %62 = vector.broadcast %cst_45 : f32 to vector<1x6x8x32xf32>
    %63 = arith.mulf %61, %62 : vector<1x6x8x32xf32>
    %64 = tpu.iota {dimensions = array<i32: 0>} : vector<6x1xi32>
    %c1_i32 = arith.constant 1 : i32
    %65 = arith.subi %1, %c1_i32 : i32
    %66 = vector.broadcast %65 : i32 to vector<6x1xi32>
    %67 = arith.addi %66, %64 : vector<6x1xi32>
    %c0_i32 = arith.constant 0 : i32
    %68 = vector.broadcast %c0_i32 : i32 to vector<6x1xi32>
    %69 = arith.cmpi sge, %67, %68 : vector<6x1xi32>
    %c8_i32 = arith.constant 8 : i32
    %70 = vector.broadcast %c8_i32 : i32 to vector<6x1xi32>
    %71 = arith.cmpi slt, %67, %70 : vector<6x1xi32>
    %72 = arith.andi %69, %71 : vector<6x1xi1>
    %73 = vector.shape_cast %72 : vector<6x1xi1> to vector<1x6x1x1xi1>
    %cst_46 = arith.constant 0.000000e+00 : f32
    %74 = vector.shape_cast %73 : vector<1x6x1x1xi1> to vector<1x6x1x1xi1>
    %75 = vector.broadcast %74 : vector<1x6x1x1xi1> to vector<1x6x8x32xi1>
    %76 = vector.broadcast %cst_46 : f32 to vector<1x6x8x32xf32>
    %77 = arith.select %75, %63, %76 : vector<1x6x8x32xi1>, vector<1x6x8x32xf32>
    %78 = vector.extract_strided_slice %77 {offsets = [0, 0, 1, 0], sizes = [1, 6, 1, 32], strides = [1, 1, 1, 1]} : vector<1x6x8x32xf32> to vector<1x6x1x32xf32>
    %79 = vector.extract_strided_slice %77 {offsets = [0, 0, 0, 0], sizes = [1, 6, 7, 32], strides = [1, 1, 1, 1]} : vector<1x6x8x32xf32> to vector<1x6x7x32xf32>
    %80 = tpu.concatenate %78, %79 in 2 : vector<1x6x1x32xf32>, vector<1x6x7x32xf32> -> vector<1x6x8x32xf32>
    %81 = vector.extract_strided_slice %77 {offsets = [0, 0, 1, 0], sizes = [1, 6, 7, 32], strides = [1, 1, 1, 1]} : vector<1x6x8x32xf32> to vector<1x6x7x32xf32>
    %82 = vector.extract_strided_slice %77 {offsets = [0, 0, 6, 0], sizes = [1, 6, 1, 32], strides = [1, 1, 1, 1]} : vector<1x6x8x32xf32> to vector<1x6x1x32xf32>
    %83 = tpu.concatenate %81, %82 in 2 : vector<1x6x7x32xf32>, vector<1x6x1x32xf32> -> vector<1x6x8x32xf32>
    %84 = vector.extract_strided_slice %80 {offsets = [0, 0, 0, 0], sizes = [1, 4, 8, 32], strides = [1, 1, 1, 1]} : vector<1x6x8x32xf32> to vector<1x4x8x32xf32>
    %c0_47 = arith.constant 0 : index
    %c0_48 = arith.constant 0 : index
    %c0_49 = arith.constant 0 : index
    %c0_50 = arith.constant 0 : index
    %85 = vector.load %arg9[%c0_47, %c0_48, %c0_49, %c0_50] : memref<1x4x8x288xf32, #tpu.memory_space<vmem>>, vector<1x4x8x32xf32>
    tpu.vector_store %arg9[%c0_47, %c0_48, %c0_49, %c0_50], %84 {strides = array<i32>} : memref<1x4x8x288xf32, #tpu.memory_space<vmem>>, vector<1x4x8x32xf32>,
    %86 = vector.extract_strided_slice %77 {offsets = [0, 0, 0, 0], sizes = [1, 4, 8, 32], strides = [1, 1, 1, 1]} : vector<1x6x8x32xf32> to vector<1x4x8x32xf32>
    %c0_51 = arith.constant 0 : index
    %c0_52 = arith.constant 0 : index
    %c0_53 = arith.constant 0 : index
    %c32_54 = arith.constant 32 : index
    %87 = vector.load %arg9[%c0_51, %c0_52, %c0_53, %c32_54] : memref<1x4x8x288xf32, #tpu.memory_space<vmem>>, vector<1x4x8x32xf32>
    tpu.vector_store %arg9[%c0_51, %c0_52, %c0_53, %c32_54], %86 {strides = array<i32>} : memref<1x4x8x288xf32, #tpu.memory_space<vmem>>, vector<1x4x8x32xf32>,
    %88 = vector.extract_strided_slice %83 {offsets = [0, 0, 0, 0], sizes = [1, 4, 8, 32], strides = [1, 1, 1, 1]} : vector<1x6x8x32xf32> to vector<1x4x8x32xf32>
    %c0_55 = arith.constant 0 : index
    %c0_56 = arith.constant 0 : index
    %c0_57 = arith.constant 0 : index
    %c64_58 = arith.constant 64 : index
    %89 = vector.load %arg9[%c0_55, %c0_56, %c0_57, %c64_58] : memref<1x4x8x288xf32, #tpu.memory_space<vmem>>, vector<1x4x8x32xf32>
    tpu.vector_store %arg9[%c0_55, %c0_56, %c0_57, %c64_58], %88 {strides = array<i32>} : memref<1x4x8x288xf32, #tpu.memory_space<vmem>>, vector<1x4x8x32xf32>,
    %90 = vector.extract_strided_slice %80 {offsets = [0, 1, 0, 0], sizes = [1, 4, 8, 32], strides = [1, 1, 1, 1]} : vector<1x6x8x32xf32> to vector<1x4x8x32xf32>
    %c0_59 = arith.constant 0 : index
    %c0_60 = arith.constant 0 : index
    %c0_61 = arith.constant 0 : index
    %c96 = arith.constant 96 : index
    %91 = vector.load %arg9[%c0_59, %c0_60, %c0_61, %c96] : memref<1x4x8x288xf32, #tpu.memory_space<vmem>>, vector<1x4x8x32xf32>
    tpu.vector_store %arg9[%c0_59, %c0_60, %c0_61, %c96], %90 {strides = array<i32>} : memref<1x4x8x288xf32, #tpu.memory_space<vmem>>, vector<1x4x8x32xf32>,
    %92 = vector.extract_strided_slice %77 {offsets = [0, 1, 0, 0], sizes = [1, 4, 8, 32], strides = [1, 1, 1, 1]} : vector<1x6x8x32xf32> to vector<1x4x8x32xf32>
    %c0_62 = arith.constant 0 : index
    %c0_63 = arith.constant 0 : index
    %c0_64 = arith.constant 0 : index
    %c128 = arith.constant 128 : index
    %93 = vector.load %arg9[%c0_62, %c0_63, %c0_64, %c128] : memref<1x4x8x288xf32, #tpu.memory_space<vmem>>, vector<1x4x8x32xf32>
    tpu.vector_store %arg9[%c0_62, %c0_63, %c0_64, %c128], %92 {strides = array<i32>} : memref<1x4x8x288xf32, #tpu.memory_space<vmem>>, vector<1x4x8x32xf32>,
    %94 = vector.extract_strided_slice %83 {offsets = [0, 1, 0, 0], sizes = [1, 4, 8, 32], strides = [1, 1, 1, 1]} : vector<1x6x8x32xf32> to vector<1x4x8x32xf32>
    %c0_65 = arith.constant 0 : index
    %c0_66 = arith.constant 0 : index
    %c0_67 = arith.constant 0 : index
    %c160 = arith.constant 160 : index
    %95 = vector.load %arg9[%c0_65, %c0_66, %c0_67, %c160] : memref<1x4x8x288xf32, #tpu.memory_space<vmem>>, vector<1x4x8x32xf32>
    tpu.vector_store %arg9[%c0_65, %c0_66, %c0_67, %c160], %94 {strides = array<i32>} : memref<1x4x8x288xf32, #tpu.memory_space<vmem>>, vector<1x4x8x32xf32>,
    %96 = vector.extract_strided_slice %80 {offsets = [0, 2, 0, 0], sizes = [1, 4, 8, 32], strides = [1, 1, 1, 1]} : vector<1x6x8x32xf32> to vector<1x4x8x32xf32>
    %c0_68 = arith.constant 0 : index
    %c0_69 = arith.constant 0 : index
    %c0_70 = arith.constant 0 : index
    %c192 = arith.constant 192 : index
    %97 = vector.load %arg9[%c0_68, %c0_69, %c0_70, %c192] : memref<1x4x8x288xf32, #tpu.memory_space<vmem>>, vector<1x4x8x32xf32>
    tpu.vector_store %arg9[%c0_68, %c0_69, %c0_70, %c192], %96 {strides = array<i32>} : memref<1x4x8x288xf32, #tpu.memory_space<vmem>>, vector<1x4x8x32xf32>,
    %98 = vector.extract_strided_slice %77 {offsets = [0, 2, 0, 0], sizes = [1, 4, 8, 32], strides = [1, 1, 1, 1]} : vector<1x6x8x32xf32> to vector<1x4x8x32xf32>
    %c0_71 = arith.constant 0 : index
    %c0_72 = arith.constant 0 : index
    %c0_73 = arith.constant 0 : index
    %c224 = arith.constant 224 : index
    %99 = vector.load %arg9[%c0_71, %c0_72, %c0_73, %c224] : memref<1x4x8x288xf32, #tpu.memory_space<vmem>>, vector<1x4x8x32xf32>
    tpu.vector_store %arg9[%c0_71, %c0_72, %c0_73, %c224], %98 {strides = array<i32>} : memref<1x4x8x288xf32, #tpu.memory_space<vmem>>, vector<1x4x8x32xf32>,
    %100 = vector.extract_strided_slice %83 {offsets = [0, 2, 0, 0], sizes = [1, 4, 8, 32], strides = [1, 1, 1, 1]} : vector<1x6x8x32xf32> to vector<1x4x8x32xf32>
    %c0_74 = arith.constant 0 : index
    %c0_75 = arith.constant 0 : index
    %c0_76 = arith.constant 0 : index
    %c256 = arith.constant 256 : index
    %101 = vector.load %arg9[%c0_74, %c0_75, %c0_76, %c256] : memref<1x4x8x288xf32, #tpu.memory_space<vmem>>, vector<1x4x8x32xf32>
    tpu.vector_store %arg9[%c0_74, %c0_75, %c0_76, %c256], %100 {strides = array<i32>} : memref<1x4x8x288xf32, #tpu.memory_space<vmem>>, vector<1x4x8x32xf32>,
    %c0_77 = arith.constant 0 : index
    %c0_78 = arith.constant 0 : index
    %c0_79 = arith.constant 0 : index
    %c0_80 = arith.constant 0 : index
    %102 = vector.load %arg9[%c0_77, %c0_78, %c0_79, %c0_80] : memref<1x4x8x288xf32, #tpu.memory_space<vmem>>, vector<1x4x8x288xf32>
    %103 = vector.shape_cast %102 : vector<1x4x8x288xf32> to vector<32x288xf32>
    %c0_81 = arith.constant 0 : index
    %c0_82 = arith.constant 0 : index
    %104 = vector.load %arg5[%c0_81, %c0_82] : memref<288x16xf32, #tpu.memory_space<vmem>>, vector<288x16xf32>
    %cst_83 = arith.constant dense<0.000000e+00> : vector<32x16xf32>
    %105 = tpu.matmul %103, %104, %cst_83 {dimension_numbers = #tpu.dot_dimension_numbers<[1], [0], [0], [1], [0, 0, 1, 1], [], []>, precision = #tpu.contract_precision<fp32>} : vector<32x288xf32>, vector<288x16xf32>, vector<32x16xf32> -> vector<32x16xf32>
    %106 = vector.extract_strided_slice %14 {offsets = [0, 2, 0, 0], sizes = [1, 4, 8, 8], strides = [1, 1, 1, 1]} : vector<1x8x8x8xf32> to vector<1x4x8x8xf32>
    %107 = vector.shape_cast %106 : vector<1x4x8x8xf32> to vector<32x8xf32>
    %c0_84 = arith.constant 0 : index
    %c0_85 = arith.constant 0 : index
    %108 = vector.load %arg6[%c0_84, %c0_85] : memref<8x16xf32, #tpu.memory_space<vmem>>, vector<8x16xf32>
    %cst_86 = arith.constant dense<0.000000e+00> : vector<32x16xf32>
    %109 = tpu.matmul %107, %108, %cst_86 {dimension_numbers = #tpu.dot_dimension_numbers<[1], [0], [0], [1], [0, 0, 1, 1], [], []>, precision = #tpu.contract_precision<fp32>} : vector<32x8xf32>, vector<8x16xf32>, vector<32x16xf32> -> vector<32x16xf32>
    %cst_87 = arith.constant 0.919145047 : f32
    %110 = vector.broadcast %cst_87 : f32 to vector<32x16xf32>
    %111 = arith.mulf %110, %109 : vector<32x16xf32>
    %cst_88 = arith.constant 0.393919289 : f32
    %112 = vector.broadcast %cst_88 : f32 to vector<32x16xf32>
    %113 = arith.mulf %112, %105 : vector<32x16xf32>
    %114 = arith.addf %111, %113 : vector<32x16xf32>
    %cst_89 = arith.constant -2.560000e+02 : f32
    %cst_90 = arith.constant 2.560000e+02 : f32
    %115 = vector.broadcast %cst_89 : f32 to vector<32x16xf32>
    %116 = arith.maximumf %115, %114 : vector<32x16xf32>
    %117 = vector.broadcast %cst_90 : f32 to vector<32x16xf32>
    %118 = arith.minimumf %117, %116 : vector<32x16xf32>
    %119 = vector.shape_cast %118 : vector<32x16xf32> to vector<1x4x8x16xf32>
    %120 = vector.extract_strided_slice %119 {offsets = [0, 0, 0, 0], sizes = [1, 4, 1, 16], strides = [1, 1, 1, 1]} : vector<1x4x8x16xf32> to vector<1x4x1x16xf32>
    %121 = vector.shape_cast %120 : vector<1x4x1x16xf32> to vector<1x4x16xf32>
    %122 = vector.extract_strided_slice %119 {offsets = [0, 0, 1, 0], sizes = [1, 4, 1, 16], strides = [1, 1, 1, 1]} : vector<1x4x8x16xf32> to vector<1x4x1x16xf32>
    %123 = vector.shape_cast %122 : vector<1x4x1x16xf32> to vector<1x4x16xf32>
    %124 = vector.extract_strided_slice %119 {offsets = [0, 0, 2, 0], sizes = [1, 4, 1, 16], strides = [1, 1, 1, 1]} : vector<1x4x8x16xf32> to vector<1x4x1x16xf32>
    %125 = vector.shape_cast %124 : vector<1x4x1x16xf32> to vector<1x4x16xf32>
    %126 = vector.extract_strided_slice %119 {offsets = [0, 0, 3, 0], sizes = [1, 4, 1, 16], strides = [1, 1, 1, 1]} : vector<1x4x8x16xf32> to vector<1x4x1x16xf32>
    %127 = vector.shape_cast %126 : vector<1x4x1x16xf32> to vector<1x4x16xf32>
    %128 = vector.extract_strided_slice %119 {offsets = [0, 0, 4, 0], sizes = [1, 4, 1, 16], strides = [1, 1, 1, 1]} : vector<1x4x8x16xf32> to vector<1x4x1x16xf32>
    %129 = vector.shape_cast %128 : vector<1x4x1x16xf32> to vector<1x4x16xf32>
    %130 = vector.extract_strided_slice %119 {offsets = [0, 0, 5, 0], sizes = [1, 4, 1, 16], strides = [1, 1, 1, 1]} : vector<1x4x8x16xf32> to vector<1x4x1x16xf32>
    %131 = vector.shape_cast %130 : vector<1x4x1x16xf32> to vector<1x4x16xf32>
    %132 = vector.extract_strided_slice %119 {offsets = [0, 0, 6, 0], sizes = [1, 4, 1, 16], strides = [1, 1, 1, 1]} : vector<1x4x8x16xf32> to vector<1x4x1x16xf32>
    %133 = vector.shape_cast %132 : vector<1x4x1x16xf32> to vector<1x4x16xf32>
    %134 = vector.extract_strided_slice %119 {offsets = [0, 0, 7, 0], sizes = [1, 4, 1, 16], strides = [1, 1, 1, 1]} : vector<1x4x8x16xf32> to vector<1x4x1x16xf32>
    %135 = vector.shape_cast %134 : vector<1x4x1x16xf32> to vector<1x4x16xf32>
    %136 = tpu.concatenate %121, %123, %125, %127, %129, %131, %133, %135 in 2 : vector<1x4x16xf32>, vector<1x4x16xf32>, vector<1x4x16xf32>, vector<1x4x16xf32>, vector<1x4x16xf32>, vector<1x4x16xf32>, vector<1x4x16xf32>, vector<1x4x16xf32> -> vector<1x4x128xf32>
    %137 = vector.shape_cast %136 : vector<1x4x128xf32> to vector<1x1x4x128xf32>
    %c0_91 = arith.constant 0 : index
    %c0_92 = arith.constant 0 : index
    %c0_93 = arith.constant 0 : index
    %c0_94 = arith.constant 0 : index
    %138 = vector.load %arg7[%c0_91, %c0_92, %c0_93, %c0_94] : memref<1x1x4x128xf32, #tpu.memory_space<vmem>>, vector<1x1x4x128xf32>
    tpu.vector_store %arg7[%c0_91, %c0_92, %c0_93, %c0_94], %137 {strides = array<i32>} : memref<1x1x4x128xf32, #tpu.memory_space<vmem>>, vector<1x1x4x128xf32>,
    return
  }
  func.func @transform_0(%arg0: i32, %arg1: i32) -> (i32, i32, i32, i32) {
    %c0_i32 = arith.constant 0 : i32
    %c0_i32_0 = arith.constant 0 : i32
    %c0_i32_1 = arith.constant 0 : i32
    %c0_i32_2 = arith.constant 0 : i32
    return %arg0, %c0_i32, %c0_i32_0, %c0_i32_1 : i32, i32, i32, i32
  }
  func.func @transform_1(%arg0: i32, %arg1: i32) -> (i32, i32, i32) {
    %c0_i32 = arith.constant 0 : i32
    %c0_i32_0 = arith.constant 0 : i32
    %c0_i32_1 = arith.constant 0 : i32
    return %arg0, %c0_i32, %c0_i32_0 : i32, i32, i32
  }
  func.func @transform_2(%arg0: i32, %arg1: i32) -> (i32, i32) {
    %c0_i32 = arith.constant 0 : i32
    %c0_i32_0 = arith.constant 0 : i32
    %c0_i32_1 = arith.constant 0 : i32
    return %c0_i32, %c0_i32_0 : i32, i32
  }
  func.func @transform_3(%arg0: i32, %arg1: i32) -> (i32, i32) {
    %c0_i32 = arith.constant 0 : i32
    %c0_i32_0 = arith.constant 0 : i32
    %c0_i32_1 = arith.constant 0 : i32
    return %c0_i32, %c0_i32_0 : i32, i32
  }
  func.func @transform_4(%arg0: i32, %arg1: i32) -> (i32, i32) {
    %c0_i32 = arith.constant 0 : i32
    %c0_i32_0 = arith.constant 0 : i32
    %c0_i32_1 = arith.constant 0 : i32
    return %c0_i32, %c0_i32_0 : i32, i32
  }
  func.func @transform_5(%arg0: i32, %arg1: i32) -> (i32, i32, i32, i32) {
    %c0_i32 = arith.constant 0 : i32
    %c0_i32_0 = arith.constant 0 : i32
    %c0_i32_1 = arith.constant 0 : i32
    return %arg0, %arg1, %c0_i32, %c0_i32_0 : i32, i32, i32, i32
  }
}

module attributes {stable_mosaic.version = 11 : i64} {
  func.func @_block_kernel(%arg0: i32, %arg1: i32, %arg2: memref<1x12x8x8xf32, #tpu.memory_space<vmem>>, %arg3: memref<1x1x32xf32, #tpu.memory_space<vmem>>, %arg4: memref<72x32xf32, #tpu.memory_space<vmem>>, %arg5: memref<288x16xf32, #tpu.memory_space<vmem>>, %arg6: memref<8x16xf32, #tpu.memory_space<vmem>>, %arg7: memref<1x1x4x128xf32, #tpu.memory_space<vmem>>, %arg8: memref<1x6x8x72xf32, #tpu.memory_space<vmem>>, %arg9: memref<1x4x8x288xf32, #tpu.memory_space<vmem>>) attributes {dimension_semantics = [#tpu.dimension_semantics<parallel>, #tpu.dimension_semantics<arbitrary>], iteration_bounds = array<i64: 2, 2>, scalar_prefetch = 0 : i64, scratch_operands = 2 : i64, tpu.core_type = #tpu.core_type<tc>, window_params = [{transform_indices = @transform_0, window_bounds = array<i64: 1, 12, 8, 8>}, {transform_indices = @transform_1, window_bounds = array<i64: 1, 1, 32>}, {pipeline_mode = #tpu.pipeline_mode<synchronous>, transform_indices = @transform_2, window_bounds = array<i64: 72, 32>}, {pipeline_mode = #tpu.pipeline_mode<synchronous>, transform_indices = @transform_3, window_bounds = array<i64: 288, 16>}, {pipeline_mode = #tpu.pipeline_mode<synchronous>, transform_indices = @transform_4, window_bounds = array<i64: 8, 16>}, {transform_indices = @transform_5, window_bounds = array<i64: 1, 1, 4, 128>}]} {
    %c4_i32 = arith.constant 4 : i32
    %0 = arith.muli %arg1, %c4_i32 : i32
    %1 = tpu.assume_multiple %0, 4 : i32
    %c0 = arith.constant 0 : index
    %2 = arith.index_cast %1 : i32 to index
    %c0_0 = arith.constant 0 : index
    %c0_1 = arith.constant 0 : index
    %3 = vector.load %arg2[%c0, %2, %c0_0, %c0_1] : memref<1x12x8x8xf32, #tpu.memory_space<vmem>>, vector<1x8x8x8xf32>
    %4 = arith.mulf %3, %3 : vector<1x8x8x8xf32>
    %cst = arith.constant dense<0.000000e+00> : vector<1x8x8xf32>
    %5 = vector.multi_reduction <add>, %4, %cst [3] : vector<1x8x8x8xf32> to vector<1x8x8xf32>
    %6 = vector.shape_cast %5 : vector<1x8x8xf32> to vector<1x8x8x1xf32>
    %7 = math.sqrt %6 : vector<1x8x8x1xf32>
    %cst_2 = arith.constant 0.353553385 : f32
    %8 = vector.broadcast %cst_2 : f32 to vector<1x8x8x1xf32>
    %9 = arith.mulf %7, %8 : vector<1x8x8x1xf32>
    %cst_3 = arith.constant 9.99999974E-5 : f32
    %10 = vector.broadcast %cst_3 : f32 to vector<1x8x8x1xf32>
    %11 = arith.addf %10, %9 : vector<1x8x8x1xf32>
    %12 = tpu.reciprocal %11 : vector<1x8x8x1xf32> -> vector<1x8x8x1xf32>
    %13 = vector.broadcast %12 : vector<1x8x8x1xf32> to vector<1x8x8x8xf32>
    %14 = arith.mulf %3, %13 : vector<1x8x8x8xf32>
    %15 = arith.negf %14 : vector<1x8x8x8xf32>
    %16 = math.exp %15 : vector<1x8x8x8xf32>
    %cst_4 = arith.constant 1.000000e+00 : f32
    %17 = vector.broadcast %cst_4 : f32 to vector<1x8x8x8xf32>
    %18 = arith.addf %17, %16 : vector<1x8x8x8xf32>
    %19 = arith.divf %17, %18 : vector<1x8x8x8xf32>
    %20 = arith.mulf %14, %19 : vector<1x8x8x8xf32>
    %cst_5 = arith.constant 1.67785239 : f32
    %21 = vector.broadcast %cst_5 : f32 to vector<1x8x8x8xf32>
    %22 = arith.mulf %20, %21 : vector<1x8x8x8xf32>
    %23 = vector.extract_strided_slice %22 {offsets = [0, 0, 1, 0], sizes = [1, 8, 1, 8], strides = [1, 1, 1, 1]} : vector<1x8x8x8xf32> to vector<1x8x1x8xf32>
    %24 = vector.extract_strided_slice %22 {offsets = [0, 0, 0, 0], sizes = [1, 8, 7, 8], strides = [1, 1, 1, 1]} : vector<1x8x8x8xf32> to vector<1x8x7x8xf32>
    %25 = tpu.concatenate %23, %24 in 2 : vector<1x8x1x8xf32>, vector<1x8x7x8xf32> -> vector<1x8x8x8xf32>
    %26 = vector.extract_strided_slice %22 {offsets = [0, 0, 1, 0], sizes = [1, 8, 7, 8], strides = [1, 1, 1, 1]} : vector<1x8x8x8xf32> to vector<1x8x7x8xf32>
    %27 = vector.extract_strided_slice %22 {offsets = [0, 0, 6, 0], sizes = [1, 8, 1, 8], strides = [1, 1, 1, 1]} : vector<1x8x8x8xf32> to vector<1x8x1x8xf32>
    %28 = tpu.concatenate %26, %27 in 2 : vector<1x8x7x8xf32>, vector<1x8x1x8xf32> -> vector<1x8x8x8xf32>
    %29 = vector.extract_strided_slice %25 {offsets = [0, 0, 0, 0], sizes = [1, 6, 8, 8], strides = [1, 1, 1, 1]} : vector<1x8x8x8xf32> to vector<1x6x8x8xf32>
    %c0_6 = arith.constant 0 : index
    %c0_7 = arith.constant 0 : index
    %c0_8 = arith.constant 0 : index
    %c0_9 = arith.constant 0 : index
    %30 = vector.load %arg8[%c0_6, %c0_7, %c0_8, %c0_9] : memref<1x6x8x72xf32, #tpu.memory_space<vmem>>, vector<1x6x8x8xf32>
    tpu.vector_store %arg8[%c0_6, %c0_7, %c0_8, %c0_9], %29 {strides = array<i32>} : memref<1x6x8x72xf32, #tpu.memory_space<vmem>>, vector<1x6x8x8xf32>,
    %31 = vector.extract_strided_slice %22 {offsets = [0, 0, 0, 0], sizes = [1, 6, 8, 8], strides = [1, 1, 1, 1]} : vector<1x8x8x8xf32> to vector<1x6x8x8xf32>
    %c0_10 = arith.constant 0 : index
    %c0_11 = arith.constant 0 : index
    %c0_12 = arith.constant 0 : index
    %c8 = arith.constant 8 : index
    %32 = vector.load %arg8[%c0_10, %c0_11, %c0_12, %c8] : memref<1x6x8x72xf32, #tpu.memory_space<vmem>>, vector<1x6x8x8xf32>
    tpu.vector_store %arg8[%c0_10, %c0_11, %c0_12, %c8], %31 {strides = array<i32>} : memref<1x6x8x72xf32, #tpu.memory_space<vmem>>, vector<1x6x8x8xf32>,
    %33 = vector.extract_strided_slice %28 {offsets = [0, 0, 0, 0], sizes = [1, 6, 8, 8], strides = [1, 1, 1, 1]} : vector<1x8x8x8xf32> to vector<1x6x8x8xf32>
    %c0_13 = arith.constant 0 : index
    %c0_14 = arith.constant 0 : index
    %c0_15 = arith.constant 0 : index
    %c16 = arith.constant 16 : index
    %34 = vector.load %arg8[%c0_13, %c0_14, %c0_15, %c16] : memref<1x6x8x72xf32, #tpu.memory_space<vmem>>, vector<1x6x8x8xf32>
    tpu.vector_store %arg8[%c0_13, %c0_14, %c0_15, %c16], %33 {strides = array<i32>} : memref<1x6x8x72xf32, #tpu.memory_space<vmem>>, vector<1x6x8x8xf32>,
    %35 = vector.extract_strided_slice %25 {offsets = [0, 1, 0, 0], sizes = [1, 6, 8, 8], strides = [1, 1, 1, 1]} : vector<1x8x8x8xf32> to vector<1x6x8x8xf32>
    %c0_16 = arith.constant 0 : index
    %c0_17 = arith.constant 0 : index
    %c0_18 = arith.constant 0 : index
    %c24 = arith.constant 24 : index
    %36 = vector.load %arg8[%c0_16, %c0_17, %c0_18, %c24] : memref<1x6x8x72xf32, #tpu.memory_space<vmem>>, vector<1x6x8x8xf32>
    tpu.vector_store %arg8[%c0_16, %c0_17, %c0_18, %c24], %35 {strides = array<i32>} : memref<1x6x8x72xf32, #tpu.memory_space<vmem>>, vector<1x6x8x8xf32>,
    %37 = vector.extract_strided_slice %22 {offsets = [0, 1, 0, 0], sizes = [1, 6, 8, 8], strides = [1, 1, 1, 1]} : vector<1x8x8x8xf32> to vector<1x6x8x8xf32>
    %c0_19 = arith.constant 0 : index
    %c0_20 = arith.constant 0 : index
    %c0_21 = arith.constant 0 : index
    %c32 = arith.constant 32 : index
    %38 = vector.load %arg8[%c0_19, %c0_20, %c0_21, %c32] : memref<1x6x8x72xf32, #tpu.memory_space<vmem>>, vector<1x6x8x8xf32>
    tpu.vector_store %arg8[%c0_19, %c0_20, %c0_21, %c32], %37 {strides = array<i32>} : memref<1x6x8x72xf32, #tpu.memory_space<vmem>>, vector<1x6x8x8xf32>,
    %39 = vector.extract_strided_slice %28 {offsets = [0, 1, 0, 0], sizes = [1, 6, 8, 8], strides = [1, 1, 1, 1]} : vector<1x8x8x8xf32> to vector<1x6x8x8xf32>
    %c0_22 = arith.constant 0 : index
    %c0_23 = arith.constant 0 : index
    %c0_24 = arith.constant 0 : index
    %c40 = arith.constant 40 : index
    %40 = vector.load %arg8[%c0_22, %c0_23, %c0_24, %c40] : memref<1x6x8x72xf32, #tpu.memory_space<vmem>>, vector<1x6x8x8xf32>
    tpu.vector_store %arg8[%c0_22, %c0_23, %c0_24, %c40], %39 {strides = array<i32>} : memref<1x6x8x72xf32, #tpu.memory_space<vmem>>, vector<1x6x8x8xf32>,
    %41 = vector.extract_strided_slice %25 {offsets = [0, 2, 0, 0], sizes = [1, 6, 8, 8], strides = [1, 1, 1, 1]} : vector<1x8x8x8xf32> to vector<1x6x8x8xf32>
    %c0_25 = arith.constant 0 : index
    %c0_26 = arith.constant 0 : index
    %c0_27 = arith.constant 0 : index
    %c48 = arith.constant 48 : index
    %42 = vector.load %arg8[%c0_25, %c0_26, %c0_27, %c48] : memref<1x6x8x72xf32, #tpu.memory_space<vmem>>, vector<1x6x8x8xf32>
    tpu.vector_store %arg8[%c0_25, %c0_26, %c0_27, %c48], %41 {strides = array<i32>} : memref<1x6x8x72xf32, #tpu.memory_space<vmem>>, vector<1x6x8x8xf32>,
    %43 = vector.extract_strided_slice %22 {offsets = [0, 2, 0, 0], sizes = [1, 6, 8, 8], strides = [1, 1, 1, 1]} : vector<1x8x8x8xf32> to vector<1x6x8x8xf32>
    %c0_28 = arith.constant 0 : index
    %c0_29 = arith.constant 0 : index
    %c0_30 = arith.constant 0 : index
    %c56 = arith.constant 56 : index
    %44 = vector.load %arg8[%c0_28, %c0_29, %c0_30, %c56] : memref<1x6x8x72xf32, #tpu.memory_space<vmem>>, vector<1x6x8x8xf32>
    tpu.vector_store %arg8[%c0_28, %c0_29, %c0_30, %c56], %43 {strides = array<i32>} : memref<1x6x8x72xf32, #tpu.memory_space<vmem>>, vector<1x6x8x8xf32>,
    %45 = vector.extract_strided_slice %28 {offsets = [0, 2, 0, 0], sizes = [1, 6, 8, 8], strides = [1, 1, 1, 1]} : vector<1x8x8x8xf32> to vector<1x6x8x8xf32>
    %c0_31 = arith.constant 0 : index
    %c0_32 = arith.constant 0 : index
    %c0_33 = arith.constant 0 : index
    %c64 = arith.constant 64 : index
    %46 = vector.load %arg8[%c0_31, %c0_32, %c0_33, %c64] : memref<1x6x8x72xf32, #tpu.memory_space<vmem>>, vector<1x6x8x8xf32>
    tpu.vector_store %arg8[%c0_31, %c0_32, %c0_33, %c64], %45 {strides = array<i32>} : memref<1x6x8x72xf32, #tpu.memory_space<vmem>>, vector<1x6x8x8xf32>,
    %c0_34 = arith.constant 0 : index
    %c0_35 = arith.constant 0 : index
    %c0_36 = arith.constant 0 : index
    %c0_37 = arith.constant 0 : index
    %47 = vector.load %arg8[%c0_34, %c0_35, %c0_36, %c0_37] : memref<1x6x8x72xf32, #tpu.memory_space<vmem>>, vector<1x6x8x72xf32>
    %48 = vector.shape_cast %47 : vector<1x6x8x72xf32> to vector<48x72xf32>
    %c0_38 = arith.constant 0 : index
    %c0_39 = arith.constant 0 : index
    %49 = vector.load %arg4[%c0_38, %c0_39] : memref<72x32xf32, #tpu.memory_space<vmem>>, vector<72x32xf32>
    %cst_40 = arith.constant dense<0.000000e+00> : vector<48x32xf32>
    %50 = tpu.matmul %48, %49, %cst_40 {dimension_numbers = #tpu.dot_dimension_numbers<[1], [0], [0], [1], [0, 0, 1, 1], [], []>, precision = #tpu.contract_precision<fp32>} : vector<48x72xf32>, vector<72x32xf32>, vector<48x32xf32> -> vector<48x32xf32>
    %c0_41 = arith.constant 0 : index
    %c0_42 = arith.constant 0 : index
    %c0_43 = arith.constant 0 : index
    %51 = vector.load %arg3[%c0_41, %c0_42, %c0_43] : memref<1x1x32xf32, #tpu.memory_space<vmem>>, vector<1x1x32xf32>
    %52 = vector.shape_cast %51 : vector<1x1x32xf32> to vector<1x1x1x32xf32>
    %53 = vector.shape_cast %50 : vector<48x32xf32> to vector<1x6x8x32xf32>
    %54 = vector.broadcast %52 : vector<1x1x1x32xf32> to vector<1x6x8x32xf32>
    %55 = arith.mulf %53, %54 : vector<1x6x8x32xf32>
    %56 = arith.negf %55 : vector<1x6x8x32xf32>
    %57 = math.exp %56 : vector<1x6x8x32xf32>
    %cst_44 = arith.constant 1.000000e+00 : f32
    %58 = vector.broadcast %cst_44 : f32 to vector<1x6x8x32xf32>
    %59 = arith.addf %58, %57 : vector<1x6x8x32xf32>
    %60 = arith.divf %58, %59 : vector<1x6x8x32xf32>
    %61 = arith.mulf %55, %60 : vector<1x6x8x32xf32>
    %cst_45 = arith.constant 1.67785239 : f32
    %62 = vector.broadcast %cst_45 : f32 to vector<1x6x8x32xf32>
    %63 = arith.mulf %61, %62 : vector<1x6x8x32xf32>
    %64 = tpu.iota {dimensions = array<i32: 0>} : vector<6x1xi32>
    %c1_i32 = arith.constant 1 : i32
    %65 = arith.subi %1, %c1_i32 : i32
    %66 = vector.broadcast %65 : i32 to vector<6x1xi32>
    %67 = arith.addi %66, %64 : vector<6x1xi32>
    %c0_i32 = arith.constant 0 : i32
    %68 = vector.broadcast %c0_i32 : i32 to vector<6x1xi32>
    %69 = arith.cmpi sge, %67, %68 : vector<6x1xi32>
    %c8_i32 = arith.constant 8 : i32
    %70 = vector.broadcast %c8_i32 : i32 to vector<6x1xi32>
    %71 = arith.cmpi slt, %67, %70 : vector<6x1xi32>
    %72 = arith.andi %69, %71 : vector<6x1xi1>
    %73 = vector.shape_cast %72 : vector<6x1xi1> to vector<1x6x1x1xi1>
    %cst_46 = arith.constant 0.000000e+00 : f32
    %74 = vector.shape_cast %73 : vector<1x6x1x1xi1> to vector<1x6x1x1xi1>
    %75 = vector.broadcast %74 : vector<1x6x1x1xi1> to vector<1x6x8x32xi1>
    %76 = vector.broadcast %cst_46 : f32 to vector<1x6x8x32xf32>
    %77 = arith.select %75, %63, %76 : vector<1x6x8x32xi1>, vector<1x6x8x32xf32>
    %78 = vector.extract_strided_slice %77 {offsets = [0, 0, 1, 0], sizes = [1, 6, 1, 32], strides = [1, 1, 1, 1]} : vector<1x6x8x32xf32> to vector<1x6x1x32xf32>
    %79 = vector.extract_strided_slice %77 {offsets = [0, 0, 0, 0], sizes = [1, 6, 7, 32], strides = [1, 1, 1, 1]} : vector<1x6x8x32xf32> to vector<1x6x7x32xf32>
    %80 = tpu.concatenate %78, %79 in 2 : vector<1x6x1x32xf32>, vector<1x6x7x32xf32> -> vector<1x6x8x32xf32>
    %81 = vector.extract_strided_slice %77 {offsets = [0, 0, 1, 0], sizes = [1, 6, 7, 32], strides = [1, 1, 1, 1]} : vector<1x6x8x32xf32> to vector<1x6x7x32xf32>
    %82 = vector.extract_strided_slice %77 {offsets = [0, 0, 6, 0], sizes = [1, 6, 1, 32], strides = [1, 1, 1, 1]} : vector<1x6x8x32xf32> to vector<1x6x1x32xf32>
    %83 = tpu.concatenate %81, %82 in 2 : vector<1x6x7x32xf32>, vector<1x6x1x32xf32> -> vector<1x6x8x32xf32>
    %84 = vector.extract_strided_slice %80 {offsets = [0, 0, 0, 0], sizes = [1, 4, 8, 32], strides = [1, 1, 1, 1]} : vector<1x6x8x32xf32> to vector<1x4x8x32xf32>
    %c0_47 = arith.constant 0 : index
    %c0_48 = arith.constant 0 : index
    %c0_49 = arith.constant 0 : index
    %c0_50 = arith.constant 0 : index
    %85 = vector.load %arg9[%c0_47, %c0_48, %c0_49, %c0_50] : memref<1x4x8x288xf32, #tpu.memory_space<vmem>>, vector<1x4x8x32xf32>
    tpu.vector_store %arg9[%c0_47, %c0_48, %c0_49, %c0_50], %84 {strides = array<i32>} : memref<1x4x8x288xf32, #tpu.memory_space<vmem>>, vector<1x4x8x32xf32>,
    %86 = vector.extract_strided_slice %77 {offsets = [0, 0, 0, 0], sizes = [1, 4, 8, 32], strides = [1, 1, 1, 1]} : vector<1x6x8x32xf32> to vector<1x4x8x32xf32>
    %c0_51 = arith.constant 0 : index
    %c0_52 = arith.constant 0 : index
    %c0_53 = arith.constant 0 : index
    %c32_54 = arith.constant 32 : index
    %87 = vector.load %arg9[%c0_51, %c0_52, %c0_53, %c32_54] : memref<1x4x8x288xf32, #tpu.memory_space<vmem>>, vector<1x4x8x32xf32>
    tpu.vector_store %arg9[%c0_51, %c0_52, %c0_53, %c32_54], %86 {strides = array<i32>} : memref<1x4x8x288xf32, #tpu.memory_space<vmem>>, vector<1x4x8x32xf32>,
    %88 = vector.extract_strided_slice %83 {offsets = [0, 0, 0, 0], sizes = [1, 4, 8, 32], strides = [1, 1, 1, 1]} : vector<1x6x8x32xf32> to vector<1x4x8x32xf32>
    %c0_55 = arith.constant 0 : index
    %c0_56 = arith.constant 0 : index
    %c0_57 = arith.constant 0 : index
    %c64_58 = arith.constant 64 : index
    %89 = vector.load %arg9[%c0_55, %c0_56, %c0_57, %c64_58] : memref<1x4x8x288xf32, #tpu.memory_space<vmem>>, vector<1x4x8x32xf32>
    tpu.vector_store %arg9[%c0_55, %c0_56, %c0_57, %c64_58], %88 {strides = array<i32>} : memref<1x4x8x288xf32, #tpu.memory_space<vmem>>, vector<1x4x8x32xf32>,
    %90 = vector.extract_strided_slice %80 {offsets = [0, 1, 0, 0], sizes = [1, 4, 8, 32], strides = [1, 1, 1, 1]} : vector<1x6x8x32xf32> to vector<1x4x8x32xf32>
    %c0_59 = arith.constant 0 : index
    %c0_60 = arith.constant 0 : index
    %c0_61 = arith.constant 0 : index
    %c96 = arith.constant 96 : index
    %91 = vector.load %arg9[%c0_59, %c0_60, %c0_61, %c96] : memref<1x4x8x288xf32, #tpu.memory_space<vmem>>, vector<1x4x8x32xf32>
    tpu.vector_store %arg9[%c0_59, %c0_60, %c0_61, %c96], %90 {strides = array<i32>} : memref<1x4x8x288xf32, #tpu.memory_space<vmem>>, vector<1x4x8x32xf32>,
    %92 = vector.extract_strided_slice %77 {offsets = [0, 1, 0, 0], sizes = [1, 4, 8, 32], strides = [1, 1, 1, 1]} : vector<1x6x8x32xf32> to vector<1x4x8x32xf32>
    %c0_62 = arith.constant 0 : index
    %c0_63 = arith.constant 0 : index
    %c0_64 = arith.constant 0 : index
    %c128 = arith.constant 128 : index
    %93 = vector.load %arg9[%c0_62, %c0_63, %c0_64, %c128] : memref<1x4x8x288xf32, #tpu.memory_space<vmem>>, vector<1x4x8x32xf32>
    tpu.vector_store %arg9[%c0_62, %c0_63, %c0_64, %c128], %92 {strides = array<i32>} : memref<1x4x8x288xf32, #tpu.memory_space<vmem>>, vector<1x4x8x32xf32>,
    %94 = vector.extract_strided_slice %83 {offsets = [0, 1, 0, 0], sizes = [1, 4, 8, 32], strides = [1, 1, 1, 1]} : vector<1x6x8x32xf32> to vector<1x4x8x32xf32>
    %c0_65 = arith.constant 0 : index
    %c0_66 = arith.constant 0 : index
    %c0_67 = arith.constant 0 : index
    %c160 = arith.constant 160 : index
    %95 = vector.load %arg9[%c0_65, %c0_66, %c0_67, %c160] : memref<1x4x8x288xf32, #tpu.memory_space<vmem>>, vector<1x4x8x32xf32>
    tpu.vector_store %arg9[%c0_65, %c0_66, %c0_67, %c160], %94 {strides = array<i32>} : memref<1x4x8x288xf32, #tpu.memory_space<vmem>>, vector<1x4x8x32xf32>,
    %96 = vector.extract_strided_slice %80 {offsets = [0, 2, 0, 0], sizes = [1, 4, 8, 32], strides = [1, 1, 1, 1]} : vector<1x6x8x32xf32> to vector<1x4x8x32xf32>
    %c0_68 = arith.constant 0 : index
    %c0_69 = arith.constant 0 : index
    %c0_70 = arith.constant 0 : index
    %c192 = arith.constant 192 : index
    %97 = vector.load %arg9[%c0_68, %c0_69, %c0_70, %c192] : memref<1x4x8x288xf32, #tpu.memory_space<vmem>>, vector<1x4x8x32xf32>
    tpu.vector_store %arg9[%c0_68, %c0_69, %c0_70, %c192], %96 {strides = array<i32>} : memref<1x4x8x288xf32, #tpu.memory_space<vmem>>, vector<1x4x8x32xf32>,
    %98 = vector.extract_strided_slice %77 {offsets = [0, 2, 0, 0], sizes = [1, 4, 8, 32], strides = [1, 1, 1, 1]} : vector<1x6x8x32xf32> to vector<1x4x8x32xf32>
    %c0_71 = arith.constant 0 : index
    %c0_72 = arith.constant 0 : index
    %c0_73 = arith.constant 0 : index
    %c224 = arith.constant 224 : index
    %99 = vector.load %arg9[%c0_71, %c0_72, %c0_73, %c224] : memref<1x4x8x288xf32, #tpu.memory_space<vmem>>, vector<1x4x8x32xf32>
    tpu.vector_store %arg9[%c0_71, %c0_72, %c0_73, %c224], %98 {strides = array<i32>} : memref<1x4x8x288xf32, #tpu.memory_space<vmem>>, vector<1x4x8x32xf32>,
    %100 = vector.extract_strided_slice %83 {offsets = [0, 2, 0, 0], sizes = [1, 4, 8, 32], strides = [1, 1, 1, 1]} : vector<1x6x8x32xf32> to vector<1x4x8x32xf32>
    %c0_74 = arith.constant 0 : index
    %c0_75 = arith.constant 0 : index
    %c0_76 = arith.constant 0 : index
    %c256 = arith.constant 256 : index
    %101 = vector.load %arg9[%c0_74, %c0_75, %c0_76, %c256] : memref<1x4x8x288xf32, #tpu.memory_space<vmem>>, vector<1x4x8x32xf32>
    tpu.vector_store %arg9[%c0_74, %c0_75, %c0_76, %c256], %100 {strides = array<i32>} : memref<1x4x8x288xf32, #tpu.memory_space<vmem>>, vector<1x4x8x32xf32>,
    %c0_77 = arith.constant 0 : index
    %c0_78 = arith.constant 0 : index
    %c0_79 = arith.constant 0 : index
    %c0_80 = arith.constant 0 : index
    %102 = vector.load %arg9[%c0_77, %c0_78, %c0_79, %c0_80] : memref<1x4x8x288xf32, #tpu.memory_space<vmem>>, vector<1x4x8x288xf32>
    %103 = vector.shape_cast %102 : vector<1x4x8x288xf32> to vector<32x288xf32>
    %c0_81 = arith.constant 0 : index
    %c0_82 = arith.constant 0 : index
    %104 = vector.load %arg5[%c0_81, %c0_82] : memref<288x16xf32, #tpu.memory_space<vmem>>, vector<288x16xf32>
    %cst_83 = arith.constant dense<0.000000e+00> : vector<32x16xf32>
    %105 = tpu.matmul %103, %104, %cst_83 {dimension_numbers = #tpu.dot_dimension_numbers<[1], [0], [0], [1], [0, 0, 1, 1], [], []>, precision = #tpu.contract_precision<fp32>} : vector<32x288xf32>, vector<288x16xf32>, vector<32x16xf32> -> vector<32x16xf32>
    %106 = vector.extract_strided_slice %14 {offsets = [0, 2, 0, 0], sizes = [1, 4, 8, 8], strides = [1, 1, 1, 1]} : vector<1x8x8x8xf32> to vector<1x4x8x8xf32>
    %107 = vector.shape_cast %106 : vector<1x4x8x8xf32> to vector<32x8xf32>
    %c0_84 = arith.constant 0 : index
    %c0_85 = arith.constant 0 : index
    %108 = vector.load %arg6[%c0_84, %c0_85] : memref<8x16xf32, #tpu.memory_space<vmem>>, vector<8x16xf32>
    %cst_86 = arith.constant dense<0.000000e+00> : vector<32x16xf32>
    %109 = tpu.matmul %107, %108, %cst_86 {dimension_numbers = #tpu.dot_dimension_numbers<[1], [0], [0], [1], [0, 0, 1, 1], [], []>, precision = #tpu.contract_precision<fp32>} : vector<32x8xf32>, vector<8x16xf32>, vector<32x16xf32> -> vector<32x16xf32>
    %cst_87 = arith.constant 0.919145047 : f32
    %110 = vector.broadcast %cst_87 : f32 to vector<32x16xf32>
    %111 = arith.mulf %110, %109 : vector<32x16xf32>
    %cst_88 = arith.constant 0.393919289 : f32
    %112 = vector.broadcast %cst_88 : f32 to vector<32x16xf32>
    %113 = arith.mulf %112, %105 : vector<32x16xf32>
    %114 = arith.addf %111, %113 : vector<32x16xf32>
    %cst_89 = arith.constant -2.560000e+02 : f32
    %cst_90 = arith.constant 2.560000e+02 : f32
    %115 = vector.broadcast %cst_89 : f32 to vector<32x16xf32>
    %116 = arith.maximumf %115, %114 : vector<32x16xf32>
    %117 = vector.broadcast %cst_90 : f32 to vector<32x16xf32>
    %118 = arith.minimumf %117, %116 : vector<32x16xf32>
    %119 = vector.shape_cast %118 : vector<32x16xf32> to vector<1x4x8x16xf32>
    %120 = vector.extract_strided_slice %119 {offsets = [0, 0, 0, 0], sizes = [1, 4, 1, 16], strides = [1, 1, 1, 1]} : vector<1x4x8x16xf32> to vector<1x4x1x16xf32>
    %121 = vector.shape_cast %120 : vector<1x4x1x16xf32> to vector<1x4x16xf32>
    %122 = vector.extract_strided_slice %119 {offsets = [0, 0, 1, 0], sizes = [1, 4, 1, 16], strides = [1, 1, 1, 1]} : vector<1x4x8x16xf32> to vector<1x4x1x16xf32>
    %123 = vector.shape_cast %122 : vector<1x4x1x16xf32> to vector<1x4x16xf32>
    %124 = vector.extract_strided_slice %119 {offsets = [0, 0, 2, 0], sizes = [1, 4, 1, 16], strides = [1, 1, 1, 1]} : vector<1x4x8x16xf32> to vector<1x4x1x16xf32>
    %125 = vector.shape_cast %124 : vector<1x4x1x16xf32> to vector<1x4x16xf32>
    %126 = vector.extract_strided_slice %119 {offsets = [0, 0, 3, 0], sizes = [1, 4, 1, 16], strides = [1, 1, 1, 1]} : vector<1x4x8x16xf32> to vector<1x4x1x16xf32>
    %127 = vector.shape_cast %126 : vector<1x4x1x16xf32> to vector<1x4x16xf32>
    %128 = vector.extract_strided_slice %119 {offsets = [0, 0, 4, 0], sizes = [1, 4, 1, 16], strides = [1, 1, 1, 1]} : vector<1x4x8x16xf32> to vector<1x4x1x16xf32>
    %129 = vector.shape_cast %128 : vector<1x4x1x16xf32> to vector<1x4x16xf32>
    %130 = vector.extract_strided_slice %119 {offsets = [0, 0, 5, 0], sizes = [1, 4, 1, 16], strides = [1, 1, 1, 1]} : vector<1x4x8x16xf32> to vector<1x4x1x16xf32>
    %131 = vector.shape_cast %130 : vector<1x4x1x16xf32> to vector<1x4x16xf32>
    %132 = vector.extract_strided_slice %119 {offsets = [0, 0, 6, 0], sizes = [1, 4, 1, 16], strides = [1, 1, 1, 1]} : vector<1x4x8x16xf32> to vector<1x4x1x16xf32>
    %133 = vector.shape_cast %132 : vector<1x4x1x16xf32> to vector<1x4x16xf32>
    %134 = vector.extract_strided_slice %119 {offsets = [0, 0, 7, 0], sizes = [1, 4, 1, 16], strides = [1, 1, 1, 1]} : vector<1x4x8x16xf32> to vector<1x4x1x16xf32>
    %135 = vector.shape_cast %134 : vector<1x4x1x16xf32> to vector<1x4x16xf32>
    %136 = tpu.concatenate %121, %123, %125, %127, %129, %131, %133, %135 in 2 : vector<1x4x16xf32>, vector<1x4x16xf32>, vector<1x4x16xf32>, vector<1x4x16xf32>, vector<1x4x16xf32>, vector<1x4x16xf32>, vector<1x4x16xf32>, vector<1x4x16xf32> -> vector<1x4x128xf32>
    %137 = vector.shape_cast %136 : vector<1x4x128xf32> to vector<1x1x4x128xf32>
    %c0_91 = arith.constant 0 : index
    %c0_92 = arith.constant 0 : index
    %c0_93 = arith.constant 0 : index
    %c0_94 = arith.constant 0 : index
    %138 = vector.load %arg7[%c0_91, %c0_92, %c0_93, %c0_94] : memref<1x1x4x128xf32, #tpu.memory_space<vmem>>, vector<1x1x4x128xf32>
    tpu.vector_store %arg7[%c0_91, %c0_92, %c0_93, %c0_94], %137 {strides = array<i32>} : memref<1x1x4x128xf32, #tpu.memory_space<vmem>>, vector<1x1x4x128xf32>,
    return
  }
  func.func @transform_0(%arg0: i32, %arg1: i32) -> (i32, i32, i32, i32) {
    %c0_i32 = arith.constant 0 : i32
    %c0_i32_0 = arith.constant 0 : i32
    %c0_i32_1 = arith.constant 0 : i32
    %c0_i32_2 = arith.constant 0 : i32
    return %arg0, %c0_i32, %c0_i32_0, %c0_i32_1 : i32, i32, i32, i32
  }
  func.func @transform_1(%arg0: i32, %arg1: i32) -> (i32, i32, i32) {
    %c0_i32 = arith.constant 0 : i32
    %c0_i32_0 = arith.constant 0 : i32
    %c0_i32_1 = arith.constant 0 : i32
    return %arg0, %c0_i32, %c0_i32_0 : i32, i32, i32
  }
  func.func @transform_2(%arg0: i32, %arg1: i32) -> (i32, i32) {
    %c0_i32 = arith.constant 0 : i32
    %c0_i32_0 = arith.constant 0 : i32
    %c0_i32_1 = arith.constant 0 : i32
    return %c0_i32, %c0_i32_0 : i32, i32
  }
  func.func @transform_3(%arg0: i32, %arg1: i32) -> (i32, i32) {
    %c0_i32 = arith.constant 0 : i32
    %c0_i32_0 = arith.constant 0 : i32
    %c0_i32_1 = arith.constant 0 : i32
    return %c0_i32, %c0_i32_0 : i32, i32
  }
  func.func @transform_4(%arg0: i32, %arg1: i32) -> (i32, i32) {
    %c0_i32 = arith.constant 0 : i32
    %c0_i32_0 = arith.constant 0 : i32
    %c0_i32_1 = arith.constant 0 : i32
    return %c0_i32, %c0_i32_0 : i32, i32
  }
  func.func @transform_5(%arg0: i32, %arg1: i32) -> (i32, i32, i32, i32) {
    %c0_i32 = arith.constant 0 : i32
    %c0_i32_0 = arith.constant 0 : i32
    %c0_i32_1 = arith.constant 0 : i32
    return %arg0, %arg1, %c0_i32, %c0_i32_0 : i32, i32, i32, i32
  }
}

</mosaic_0001>

<bundles_post_ra>
// kernel: tpu_custom_call.1
= control target key start
LH: loop header
LB: loop body
LE: loop exit
PB: predicated region body
PF: predicated region fallthrough
CT: control target
= control target key end

     0   :  { %10 = vsyncpa [#allocation5], 0  ;;  %s5795_s0 = inlined_call_operand.vmem [shape: f32[2,12,8,8], index: 0, kind: input, shape index: {}]   ;;  %s5796_s1 = inlined_call_operand.vmem [shape: f32[2,1,32], index: 1, kind: input, shape index: {}]   ;;  %s5797_s2 = inlined_call_operand.vmem [shape: f32[72,32], index: 2, kind: input, shape index: {}]   ;;  %s5798_s3 = inlined_call_operand.vmem [shape: f32[288,16], index: 3, kind: input, shape index: {}]   ;;  %s5799_s4 = inlined_call_operand.vmem [shape: f32[8,16], index: 4, kind: input, shape index: {}]   ;;  %s5800_s5 = inlined_call_operand.hbm [shape: f32[2,2,4,128], index: 5, kind: output, shape index: {}]  }
   0x1   :  { %12 = vsyncpa [#allocation5 + $0x1], 0  ;;  %s3803_s18 = smov 0   ;;  %s3805_s19 = smov 0  }
   0x2   :  { %s3807_s20 = smov 0   ;;  %s3809_s21 = smov 0  }
   0x3   :  { %s3811_s22 = smov 0   ;;  %s3813_s23 = smov 0  }
   0x4   :  { %s3815_s24 = smov 0   ;;  %s3817_s25 = smov 0  }
   0x5 LB: > { %s3426_s26 = sadd.s32 4294967295, %s3759_s25   ;;  %s3427_s27 = sadd.s32 4294967294, %s3759_s25   ;;  %s3759_s25 = sphi %s3817_s25, %s18_s25   ;;  %s3755_s24 = sphi %s3815_s24, %s5837_s24   ;;  %s3751_s23 = sphi %s3813_s23, %s5836_s23   ;;  %s3747_s22 = sphi %s3811_s22, %s5835_s22   ;;  %s3743_s21 = sphi %s3809_s21, %s5834_s21   ;;  %s3739_s20 = sphi %s3807_s20, %s5833_s20   ;;  %s3735_s19 = sphi %s3805_s19, %s5832_s19   ;;  %s3731_s18 = sphi %s3803_s18, %s5831_s18  }
   0x6   : > { %s27_s28 = sadd.s32 1, %s3751_s23  ;;  %s30_s29 = sadd.s32 1, %s3755_s24 }
   0x7   : > { %p28_p0 = scmp.ge.s32.totalorder %s27_s28, 2  ;;  %p164_p1 = scmp.ne.s32.totalorder %s3739_s20, %s3735_s19 }
   0x8   : > { %p165_p2 = scmp.eq.s32.totalorder %s3426_s26, 3  ;;  %p170_p5 = scmp.ne.s32.totalorder %s3735_s19, %s3731_s18 }
   0x9   : > { %s5839_s28 = smov (%p28_p0, %s27_s28), 0  ;;  %s5841_s29 = smov (!%p28_p0, %s30_s29), %s3755_s24 }
   0xa   : > { %s150_s30 = ssub.s32 %s3751_s23, %s5839_s28  ;;  %p3854_p3 = por %p165_p2, %p164_p1 }
   0xb   : > { %p32_p4 = scmp.ge.s32.totalorder %s5841_s29, 2  ;;  %p171_p6 = scmp.eq.s32.totalorder %s3427_s27, 3 }
   0xc   : > { %p3430_p7 = scmp.ge.s32.totalorder %s3759_s25, 1  ;;  %p212_p9 = scmp.lt.s32.totalorder %s3759_s25, 5 }
   0xd   : > { %s5843_s29 = smov (%p32_p4, %s5841_s29), 0  ;;  %p3863_p8 = por %p171_p6, %p170_p5 }
   0xe   : > { %s149_s8 = ssub.s32 %s3755_s24, %s5843_s29  ;;  %s154_s9 = sadd.s32 1, %s3739_s20 }
   0xf   : > { %s151_s10 = sor.u32 %s150_s30, %s149_s8  ;;  %p213_p10 = pnand %p3430_p7, %p212_p9 }
  0x10   : > { %p152_p11 = scmp.eq.s32.totalorder %s151_s10, 0  ;;  %p243_p12 = scmp.lt.s32.totalorder (!%p213_p10), %s3747_s22, 1 }
  0x11   : > { %216 = sbr.rel (%p213_p10) target bundleno = 1280 (0x500), region = 40  ;;  %s3459_s14 = sshll.u32 (!%p213_p10), %s3743_s21, 5 }
  0x12   : > { %s3872_s11 = scalar_select %p152_p11, %s3739_s20, %s154_s9  }
  0x13   : > { %s3761_s27 = smov (!%p213_p10), 56   ;;  %s3762_s30 = smov (!%p213_p10), 8  }
  0x14   : > { %s3763_s8 = smov (!%p213_p10), 32   ;;  %s5801_s9 = smov (!%p213_p10), 16  }
  0x15   : > { %s3765_s10 = smov (!%p213_p10), 24   ;;  %s3768_s15 = smov (!%p213_p10), 48  }
  0x16   : > { %s3876_s12 = scalar_select %p243_p12, %s3747_s22, 1  ;;  %vm270_vm0 = vcmask 64512  }
  0x18   : > { %s3492_s13 = smul.u32 96, %s3876_s12 }
  0x1a   : > { %s247_s17 = scalar_lea.vmem %s5795_s0, %s3492_s13  ;;  %s3766_s13 = smov 40  }
  0x1b   : > { %s253_s26 = scalar_lea.vmem %s247_s17, %s3459_s14  ;;  %s3767_s14 = smov 64  }
  0x1c   : > { %v3883_v0 = vld [vmem:[%s253_s26 + $0x20] sm:$0xff]  ;;  %v3885_v1 = vld [vmem:[%s253_s26 + $0x10] sm:$0xff]  ;;  %v3895_v6 = vld [vmem:[%s253_s26 + $0x28] sm:$0xff] }
  0x1d   : > { %v3887_v2 = vld [vmem:[%s253_s26] sm:$0xff]  ;;  %v266_v3 = vmul.f32 %v3883_v0, %v3883_v0  ;;  %v264_v4 = vmul.f32 %v3885_v1, %v3885_v1  ;;  %v3897_v7 = vld [vmem:[%s253_s26 + $0x18] sm:$0xff]  ;;  %v3902_v11 = vld [vmem:[%s253_s26 + $0x8] sm:$0xff]  ;;  %v267_v12 = vmul.f32 %v3895_v6, %v3895_v6 }
  0x1e   : > { %v262_v5 = vmul.f32 %v3887_v2, %v3887_v2  ;;  %v265_v13 = vmul.f32 %v3897_v7, %v3897_v7  ;;  %v263_v14 = vmul.f32 %v3902_v11, %v3902_v11  ;;  %v3913_v18 = vld [vmem:[%s253_s26 + $0x38] sm:$0xff]  ;;  %v3915_v19 = vld [vmem:[%s253_s26 + $0x30] sm:$0xff]  ;;  %s5830_s26 = smov 16  }
  0x1f   : > { %v283_v8 = vsel %vm270_vm0, %v266_v3, 0.0  ;;  %v277_v9 = vsel %vm270_vm0, %v264_v4, 0.0  ;;  %v286_v15 = vsel %vm270_vm0, %v267_v12, 0.0  ;;  %v269_v20 = vmul.f32 %v3913_v18, %v3913_v18 }
  0x20   : > { %v271_v10 = vsel %vm270_vm0, %v262_v5, 0.0  ;;  %284 = vadd.xlane.f32.xlu2 %v283_v8  ;;  %278 = vadd.xlane.f32.xlu1 %v277_v9  ;;  %v280_v16 = vsel %vm270_vm0, %v265_v13, 0.0  ;;  %v274_v17 = vsel %vm270_vm0, %v263_v14, 0.0  ;;  %v268_v21 = vmul.f32 %v3915_v19, %v3915_v19 }
  0x21   : > { %272 = vadd.xlane.f32.xlu0 %v271_v10  ;;  %v292_v22 = vsel %vm270_vm0, %v269_v20, 0.0 }
  0x22   : > { %v289_v23 = vsel %vm270_vm0, %v268_v21, 0.0 }
  0x28   : > { %287 = vadd.xlane.f32.xlu2 %v286_v15  ;;  %281 = vadd.xlane.f32.xlu1 %v280_v16 }
  0x29   : > { %275 = vadd.xlane.f32.xlu0 %v274_v17 }
  0x30   : > { %293 = vadd.xlane.f32.xlu1 %v292_v22 }
  0x31   : > { %290 = vadd.xlane.f32.xlu0 %v289_v23 }
  0x93   : > { %v3923_v24 = vpop.xlane.xlu2 %284  ;;  %v3925_v25 = vpop.xlane.xlu1 %278 }
  0x94   : > { %3577 = vrsqrt.f32 %v3923_v24  ;;  %v3928_v26 = vpop.xlane.xlu0 %272  ;;  %vm350_vm1 = vcmp.eq.f32.partialorder %v3923_v24, inf  ;;  %v353_v42 = vand.u32 2147483648, %v3923_v24  ;;  %vm326_vm2 = vcmp.eq.f32.partialorder %v3925_v25, inf }
  0x95   : > { %3579 = vrsqrt.f32 %v3925_v25  ;;  %vm352_vm3 = vcmp.eq.f32.partialorder %v3923_v24, 0.0  ;;  %vm328_vm4 = vcmp.eq.f32.partialorder %v3925_v25, 0.0  ;;  %v329_v46 = vand.u32 2147483648, %v3925_v25 }
  0x96   : > { %3581 = vrsqrt.f32 %v3928_v26  ;;  %vm302_vm5 = vcmp.eq.f32.partialorder %v3928_v26, inf  ;;  %vm304_vm6 = vcmp.eq.f32.partialorder %v3928_v26, 0.0  ;;  %v305_v53 = vand.u32 2147483648, %v3928_v26 }
  0x9a   : > { %v3578_v27 = vpop.eup %3577 }
  0x9b   : > { %v3580_v28 = vpop.eup %3579  ;;  %v344_v29 = vmul.f32 %v3578_v27, %v3923_v24  ;;  %v3933_v30 = vpop.xlane.xlu2 %287 }
  0x9c   : > { %v3935_v31 = vpop.xlane.xlu1 %281  ;;  %v3582_v32 = vpop.eup %3581  ;;  %v320_v33 = vmul.f32 %v3580_v28, %v3925_v25  ;;  %3583 = vrsqrt.f32 %v3933_v30  ;;  %vm362_vm7 = vcmp.eq.f32.partialorder %v3933_v30, inf  ;;  %vm364_vm8 = vcmp.eq.f32.partialorder %v3933_v30, 0.0 }
  0x9d   : > { %v3939_v34 = vpop.xlane.xlu0 %275  ;;  %v345_v35 = vmul.f32 %v3578_v27, %v344_v29  ;;  %v296_v36 = vmul.f32 %v3582_v32, %v3928_v26  ;;  %3585 = vrsqrt.f32 %v3935_v31  ;;  %v365_v4 = vand.u32 2147483648, %v3933_v30 }
  0x9e   : > { %v321_v37 = vmul.f32 %v3580_v28, %v320_v33  ;;  %3587 = vrsqrt.f32 %v3939_v34  ;;  %vm338_vm9 = vcmp.eq.f32.partialorder %v3935_v31, inf  ;;  %vm340_vm10 = vcmp.eq.f32.partialorder %v3935_v31, 0.0 }
  0x9f   : > { %v346_v38 = vmul.f32 0.5, %v345_v35  ;;  %v297_v39 = vmul.f32 %v3582_v32, %v296_v36  ;;  %v341_v15 = vand.u32 2147483648, %v3935_v31  ;;  %vm314_vm11 = vcmp.eq.f32.partialorder %v3939_v34, inf }
  0xa0   : > { %v322_v40 = vmul.f32 0.5, %v321_v37  ;;  %v317_v37 = vand.u32 2147483648, %v3939_v34  ;;  %vm316_vm12 = vcmp.eq.f32.partialorder %v3939_v34, 0.0 }
  0xa1   : > { %v347_v41 = vsub.f32 1.5, %v346_v38  ;;  %v298_v43 = vmul.f32 0.5, %v297_v39 }
  0xa2   : > { %v3584_v44 = vpop.eup %3583  ;;  %v323_v45 = vsub.f32 1.5, %v322_v40 }
  0xa3   : > { %v3586_v47 = vpop.eup %3585  ;;  %v348_v48 = vmul.f32 %v3578_v27, %v347_v41  ;;  %v299_v49 = vsub.f32 1.5, %v298_v43  ;;  %v356_v50 = vmul.f32 %v3584_v44, %v3933_v30 }
  0xa4   : > { %v3953_v51 = vpop.xlane.xlu1 %293  ;;  %v324_v52 = vmul.f32 %v3580_v28, %v323_v45  ;;  %v332_v54 = vmul.f32 %v3586_v47, %v3935_v31  ;;  %v3588_v56 = vpop.eup %3587 }
  0xa5   : > { %v3957_v55 = vpop.xlane.xlu0 %290  ;;  %3589 = vrsqrt.f32 %v3953_v51  ;;  %v349_v57 = vmul.f32 %v348_v48, %v3923_v24  ;;  %v300_v58 = vmul.f32 %v3582_v32, %v299_v49  ;;  %v357_v59 = vmul.f32 %v3584_v44, %v356_v50 }
  0xa6   : > { %3591 = vrsqrt.f32 %v3957_v55  ;;  %v325_v60 = vmul.f32 %v324_v52, %v3925_v25  ;;  %v333_v61 = vmul.f32 %v3586_v47, %v332_v54  ;;  %v308_v62 = vmul.f32 %v3588_v56, %v3939_v34 }
  0xa7   : > { %v301_v63 = vmul.f32 %v300_v58, %v3928_v26  ;;  %v358_v3 = vmul.f32 0.5, %v357_v59  ;;  %v351_v5 = vsel %vm350_vm1, %v3923_v24, %v349_v57  ;;  %vm374_vm13 = vcmp.eq.f32.partialorder %v3957_v55, inf }
  0xa8   : > { %v327_v8 = vsel %vm326_vm2, %v3925_v25, %v325_v60  ;;  %v334_v9 = vmul.f32 0.5, %v333_v61  ;;  %v309_v10 = vmul.f32 %v3588_v56, %v308_v62  ;;  %v354_v25 = vsel %vm352_vm3, %v353_v42, %v351_v5 }
  0xa9   : > { %v330_v12 = vsel %vm328_vm4, %v329_v46, %v327_v8  ;;  %v303_v13 = vsel %vm302_vm5, %v3928_v26, %v301_v63  ;;  %v359_v14 = vsub.f32 1.5, %v358_v3  ;;  %v395_v41 = vmul.f32 0.35355338, %v354_v25 }
  0xaa   : > { %v393_v17 = vmul.f32 0.35355338, %v330_v12  ;;  %v306_v20 = vsel %vm304_vm6, %v305_v53, %v303_v13  ;;  %v335_v21 = vsub.f32 1.5, %v334_v9  ;;  %v310_v22 = vmul.f32 0.5, %v309_v10 }
  0xab   : > { %v3982_v16 = vpop.eup %3589  ;;  %v391_v27 = vmul.f32 0.35355338, %v306_v20  ;;  %v360_v28 = vmul.f32 %v3584_v44, %v359_v14  ;;  %v4017_v53 = vadd.f32 0.0001, %v395_v41  ;;  %vm376_vm14 = vcmp.eq.f32.partialorder %v3957_v55, 0.0 }
  0xac   : > { %v3592_v23 = vpop.eup %3591  ;;  %v3989_v29 = vadd.f32 0.0001, %v393_v17  ;;  %v336_v32 = vmul.f32 %v3586_v47, %v335_v21  ;;  %v311_v33 = vsub.f32 1.5, %v310_v22  ;;  %v380_v24 = vmul.f32 %v3982_v16, %v3953_v51 }
  0xad   : > { %v368_v35 = vmul.f32 %v3592_v23, %v3957_v55  ;;  %v3992_v36 = vadd.f32 0.0001, %v391_v27  ;;  %v361_v26 = vmul.f32 %v360_v28, %v3933_v30  ;;  %v377_v61 = vand.u32 2147483648, %v3957_v55 }
  0xae   : > { %3593 = vrcp.f32 %v3989_v29  ;;  %v337_v38 = vmul.f32 %v336_v32, %v3935_v31  ;;  %v312_v39 = vmul.f32 %v3588_v56, %v311_v33  ;;  %v381_v43 = vmul.f32 %v3982_v16, %v380_v24 }
  0xaf   : > { %v369_v40 = vmul.f32 %v3592_v23, %v368_v35  ;;  %3595 = vrcp.f32 %v3992_v36  ;;  %v363_v42 = vsel %vm362_vm7, %v3933_v30, %v361_v26  ;;  %v444_v10 = vand.u32 2147483647, %v3989_v29 }
  0xb0   : > { %v366_v44 = vsel %vm364_vm8, %v365_v4, %v363_v42  ;;  %v339_v45 = vsel %vm338_vm9, %v3935_v31, %v337_v38  ;;  %v313_v46 = vmul.f32 %v312_v39, %v3939_v34  ;;  %v382_v56 = vmul.f32 0.5, %v381_v43 }
  0xb1   : > { %v370_v47 = vmul.f32 0.5, %v369_v40  ;;  %v342_v48 = vsel %vm340_vm10, %v341_v15, %v339_v45  ;;  %v396_v49 = vmul.f32 0.35355338, %v366_v44  ;;  %v446_v12 = vand.u32 2147483648, %v3989_v29 }
  0xb2   : > { %v394_v50 = vmul.f32 0.35355338, %v342_v48  ;;  %v315_v52 = vsel %vm314_vm11, %v3939_v34, %v313_v46  ;;  %v383_v4 = vsub.f32 1.5, %v382_v56  ;;  %vm440_vm1 = vweird.f32 %v3989_v29 }
  0xb3   : > { %v371_v30 = vsub.f32 1.5, %v370_v47  ;;  %v318_v54 = vsel %vm316_vm12, %v317_v37, %v315_v52  ;;  %v4025_v34 = vadd.f32 0.0001, %v396_v49  ;;  %v418_v20 = vand.u32 2147483648, %v3992_v36 }
  0xb4   : > { %v3594_v57 = vpop.eup %3593  ;;  %v4019_v58 = vadd.f32 0.0001, %v394_v50  ;;  %v392_v59 = vmul.f32 0.35355338, %v318_v54  ;;  %v4044_v27 = vmul.f32 %v3982_v16, %v383_v4  ;;  %vm445_vm4 = vcmp.eq.f32.partialorder %v444_v10, 8.507059e+37 }
  0xb5   : > { %v372_v60 = vmul.f32 %v3592_v23, %v371_v30  ;;  %v3596_v31 = vpop.eup %3595  ;;  %v436_v62 = vmul.f32 %v3594_v57, %v3989_v29  ;;  %vm441_vm15 = vweird.f32 %v3594_v57  ;;  %v447_v28 = vor.u32 1.1754944e-38, %v446_v12 }
  0xb6   : > { %3597 = vrcp.f32 %v4019_v58  ;;  %v4028_v63 = vadd.f32 0.0001, %v392_v59  ;;  %v408_v8 = vmul.f32 %v3596_v31, %v3992_v36  ;;  %vm413_vm2 = vweird.f32 %v3596_v31  ;;  %vm442_vm3 = vmor %vm440_vm1, %vm441_vm15 }
  0xb7   : > { %v373_v3 = vmul.f32 %v372_v60, %v3957_v55  ;;  %3599 = vrcp.f32 %v4017_v53  ;;  %v437_v5 = vsub.f32 1.0, %v436_v62  ;;  %vm412_vm5 = vweird.f32 %v3992_v36 }
  0xb8   : > { %3601 = vrcp.f32 %v4028_v63  ;;  %v409_v15 = vsub.f32 1.0, %v408_v8  ;;  %vm414_vm6 = vmor %vm412_vm5, %vm413_vm2  ;;  %v419_v24 = vor.u32 1.1754944e-38, %v418_v20  ;;  %vm454_vm7 = vweird.f32 %v4019_v58 }
  0xb9   : > { %v375_v9 = vsel %vm374_vm13, %v3957_v55, %v373_v3  ;;  %v438_v14 = vmul.f32 %v3594_v57, %v437_v5  ;;  %3603 = vrcp.f32 %v4025_v34  ;;  %v416_v55 = vand.u32 2147483647, %v3992_v36 }
  0xba   : > { %v378_v13 = vsel %vm376_vm14, %v377_v61, %v375_v9  ;;  %v410_v22 = vmul.f32 %v3596_v31, %v409_v15  ;;  %v458_v16 = vand.u32 2147483647, %v4019_v58  ;;  %v460_v42 = vand.u32 2147483648, %v4019_v58 }
  0xbb   : > { %v397_v17 = vmul.f32 0.35355338, %v378_v13  ;;  %v439_v21 = vadd.f32 %v3594_v57, %v438_v14  ;;  %vm417_vm8 = vcmp.eq.f32.partialorder %v416_v55, 8.507059e+37  ;;  %vm426_vm11 = vweird.f32 %v4028_v63 }
  0xbc   : > { %v3598_v23 = vpop.eup %3597  ;;  %v411_v29 = vadd.f32 %v3596_v31, %v410_v22  ;;  %vm4065_vm10 = vcmp.eq.f32.partialorder %v458_v16, 8.507059e+37  ;;  %v432_v48 = vand.u32 2147483648, %v4028_v63  ;;  %vm386_vm12 = vcmp.eq.f32.partialorder %v3953_v51, inf }
  0xbd   : > { %v4041_v25 = vadd.f32 0.0001, %v397_v17  ;;  %v4046_v32 = vpop.eup %3599  ;;  %v443_v33 = vsel %vm442_vm3, %v3594_v57, %v439_v21  ;;  %v450_v35 = vmul.f32 %v3598_v23, %v4019_v58  ;;  %vm455_vm9 = vweird.f32 %v3598_v23 }
  0xbe   : > { %v3602_v26 = vpop.eup %3601  ;;  %v448_v37 = vsel %vm445_vm4, %v447_v28, %v443_v33  ;;  %v415_v39 = vsel %vm414_vm6, %v3596_v31, %v411_v29  ;;  %vm456_vm13 = vmor %vm454_vm7, %vm455_vm9  ;;  %v461_v52 = vor.u32 1.1754944e-38, %v460_v42  ;;  %v430_v54 = vand.u32 2147483647, %v4028_v63 }
  0xbf   : > { %v4054_v38 = vmul.f32 %v448_v37, %v3885_v1  ;;  %v451_v40 = vsub.f32 1.0, %v450_v35  ;;  %v4056_v41 = vpop.eup %3603  ;;  %3605 = vrcp.f32 %v4041_v25  ;;  %v420_v36 = vsel %vm417_vm8, %v419_v24, %v415_v39 }
  0xc0   : > { %v422_v43 = vmul.f32 %v3602_v26, %v4028_v63  ;;  %v4063_v45 = vmul.f32 %v420_v36, %v3887_v2  ;;  %v464_v2 = vmul.f32 %v4046_v32, %v4017_v53  ;;  %vm427_vm14 = vweird.f32 %v3602_v26 }
  0xc1   : > { %v3437_v44 = vmul.f32 -1.442695, %v4054_v38  ;;  %v452_v46 = vmul.f32 %v3598_v23, %v451_v40  ;;  %v433_v57 = vor.u32 1.1754944e-38, %v432_v48  ;;  %vm388_vm15 = vcmp.eq.f32.partialorder %v3953_v51, 0.0  ;;  %vm428_vm2 = vmor %vm426_vm11, %vm427_vm14 }
  0xc2   : > { %v423_v47 = vsub.f32 1.0, %v422_v43  ;;  %v3435_v49 = vmul.f32 -1.442695, %v4063_v45  ;;  %v465_v59 = vsub.f32 1.0, %v464_v2  ;;  %vm469_vm1 = vweird.f32 %v4046_v32 }
  0xc3   : > { %3607 = vpow2.f32 %v3437_v44  ;;  %v453_v50 = vadd.f32 %v3598_v23, %v452_v46  ;;  %v472_v58 = vand.u32 2147483647, %v4017_v53  ;;  %v474_v4 = vand.u32 2147483648, %v4017_v53 }
  0xc4   : > { %v424_v30 = vmul.f32 %v3602_v26, %v423_v47  ;;  %3609 = vpow2.f32 %v3435_v49  ;;  %v466_v3 = vmul.f32 %v4046_v32, %v465_v59  ;;  %v478_v5 = vmul.f32 %v4056_v41, %v4025_v34 }
  0xc5   : > { %v457_v56 = vsel %vm456_vm13, %v3598_v23, %v453_v50  ;;  %v4078_v60 = vpop.eup %3605  ;;  %v389_v8 = vand.u32 2147483648, %v3953_v51  ;;  %vm431_vm3 = vcmp.eq.f32.partialorder %v430_v54, 8.507059e+37  ;;  %vm468_vm4 = vweird.f32 %v4017_v53 }
  0xc6   : > { %v462_v31 = vsel %vm4065_vm10, %v461_v52, %v457_v56  ;;  %v425_v61 = vadd.f32 %v3602_v26, %v424_v30  ;;  %v467_v63 = vadd.f32 %v4046_v32, %v466_v3  ;;  %v479_v13 = vsub.f32 1.0, %v478_v5  ;;  %vm470_vm5 = vmor %vm468_vm4, %vm469_vm1 }
  0xc7   : > { %v4086_v62 = vmul.f32 %v462_v31, %v3897_v7  ;;  %v385_v14 = vmul.f32 %v4044_v27, %v3953_v51  ;;  %vm473_vm6 = vcmp.eq.f32.partialorder %v472_v58, 8.507059e+37  ;;  %v475_v21 = vor.u32 1.1754944e-38, %v474_v4 }
  0xc8   : > { %v429_v9 = vsel %vm428_vm2, %v3602_v26, %v425_v61  ;;  %v471_v20 = vsel %vm470_vm5, %v4046_v32, %v467_v63  ;;  %v480_v22 = vmul.f32 %v4056_v41, %v479_v13  ;;  %vm483_vm7 = vweird.f32 %v4056_v41 }
  0xc9   : > { %v3608_v10 = vpop.eup %3607  ;;  %v3438_v7 = vmul.f32 -1.442695, %v4086_v62  ;;  %v434_v12 = vsel %vm431_vm3, %v433_v57, %v429_v9  ;;  %v486_v55 = vand.u32 2147483647, %v4025_v34  ;;  %v476_v28 = vsel %vm473_vm6, %v475_v21, %v471_v20 }
  0xca   : > { %v4100_v15 = vadd.f32 1.0, %v3608_v10  ;;  %v4103_v17 = vmul.f32 %v434_v12, %v3902_v11  ;;  %v3610_v53 = vpop.eup %3609  ;;  %v488_v11 = vand.u32 2147483648, %v4025_v34  ;;  %v481_v33 = vadd.f32 %v4056_v41, %v480_v22 }
  0xcb   : > { %3611 = vpow2.f32 %v3438_v7  ;;  %v4113_v23 = vadd.f32 1.0, %v3610_v53  ;;  %v387_v32 = vsel %vm386_vm12, %v3953_v51, %v385_v14  ;;  %v4121_v29 = vmul.f32 %v476_v28, %v3883_v0 }
  0xcc   : > { %3613 = vrcp.f32 %v4100_v15  ;;  %v3436_v27 = vmul.f32 -1.442695, %v4103_v17  ;;  %vm482_vm8 = vweird.f32 %v4025_v34  ;;  %v492_v35 = vmul.f32 %v4078_v60, %v4041_v25 }
  0xcd   : > { %v598_v26 = vand.u32 2147483647, %v4100_v15  ;;  %3615 = vrcp.f32 %v4113_v23  ;;  %vm484_vm9 = vmor %vm482_vm8, %vm483_vm7  ;;  %v3439_v37 = vmul.f32 -1.442695, %v4121_v29  ;;  %v489_v16 = vor.u32 1.1754944e-38, %v488_v11 }
  0xce   : > { %3617 = vpow2.f32 %v3436_v27  ;;  %v485_v24 = vsel %vm484_vm9, %v4056_v41, %v481_v33  ;;  %v390_v0 = vsel %vm388_vm15, %v389_v8, %v387_v32  ;;  %v600_v34 = vand.u32 2147483648, %v4100_v15 }
  0xcf   : > { %v568_v40 = vand.u32 2147483647, %v4113_v23  ;;  %vm487_vm10 = vcmp.eq.f32.partialorder %v486_v55, 8.507059e+37  ;;  %3619 = vpow2.f32 %v3439_v37  ;;  %v493_v44 = vsub.f32 1.0, %v492_v35 }
  0xd0   : > { %v490_v43 = vsel %vm487_vm10, %v489_v16, %v485_v24  ;;  %v4140_v1 = vmul.f32 0.35355338, %v390_v0  ;;  %vm594_vm11 = vweird.f32 %v4100_v15  ;;  %vm4143_vm12 = vcmp.eq.f32.partialorder %v598_v26, 8.507059e+37 }
  0xd1   : > { %v3612_v39 = vpop.eup %3611  ;;  %v4138_v41 = vmul.f32 %v490_v43, %v3895_v6  ;;  %v601_v49 = vor.u32 1.1754944e-38, %v600_v34  ;;  %v570_v50 = vand.u32 2147483648, %v4113_v23  ;;  %vm564_vm13 = vweird.f32 %v4113_v23 }
  0xd2   : > { %v3614_v36 = vpop.eup %3613  ;;  %v4134_v42 = vadd.f32 1.0, %v3612_v39  ;;  %vm4152_vm14 = vcmp.eq.f32.partialorder %v568_v40, 8.507059e+37  ;;  %v494_v54 = vmul.f32 %v4078_v60, %v493_v44  ;;  %vm496_vm1 = vweird.f32 %v4041_v25 }
  0xd3   : > { %v590_v46 = vmul.f32 %v3614_v36, %v4100_v15  ;;  %v3616_v47 = vpop.eup %3615  ;;  %v3440_v2 = vmul.f32 -1.442695, %v4138_v41  ;;  %vm595_vm15 = vweird.f32 %v3614_v36  ;;  %vm497_vm2 = vweird.f32 %v4078_v60 }
  0xd4   : > { %3621 = vrcp.f32 %v4134_v42  ;;  %v3618_v52 = vpop.eup %3617  ;;  %v560_v6 = vmul.f32 %v3616_v47, %v4113_v23  ;;  %v613_v61 = vand.u32 2147483647, %v4134_v42  ;;  %v571_v3 = vor.u32 1.1754944e-38, %v570_v50  ;;  %vm596_vm3 = vmor %vm594_vm11, %vm595_vm15 }
  0xd5   : > { %v591_v48 = vsub.f32 1.0, %v590_v46  ;;  %v4157_v57 = vadd.f32 1.0, %v3618_v52  ;;  %3623 = vpow2.f32 %v3440_v2  ;;  %v3620_v59 = vpop.eup %3619  ;;  %v615_v4 = vand.u32 2147483648, %v4134_v42  ;;  %vm4175_vm6 = vmor %vm496_vm1, %vm497_vm2 }
  0xd6   : > { %v561_v31 = vsub.f32 1.0, %v560_v6  ;;  %vm565_vm4 = vweird.f32 %v3616_v47  ;;  %v4166_v9 = vadd.f32 1.0, %v3620_v59  ;;  %v4169_v10 = vadd.f32 %v4078_v60, %v494_v54 }
  0xd7   : > { %v592_v56 = vmul.f32 %v3614_v36, %v591_v48  ;;  %3625 = vrcp.f32 %v4157_v57  ;;  %vm609_vm5 = vweird.f32 %v4134_v42  ;;  %v500_v13 = vand.u32 2147483647, %v4041_v25  ;;  %vm566_vm8 = vmor %vm564_vm13, %vm565_vm4 }
  0xd8   : > { %v562_v8 = vmul.f32 %v3616_v47, %v561_v31  ;;  %vm4182_vm7 = vcmp.eq.f32.partialorder %v613_v61, 8.507059e+37  ;;  %3627 = vrcp.f32 %v4166_v9  ;;  %v616_v55 = vor.u32 1.1754944e-38, %v615_v4 }
  0xd9   : > { %v593_v58 = vadd.f32 %v3614_v36, %v592_v56  ;;  %v583_v11 = vand.u32 2147483647, %v4157_v57  ;;  %v585_v28 = vand.u32 2147483648, %v4157_v57  ;;  %v499_v32 = vsel %vm4175_vm6, %v4078_v60, %v4169_v10 }
  0xda   : > { %v3622_v5 = vpop.eup %3621  ;;  %v563_v15 = vadd.f32 %v3616_v47, %v562_v8  ;;  %vm4202_vm10 = vcmp.eq.f32.partialorder %v500_v13, 8.507059e+37  ;;  %vm579_vm11 = vweird.f32 %v4157_v57  ;;  %v502_v0 = vand.u32 2147483648, %v4041_v25 }
  0xdb   : > { %v597_v7 = vsel %vm596_vm3, %v3614_v36, %v593_v58  ;;  %v605_v12 = vmul.f32 %v3622_v5, %v4134_v42  ;;  %v3624_v20 = vpop.eup %3623  ;;  %vm610_vm9 = vweird.f32 %v3622_v5  ;;  %v586_v44 = vor.u32 1.1754944e-38, %v585_v28 }
  0xdc   : > { %v602_v14 = vsel %vm4143_vm12, %v601_v49, %v597_v7  ;;  %v567_v27 = vsel %vm566_vm8, %v3616_v47, %v563_v15  ;;  %v4192_v33 = vadd.f32 1.0, %v3624_v20  ;;  %vm4214_vm12 = vcmp.eq.f32.partialorder %v583_v11, 8.507059e+37  ;;  %vm611_vm13 = vmor %vm609_vm5, %vm610_vm9 }
  0xdd   : > { %v681_v21 = vmul.f32 %v602_v14, %v4054_v38  ;;  %v606_v22 = vsub.f32 1.0, %v605_v12  ;;  %v3626_v35 = vpop.eup %3625  ;;  %v572_v23 = vsel %vm4152_vm14, %v571_v3, %v567_v27  ;;  %vm624_vm14 = vweird.f32 %v4166_v9 }
  0xde   : > { %v679_v16 = vmul.f32 %v572_v23, %v4063_v45  ;;  %v575_v39 = vmul.f32 %v3626_v35, %v4157_v57  ;;  %v628_v45 = vand.u32 2147483647, %v4166_v9  ;;  %3629 = vrcp.f32 %v4192_v33  ;;  %v3628_v36 = vpop.eup %3627 }
  0xdf   : > { %v4198_v26 = vmul.f32 1.6778524, %v681_v21  ;;  %v607_v37 = vmul.f32 %v3622_v5, %v606_v22  ;;  %v620_v51 = vmul.f32 %v3628_v36, %v4166_v9  ;;  %v630_v47 = vand.u32 2147483648, %v4166_v9 }
  0xe0   : > { %v4220_v43 = vmul.f32 1.6778524, %v679_v16  ;;  %v576_v25 = vsub.f32 1.0, %v575_v39  ;;  %vm735_vm15 = vcmask 1040384   ;;  %vm580_vm1 = vweird.f32 %v3626_v35 }
  0xe1   : > { %923 = vrot.lane.b32.xlu1 %v4198_v26, %s3761_s27  ;;  %763 = vrot.lane.b32.xlu0 %v4198_v26, %s3762_s30  ;;  %v608_v34 = vadd.f32 %v3622_v5, %v607_v37  ;;  %v705_v42 = vrot.slane %v4198_v26, 1  ;;  %v621_v2 = vsub.f32 1.0, %v620_v51  ;;  %vm4234_vm2 = vcmp.eq.f32.partialorder %v628_v45, 8.507059e+37  ;;  %vm581_vm3 = vmor %vm579_vm11, %vm580_vm1 }
  0xe2   : > { %759 = vrot.lane.b32.xlu2 %v4220_v43, %s3762_s30  ;;  %v577_v49 = vmul.f32 %v3626_v35, %v576_v25  ;;  %v721_v6 = vrot.slane %v4198_v26, 7  ;;  %v703_v54 = vrot.slane %v4220_v43, 1  ;;  %v719_v56 = vrot.slane %v4220_v43, 7 }
  0xe3   : > { %v612_v46 = vsel %vm611_vm13, %v3622_v5, %v608_v34  ;;  %v503_v59 = vor.u32 1.1754944e-38, %v502_v0  ;;  %v622_v58 = vmul.f32 %v3628_v36, %v621_v2  ;;  %vm625_vm4 = vweird.f32 %v3628_v36 }
  0xe4   : > { %v617_v48 = vsel %vm4182_vm7, %v616_v55, %v612_v46  ;;  %v578_v30 = vadd.f32 %v3626_v35, %v577_v49  ;;  %v3630_v31 = vpop.eup %3629  ;;  %v631_v3 = vor.u32 1.1754944e-38, %v630_v47  ;;  %v643_v8 = vand.u32 2147483647, %v4192_v33  ;;  %vm626_vm5 = vmor %vm624_vm14, %vm625_vm4 }
  0xe5   : > { %v682_v50 = vmul.f32 %v617_v48, %v4086_v62  ;;  %v635_v5 = vmul.f32 %v3630_v31, %v4192_v33  ;;  %v4252_v7 = vsel %vm735_vm15, %v705_v42, %v721_v6  ;;  %v623_v12 = vadd.f32 %v3628_v36, %v622_v58 }
  0xe6   : > { %v582_v4 = vsel %vm581_vm3, %v3626_v35, %v578_v30  ;;  %755 = vst.msk [vmem:[#allocation2 + $0x10] sm:$0xff] %vm270_vm0, %v4252_v7  ;;  %v504_v20 = vsel %vm4202_vm10, %v503_v59, %v499_v32  ;;  %v736_v21 = vsel %vm735_vm15, %v703_v54, %v719_v56  ;;  %v645_v22 = vand.u32 2147483648, %v4192_v33 }
  0xe7   : > { %v4241_v61 = vmul.f32 1.6778524, %v682_v50  ;;  %v587_v57 = vsel %vm4214_vm12, %v586_v44, %v582_v4  ;;  %v636_v53 = vsub.f32 1.0, %v635_v5  ;;  %v4282_v9 = vmul.f32 %v504_v20, %v3915_v19  ;;  %753 = vst.msk [vmem:[#allocation2] sm:$0xff] %vm270_vm0, %v736_v21 }
  0xe8   : > { %v680_v15 = vmul.f32 %v587_v57, %v4103_v17  ;;  %v627_v17 = vsel %vm626_vm5, %v3628_v36, %v623_v12  ;;  %vm640_vm6 = vweird.f32 %v3630_v31  ;;  %v4299_v19 = vadd.f32 0.0001, %v4140_v1 }
  0xe9   : > { %765 = vrot.lane.b32.xlu1 %v4241_v61, %s3762_s30  ;;  %850 = vrot.lane.b32.xlu0 %v4241_v61, %s3763_s8  ;;  %v706_v13 = vrot.slane %v4241_v61, 1  ;;  %v722_v14 = vrot.slane %v4241_v61, 7  ;;  %v632_v63 = vsel %vm4234_vm2, %v631_v3, %v627_v17  ;;  %v637_v55 = vmul.f32 %v3630_v31, %v636_v53 }
  0xea   : > { %v4292_v10 = vmul.f32 1.6778524, %v680_v15  ;;  %v683_v11 = vmul.f32 %v632_v63, %v4121_v29  ;;  %v3441_v27 = vmul.f32 -1.442695, %v4282_v9  ;;  %vm639_vm7 = vweird.f32 %v4192_v33 }
  0xeb   : > { %v4289_v60 = vsel %vm735_vm15, %v706_v13, %v722_v14  ;;  %v638_v28 = vadd.f32 %v3630_v31, %v637_v55  ;;  %vm641_vm8 = vmor %vm639_vm7, %vm640_vm6  ;;  %v646_v37 = vor.u32 1.1754944e-38, %v645_v22  ;;  %vm644_vm9 = vcmp.eq.f32.partialorder %v643_v8, 8.507059e+37 }
  0xec   : > { %756 = vst.msk [vmem:[#allocation2 + $0x18] sm:$0xff] %vm270_vm0, %v4289_v60  ;;  %846 = vrot.lane.b32.xlu2 %v4292_v10, %s3763_s8  ;;  %v704_v32 = vrot.slane %v4292_v10, 1  ;;  %v720_v35 = vrot.slane %v4292_v10, 7  ;;  %v4308_v23 = vmul.f32 1.6778524, %v683_v11  ;;  %3631 = vpow2.f32 %v3441_v27 }
  0xed   : > { %v642_v1 = vsel %vm641_vm8, %v3630_v31, %v638_v28  ;;  %3633 = vrcp.f32 %v4299_v19  ;;  %vm744_vm10 = vcmask 1046528   ;;  %vm510_vm11 = vweird.f32 %v4299_v19 }
  0xee   : > { %v737_v24 = vsel %vm735_vm15, %v704_v32, %v720_v35  ;;  %v647_v33 = vsel %vm644_vm9, %v646_v37, %v642_v1  ;;  %v707_v16 = vrot.slane %v4308_v23, 1  ;;  %v723_v39 = vrot.slane %v4308_v23, 7 }
  0xef   : > { %754 = vst.msk [vmem:[#allocation2 + $0x8] sm:$0xff] %vm270_vm0, %v737_v24  ;;  %v684_v0 = vmul.f32 %v647_v33, %v4138_v41  ;;  %v745_v2 = vsel %vm744_vm10, %v703_v54, %v719_v56  ;;  %v516_v59 = vand.u32 2147483648, %v4299_v19  ;;  %v514_v54 = vand.u32 2147483647, %v4299_v19 }
  0xf0   : > { %v4325_v34 = vsel %vm735_vm15, %v707_v16, %v723_v39  ;;  %v746_v56 = vsel %vm744_vm10, %v704_v32, %v720_v35  ;;  %v747_v15 = vsel %vm744_vm10, %v705_v42, %v721_v6  ;;  %vm777_vm8 = vcmask 130112  }
  0xf1   : > { %852 = vrot.lane.b32.xlu1 %v4308_v23, %s3763_s8  ;;  %927 = vrot.lane.b32.xlu0 %v4308_v23, %s3761_s27  ;;  %v692_v40 = vmul.f32 1.6778524, %v684_v0  ;;  %757 = vst.msk [vmem:[#allocation2 + $0x20] sm:$0xff] %vm270_vm0, %v4325_v34  ;;  %v517_v58 = vor.u32 1.1754944e-38, %v516_v59  ;;  %vm515_vm14 = vcmp.eq.f32.partialorder %v514_v54, 8.507059e+37 }
  0xf2   : > { %v3632_v45 = vpop.eup %3631 }
  0xf3   : > { %v557_v36 = vadd.f32 1.0, %v3632_v45  ;;  %v708_v25 = vrot.slane %v692_v40, 1  ;;  %v724_v44 = vrot.slane %v692_v40, 7  ;;  %v3634_v46 = vpop.eup %3633 }
  0xf4   : > { %761 = vrot.lane.b32.xlu2 %v4292_v10, %s3762_s30  ;;  %v506_v48 = vmul.f32 %v3634_v46, %v4299_v19  ;;  %vm511_vm12 = vweird.f32 %v3634_v46 }
  0xf5   : > { %3635 = vrcp.f32 %v557_v36  ;;  %v4334_v51 = vsel %vm744_vm10, %v708_v25, %v724_v44  ;;  %v4337_v47 = vsel %vm735_vm15, %v708_v25, %v724_v44  ;;  %vm512_vm13 = vmor %vm510_vm11, %vm511_vm12  ;;  %vm654_vm1 = vweird.f32 %v557_v36 }
  0xf6   : > { %758 = vst.msk [vmem:[#allocation2 + $0x28] sm:$0xff] %vm270_vm0, %v4337_v47  ;;  %v507_v49 = vsub.f32 1.0, %v506_v48  ;;  %v660_v5 = vand.u32 2147483648, %v557_v36  ;;  %v658_v12 = vand.u32 2147483647, %v557_v36  ;;  %v986_v48 = vld [vmem:[%s5797_s2 + $0x30] sm:$0xff] }
  0xf7   : > { %vm808_vm11 = vcmask 195712   ;;  %vm839_vm12 = vcmask 261312  }
  0xf8   : > { %v508_v30 = vmul.f32 %v3634_v46, %v507_v49  ;;  %v661_v20 = vor.u32 1.1754944e-38, %v660_v5  ;;  %vm659_vm4 = vcmp.eq.f32.partialorder %v658_v12, 8.507059e+37  ;;  %v985_v12 = vld [vmem:[%s5797_s2 + $0x28] sm:$0xff] }
  0xf9   : > { %929 = vrot.lane.b32.xlu1 %v692_v40, %s3761_s27  ;;  %769 = vrot.lane.b32.xlu0 %v692_v40, %s3762_s30 }
  0xfa   : > { %v509_v43 = vadd.f32 %v3634_v46, %v508_v30 }
  0xfb   : > { %v3636_v50 = vpop.eup %3635 }
  0xfc   : > { %848 = vrot.lane.b32.xlu2 %v4198_v26, %s3763_s8  ;;  %v650_v52 = vmul.f32 %v3636_v50, %v557_v36  ;;  %v513_v4 = vsel %vm512_vm13, %v3634_v46, %v509_v43  ;;  %vm655_vm2 = vweird.f32 %v3636_v50  ;;  %v748_v26 = vsel %vm744_vm10, %v706_v13, %v722_v14 }
  0xfd   : > { %v518_v8 = vsel %vm515_vm14, %v517_v58, %v513_v4  ;;  %vm656_vm3 = vmor %vm654_vm1, %vm655_vm2  ;;  %vm864_vm13 = vcmask 326912   ;;  %vm890_vm14 = vcmask 392512   ;;  %vm916_vm1 = vcmask 458112  }
  0xfe   : > { %v651_v31 = vsub.f32 1.0, %v650_v52  ;;  %v526_v53 = vmul.f32 %v518_v8, %v3913_v18  ;;  %vm941_vm2 = vcmask 523712  }
 0x100   : > { %v652_v3 = vmul.f32 %v3636_v50, %v651_v31  ;;  %v3442_v17 = vmul.f32 -1.442695, %v526_v53 }
 0x101   : > { %790 = vrot.lane.b32.xlu0 %v745_v2, %s5801_s9  ;;  %821 = vrot.lane.b32.xlu1 %v737_v24, %s3765_s10  ;;  %v4448_v2 = vand.u32 4294901760, %v986_v48 }
 0x102   : > { %v653_v57 = vadd.f32 %v3636_v50, %v652_v3  ;;  %3637 = vpow2.f32 %v3442_v17  ;;  %v4495_v17 = vand.u32 4294901760, %v985_v12 }
 0x103   : > { %v4461_v43 = vsub.f32 %v986_v48, %v4448_v2 }
 0x104   : > { %925 = vrot.lane.b32.xlu2 %v4241_v61, %s3761_s27  ;;  %v657_v21 = vsel %vm656_vm3, %v3636_v50, %v653_v57  ;;  %vm967_vm3 = vcmask 589312  }
 0x105   : > { %v662_v22 = vsel %vm659_vm4, %v661_v20, %v657_v21  ;;  %v1103_v3 = vand.u32 4294901760, %v4461_v43  ;;  %vm989_vm4 = vcmask 588800  }
 0x106   : > { %v685_v18 = vmul.f32 %v662_v22, %v4282_v9  ;;  %v749_v9 = vsel %vm744_vm10, %v707_v16, %v723_v39  ;;  %v982_v22 = vld [vmem:[%s5797_s2 + $0x10] sm:$0xff] }
 0x107   : > { %v1104_v57 = vsub.f32 %v4461_v43, %v1103_v3 }
 0x108   : > { %v693_v42 = vmul.f32 1.6778524, %v685_v18  ;;  %v3638_v6 = vpop.eup %3637 }
 0x109   : > { %872 = vrot.lane.b32.xlu0 %v746_v56, %s3766_s13  ;;  %792 = vrot.lane.b32.xlu1 %v746_v56, %s5801_s9  ;;  %v558_v61 = vadd.f32 1.0, %v3638_v6 }
 0x10a   : > { %v709_v19 = vrot.slane %v693_v42, 1  ;;  %v725_v11 = vrot.slane %v693_v42, 7 }
 0x10b   : > { %3639 = vrcp.f32 %v558_v61  ;;  %vm669_vm5 = vweird.f32 %v558_v61  ;;  %v675_v10 = vand.u32 2147483648, %v558_v61  ;;  %v673_v55 = vand.u32 2147483647, %v558_v61 }
 0x10c   : > { %767 = vrot.lane.b32.xlu2 %v4308_v23, %s3762_s30  ;;  %v751_v35 = vsel %vm744_vm10, %v709_v19, %v725_v11  ;;  %v742_v24 = vsel %vm735_vm15, %v709_v19, %v725_v11  ;;  %s250_s30 = scalar_lea.vmem %s5796_s1, %s3876_s12  ;;  %s3433_s12 = sshll.u32 %s3743_s21, 2 }
 0x10d   : > { %v676_v27 = vor.u32 1.1754944e-38, %v675_v10  ;;  %vm674_vm9 = vcmp.eq.f32.partialorder %v673_v55, 8.507059e+37 }
 0x111   : > { %949 = vrot.lane.b32.xlu0 %v747_v15, %s3767_s14  ;;  %874 = vrot.lane.b32.xlu1 %v747_v15, %s3766_s13  ;;  %v3640_v13 = vpop.eup %3639 }
 0x112   : > { %v665_v14 = vmul.f32 %v3640_v13, %v558_v61  ;;  %vm670_vm6 = vweird.f32 %v3640_v13  ;;  %v4507_v61 = vand.u32 4294901760, %v982_v22 }
 0x113   : > { %vm671_vm7 = vmor %vm669_vm5, %vm670_vm6 }
 0x114   : > { %854 = vrot.lane.b32.xlu2 %v692_v40, %s3763_s8 }
 0x119   : > { %823 = vrot.lane.b32.xlu0 %v4252_v7, %s3765_s10  ;;  %951 = vrot.lane.b32.xlu1 %v748_v26, %s3767_s14 }
 0x11c   : > { %931 = vrot.lane.b32.xlu2 %v693_v42, %s3761_s27 }
 0x121   : > { %900 = vrot.lane.b32.xlu0 %v4289_v60, %s3768_s15  ;;  %825 = vrot.lane.b32.xlu1 %v4289_v60, %s3765_s10 }
 0x124   : > { %898 = vrot.lane.b32.xlu2 %v4252_v7, %s3768_s15  ;;  %v666_v7 = vsub.f32 1.0, %v665_v14  ;;  %v4511_v14 = vsub.f32 %v985_v12, %v4495_v17 }
 0x126   : > { %v667_v60 = vmul.f32 %v3640_v13, %v666_v7  ;;  %v1109_v10 = vand.u32 4294901760, %v4511_v14 }
 0x128   : > { %v668_v63 = vadd.f32 %v3640_v13, %v667_v60  ;;  %v4521_v60 = vsub.f32 %v982_v22, %v4507_v61 }
 0x129   : > { %796 = vrot.lane.b32.xlu0 %v748_v26, %s5801_s9  ;;  %902 = vrot.lane.b32.xlu1 %v4325_v34, %s3768_s15 }
 0x12a   : > { %v672_v32 = vsel %vm671_vm7, %v3640_v13, %v668_v63  ;;  %v1105_v13 = vand.u32 4294901760, %v1104_v57  ;;  %v1127_v19 = vand.u32 4294901760, %v4521_v60 }
 0x12b   : > { %v677_v23 = vsel %vm674_vm9, %v676_v27, %v672_v32  ;;  %v1110_v27 = vsub.f32 %v4511_v14, %v1109_v10  ;;  %v980_v32 = vld [vmem:[%s5797_s2] sm:$0xff] }
 0x12c   : > { %794 = vrot.lane.b32.xlu2 %v747_v15, %s5801_s9  ;;  %v686_v37 = vmul.f32 %v677_v23, %v526_v53  ;;  %v984_v15 = vld [vmem:[%s5797_s2 + $0x20] sm:$0xff]  ;;  %v983_v53 = vld [vmem:[%s5797_s2 + $0x18] sm:$0xff] }
 0x12d   : > { %v4505_v6 = vand.u32 4294901760, %v983_v53 }
 0x12e   : > { %v694_v33 = vmul.f32 1.6778524, %v686_v37 }
 0x12f   : > { %v4518_v7 = vsub.f32 %v983_v53, %v4505_v6 }
 0x130   : > { %v710_v16 = vrot.slane %v694_v33, 1  ;;  %v726_v39 = vrot.slane %v694_v33, 7 }
 0x131   : > { %878 = vrot.lane.b32.xlu0 %v749_v9, %s3766_s13  ;;  %798 = vrot.lane.b32.xlu1 %v749_v9, %s5801_s9  ;;  %v1121_v55 = vand.u32 4294901760, %v4518_v7 }
 0x132   : > { %v743_v40 = vsel %vm735_vm15, %v710_v16, %v726_v39  ;;  %v752_v54 = vsel %vm744_vm10, %v710_v16, %v726_v39  ;;  %v4557_v16 = vand.u32 4294901760, %v980_v32 }
 0x133   : > { %v1122_v23 = vsub.f32 %v4518_v7, %v1121_v55 }
 0x134   : > { %876 = vrot.lane.b32.xlu2 %v748_v26, %s3766_s13 }
 0x139   : > { %955 = vrot.lane.b32.xlu0 %v4334_v51, %s3767_s14  ;;  %880 = vrot.lane.b32.xlu1 %v4334_v51, %s3766_s13 }
 0x13c   : > { %953 = vrot.lane.b32.xlu2 %v749_v9, %s3767_s14  ;;  %v760_v28 = vpop.permute.xlu2 %759 }
 0x13d   : > { %778 = vst.msk [vmem:[#allocation2] sm:$0xff] %vm777_vm8, %v760_v28  ;;  %v981_v28 = vld [vmem:[%s5797_s2 + $0x8] sm:$0xff] }
 0x13e   : > { %v4549_v37 = vand.u32 4294901760, %v981_v28 }
 0x141   : > { %829 = vrot.lane.b32.xlu0 %v4337_v47, %s3765_s10  ;;  %957 = vrot.lane.b32.xlu1 %v751_v35, %s3767_s14 }
 0x144   : > { %827 = vrot.lane.b32.xlu2 %v4325_v34, %s3765_s10 }
 0x146   : > { %v4410_v1 = vpop.permute.xlu2 %846 }
 0x149   : > { %831 = vrot.lane.b32.xlu1 %v742_v24, %s3765_s10  ;;  %906 = vrot.lane.b32.xlu0 %v742_v24, %s3768_s15  ;;  %v1111_v24 = vand.u32 4294901760, %v1110_v27  ;;  %s240_s10 = sand.u32 1, %s3735_s19  }
 0x14c   : > { %904 = vrot.lane.b32.xlu2 %v4337_v47, %s3768_s15  ;;  %v988_v47 = vld [vmem:[%s5797_s2 + $0x40] sm:$0xff] }
 0x14d   : > { %v4444_v49 = vand.u32 4294901760, %v988_v47 }
 0x14e   : > { %v762_v0 = vpop.permute.xlu2 %761 }
 0x14f   : > { %779 = vst.msk [vmem:[#allocation2 + $0x8] sm:$0xff] %vm777_vm8, %v762_v0  ;;  %v4455_v59 = vsub.f32 %v988_v47, %v4444_v49  ;;  %1241 = vmatpush.msra.mxu3 %v4444_v49  ;;  %1016 = vmatpush.msra.mxu0 %v4444_v49  ;;  %v1138_v47 = vsub.f32 %v980_v32, %v4557_v16 }
 0x151   : > { %908 = vrot.lane.b32.xlu1 %v743_v40, %s3768_s15  ;;  %856 = vrot.lane.b32.xlu0 %v693_v42, %s3763_s8  ;;  %v1091_v56 = vand.u32 4294901760, %v4455_v59  ;;  %v4503_v42 = vand.u32 4294901760, %v984_v15 }
 0x152   : > { %1177 = vmatpush.msra.mxu2 %v4455_v59 }
 0x153   : > { %v4421_v34 = vpop.permute.xlu1 %923  ;;  %v764_v45 = vpop.permute.xlu0 %763  ;;  %v1092_v5 = vsub.f32 %v4455_v59, %v1091_v56  ;;  %v4515_v9 = vsub.f32 %v984_v15, %v4503_v42 }
 0x154   : > { %780 = vst.msk [vmem:[#allocation2 + $0x10] sm:$0xff] %vm777_vm8, %v764_v45  ;;  %800 = vrot.lane.b32.xlu2 %v4334_v51, %s5801_s9  ;;  %v987_v51 = vld [vmem:[%s5797_s2 + $0x38] sm:$0xff]  ;;  %v1132_v45 = vsub.f32 %v981_v28, %v4549_v37  ;;  %s3449_s9 = sadd.s32 4294967295, %s3433_s12 }
 0x155   : > { %v4446_v50 = vand.u32 4294901760, %v987_v51  ;;  %v1093_v20 = vand.u32 4294901760, %v1092_v5  ;;  %v1115_v63 = vand.u32 4294901760, %v4515_v9 }
 0x156   : > { %v4426_v36 = vpop.permute.xlu2 %848 }
 0x157   : > { %v4458_v31 = vsub.f32 %v987_v51, %v4446_v50  ;;  %1243 = vmatpush.msra.mxu3 %v4446_v50  ;;  %1018 = vmatpush.msra.mxu0 %v4446_v50  ;;  %v1133_v51 = vand.u32 4294901760, %v1132_v45 }
 0x158   : > { %1094 = vmatpush.msra.mxu1 %v1093_v20 }
 0x159   : > { %933 = vrot.lane.b32.xlu0 %v694_v33, %s3761_s27  ;;  %v1097_v58 = vand.u32 4294901760, %v4458_v31  ;;  %1180 = vmatpush.msra.mxu2 %v4458_v31  ;;  %v1128_v33 = vsub.f32 %v4521_v60, %v1127_v19 }
 0x15a   : > { %1245 = vmatpush.msra.mxu3 %v4448_v2  ;;  %1020 = vmatpush.msra.mxu0 %v4448_v2 }
 0x15b   : > { %v766_v25 = vpop.permute.xlu1 %765  ;;  %v4429_v44 = vpop.permute.xlu0 %850  ;;  %v1098_v8 = vsub.f32 %v4458_v31, %v1097_v58  ;;  %1183 = vmatpush.msra.mxu2 %v4461_v43  ;;  %v1129_v48 = vand.u32 4294901760, %v1128_v33 }
 0x15c   : > { %781 = vst.msk [vmem:[#allocation2 + $0x18] sm:$0xff] %vm777_vm8, %v766_v25  ;;  %882 = vrot.lane.b32.xlu2 %v751_v35, %s3766_s13  ;;  %1247 = vmatpush.msra.mxu3 %v4495_v17  ;;  %v1116_v35 = vsub.f32 %v4515_v9, %v1115_v63  ;;  %v1123_v25 = vand.u32 4294901760, %v1122_v23  ;;  %s3770_s13 = smov 96  }
 0x15d   : > { %v1099_v21 = vand.u32 4294901760, %v1098_v8  ;;  %1022 = vmatpush.msra.mxu0 %v4495_v17  ;;  %1186 = vmatpush.msra.mxu2 %v4511_v14 }
 0x15e   : > { %v4433_v46 = vpop.permute.xlu2 %925  ;;  %1249 = vmatpush.msra.mxu3 %v4503_v42  ;;  %v1117_v40 = vand.u32 4294901760, %v1116_v35 }
 0x15f   : > { %1100 = vmatpush.msra.mxu1 %v1099_v21  ;;  %1024 = vmatpush.msra.mxu0 %v4503_v42 }
 0x160   : > { %1189 = vmatpush.msra.mxu2 %v4515_v9  ;;  %1251 = vmatpush.msra.mxu3 %v4505_v6 }
 0x161   : > { %1106 = vmatpush.msra.mxu1 %v1105_v13  ;;  %1026 = vmatpush.msra.mxu0 %v4505_v6 }
 0x162   : > { %1192 = vmatpush.msra.mxu2 %v4518_v7  ;;  %1253 = vmatpush.msra.mxu3 %v4507_v61 }
 0x163   : > { %v4450_v52 = vpop.permute.xlu1 %852  ;;  %v4452_v30 = vpop.permute.xlu0 %927  ;;  %1028 = vmatpush.msra.mxu0 %v4507_v61  ;;  %1112 = vmatpush.msra.mxu1 %v1111_v24 }
 0x164   : > { %959 = vrot.lane.b32.xlu2 %v752_v54, %s3767_s14  ;;  %1195 = vmatpush.msra.mxu2 %v4521_v60  ;;  %v1139_v54 = vand.u32 4294901760, %v1138_v47 }
 0x165   : > { %1255 = vmatpush.msra.mxu3 %v4549_v37  ;;  %1030 = vmatpush.msra.mxu0 %v4549_v37 }
 0x166   : > { %v768_v4 = vpop.permute.xlu2 %767  ;;  %1118 = vmatpush.msra.mxu1 %v1117_v40  ;;  %1198 = vmatpush.msra.mxu2 %v1132_v45  ;;  %v1140_v8 = vsub.f32 %v1138_v47, %v1139_v54 }
 0x167   : > { %782 = vst.msk [vmem:[#allocation2 + $0x20] sm:$0xff] %vm777_vm8, %v768_v4  ;;  %v1134_v4 = vsub.f32 %v1132_v45, %v1133_v51  ;;  %1257 = vmatpush.msra.mxu3 %v4557_v16  ;;  %1032 = vmatpush.msra.mxu0 %v4557_v16 }
 0x168   : > { %1124 = vmatpush.msra.mxu1 %v1123_v25  ;;  %1201 = vmatpush.msra.mxu2 %v1138_v47 }
 0x169   : > { %v1135_v57 = vand.u32 4294901760, %v1134_v4  ;;  %1305 = vmatpush.msrb.mxu0 %v1091_v56 }
 0x16a   : > { %1130 = vmatpush.msra.mxu1 %v1129_v48 }
 0x16b   : > { %v4501_v26 = vpop.permute.xlu1 %929  ;;  %v770_v18 = vpop.permute.xlu0 %769  ;;  %1309 = vmatpush.msrb.mxu0 %v1097_v58 }
 0x16c   : > { %783 = vst.msk [vmem:[#allocation2 + $0x28] sm:$0xff] %vm777_vm8, %v770_v18  ;;  %1136 = vmatpush.msra.mxu1 %v1135_v57 }
 0x16d   : > { %1313 = vmatpush.msrb.mxu0 %v1103_v3 }
 0x16e   : > { %v4531_v11 = vpop.permute.xlu2 %854 }
 0x16f   : > { %1317 = vmatpush.msrb.mxu0 %v1109_v10 }
 0x171   : > { %1321 = vmatpush.msrb.mxu0 %v1115_v63 }
 0x173   : > { %v822_v39 = vpop.permute.xlu1 %821  ;;  %v791_v0 = vpop.permute.xlu0 %790  ;;  %1325 = vmatpush.msrb.mxu0 %v1121_v55 }
 0x174   : > { %809 = vst.msk [vmem:[#allocation2] sm:$0xff] %vm808_vm11, %v791_v0 }
 0x175   : > { %840 = vst.msk [vmem:[#allocation2] sm:$0xff] %vm839_vm12, %v822_v39  ;;  %1329 = vmatpush.msrb.mxu0 %v1127_v19 }
 0x176   : > { %865 = vst.msk [vmem:[#allocation2] sm:$0xff] %vm864_vm13, %v4410_v1  ;;  %v4572_v5 = vpop.permute.xlu2 %931  ;;  %v1141_v1 = vand.u32 4294901760, %v1140_v8 }
 0x177   : > { %1333 = vmatpush.msrb.mxu0 %v1133_v51 }
 0x178   : > { %1142 = vmatpush.msra.mxu1 %v1141_v1 }
 0x179   : > { %1337 = vmatpush.msrb.mxu0 %v1139_v54 }
 0x17a   : > { %1371 = vmatpush.msrb.mxu1 %v4444_v49 }
 0x17b   : > { %v793_v12 = vpop.permute.xlu1 %792  ;;  %v873_v15 = vpop.permute.xlu0 %872 }
 0x17c   : > { %810 = vst.msk [vmem:[#allocation2 + $0x8] sm:$0xff] %vm808_vm11, %v793_v12  ;;  %1373 = vmatpush.msrb.mxu1 %v4446_v50 }
 0x17d   : > { %891 = vst.msk [vmem:[#allocation2] sm:$0xff] %vm890_vm14, %v873_v15 }
 0x17e   : > { %v899_v59 = vpop.permute.xlu2 %898  ;;  %1375 = vmatpush.msrb.mxu1 %v4448_v2 }
 0x17f   : > { %917 = vst.msk [vmem:[#allocation2] sm:$0xff] %vm916_vm1, %v899_v59 }
 0x180   : > { %942 = vst.msk [vmem:[#allocation2] sm:$0xff] %vm941_vm2, %v4421_v34  ;;  %1377 = vmatpush.msrb.mxu1 %v4495_v17 }
 0x182   : > { %1379 = vmatpush.msrb.mxu1 %v4503_v42 }
 0x183   : > { %v875_v31 = vpop.permute.xlu1 %874  ;;  %v950_v43 = vpop.permute.xlu0 %949 }
 0x184   : > { %968 = vst.msk [vmem:[#allocation2] sm:$0xff] %vm967_vm3, %v950_v43  ;;  %1381 = vmatpush.msrb.mxu1 %v4505_v6 }
 0x186   : > { %v795_v49 = vpop.permute.xlu2 %794  ;;  %1383 = vmatpush.msrb.mxu1 %v4507_v61 }
 0x187   : > { %811 = vst.msk [vmem:[#allocation2 + $0x10] sm:$0xff] %vm808_vm11, %v795_v49 }
 0x188   : > { %1385 = vmatpush.msrb.mxu1 %v4549_v37 }
 0x18a   : > { %1387 = vmatpush.msrb.mxu1 %v4557_v16 }
 0x18b   : > { %v952_v34 = vpop.permute.xlu1 %951  ;;  %v824_v50 = vpop.permute.xlu0 %823  ;;  %v974_v2 = vld [vmem:[#allocation2] sm:$0xff] }
 0x18c   : > { %841 = vst.msk [vmem:[#allocation2 + $0x8] sm:$0xff] %vm839_vm12, %v824_v50  ;;  %v991_v56 = vsel %vm989_vm4, %v974_v2, 0 }
 0x18d   : > { %866 = vst.msk [vmem:[#allocation2 + $0x8] sm:$0xff] %vm864_vm13, %v4426_v36  ;;  %v4606_v58 = vand.u32 4294901760, %v991_v56 }
 0x18e   : > { %892 = vst.msk [vmem:[#allocation2 + $0x8] sm:$0xff] %vm890_vm14, %v875_v31  ;;  %v877_v53 = vpop.permute.xlu2 %876 }
 0x18f   : > { %1144 = vmatmul.f32.vlgmr.msra.gmra.mxu1 %v4606_v58  ;;  %v1034_v3 = vsub.f32 %v991_v56, %v4606_v58 }
 0x191   : > { %1204 = vmatmul.f32.vlgmr.msra.gmra.mxu2 %v1034_v3  ;;  %v1035_v20 = vand.u32 4294901760, %v1034_v3 }
 0x193   : > { %v826_v21 = vpop.permute.xlu1 %825  ;;  %1261 = vmatmul.f32.vlgmr.msra.gmra.mxu3 %v1035_v20  ;;  %v901_v17 = vpop.permute.xlu0 %900  ;;  %v1036_v22 = vsub.f32 %v1034_v3, %v1035_v20 }
 0x194   : > { %842 = vst.msk [vmem:[#allocation2 + $0x10] sm:$0xff] %vm839_vm12, %v826_v21 }
 0x195   : > { %867 = vst.msk [vmem:[#allocation2 + $0x10] sm:$0xff] %vm864_vm13, %v4429_v44  ;;  %v1037_v36 = vand.u32 4294901760, %v1036_v22 }
 0x196   : > { %893 = vst.msk [vmem:[#allocation2 + $0x10] sm:$0xff] %vm890_vm14, %v877_v53  ;;  %v954_v18 = vpop.permute.xlu2 %953 }
 0x197   : > { %918 = vst.msk [vmem:[#allocation2 + $0x8] sm:$0xff] %vm916_vm1, %v901_v17  ;;  %1038 = vmatmul.f32.vlgmr.msra.gmra.mxu0 %v1037_v36 }
 0x198   : > { %943 = vst.msk [vmem:[#allocation2 + $0x8] sm:$0xff] %vm941_vm2, %v4433_v46 }
 0x199   : > { %969 = vst.msk [vmem:[#allocation2 + $0x8] sm:$0xff] %vm967_vm3, %v952_v34 }
 0x19b   : > { %v903_v42 = vpop.permute.xlu1 %902  ;;  %v797_v6 = vpop.permute.xlu0 %796 }
 0x19c   : > { %919 = vst.msk [vmem:[#allocation2 + $0x10] sm:$0xff] %vm916_vm1, %v903_v42 }
 0x19d   : > { %944 = vst.msk [vmem:[#allocation2 + $0x10] sm:$0xff] %vm941_vm2, %v4452_v30 }
 0x19e   : > { %970 = vst.msk [vmem:[#allocation2 + $0x10] sm:$0xff] %vm967_vm3, %v954_v18  ;;  %v828_v44 = vpop.permute.xlu2 %827 }
 0x19f   : > { %812 = vst.msk [vmem:[#allocation2 + $0x18] sm:$0xff] %vm808_vm11, %v797_v6 }
 0x1a0   : > { %v975_v61 = vld [vmem:[#allocation2 + $0x8] sm:$0xff]  ;;  %843 = vst.msk [vmem:[#allocation2 + $0x18] sm:$0xff] %vm839_vm12, %v828_v44 }
 0x1a1   : > { %v994_v13 = vsel %vm989_vm4, %v975_v61, 0  ;;  %868 = vst.msk [vmem:[#allocation2 + $0x18] sm:$0xff] %vm864_vm13, %v4450_v52 }
 0x1a2   : > { %v4630_v46 = vand.u32 4294901760, %v994_v13 }
 0x1a3   : > { %v799_v14 = vpop.permute.xlu1 %798  ;;  %v879_v9 = vpop.permute.xlu0 %878 }
 0x1a4   : > { %1148 = vmatmul.f32.gmra.mxu1 %v4630_v46  ;;  %813 = vst.msk [vmem:[#allocation2 + $0x20] sm:$0xff] %vm808_vm11, %v799_v14  ;;  %v1042_v30 = vsub.f32 %v994_v13, %v4630_v46 }
 0x1a5   : > { %894 = vst.msk [vmem:[#allocation2 + $0x18] sm:$0xff] %vm890_vm14, %v879_v9  ;;  %v976_v7 = vld [vmem:[#allocation2 + $0x10] sm:$0xff] }
 0x1a6   : > { %1209 = vmatmul.f32.gmra.mxu2 %v1042_v30  ;;  %v1043_v60 = vand.u32 4294901760, %v1042_v30  ;;  %v997_v10 = vsel %vm989_vm4, %v976_v7, 0  ;;  %v905_v52 = vpop.permute.xlu2 %904 }
 0x1a7   : > { %v4637_v63 = vand.u32 4294901760, %v997_v10  ;;  %920 = vst.msk [vmem:[#allocation2 + $0x18] sm:$0xff] %vm916_vm1, %v905_v52 }
 0x1a8   : > { %1267 = vmatmul.f32.gmra.mxu3 %v1043_v60  ;;  %v1044_v55 = vsub.f32 %v1042_v30, %v1043_v60  ;;  %945 = vst.msk [vmem:[#allocation2 + $0x18] sm:$0xff] %vm941_vm2, %v4501_v26 }
 0x1a9   : > { %v1050_v19 = vsub.f32 %v997_v10, %v4637_v63 }
 0x1aa   : > { %v1045_v27 = vand.u32 4294901760, %v1044_v55 }
 0x1ab   : > { %v881_v28 = vpop.permute.xlu1 %880  ;;  %v956_v32 = vpop.permute.xlu0 %955  ;;  %v1051_v35 = vand.u32 4294901760, %v1050_v19 }
 0x1ac   : > { %1046 = vmatmul.f32.gmra.mxu0 %v1045_v27  ;;  %1152 = vmatmul.f32.gmra.mxu1 %v4637_v63  ;;  %971 = vst.msk [vmem:[#allocation2 + $0x18] sm:$0xff] %vm967_vm3, %v956_v32 }
 0x1ad   : > { %v1052_v23 = vsub.f32 %v1050_v19, %v1051_v35 }
 0x1ae   : > { %1214 = vmatmul.f32.gmra.mxu2 %v1050_v19  ;;  %v801_v37 = vpop.permute.xlu2 %800  ;;  %v4682_v19 = vld [vmem:[%s250_s30] ss:$0 sm:$0xff]  ;;  %s3455_s30 = sshll.u32 %s3747_s22, 1 }
 0x1af   : > { %v1053_v24 = vand.u32 4294901760, %v1052_v23  ;;  %814 = vst.msk [vmem:[#allocation2 + $0x28] sm:$0xff] %vm808_vm11, %v801_v37  ;;  %s3336_s27 = sadd.s32 %s3743_s21, %s3455_s30 }
 0x1b0   : > { %1273 = vmatmul.f32.gmra.mxu3 %v1051_v35  ;;  %s3456_s12 = sshll.u32 %s3336_s27, 2 }
 0x1b1   : > { %s3338_s16 = scalar_lea.hbm %s5800_s5, %s3456_s12 }
 0x1b2   : > { %s3342_s17 = sshll.u32 %s3338_s16, 4  ;;  %s3343_s17 = int_to_ptr.hbm [resolvable:$true] %s3342_s17 }
 0x1b3   : > { %v958_v33 = vpop.permute.xlu1 %957  ;;  %v830_v16 = vpop.permute.xlu0 %829  ;;  %v977_v39 = vld [vmem:[#allocation2 + $0x18] sm:$0xff] }
 0x1b4   : > { %1054 = vmatmul.f32.gmra.mxu0 %v1053_v24  ;;  %844 = vst.msk [vmem:[#allocation2 + $0x20] sm:$0xff] %vm839_vm12, %v830_v16  ;;  %v1000_v26 = vsel %vm989_vm4, %v977_v39, 0 }
 0x1b5   : > { %869 = vst.msk [vmem:[#allocation2 + $0x20] sm:$0xff] %vm864_vm13, %v4531_v11  ;;  %v1057_v0 = vand.u32 4294901760, %v1000_v26 }
 0x1b6   : > { %895 = vst.msk [vmem:[#allocation2 + $0x20] sm:$0xff] %vm890_vm14, %v881_v28  ;;  %v883_v11 = vpop.permute.xlu2 %882 }
 0x1b7   : > { %1156 = vmatmul.f32.gmra.mxu1 %v1057_v0  ;;  %v1058_v40 = vsub.f32 %v1000_v26, %v1057_v0 }
 0x1b9   : > { %1219 = vmatmul.f32.gmra.mxu2 %v1058_v40  ;;  %v1059_v45 = vand.u32 4294901760, %v1058_v40 }
 0x1bb   : > { %v832_v25 = vpop.permute.xlu1 %831  ;;  %1279 = vmatmul.f32.gmra.mxu3 %v1059_v45  ;;  %v907_v47 = vpop.permute.xlu0 %906  ;;  %v1060_v51 = vsub.f32 %v1058_v40, %v1059_v45 }
 0x1bc   : > { %845 = vst.msk [vmem:[#allocation2 + $0x28] sm:$0xff] %vm839_vm12, %v832_v25 }
 0x1bd   : > { %921 = vst.msk [vmem:[#allocation2 + $0x20] sm:$0xff] %vm916_vm1, %v907_v47  ;;  %v1061_v48 = vand.u32 4294901760, %v1060_v51 }
 0x1be   : > { %946 = vst.msk [vmem:[#allocation2 + $0x20] sm:$0xff] %vm941_vm2, %v4572_v5  ;;  %v960_v5 = vpop.permute.xlu2 %959 }
 0x1bf   : > { %972 = vst.msk [vmem:[#allocation2 + $0x20] sm:$0xff] %vm967_vm3, %v958_v33  ;;  %1062 = vmatmul.f32.gmra.mxu0 %v1061_v48 }
 0x1c3   : > { %v857_v54 = vpop.permute.xlu0 %856  ;;  %v909_v4 = vpop.permute.xlu1 %908 }
 0x1c4   : > { %870 = vst.msk [vmem:[#allocation2 + $0x28] sm:$0xff] %vm864_vm13, %v857_v54 }
 0x1c5   : > { %896 = vst.msk [vmem:[#allocation2 + $0x28] sm:$0xff] %vm890_vm14, %v883_v11 }
 0x1c6   : > { %922 = vst.msk [vmem:[#allocation2 + $0x28] sm:$0xff] %vm916_vm1, %v909_v4  ;;  %v978_v8 = vld [vmem:[#allocation2 + $0x20] sm:$0xff] }
 0x1c7   : > { %v1003_v57 = vsel %vm989_vm4, %v978_v8, 0 }
 0x1c8   : > { %v1065_v1 = vand.u32 4294901760, %v1003_v57 }
 0x1ca   : > { %1160 = vmatmul.f32.gmra.mxu1 %v1065_v1  ;;  %v1066_v12 = vsub.f32 %v1003_v57, %v1065_v1 }
 0x1cb   : > { %v934_v15 = vpop.permute.xlu0 %933 }
 0x1cc   : > { %1224 = vmatmul.f32.gmra.mxu2 %v1066_v12  ;;  %947 = vst.msk [vmem:[#allocation2 + $0x28] sm:$0xff] %vm941_vm2, %v934_v15  ;;  %v1067_v59 = vand.u32 4294901760, %v1066_v12 }
 0x1cd   : > { %973 = vst.msk [vmem:[#allocation2 + $0x28] sm:$0xff] %vm967_vm3, %v960_v5 }
 0x1ce   : > { %1285 = vmatmul.f32.gmra.mxu3 %v1067_v59  ;;  %v1068_v31 = vsub.f32 %v1066_v12, %v1067_v59 }
 0x1d0   : > { %v1069_v43 = vand.u32 4294901760, %v1068_v31 }
 0x1d2   : > { %1070 = vmatmul.f32.gmra.mxu0 %v1069_v43 }
 0x1d4   : > { %v979_v49 = vld [vmem:[#allocation2 + $0x28] sm:$0xff] }
 0x1d5   : > { %v1006_v34 = vsel %vm989_vm4, %v979_v49, 0 }
 0x1d6   : > { %v1073_v50 = vand.u32 4294901760, %v1006_v34 }
 0x1d8   : > { %1164 = vmatmul.f32.gmra.mxu1 %v1073_v50  ;;  %v1074_v2 = vsub.f32 %v1006_v34, %v1073_v50 }
 0x1da   : > { %1229 = vmatmul.f32.gmra.mxu2 %v1074_v2  ;;  %v1075_v56 = vand.u32 4294901760, %v1074_v2 }
 0x1dc   : > { %1291 = vmatmul.f32.gmra.mxu3 %v1075_v56  ;;  %v1076_v3 = vsub.f32 %v1074_v2, %v1075_v56  ;;  %v1549_v2 = vlaneseq }
 0x1de   : > { %v1077_v53 = vand.u32 4294901760, %v1076_v3 }
 0x1e0   : > { %1078 = vmatmul.f32.gmra.mxu0 %v1077_v53  ;;  %1389 = vmatmul.f32.vlgmr.msrb.gmra.mxu1 %v4606_v58 }
 0x1e8   : > { %1339 = vmatmul.f32.vlgmr.msrb.gmra.mxu0 %v4606_v58  ;;  %1393 = vmatmul.f32.gmra.mxu1 %v4630_v46 }
 0x1f0   : > { %1343 = vmatmul.f32.gmra.mxu0 %v4630_v46  ;;  %1397 = vmatmul.f32.gmra.mxu1 %v4637_v63 }
 0x1f8   : > { %1347 = vmatmul.f32.gmra.mxu0 %v4637_v63  ;;  %1401 = vmatmul.f32.gmra.mxu1 %v1057_v0 }
 0x200   : > { %1351 = vmatmul.f32.gmra.mxu0 %v1057_v0  ;;  %1405 = vmatmul.f32.gmra.mxu1 %v1065_v1 }
 0x208   : > { %1355 = vmatmul.f32.gmra.mxu0 %v1065_v1  ;;  %1409 = vmatmul.f32.gmra.mxu1 %v1073_v50 }
 0x20c   : > { %v1145_v20 = vpop.f32.mrf.mxu1 }
 0x210   : > { %1359 = vmatmul.f32.gmra.mxu0 %v1073_v50 }
 0x214   : > { %v1039_v21 = vpop.f32.mrf.mxu0  ;;  %v1205_v46 = vpop.f32.mrf.mxu2 }
 0x215   : > { %v1146_v13 = vadd.f32 %v1145_v20, %v1039_v21 }
 0x216   : > { %v1262_v7 = vpop.f32.mrf.mxu3 }
 0x217   : > { %v1206_v30 = vadd.f32 %v1205_v46, %v1146_v13 }
 0x219   : > { %v1263_v60 = vadd.f32 %v1262_v7, %v1206_v30 }
 0x221   : > { %v1149_v17 = vpop.f32.mrf.mxu1 }
 0x229   : > { %v1047_v22 = vpop.f32.mrf.mxu0  ;;  %v1153_v36 = vpop.f32.mrf.mxu1 }
 0x22a   : > { %v1150_v10 = vadd.f32 %v1149_v17, %v1047_v22  ;;  %v1210_v63 = vpop.f32.mrf.mxu2  ;;  %v1550_v17 = vshrl.u32 %v1549_v2, 7 }
 0x22b   : > { %v1268_v32 = vpop.f32.mrf.mxu3 }
 0x22c   : > { %v1211_v28 = vadd.f32 %v1210_v63, %v1150_v10 }
 0x22e   : > { %v1269_v37 = vadd.f32 %v1268_v32, %v1211_v28 }
 0x231   : > { %v1055_v58 = vpop.f32.mrf.mxu0 }
 0x232   : > { %v1154_v24 = vadd.f32 %v1153_v36, %v1055_v58  ;;  %v1215_v39 = vpop.f32.mrf.mxu2  ;;  %v1552_v58 = vstv %s3449_s9 }
 0x233   : > { %v1274_v25 = vpop.f32.mrf.mxu3 }
 0x234   : > { %v1157_v18 = vpop.f32.mrf.mxu1  ;;  %v1216_v0 = vadd.f32 %v1215_v39, %v1154_v24 }
 0x236   : > { %v1275_v48 = vadd.f32 %v1274_v25, %v1216_v0 }
 0x23c   : > { %v1063_v42 = vpop.f32.mrf.mxu0  ;;  %v1220_v57 = vpop.f32.mrf.mxu2 }
 0x23d   : > { %v1158_v11 = vadd.f32 %v1157_v18, %v1063_v42  ;;  %v1553_v42 = vadd.s32 %v1552_v58, %v1550_v17 }
 0x23e   : > { %v1280_v5 = vpop.f32.mrf.mxu3 }
 0x23f   : > { %v1221_v12 = vadd.f32 %v1220_v57, %v1158_v11  ;;  %vm1554_vm6 = vcmp.ge.s32.totalorder %v1553_v42, 0  ;;  %vm1555_vm7 = vcmp.lt.s32.totalorder %v1553_v42, 8 }
 0x240   : > { %vm1556_vm8 = vmand %vm1554_vm6, %vm1555_vm7 }
 0x241   : > { %v1281_v34 = vadd.f32 %v1280_v5, %v1221_v12 }
 0x247   : > { %v1161_v6 = vpop.f32.mrf.mxu1 }
 0x24f   : > { %v1071_v44 = vpop.f32.mrf.mxu0  ;;  %v1225_v20 = vpop.f32.mrf.mxu2 }
 0x250   : > { %v1162_v31 = vadd.f32 %v1161_v6, %v1071_v44 }
 0x251   : > { %v1286_v13 = vpop.f32.mrf.mxu3 }
 0x252   : > { %v1226_v36 = vadd.f32 %v1225_v20, %v1162_v31 }
 0x254   : > { %v1287_v30 = vadd.f32 %v1286_v13, %v1226_v36 }
 0x255   : > { %v4673_v61 = vpop.f32.mrf.mxu1 }
 0x25d   : > { %v4675_v14 = vpop.f32.mrf.mxu0  ;;  %v1390_v9 = vpop.f32.mrf.mxu1 }
 0x25e   : > { %v1166_v7 = vadd.f32 %v4673_v61, %v4675_v14  ;;  %v1230_v39 = vpop.f32.mrf.mxu2 }
 0x265   : > { %v1340_v52 = vpop.f32.mrf.mxu0  ;;  %v1394_v27 = vpop.f32.mrf.mxu1 }
 0x266   : > { %v1341_v55 = vadd.f32 %v1340_v52, %v1263_v60  ;;  %v3769_v52 = vmov 0  }
 0x268   : > { %v1391_v35 = vadd.f32 %v1390_v9, %v1341_v55  ;;  %v4706_v55 = vsel %vm1556_vm8, 1, %v3769_v52 }
 0x269   : > { %v1558_v61 = vperm.slane %v4706_v55, 0 }
 0x26a   : > { %v4685_v23 = vmul.f32 %v4682_v19, %v1391_v35 }
 0x26b   : > { %vm1564_vm13 = vcmp.ne.s32.totalorder %v1558_v61, 0 }
 0x26c   : > { %v3443_v33 = vmul.f32 -1.442695, %v4685_v23 }
 0x26d   : > { %v1344_v16 = vpop.f32.mrf.mxu0  ;;  %v1398_v45 = vpop.f32.mrf.mxu1 }
 0x26e   : > { %3641 = vpow2.f32 %v3443_v33  ;;  %v1345_v26 = vadd.f32 %v1344_v16, %v1269_v37 }
 0x270   : > { %v1395_v40 = vadd.f32 %v1394_v27, %v1345_v26  ;;  %v1231_v26 = vadd.f32 %v1230_v39, %v1166_v7 }
 0x272   : > { %v4689_v47 = vmul.f32 %v4682_v19, %v1395_v40 }
 0x274   : > { %v3642_v51 = vpop.eup %3641  ;;  %v3444_v54 = vmul.f32 -1.442695, %v4689_v47 }
 0x275   : > { %v1441_v4 = vadd.f32 1.0, %v3642_v51  ;;  %v1348_v8 = vpop.f32.mrf.mxu0  ;;  %v1402_v43 = vpop.f32.mrf.mxu1 }
 0x276   : > { %3643 = vpow2.f32 %v3444_v54  ;;  %v1349_v1 = vadd.f32 %v1348_v8, %v1275_v48  ;;  %v1292_v54 = vpop.f32.mrf.mxu3 }
 0x277   : > { %3645 = vrcp.f32 %v1441_v4  ;;  %v1458_v44 = vand.u32 2147483648, %v1441_v4  ;;  %v1456_v60 = vand.u32 2147483647, %v1441_v4  ;;  %vm1452_vm9 = vweird.f32 %v1441_v4 }
 0x278   : > { %v1399_v15 = vadd.f32 %v1398_v45, %v1349_v1  ;;  %v1293_v1 = vadd.f32 %v1292_v54, %v1231_v26 }
 0x279   : > { %v1459_v24 = vor.u32 1.1754944e-38, %v1458_v44  ;;  %vm1457_vm12 = vcmp.eq.f32.partialorder %v1456_v60, 8.507059e+37 }
 0x27a   : > { %v4694_v59 = vmul.f32 %v4682_v19, %v1399_v15 }
 0x27c   : > { %v3644_v49 = vpop.eup %3643  ;;  %v3445_v50 = vmul.f32 -1.442695, %v4694_v59 }
 0x27d   : > { %v3646_v56 = vpop.eup %3645  ;;  %v4697_v3 = vadd.f32 1.0, %v3644_v49  ;;  %v1352_v53 = vpop.f32.mrf.mxu0 }
 0x27e   : > { %3647 = vpow2.f32 %v3445_v50  ;;  %v1353_v21 = vadd.f32 %v1352_v53, %v1281_v34  ;;  %v1448_v22 = vmul.f32 %v3646_v56, %v1441_v4  ;;  %vm1453_vm5 = vweird.f32 %v3646_v56  ;;  %v1406_v35 = vpop.f32.mrf.mxu1 }
 0x27f   : > { %3649 = vrcp.f32 %v4697_v3  ;;  %vm1454_vm11 = vmor %vm1452_vm9, %vm1453_vm5  ;;  %v1471_v11 = vand.u32 2147483647, %v4697_v3  ;;  %v1473_v8 = vand.u32 2147483648, %v4697_v3  ;;  %vm1467_vm14 = vweird.f32 %v4697_v3 }
 0x280   : > { %v1403_v18 = vadd.f32 %v1402_v43, %v1353_v21  ;;  %v1449_v6 = vsub.f32 1.0, %v1448_v22  ;;  %vm1630_vm5 = vcmask 261120  }
 0x281   : > { %vm4726_vm2 = vcmp.eq.f32.partialorder %v1471_v11, 8.507059e+37  ;;  %v1474_v20 = vor.u32 1.1754944e-38, %v1473_v8 }
 0x282   : > { %v4701_v46 = vmul.f32 %v4682_v19, %v1403_v18  ;;  %v1450_v9 = vmul.f32 %v3646_v56, %v1449_v6  ;;  %v1559_v18 = vperm.slane %v4706_v55, 1 }
 0x284   : > { %v3648_v10 = vpop.eup %3647  ;;  %v3446_v63 = vmul.f32 -1.442695, %v4701_v46  ;;  %v1451_v27 = vadd.f32 %v3646_v56, %v1450_v9  ;;  %vm1565_vm8 = vcmp.ne.s32.totalorder %v1559_v18, 0 }
 0x285   : > { %v3650_v28 = vpop.eup %3649  ;;  %v4708_v32 = vadd.f32 1.0, %v3648_v10  ;;  %v1356_v37 = vpop.f32.mrf.mxu0 }
 0x286   : > { %3651 = vpow2.f32 %v3446_v63  ;;  %v1357_v14 = vadd.f32 %v1356_v37, %v1287_v30  ;;  %v1455_v33 = vsel %vm1454_vm11, %v3646_v56, %v1451_v27  ;;  %v1463_v16 = vmul.f32 %v3650_v28, %v4697_v3  ;;  %v1410_v53 = vpop.f32.mrf.mxu1 }
 0x287   : > { %3653 = vrcp.f32 %v4708_v32  ;;  %v1460_v40 = vsel %vm1457_vm12, %v1459_v24, %v1455_v33  ;;  %vm1468_vm1 = vweird.f32 %v3650_v28  ;;  %v1486_v2 = vand.u32 2147483647, %v4708_v32 }
 0x288   : > { %v1407_v0 = vadd.f32 %v1406_v35, %v1357_v14  ;;  %v1464_v45 = vsub.f32 1.0, %v1463_v16  ;;  %v1537_v25 = vmul.f32 %v1460_v40, %v4685_v23  ;;  %v1488_v56 = vand.u32 2147483648, %v4708_v32  ;;  %vm1469_vm3 = vmor %vm1467_vm14, %vm1468_vm1 }
 0x289   : > { %vm1482_vm6 = vweird.f32 %v4708_v32  ;;  %vm1487_vm9 = vcmp.eq.f32.partialorder %v1486_v2, 8.507059e+37 }
 0x28a   : > { %v4716_v51 = vmul.f32 %v4682_v19, %v1407_v0  ;;  %v1465_v48 = vmul.f32 %v3650_v28, %v1464_v45  ;;  %v1543_v4 = vmul.f32 1.6778524, %v1537_v25  ;;  %v1489_v60 = vor.u32 1.1754944e-38, %v1488_v56 }
 0x28c   : > { %v3652_v57 = vpop.eup %3651  ;;  %v3447_v12 = vmul.f32 -1.442695, %v4716_v51  ;;  %v1582_v31 = vsel %vm1564_vm13, %v1543_v4, 0.0  ;;  %v1466_v43 = vadd.f32 %v3650_v28, %v1465_v48 }
 0x28d   : > { %v3654_v15 = vpop.eup %3653  ;;  %v4722_v5 = vadd.f32 1.0, %v3652_v57  ;;  %v1360_v23 = vpop.f32.mrf.mxu0  ;;  %1635 = vrot.lane.b32.xlu1 %v1582_v31, %s3763_s8  ;;  %v1594_v22 = vrot.slane %v1582_v31, 1  ;;  %v1606_v36 = vrot.slane %v1582_v31, 7  ;;  %v1561_v57 = vperm.slane %v4706_v55, 3 }
 0x28e   : > { %v1478_v49 = vmul.f32 %v3654_v15, %v4708_v32  ;;  %3655 = vpow2.f32 %v3447_v12  ;;  %v1361_v34 = vadd.f32 %v1360_v23, %v1293_v1  ;;  %vm1483_vm4 = vweird.f32 %v3654_v15 }
 0x28f   : > { %3657 = vrcp.f32 %v4722_v5  ;;  %v1470_v58 = vsel %vm1469_vm3, %v3650_v28, %v1466_v43  ;;  %v1624_v44 = vsel %vm744_vm10, %v1594_v22, %v1606_v36  ;;  %v1618_v3 = vsel %vm735_vm15, %v1594_v22, %v1606_v36  ;;  %vm1484_vm7 = vmor %vm1482_vm6, %vm1483_vm4 }
 0x290   : > { %v1479_v21 = vsub.f32 1.0, %v1478_v49  ;;  %v1411_v17 = vadd.f32 %v1410_v53, %v1361_v34  ;;  %v1475_v13 = vsel %vm4726_vm2, %v1474_v20, %v1470_v58  ;;  %1656 = vrot.lane.b32.xlu0 %v1624_v44, %s3767_s14  ;;  %1631 = vst.msk [vmem:[#allocation3] sm:$0xff] %vm1630_vm5, %v1618_v3  ;;  %v1503_v24 = vand.u32 2147483648, %v4722_v5 }
 0x291   : > { %v1538_v9 = vmul.f32 %v1475_v13, %v4689_v47  ;;  %v1560_v47 = vperm.slane %v4706_v55, 2  ;;  %v1501_v39 = vand.u32 2147483647, %v4722_v5  ;;  %vm1497_vm13 = vweird.f32 %v4722_v5 }
 0x292   : > { %v1480_v42 = vmul.f32 %v3654_v15, %v1479_v21  ;;  %v4738_v6 = vmul.f32 %v4682_v19, %v1411_v17  ;;  %v1504_v25 = vor.u32 1.1754944e-38, %v1503_v24  ;;  %vm1567_vm2 = vcmp.ne.s32.totalorder %v1561_v57, 0 }
 0x293   : > { %v1544_v52 = vmul.f32 1.6778524, %v1538_v9  ;;  %vm1566_vm11 = vcmp.ne.s32.totalorder %v1560_v47, 0  ;;  %vm1502_vm1 = vcmp.eq.f32.partialorder %v1501_v39, 8.507059e+37  ;;  %v1562_v21 = vperm.slane %v4706_v55, 4 }
 0x294   : > { %v3656_v30 = vpop.eup %3655  ;;  %v1481_v7 = vadd.f32 %v3654_v15, %v1480_v42  ;;  %v3448_v10 = vmul.f32 -1.442695, %v4738_v6  ;;  %v1563_v47 = vperm.slane %v4706_v55, 5 }
 0x295   : > { %v3658_v19 = vpop.eup %3657  ;;  %v4750_v63 = vadd.f32 1.0, %v3656_v30  ;;  %v1583_v61 = vsel %vm1565_vm8, %v1544_v52, 0.0  ;;  %vm1568_vm8 = vcmp.ne.s32.totalorder %v1562_v21, 0 }
 0x296   : > { %v1485_v27 = vsel %vm1484_vm7, %v3654_v15, %v1481_v7  ;;  %v1493_v28 = vmul.f32 %v3658_v19, %v4722_v5  ;;  %3659 = vpow2.f32 %v3448_v10  ;;  %1637 = vrot.lane.b32.xlu1 %v1583_v61, %s3763_s8  ;;  %v1595_v14 = vrot.slane %v1583_v61, 1  ;;  %1694 = vst.msk [vmem:[#allocation3 + $0x8] sm:$0xff] %vm1630_vm5, %v1583_v61 }
 0x297   : > { %v1490_v32 = vsel %vm1487_vm9, %v1489_v60, %v1485_v27  ;;  %3661 = vrcp.f32 %v4750_v63  ;;  %v1607_v33 = vrot.slane %v1583_v61, 7  ;;  %vm1498_vm12 = vweird.f32 %v3658_v19  ;;  %v1779_v61 = vld [vmem:[%s5798_s3 + $0x78] sm:$0xff] }
 0x298   : > { %v1539_v35 = vmul.f32 %v1490_v32, %v4694_v59  ;;  %v1494_v37 = vsub.f32 1.0, %v1493_v28  ;;  %vm1499_vm14 = vmor %vm1497_vm13, %vm1498_vm12  ;;  %v1518_v43 = vand.u32 2147483648, %v4750_v63  ;;  %v1516_v2 = vand.u32 2147483647, %v4750_v63 }
 0x299   : > { %v1619_v0 = vsel %vm735_vm15, %v1595_v14, %v1607_v33  ;;  %v4762_v59 = vsel %vm744_vm10, %v1595_v14, %v1607_v33  ;;  %vm1512_vm4 = vweird.f32 %v4750_v63 }
 0x29a   : > { %v1495_v16 = vmul.f32 %v3658_v19, %v1494_v37  ;;  %v1545_v26 = vmul.f32 1.6778524, %v1539_v35  ;;  %1677 = vrot.lane.b32.xlu2 %v1619_v0, %s3770_s13  ;;  %1632 = vst.msk [vmem:[#allocation3 + $0x18] sm:$0xff] %vm1630_vm5, %v1619_v0  ;;  %1658 = vrot.lane.b32.xlu0 %v4762_v59, %s3767_s14  ;;  %v1519_v20 = vor.u32 1.1754944e-38, %v1518_v43  ;;  %vm1517_vm7 = vcmp.eq.f32.partialorder %v1516_v2, 8.507059e+37  ;;  %v1776_v0 = vld [vmem:[%s5798_s3 + $0x60] sm:$0xff] }
 0x29c   : > { %v3660_v40 = vpop.eup %3659  ;;  %v1496_v45 = vadd.f32 %v3658_v19, %v1495_v16  ;;  %v4769_v48 = vsel %vm1566_vm11, %v1545_v26, 0.0  ;;  %v4849_v16 = vand.u32 4294901760, %v1779_v61  ;;  %v1777_v26 = vld [vmem:[%s5798_s3 + $0x68] sm:$0xff] }
 0x29d   : > { %v3662_v11 = vpop.eup %3661  ;;  %v4772_v54 = vadd.f32 1.0, %v3660_v40  ;;  %1695 = vst.msk [vmem:[#allocation3 + $0x20] sm:$0xff] %vm1630_vm5, %v4769_v48  ;;  %v1596_v4 = vrot.slane %v4769_v48, 1  ;;  %v1608_v8 = vrot.slane %v4769_v48, 7  ;;  %v4861_v40 = vand.u32 4294901760, %v1776_v0 }
 0x29e   : > { %v1500_v1 = vsel %vm1499_vm14, %v3658_v19, %v1496_v45  ;;  %v1508_v12 = vmul.f32 %v3662_v11, %v4750_v63  ;;  %1639 = vrot.lane.b32.xlu1 %v4769_v48, %s3763_s8  ;;  %vm1513_vm3 = vweird.f32 %v3662_v11  ;;  %vm1569_vm14 = vcmp.ne.s32.totalorder %v1563_v47, 0  ;;  %1813 = vmatpush.msrb.mxu2 %v4849_v16  ;;  %v1770_v47 = vld [vmem:[%s5798_s3 + $0x30] sm:$0xff] }
 0x29f   : > { %v1505_v15 = vsel %vm1502_vm1, %v1504_v25, %v1500_v1  ;;  %3663 = vrcp.f32 %v4772_v54  ;;  %v1620_v31 = vsel %vm735_vm15, %v1596_v4, %v1608_v8  ;;  %v4788_v49 = vsel %vm744_vm10, %v1596_v4, %v1608_v8  ;;  %vm1514_vm6 = vmor %vm1512_vm4, %vm1513_vm3  ;;  %2198 = vmatpush.msra.mxu1 %v4849_v16 }
 0x2a0   : > { %v1540_v5 = vmul.f32 %v1505_v15, %v4701_v46  ;;  %v1509_v23 = vsub.f32 1.0, %v1508_v12  ;;  %1633 = vst.msk [vmem:[#allocation3 + $0x30] sm:$0xff] %vm1630_vm5, %v1620_v31  ;;  %v1533_v3 = vand.u32 2147483648, %v4772_v54  ;;  %v1531_v60 = vand.u32 2147483647, %v4772_v54  ;;  %v1775_v15 = vld [vmem:[%s5798_s3 + $0x58] sm:$0xff] }
 0x2a1   : > { %1748 = vst.msk [vmem:[#allocation3 + $0x10] sm:$0xff] %vm1630_vm5, %v4788_v49  ;;  %vm1527_vm11 = vweird.f32 %v4772_v54  ;;  %v4866_v25 = vsub.f32 %v1779_v61, %v4849_v16  ;;  %v4877_v4 = vsub.f32 %v1776_v0, %v4861_v40  ;;  %vm1689_vm1 = vcmask 1048320  }
 0x2a2   : > { %v1546_v34 = vmul.f32 1.6778524, %v1540_v5  ;;  %v1510_v50 = vmul.f32 %v3662_v11, %v1509_v23  ;;  %1679 = vrot.lane.b32.xlu2 %v1620_v31, %s3770_s13  ;;  %1660 = vrot.lane.b32.xlu0 %v4788_v49, %s3767_s14  ;;  %v1534_v19 = vor.u32 1.1754944e-38, %v1533_v3  ;;  %vm1532_vm13 = vcmp.eq.f32.partialorder %v1531_v60, 8.507059e+37 }
 0x2a3   : > { %v1879_v8 = vand.u32 4294901760, %v4866_v25  ;;  %v1897_v12 = vand.u32 4294901760, %v4877_v4  ;;  %vm3241_vm3 = vcmask 1043459   ;;  %vm3311_vm4 = vcmask 130048  }
 0x2a4   : > { %v1511_v46 = vadd.f32 %v3662_v11, %v1510_v50  ;;  %v4797_v56 = vsel %vm1567_vm2, %v1546_v34, 0.0  ;;  %v4900_v50 = vand.u32 4294901760, %v1775_v15  ;;  %vm3238_vm2 = vcmask 1042434  }
 0x2a5   : > { %v3664_v53 = vpop.eup %3663  ;;  %1696 = vst.msk [vmem:[#allocation3 + $0x38] sm:$0xff] %vm1630_vm5, %v4797_v56  ;;  %v1597_v17 = vrot.slane %v4797_v56, 1  ;;  %v1609_v22 = vrot.slane %v4797_v56, 7  ;;  %v1880_v5 = vsub.f32 %v4866_v25, %v1879_v8  ;;  %2119 = vmatpush.msra.mxu0 %v1879_v8  ;;  %v1898_v34 = vsub.f32 %v4877_v4, %v1897_v12 }
 0x2a6   : > { %v1515_v36 = vsel %vm1514_vm6, %v3662_v11, %v1511_v46  ;;  %v1523_v58 = vmul.f32 %v3664_v53, %v4772_v54  ;;  %1641 = vrot.lane.b32.xlu1 %v4797_v56, %s3763_s8  ;;  %vm1528_vm9 = vweird.f32 %v3664_v53  ;;  %vm3314_vm6 = vcmask 392192  }
 0x2a7   : > { %v1520_v18 = vsel %vm1517_vm7, %v1519_v20, %v1515_v36  ;;  %v4806_v42 = vsel %vm735_vm15, %v1597_v17, %v1609_v22  ;;  %v4809_v44 = vsel %vm744_vm10, %v1597_v17, %v1609_v22  ;;  %vm1529_vm12 = vmor %vm1527_vm11, %vm1528_vm9  ;;  %v1881_v43 = vand.u32 4294901760, %v1880_v5  ;;  %v1773_v20 = vld [vmem:[%s5798_s3 + $0x48] sm:$0xff] }
 0x2a8   : > { %v1541_v13 = vmul.f32 %v1520_v18, %v4716_v51  ;;  %v1524_v9 = vsub.f32 1.0, %v1523_v58  ;;  %1634 = vst.msk [vmem:[#allocation3 + $0x48] sm:$0xff] %vm1630_vm5, %v4806_v42  ;;  %v4929_v17 = vand.u32 4294901760, %v1773_v20  ;;  %vm3316_vm7 = vcmask 523264  }
 0x2a9   : > { %1749 = vst.msk [vmem:[#allocation3 + $0x28] sm:$0xff] %vm1630_vm5, %v4809_v44  ;;  %1882 = vmatpush.msrb.mxu3 %v1881_v43  ;;  %vm3320_vm9 = vcmask 785408  }
 0x2aa   : > { %v1547_v30 = vmul.f32 1.6778524, %v1541_v13  ;;  %v1525_v7 = vmul.f32 %v3664_v53, %v1524_v9  ;;  %1681 = vrot.lane.b32.xlu2 %v4806_v42, %s3770_s13  ;;  %1662 = vrot.lane.b32.xlu0 %v4809_v44, %s3767_s14  ;;  %v4938_v58 = vsub.f32 %v1773_v20, %v4929_v17 }
 0x2ac   : > { %v4820_v10 = vsel %vm1568_vm8, %v1547_v30, 0.0  ;;  %v1526_v51 = vadd.f32 %v3664_v53, %v1525_v7  ;;  %v1772_v30 = vld [vmem:[%s5798_s3 + $0x40] sm:$0xff]  ;;  %v1771_v7 = vld [vmem:[%s5798_s3 + $0x38] sm:$0xff]  ;;  %vm3318_vm8 = vcmask 654336  }
 0x2ad   : > { %1697 = vst.msk [vmem:[#allocation3 + $0x50] sm:$0xff] %vm1630_vm5, %v4820_v10  ;;  %v1598_v63 = vrot.slane %v4820_v10, 1  ;;  %v1610_v52 = vrot.slane %v4820_v10, 7 }
 0x2ae   : > { %v1530_v27 = vsel %vm1529_vm12, %v3664_v53, %v1526_v51  ;;  %1699 = vrot.lane.b32.xlu1 %v4762_v59, %s3763_s8  ;;  %v4859_v59 = vand.u32 4294901760, %v1777_v26  ;;  %v4919_v53 = vsub.f32 %v1775_v15, %v4900_v50  ;;  %v4953_v51 = vand.u32 4294901760, %v1772_v30 }
 0x2af   : > { %v1535_v28 = vsel %vm1532_vm13, %v1534_v19, %v1530_v27  ;;  %v4833_v32 = vsel %vm744_vm10, %v1598_v63, %v1610_v52  ;;  %v1622_v37 = vsel %vm735_vm15, %v1598_v63, %v1610_v52  ;;  %v4955_v19 = vand.u32 4294901760, %v1771_v7 }
 0x2b0   : > { %v1542_v35 = vmul.f32 %v1535_v28, %v4738_v6  ;;  %1750 = vst.msk [vmem:[#allocation3 + $0x40] sm:$0xff] %vm1630_vm5, %v4833_v32  ;;  %v1778_v6 = vld [vmem:[%s5798_s3 + $0x70] sm:$0xff]  ;;  %v4873_v54 = vsub.f32 %v1777_v26, %v4859_v59  ;;  %v1903_v22 = vand.u32 4294901760, %v4919_v53  ;;  %v4959_v63 = vsub.f32 %v1772_v30, %v4953_v51  ;;  %v1767_v26 = vld [vmem:[%s5798_s3 + $0x18] sm:$0xff] }
 0x2b1   : > { %v4851_v39 = vand.u32 4294901760, %v1778_v6  ;;  %v4962_v52 = vsub.f32 %v1771_v7, %v4955_v19  ;;  %v4968_v27 = vand.u32 4294901760, %v1770_v47 }
 0x2b2   : > { %v1548_v24 = vmul.f32 1.6778524, %v1542_v35  ;;  %1683 = vrot.lane.b32.xlu2 %v1622_v37, %s3770_s13  ;;  %1716 = vrot.lane.b32.xlu0 %v1620_v31, %s3767_s14  ;;  %v1891_v1 = vand.u32 4294901760, %v4873_v54  ;;  %v1904_v18 = vsub.f32 %v4919_v53, %v1903_v22  ;;  %v1921_v28 = vand.u32 4294901760, %v4959_v63 }
 0x2b3   : > { %v4869_v11 = vsub.f32 %v1778_v6, %v4851_v39  ;;  %1815 = vmatpush.msrb.mxu2 %v4851_v39  ;;  %2200 = vmatpush.msra.mxu1 %v4851_v39  ;;  %v4975_v35 = vsub.f32 %v1770_v47, %v4968_v27 }
 0x2b4   : > { %v1587_v55 = vsel %vm1569_vm14, %v1548_v24, 0.0  ;;  %v1892_v31 = vsub.f32 %v4873_v54, %v1891_v1  ;;  %v1905_v13 = vand.u32 4294901760, %v1904_v18  ;;  %v1765_v18 = vld [vmem:[%s5798_s3 + $0x8] sm:$0xff] }
 0x2b5   : > { %v1599_v14 = vrot.slane %v1587_v55, 1  ;;  %v1611_v33 = vrot.slane %v1587_v55, 7  ;;  %v1885_v57 = vand.u32 4294901760, %v4869_v11  ;;  %1817 = vmatpush.msrb.mxu2 %v4859_v59  ;;  %2202 = vmatpush.msra.mxu1 %v4859_v59 }
 0x2b6   : > { %1701 = vrot.lane.b32.xlu1 %v4788_v49, %s3763_s8  ;;  %v1893_v2 = vand.u32 4294901760, %v1892_v31 }
 0x2b7   : > { %v1629_v45 = vsel %vm744_vm10, %v1599_v14, %v1611_v33  ;;  %v1886_v23 = vsub.f32 %v4869_v11, %v1885_v57  ;;  %1819 = vmatpush.msrb.mxu2 %v4861_v40  ;;  %2123 = vmatpush.msra.mxu0 %v1885_v57  ;;  %v1623_v46 = vsel %vm735_vm15, %v1599_v14, %v1611_v33  ;;  %v1769_v14 = vld [vmem:[%s5798_s3 + $0x28] sm:$0xff]  ;;  %v1768_v33 = vld [vmem:[%s5798_s3 + $0x20] sm:$0xff]  ;;  %v4996_v57 = vand.u32 4294901760, %v1767_v26 }
 0x2b8   : > { %1751 = vst.msk [vmem:[#allocation3 + $0x58] sm:$0xff] %vm1630_vm5, %v1629_v45  ;;  %2204 = vmatpush.msra.mxu1 %v4861_v40  ;;  %v4992_v45 = vand.u32 4294901760, %v1769_v14  ;;  %v4994_v8 = vand.u32 4294901760, %v1768_v33  ;;  %vm1647_vm15 = vcmask 523520   ;;  %vm1668_vm10 = vcmask 785920  }
 0x2b9   : > { %v1887_v49 = vand.u32 4294901760, %v1886_v23  ;;  %1821 = vmatpush.msrb.mxu2 %v4900_v50  ;;  %2127 = vmatpush.msra.mxu0 %v1891_v1  ;;  %v5007_v5 = vsub.f32 %v1767_v26, %v4996_v57 }
 0x2ba   : > { %1732 = vrot.lane.b32.xlu2 %v4769_v48, %s3770_s13  ;;  %1718 = vrot.lane.b32.xlu0 %v4806_v42, %s3767_s14  ;;  %v1899_v48 = vand.u32 4294901760, %v1898_v34  ;;  %v5004_v15 = vsub.f32 %v1768_v33, %v4994_v8 }
 0x2bb   : > { %1888 = vmatpush.msrb.mxu3 %v1887_v49  ;;  %2131 = vmatpush.msra.mxu0 %v1897_v12  ;;  %v4999_v12 = vsub.f32 %v1769_v14, %v4992_v45  ;;  %v1951_v43 = vand.u32 4294901760, %v5007_v5  ;;  %v1766_v49 = vld [vmem:[%s5798_s3 + $0x10] sm:$0xff]  ;;  %v1793_v14 = vld [vmem:[%s5798_s3 + $0xe8] sm:$0xff] }
 0x2bc   : > { %2206 = vmatpush.msra.mxu1 %v4900_v50  ;;  %v1945_v31 = vand.u32 4294901760, %v5004_v15  ;;  %v5017_v34 = vand.u32 4294901760, %v1766_v49 }
 0x2bd   : > { %1894 = vmatpush.msrb.mxu3 %v1893_v2  ;;  %2135 = vmatpush.msra.mxu0 %v1903_v22  ;;  %v1939_v23 = vand.u32 4294901760, %v4999_v12 }
 0x2be   : > { %1703 = vrot.lane.b32.xlu1 %v4809_v44, %s3763_s8  ;;  %v1915_v44 = vand.u32 4294901760, %v4938_v58 }
 0x2bf   : > { %1900 = vmatpush.msrb.mxu3 %v1899_v48  ;;  %v1940_v2 = vsub.f32 %v4999_v12, %v1939_v23  ;;  %v1946_v48 = vsub.f32 %v5004_v15, %v1945_v31 }
 0x2c0   : > { %v1916_v3 = vsub.f32 %v4938_v58, %v1915_v44 }
 0x2c1   : > { %1906 = vmatpush.msrb.mxu3 %v1905_v13  ;;  %v1941_v20 = vand.u32 4294901760, %v1940_v2  ;;  %v1947_v22 = vand.u32 4294901760, %v1946_v48  ;;  %v5035_v13 = vand.u32 4294901760, %v1765_v18 }
 0x2c2   : > { %1734 = vrot.lane.b32.xlu2 %v4797_v56, %s3770_s13  ;;  %1720 = vrot.lane.b32.xlu0 %v1622_v37, %s3767_s14  ;;  %v1774_v56 = vld [vmem:[%s5798_s3 + $0x50] sm:$0xff]  ;;  %v1922_v37 = vsub.f32 %v4959_v63, %v1921_v28 }
 0x2c3   : > { %v4927_v21 = vand.u32 4294901760, %v1774_v56  ;;  %v5042_v7 = vsub.f32 %v1765_v18, %v5035_v13 }
 0x2c4   : > { %v1923_v61 = vand.u32 4294901760, %v1922_v37 }
 0x2c5   : > { %1823 = vmatpush.msrb.mxu2 %v4927_v21  ;;  %v4934_v36 = vsub.f32 %v1774_v56, %v4927_v21  ;;  %2208 = vmatpush.msra.mxu1 %v4927_v21  ;;  %v5024_v56 = vsub.f32 %v1766_v49, %v5017_v34  ;;  %v1791_v49 = vld [vmem:[%s5798_s3 + $0xd8] sm:$0xff] }
 0x2c6   : > { %1705 = vrot.lane.b32.xlu1 %v4833_v32, %s3763_s8  ;;  %v1927_v32 = vand.u32 4294901760, %v4962_v52 }
 0x2c7   : > { %v1909_v42 = vand.u32 4294901760, %v4934_v36  ;;  %1825 = vmatpush.msrb.mxu2 %v4929_v17  ;;  %2210 = vmatpush.msra.mxu1 %v4929_v17 }
 0x2c8   : > { %v1928_v24 = vsub.f32 %v4962_v52, %v1927_v32 }
 0x2c9   : > { %v1910_v9 = vsub.f32 %v4934_v36, %v1909_v42  ;;  %2139 = vmatpush.msra.mxu0 %v1909_v42  ;;  %1827 = vmatpush.msrb.mxu2 %v4953_v51  ;;  %v1764_v42 = vld [vmem:[%s5798_s3] sm:$0xff] }
 0x2ca   : > { %1736 = vrot.lane.b32.xlu2 %v4820_v10, %s3770_s13  ;;  %1722 = vrot.lane.b32.xlu0 %v1623_v46, %s3767_s14  ;;  %v1917_v10 = vand.u32 4294901760, %v1916_v3  ;;  %v1929_v6 = vand.u32 4294901760, %v1928_v24  ;;  %v1952_v46 = vsub.f32 %v5007_v5, %v1951_v43 }
 0x2cb   : > { %v1911_v60 = vand.u32 4294901760, %v1910_v9  ;;  %2143 = vmatpush.msra.mxu0 %v1915_v44  ;;  %2212 = vmatpush.msra.mxu1 %v4953_v51  ;;  %v1957_v44 = vand.u32 4294901760, %v5024_v56  ;;  %v5038_v9 = vand.u32 4294901760, %v1764_v42 }
 0x2cc   : > { %1829 = vmatpush.msrb.mxu2 %v4955_v19  ;;  %v1953_v3 = vand.u32 4294901760, %v1952_v46  ;;  %v1789_v46 = vld [vmem:[%s5798_s3 + $0xc8] sm:$0xff] }
 0x2cd   : > { %1912 = vmatpush.msrb.mxu3 %v1911_v60  ;;  %2214 = vmatpush.msra.mxu1 %v4955_v19  ;;  %v1958_v30 = vsub.f32 %v5024_v56, %v1957_v44  ;;  %v5046_v60 = vsub.f32 %v1764_v42, %v5038_v9  ;;  %v1788_v42 = vld [vmem:[%s5798_s3 + $0xc0] sm:$0xff] }
 0x2ce   : > { %2147 = vmatpush.msra.mxu0 %v1921_v28  ;;  %1831 = vmatpush.msrb.mxu2 %v4968_v27  ;;  %v1963_v28 = vand.u32 4294901760, %v5042_v7 }
 0x2cf   : > { %1918 = vmatpush.msrb.mxu3 %v1917_v10  ;;  %2216 = vmatpush.msra.mxu1 %v4968_v27  ;;  %v1795_v10 = vld [vmem:[%s5798_s3 + $0xf8] sm:$0xff]  ;;  %v1959_v47 = vand.u32 4294901760, %v1958_v30 }
 0x2d0   : > { %2151 = vmatpush.msra.mxu0 %v1927_v32  ;;  %1833 = vmatpush.msrb.mxu2 %v4992_v45  ;;  %v1969_v32 = vand.u32 4294901760, %v5046_v60  ;;  %v5055_v37 = vand.u32 4294901760, %v1795_v10  ;;  %v1964_v24 = vsub.f32 %v5042_v7, %v1963_v28 }
 0x2d1   : > { %1924 = vmatpush.msrb.mxu3 %v1923_v61  ;;  %2218 = vmatpush.msra.mxu1 %v4992_v45 }
 0x2d2   : > { %1738 = vrot.lane.b32.xlu2 %v1587_v55, %s3770_s13  ;;  %v1933_v55 = vand.u32 4294901760, %v4975_v35  ;;  %1835 = vmatpush.msrb.mxu2 %v4994_v8  ;;  %v5062_v61 = vsub.f32 %v1795_v10, %v5055_v37  ;;  %v1965_v33 = vand.u32 4294901760, %v1964_v24 }
 0x2d3   : > { %1930 = vmatpush.msrb.mxu3 %v1929_v6  ;;  %2220 = vmatpush.msra.mxu1 %v4994_v8  ;;  %v1794_v6 = vld [vmem:[%s5798_s3 + $0xf0] sm:$0xff] }
 0x2d4   : > { %v1934_v0 = vsub.f32 %v4975_v35, %v1933_v55  ;;  %2155 = vmatpush.msra.mxu0 %v1933_v55  ;;  %1837 = vmatpush.msrb.mxu2 %v4996_v57  ;;  %v1970_v55 = vsub.f32 %v5046_v60, %v1969_v32 }
 0x2d5   : > { %2222 = vmatpush.msra.mxu1 %v4996_v57 }
 0x2d6   : > { %v1935_v1 = vand.u32 4294901760, %v1934_v0  ;;  %2159 = vmatpush.msra.mxu0 %v1939_v23  ;;  %1839 = vmatpush.msrb.mxu2 %v5017_v34  ;;  %v1971_v26 = vand.u32 4294901760, %v1970_v55  ;;  %v5072_v0 = vand.u32 4294901760, %v1794_v6 }
 0x2d7   : > { %2224 = vmatpush.msra.mxu1 %v5017_v34 }
 0x2d8   : > { %1936 = vmatpush.msrb.mxu3 %v1935_v1  ;;  %2163 = vmatpush.msra.mxu0 %v1945_v31  ;;  %v5075_v1 = vand.u32 4294901760, %v1793_v14  ;;  %v5079_v23 = vsub.f32 %v1794_v6, %v5072_v0 }
 0x2d9   : > { %2226 = vmatpush.msra.mxu1 %v5035_v13  ;;  %1841 = vmatpush.msrb.mxu2 %v5035_v13 }
 0x2da   : > { %1942 = vmatpush.msrb.mxu3 %v1941_v20  ;;  %2167 = vmatpush.msra.mxu0 %v1951_v43  ;;  %v5086_v31 = vsub.f32 %v1793_v14, %v5075_v1 }
 0x2db   : > { %2228 = vmatpush.msra.mxu1 %v5038_v9  ;;  %1843 = vmatpush.msrb.mxu2 %v5038_v9 }
 0x2dc   : > { %1948 = vmatpush.msrb.mxu3 %v1947_v22  ;;  %2171 = vmatpush.msra.mxu0 %v1957_v44 }
 0x2dd   : > { %1992 = vmatpush.msra.mxu2 %v4866_v25  ;;  %2494 = vmatpush.msrb.mxu1 %v5055_v37 }
 0x2de   : > { %1954 = vmatpush.msrb.mxu3 %v1953_v3  ;;  %2175 = vmatpush.msra.mxu0 %v1963_v28  ;;  %v1784_v28 = vld [vmem:[%s5798_s3 + $0xa0] sm:$0xff] }
 0x2df   : > { %1995 = vmatpush.msra.mxu2 %v4869_v11  ;;  %2496 = vmatpush.msrb.mxu1 %v5072_v0  ;;  %v1792_v11 = vld [vmem:[%s5798_s3 + $0xe0] sm:$0xff] }
 0x2e0   : > { %1960 = vmatpush.msrb.mxu3 %v1959_v47  ;;  %2179 = vmatpush.msra.mxu0 %v1969_v32  ;;  %v5088_v43 = vand.u32 4294901760, %v1792_v11 }
 0x2e1   : > { %1998 = vmatpush.msra.mxu2 %v4873_v54  ;;  %v5095_v54 = vand.u32 4294901760, %v1791_v49  ;;  %2498 = vmatpush.msrb.mxu1 %v5075_v1 }
 0x2e2   : > { %2426 = vmatpush.msrb.mxu0 %v5062_v61  ;;  %1966 = vmatpush.msrb.mxu3 %v1965_v33  ;;  %v5099_v2 = vsub.f32 %v1792_v11, %v5088_v43  ;;  %v5224_v33 = vand.u32 4294901760, %v5062_v61 }
 0x2e3   : > { %2001 = vmatpush.msra.mxu2 %v4877_v4  ;;  %v5104_v48 = vsub.f32 %v1791_v49, %v5095_v54  ;;  %2500 = vmatpush.msrb.mxu1 %v5088_v43 }
 0x2e4   : > { %1972 = vmatpush.msrb.mxu3 %v1971_v26  ;;  %2429 = vmatpush.msrb.mxu0 %v5079_v23  ;;  %v1780_v26 = vld [vmem:[%s5798_s3 + $0x80] sm:$0xff] }
 0x2e5   : > { %2004 = vmatpush.msra.mxu2 %v4919_v53  ;;  %v5119_v53 = vand.u32 4294901760, %v1789_v46  ;;  %2502 = vmatpush.msrb.mxu1 %v5095_v54 }
 0x2e6   : > { %2060 = vmatpush.msra.mxu3 %v4849_v16  ;;  %2432 = vmatpush.msrb.mxu0 %v5086_v31  ;;  %v1790_v16 = vld [vmem:[%s5798_s3 + $0xd0] sm:$0xff] }
 0x2e7   : > { %v5117_v20 = vand.u32 4294901760, %v1790_v16  ;;  %2007 = vmatpush.msra.mxu2 %v4934_v36  ;;  %v5129_v18 = vsub.f32 %v1789_v46, %v5119_v53  ;;  %v1787_v36 = vld [vmem:[%s5798_s3 + $0xb8] sm:$0xff] }
 0x2e8   : > { %2062 = vmatpush.msra.mxu3 %v4851_v39  ;;  %2435 = vmatpush.msrb.mxu0 %v5099_v2  ;;  %v5143_v3 = vand.u32 4294901760, %v1787_v36 }
 0x2e9   : > { %v5126_v22 = vsub.f32 %v1790_v16, %v5117_v20  ;;  %2010 = vmatpush.msra.mxu2 %v4938_v58  ;;  %2504 = vmatpush.msrb.mxu1 %v5117_v20  ;;  %v5238_v16 = vand.u32 4294901760, %v5079_v23 }
 0x2ea   : > { %2064 = vmatpush.msra.mxu3 %v4859_v59  ;;  %2438 = vmatpush.msrb.mxu0 %v5104_v48  ;;  %v5137_v59 = vand.u32 4294901760, %v1788_v42  ;;  %v5155_v58 = vsub.f32 %v1787_v36, %v5143_v3 }
 0x2eb   : > { %2013 = vmatpush.msra.mxu2 %v4959_v63  ;;  %2506 = vmatpush.msrb.mxu1 %v5119_v53  ;;  %v1785_v63 = vld [vmem:[%s5798_s3 + $0xa8] sm:$0xff] }
 0x2ec   : > { %2066 = vmatpush.msra.mxu3 %v4861_v40  ;;  %2441 = vmatpush.msrb.mxu0 %v5126_v22  ;;  %v5149_v40 = vsub.f32 %v1788_v42, %v5137_v59  ;;  %v5169_v10 = vand.u32 4294901760, %v1785_v63 }
 0x2ed   : > { %2016 = vmatpush.msra.mxu2 %v4962_v52  ;;  %2508 = vmatpush.msrb.mxu1 %v5137_v59 }
 0x2ee   : > { %2068 = vmatpush.msra.mxu3 %v4900_v50  ;;  %2444 = vmatpush.msrb.mxu0 %v5129_v18  ;;  %v1786_v50 = vld [vmem:[%s5798_s3 + $0xb0] sm:$0xff]  ;;  %v5179_v47 = vsub.f32 %v1785_v63, %v5169_v10  ;;  %v5272_v63 = vand.u32 4294901760, %v5099_v2 }
 0x2ef   : > { %v5167_v30 = vand.u32 4294901760, %v1786_v50  ;;  %2019 = vmatpush.msra.mxu2 %v4975_v35  ;;  %2510 = vmatpush.msrb.mxu1 %v5143_v3  ;;  %v1783_v35 = vld [vmem:[%s5798_s3 + $0x98] sm:$0xff] }
 0x2f0   : > { %2070 = vmatpush.msra.mxu3 %v4927_v21  ;;  %2447 = vmatpush.msrb.mxu0 %v5149_v40  ;;  %v5194_v24 = vand.u32 4294901760, %v1783_v35 }
 0x2f1   : > { %v5176_v52 = vsub.f32 %v1786_v50, %v5167_v30  ;;  %2022 = vmatpush.msra.mxu2 %v4999_v12  ;;  %2512 = vmatpush.msrb.mxu1 %v5167_v30  ;;  %v5261_v50 = vand.u32 4294901760, %v5086_v31 }
 0x2f2   : > { %2072 = vmatpush.msra.mxu3 %v4929_v17  ;;  %2450 = vmatpush.msrb.mxu0 %v5155_v58  ;;  %v5188_v17 = vand.u32 4294901760, %v1784_v28 }
 0x2f3   : > { %2025 = vmatpush.msra.mxu2 %v5004_v15  ;;  %2514 = vmatpush.msrb.mxu1 %v5169_v10  ;;  %v1781_v15 = vld [vmem:[%s5798_s3 + $0x88] sm:$0xff] }
 0x2f4   : > { %v1678_v25 = vpop.permute.xlu2 %1677  ;;  %2074 = vmatpush.msra.mxu3 %v4953_v51  ;;  %2453 = vmatpush.msrb.mxu0 %v5176_v52  ;;  %v5202_v6 = vsub.f32 %v1784_v28, %v5188_v17 }
 0x2f5   : > { %2028 = vmatpush.msra.mxu2 %v5007_v5  ;;  %2516 = vmatpush.msrb.mxu1 %v5188_v17  ;;  %v5217_v5 = vsub.f32 %v1783_v35, %v5194_v24 }
 0x2f6   : > { %2076 = vmatpush.msra.mxu3 %v4955_v19  ;;  %2456 = vmatpush.msrb.mxu0 %v5179_v47  ;;  %v1782_v19 = vld [vmem:[%s5798_s3 + $0x90] sm:$0xff] }
 0x2f7   : > { %2518 = vmatpush.msrb.mxu1 %v5194_v24  ;;  %2031 = vmatpush.msra.mxu2 %v5024_v56 }
 0x2f8   : > { %2078 = vmatpush.msra.mxu3 %v4968_v27  ;;  %v5221_v27 = vand.u32 4294901760, %v1781_v15  ;;  %2459 = vmatpush.msrb.mxu0 %v5202_v6 }
 0x2f9   : > { %2034 = vmatpush.msra.mxu2 %v5042_v7  ;;  %v2320_v7 = vsub.f32 %v5079_v23, %v5238_v16  ;;  %v5279_v23 = vand.u32 4294901760, %v5104_v48 }
 0x2fa   : > { %2080 = vmatpush.msra.mxu3 %v4992_v45  ;;  %v5241_v45 = vand.u32 4294901760, %v1780_v26  ;;  %2462 = vmatpush.msrb.mxu0 %v5217_v5 }
 0x2fb   : > { %2037 = vmatpush.msra.mxu2 %v5046_v60  ;;  %v2321_v35 = vand.u32 4294901760, %v2320_v7 }
 0x2fc   : > { %v1680_v39 = vpop.permute.xlu2 %1679  ;;  %2082 = vmatpush.msra.mxu3 %v4994_v8  ;;  %v2314_v8 = vsub.f32 %v5062_v61, %v5224_v33  ;;  %v5265_v61 = vsub.f32 %v1780_v26, %v5241_v45 }
 0x2fe   : > { %2084 = vmatpush.msra.mxu3 %v4996_v57  ;;  %v2315_v28 = vand.u32 4294901760, %v2314_v8 }
 0x2ff   : > { %v1636_v4 = vpop.permute.xlu1 %1635 }
 0x300   : > { %1648 = vst.msk [vmem:[#allocation3] sm:$0xff] %vm1647_vm15, %v1636_v4  ;;  %2086 = vmatpush.msra.mxu3 %v5017_v34 }
 0x302   : > { %v1657_v44 = vpop.permute.xlu0 %1656  ;;  %2088 = vmatpush.msra.mxu3 %v5035_v13 }
 0x303   : > { %1669 = vst.msk [vmem:[#allocation3] sm:$0xff] %vm1668_vm10, %v1657_v44 }
 0x304   : > { %1690 = vst.msk [vmem:[#allocation3] sm:$0xff] %vm1689_vm1, %v1678_v25  ;;  %v1682_v32 = vpop.permute.xlu2 %1681  ;;  %v5219_v25 = vand.u32 4294901760, %v1782_v19  ;;  %2090 = vmatpush.msra.mxu3 %v5038_v9 }
 0x306   : > { %v5233_v4 = vsub.f32 %v1782_v19, %v5219_v25  ;;  %2520 = vmatpush.msrb.mxu1 %v5219_v25 }
 0x308   : > { %v1638_v21 = vpop.permute.xlu1 %1637  ;;  %2465 = vmatpush.msrb.mxu0 %v5233_v4  ;;  %2522 = vmatpush.msrb.mxu1 %v5221_v27 }
 0x309   : > { %1649 = vst.msk [vmem:[#allocation3 + $0x18] sm:$0xff] %vm1647_vm15, %v1638_v21 }
 0x30a   : > { %2524 = vmatpush.msrb.mxu1 %v5241_v45 }
 0x30b   : > { %v1752_v55 = vld [vmem:[#allocation3] sm:$0xff] }
 0x30c   : > { %v1659_v12 = vpop.permute.xlu0 %1658  ;;  %v1844_v51 = vand.u32 4294901760, %v1752_v55  ;;  %v1684_v56 = vpop.permute.xlu2 %1683 }
 0x30d   : > { %1670 = vst.msk [vmem:[#allocation3 + $0x18] sm:$0xff] %vm1668_vm10, %v1659_v12 }
 0x30e   : > { %1691 = vst.msk [vmem:[#allocation3 + $0x18] sm:$0xff] %vm1689_vm1, %v1680_v39  ;;  %1974 = vmatmul.f32.vlgmr.msrb.gmra.mxu3 %v1844_v51  ;;  %2181 = vmatmul.f32.vlgmr.msra.gmra.mxu0 %v1844_v51  ;;  %v5214_v14 = vsub.f32 %v1752_v55, %v1844_v51  ;;  %v5249_v39 = vsub.f32 %v1781_v15, %v5221_v27 }
 0x30f   : > { %2230 = vmatmul.f32.vlgmr.msra.gmra.mxu1 %v1844_v51  ;;  %2316 = vmatpush.msrb.mxu3 %v2315_v28  ;;  %v2332_v55 = vsub.f32 %v5099_v2, %v5272_v63  ;;  %v5296_v51 = vand.u32 4294901760, %v5126_v22  ;;  %v2338_v2 = vsub.f32 %v5104_v48, %v5279_v23 }
 0x310   : > { %v1640_v11 = vpop.permute.xlu1 %1639  ;;  %v1846_v49 = vand.u32 4294901760, %v5214_v14  ;;  %2468 = vmatpush.msrb.mxu0 %v5249_v39  ;;  %2632 = vmatpush.msra.mxu1 %v5055_v37 }
 0x311   : > { %1650 = vst.msk [vmem:[#allocation3 + $0x30] sm:$0xff] %vm1647_vm15, %v1640_v11  ;;  %2322 = vmatpush.msrb.mxu3 %v2321_v35  ;;  %v5307_v11 = vand.u32 4294901760, %v5129_v18 }
 0x312   : > { %v1847_v46 = vsub.f32 %v5214_v14, %v1846_v49  ;;  %2471 = vmatpush.msrb.mxu0 %v5265_v61  ;;  %2634 = vmatpush.msra.mxu1 %v5072_v0 }
 0x313   : > { %v2350_v28 = vsub.f32 %v5129_v18, %v5307_v11 }
 0x314   : > { %v1661_v42 = vpop.permute.xlu0 %1660  ;;  %v1848_v36 = vand.u32 4294901760, %v1847_v46  ;;  %2553 = vmatpush.msra.mxu0 %v5224_v33  ;;  %v1733_v26 = vpop.permute.xlu2 %1732  ;;  %2636 = vmatpush.msra.mxu1 %v5075_v1 }
 0x315   : > { %1671 = vst.msk [vmem:[#allocation3 + $0x30] sm:$0xff] %vm1668_vm10, %v1661_v42  ;;  %v1755_v44 = vld [vmem:[#allocation3 + $0x18] sm:$0xff]  ;;  %v2333_v42 = vand.u32 4294901760, %v2332_v55 }
 0x316   : > { %1692 = vst.msk [vmem:[#allocation3 + $0x30] sm:$0xff] %vm1689_vm1, %v1682_v32  ;;  %v1852_v57 = vand.u32 4294901760, %v1755_v44  ;;  %1849 = vmatmul.f32.vlgmr.msrb.gmra.mxu2 %v1848_v36  ;;  %v2326_v32 = vsub.f32 %v5086_v31, %v5261_v50  ;;  %2557 = vmatpush.msra.mxu0 %v5238_v16  ;;  %v2339_v36 = vand.u32 4294901760, %v2338_v2 }
 0x317   : > { %2247 = vmatpush.msrb.mxu2 %v5055_v37  ;;  %2638 = vmatpush.msra.mxu1 %v5088_v43 }
 0x318   : > { %1978 = vmatmul.f32.gmra.mxu3 %v1852_v57  ;;  %2185 = vmatmul.f32.gmra.mxu0 %v1852_v57  ;;  %v5274_v21 = vsub.f32 %v1755_v44, %v1852_v57  ;;  %v1642_v34 = vpop.permute.xlu1 %1641  ;;  %v2327_v15 = vand.u32 4294901760, %v2326_v32  ;;  %v2344_v44 = vsub.f32 %v5126_v22, %v5296_v51 }
 0x319   : > { %2234 = vmatmul.f32.gmra.mxu1 %v1852_v57  ;;  %1651 = vst.msk [vmem:[#allocation3 + $0x48] sm:$0xff] %vm1647_vm15, %v1642_v34  ;;  %2561 = vmatpush.msra.mxu0 %v5261_v50  ;;  %v5328_v34 = vand.u32 4294901760, %v5155_v58 }
 0x31a   : > { %v1854_v60 = vand.u32 4294901760, %v5274_v21  ;;  %2249 = vmatpush.msrb.mxu2 %v5072_v0  ;;  %2328 = vmatpush.msrb.mxu3 %v2327_v15 }
 0x31b   : > { %2565 = vmatpush.msra.mxu0 %v5272_v63  ;;  %2640 = vmatpush.msra.mxu1 %v5095_v54 }
 0x31c   : > { %v1663_v13 = vpop.permute.xlu0 %1662  ;;  %v1855_v12 = vsub.f32 %v5274_v21, %v1854_v60  ;;  %2251 = vmatpush.msrb.mxu2 %v5075_v1  ;;  %2334 = vmatpush.msrb.mxu3 %v2333_v42  ;;  %v5353_v42 = vand.u32 4294901760, %v5202_v6 }
 0x31d   : > { %1672 = vst.msk [vmem:[#allocation3 + $0x48] sm:$0xff] %vm1668_vm10, %v1663_v13  ;;  %v1758_v31 = vld [vmem:[#allocation3 + $0x30] sm:$0xff]  ;;  %2569 = vmatpush.msra.mxu0 %v5279_v23  ;;  %v2345_v13 = vand.u32 4294901760, %v2344_v44  ;;  %2642 = vmatpush.msra.mxu1 %v5117_v20  ;;  %v5364_v44 = vand.u32 4294901760, %v5217_v5 }
 0x31e   : > { %1693 = vst.msk [vmem:[#allocation3 + $0x48] sm:$0xff] %vm1689_vm1, %v1684_v56  ;;  %v1856_v9 = vand.u32 4294901760, %v1855_v12  ;;  %v1860_v19 = vand.u32 4294901760, %v1758_v31  ;;  %v5312_v56 = vand.u32 4294901760, %v5149_v40  ;;  %2253 = vmatpush.msrb.mxu2 %v5088_v43  ;;  %2340 = vmatpush.msrb.mxu3 %v2339_v36  ;;  %v5338_v12 = vand.u32 4294901760, %v5176_v52 }
 0x31f   : > { %2573 = vmatpush.msra.mxu0 %v5296_v51  ;;  %2644 = vmatpush.msra.mxu1 %v5119_v53 }
 0x320   : > { %1857 = vmatmul.f32.gmra.mxu2 %v1856_v9  ;;  %1982 = vmatmul.f32.gmra.mxu3 %v1860_v19  ;;  %v5309_v46 = vsub.f32 %v1758_v31, %v1860_v19  ;;  %v1700_v8 = vpop.permute.xlu1 %1699  ;;  %v2356_v18 = vsub.f32 %v5149_v40, %v5312_v56  ;;  %v2351_v31 = vand.u32 4294901760, %v2350_v28  ;;  %v1735_v9 = vpop.permute.xlu2 %1734  ;;  %v2362_v40 = vsub.f32 %v5155_v58, %v5328_v34 }
 0x321   : > { %2189 = vmatmul.f32.gmra.mxu0 %v1860_v19  ;;  %2238 = vmatmul.f32.gmra.mxu1 %v1860_v19  ;;  %1711 = vst.msk [vmem:[#allocation3 + $0x8] sm:$0xff] %vm1647_vm15, %v1700_v8  ;;  %v5345_v19 = vand.u32 4294901760, %v5179_v47  ;;  %v2368_v8 = vsub.f32 %v5176_v52, %v5338_v12 }
 0x322   : > { %v1862_v48 = vand.u32 4294901760, %v5309_v46  ;;  %2255 = vmatpush.msrb.mxu2 %v5095_v54  ;;  %2346 = vmatpush.msrb.mxu3 %v2345_v13  ;;  %v2380_v13 = vsub.f32 %v5202_v6, %v5353_v42 }
 0x323   : > { %2577 = vmatpush.msra.mxu0 %v5307_v11  ;;  %v2374_v52 = vsub.f32 %v5179_v47, %v5345_v19  ;;  %2646 = vmatpush.msra.mxu1 %v5137_v59 }
 0x324   : > { %v1717_v57 = vpop.permute.xlu0 %1716  ;;  %v1863_v7 = vsub.f32 %v5309_v46, %v1862_v48  ;;  %2257 = vmatpush.msrb.mxu2 %v5117_v20  ;;  %2352 = vmatpush.msrb.mxu3 %v2351_v31 }
 0x325   : > { %1728 = vst.msk [vmem:[#allocation3 + $0x8] sm:$0xff] %vm1668_vm10, %v1717_v57  ;;  %v1761_v22 = vld [vmem:[#allocation3 + $0x48] sm:$0xff]  ;;  %2581 = vmatpush.msra.mxu0 %v5312_v56  ;;  %2648 = vmatpush.msra.mxu1 %v5143_v3 }
 0x326   : > { %1744 = vst.msk [vmem:[#allocation3 + $0x8] sm:$0xff] %vm1689_vm1, %v1733_v26  ;;  %v1864_v35 = vand.u32 4294901760, %v1863_v7  ;;  %v1868_v32 = vand.u32 4294901760, %v1761_v22  ;;  %v2357_v26 = vand.u32 4294901760, %v2356_v18  ;;  %v2363_v7 = vand.u32 4294901760, %v2362_v40  ;;  %2259 = vmatpush.msrb.mxu2 %v5119_v53 }
 0x327   : > { %2585 = vmatpush.msra.mxu0 %v5328_v34  ;;  %v5388_v18 = vand.u32 4294901760, %v5249_v39  ;;  %2650 = vmatpush.msra.mxu1 %v5167_v30 }
 0x328   : > { %1865 = vmatmul.f32.gmra.mxu2 %v1864_v35  ;;  %1986 = vmatmul.f32.gmra.mxu3 %v1868_v32  ;;  %v5342_v55 = vsub.f32 %v1761_v22, %v1868_v32  ;;  %v1702_v15 = vpop.permute.xlu1 %1701  ;;  %v5376_v35 = vand.u32 4294901760, %v5233_v4  ;;  %v1737_v40 = vpop.permute.xlu2 %1736 }
 0x329   : > { %2193 = vmatmul.f32.gmra.mxu0 %v1868_v32  ;;  %2242 = vmatmul.f32.gmra.mxu1 %v1868_v32  ;;  %1712 = vst.msk [vmem:[#allocation3 + $0x20] sm:$0xff] %vm1647_vm15, %v1702_v15  ;;  %v2369_v32 = vand.u32 4294901760, %v2368_v8  ;;  %v2386_v15 = vsub.f32 %v5217_v5, %v5364_v44  ;;  %v2381_v8 = vand.u32 4294901760, %v2380_v13  ;;  %v1797_v13 = vld [vmem:[%s5798_s3 + $0x108] sm:$0xff] }
 0x32a   : > { %v1870_v2 = vand.u32 4294901760, %v5342_v55  ;;  %2358 = vmatpush.msrb.mxu3 %v2357_v26  ;;  %2261 = vmatpush.msrb.mxu2 %v5137_v59  ;;  %v5401_v26 = vand.u32 4294901760, %v5265_v61  ;;  %v2392_v5 = vsub.f32 %v5233_v4, %v5376_v35  ;;  %v2398_v4 = vsub.f32 %v5249_v39, %v5388_v18 }
 0x32b   : > { %2589 = vmatpush.msra.mxu0 %v5338_v12  ;;  %2652 = vmatpush.msra.mxu1 %v5169_v10 }
 0x32c   : > { %v1719_v36 = vpop.permute.xlu0 %1718  ;;  %v1871_v58 = vsub.f32 %v5342_v55, %v1870_v2  ;;  %2364 = vmatpush.msrb.mxu3 %v2363_v7  ;;  %2263 = vmatpush.msrb.mxu2 %v5143_v3  ;;  %v2404_v39 = vsub.f32 %v5265_v61, %v5401_v26  ;;  %v2399_v61 = vand.u32 4294901760, %v2398_v4 }
 0x32d   : > { %1729 = vst.msk [vmem:[#allocation3 + $0x20] sm:$0xff] %vm1668_vm10, %v1719_v36  ;;  %v1753_v57 = vld [vmem:[#allocation3 + $0x8] sm:$0xff]  ;;  %2593 = vmatpush.msra.mxu0 %v5345_v19  ;;  %2654 = vmatpush.msra.mxu1 %v5188_v17 }
 0x32e   : > { %1745 = vst.msk [vmem:[#allocation3 + $0x20] sm:$0xff] %vm1689_vm1, %v1735_v9  ;;  %v1872_v28 = vand.u32 4294901760, %v1871_v58  ;;  %v5372_v22 = vand.u32 4294901760, %v1753_v57  ;;  %v2375_v9 = vand.u32 4294901760, %v2374_v52  ;;  %2370 = vmatpush.msrb.mxu3 %v2369_v32  ;;  %v2387_v52 = vand.u32 4294901760, %v2386_v15  ;;  %2265 = vmatpush.msrb.mxu2 %v5167_v30 }
 0x32f   : > { %2597 = vmatpush.msra.mxu0 %v5353_v42  ;;  %2656 = vmatpush.msra.mxu1 %v5194_v24 }
 0x330   : > { %1873 = vmatmul.f32.gmra.mxu2 %v1872_v28  ;;  %2094 = vmatmul.f32.vlgmr.msra.gmra.mxu3 %v1846_v49  ;;  %v5385_v47 = vsub.f32 %v1753_v57, %v5372_v22  ;;  %v1704_v31 = vpop.permute.xlu1 %1703  ;;  %v1799_v49 = vld [vmem:[%s5798_s3 + $0x118] sm:$0xff]  ;;  %v1798_v57 = vld [vmem:[%s5798_s3 + $0x110] sm:$0xff]  ;;  %v1739_v4 = vpop.permute.xlu2 %1738 }
 0x331   : > { %1713 = vst.msk [vmem:[#allocation3 + $0x38] sm:$0xff] %vm1647_vm15, %v1704_v31  ;;  %v5406_v36 = vand.u32 4294901760, %v1799_v49  ;;  %2376 = vmatpush.msrb.mxu3 %v2375_v9  ;;  %v5423_v32 = vand.u32 4294901760, %v1798_v57  ;;  %v2393_v31 = vand.u32 4294901760, %v2392_v5  ;;  %2601 = vmatpush.msra.mxu0 %v5364_v44  ;;  %v5444_v5 = vand.u32 4294901760, %v1797_v13 }
 0x332   : > { %2474 = vmatmul.f32.vlgmr.msrb.gmra.mxu0 %v5385_v47  ;;  %v2280_v6 = vand.u32 4294901760, %v5385_v47  ;;  %2267 = vmatpush.msrb.mxu2 %v5169_v10 }
 0x333   : > { %2382 = vmatpush.msrb.mxu3 %v2381_v8  ;;  %v5432_v9 = vsub.f32 %v1799_v49, %v5406_v36  ;;  %v2405_v49 = vand.u32 4294901760, %v2404_v39  ;;  %2605 = vmatpush.msra.mxu0 %v5376_v35 }
 0x334   : > { %v1721_v58 = vpop.permute.xlu0 %1720  ;;  %2528 = vmatmul.f32.vlgmr.msrb.gmra.mxu1 %v2280_v6  ;;  %2269 = vmatpush.msrb.mxu2 %v5188_v17 }
 0x335   : > { %1730 = vst.msk [vmem:[#allocation3 + $0x38] sm:$0xff] %vm1668_vm10, %v1721_v58  ;;  %v1756_v7 = vld [vmem:[#allocation3 + $0x20] sm:$0xff]  ;;  %2388 = vmatpush.msrb.mxu3 %v2387_v52  ;;  %v5804_v58 = vand.u32 4294901760, %v5432_v9  ;;  %2609 = vmatpush.msra.mxu0 %v5388_v18 }
 0x336   : > { %1746 = vst.msk [vmem:[#allocation3 + $0x38] sm:$0xff] %vm1689_vm1, %v1737_v40  ;;  %v5419_v28 = vand.u32 4294901760, %v1756_v7  ;;  %v1796_v40 = vld [vmem:[%s5798_s3 + $0x100] sm:$0xff]  ;;  %2658 = vmatpush.msra.mxu1 %v5219_v25  ;;  %2271 = vmatpush.msrb.mxu2 %v5194_v24 }
 0x337   : > { %2394 = vmatpush.msrb.mxu3 %v2393_v31  ;;  %2613 = vmatpush.msra.mxu0 %v5401_v26 }
 0x338   : > { %2040 = vmatmul.f32.vlgmr.msra.gmra.mxu2 %v5214_v14  ;;  %2100 = vmatmul.f32.gmra.mxu3 %v1854_v60  ;;  %v5438_v15 = vsub.f32 %v1756_v7, %v5419_v28  ;;  %v1706_v8 = vpop.permute.xlu1 %1705  ;;  %v5451_v60 = vsub.f32 %v1798_v57, %v5423_v32  ;;  %v5455_v7 = vand.u32 4294901760, %v1796_v40  ;;  %v5463_v57 = vsub.f32 %v1797_v13, %v5444_v5 }
 0x339   : > { %1714 = vst.msk [vmem:[#allocation3 + $0x50] sm:$0xff] %vm1647_vm15, %v1706_v8  ;;  %2400 = vmatpush.msrb.mxu3 %v2399_v61  ;;  %v2748_v61 = vsub.f32 %v5432_v9, %v5804_v58  ;;  %2660 = vmatpush.msra.mxu1 %v5221_v27 }
 0x33a   : > { %2479 = vmatmul.f32.gmra.mxu0 %v5438_v15  ;;  %v5802_v14 = vand.u32 4294901760, %v5438_v15  ;;  %v5803_v39 = vand.u32 4294901760, %v5451_v60  ;;  %v5476_v13 = vsub.f32 %v1796_v40, %v5455_v7  ;;  %2273 = vmatpush.msrb.mxu2 %v5219_v25 }
 0x33b   : > { %2406 = vmatpush.msrb.mxu3 %v2405_v49  ;;  %v2759_v49 = vand.u32 4294901760, %v5463_v57  ;;  %v2749_v40 = vand.u32 4294901760, %v2748_v61  ;;  %2662 = vmatpush.msra.mxu1 %v5241_v45 }
 0x33c   : > { %2534 = vmatmul.f32.gmra.mxu1 %v5802_v14  ;;  %v1723_v52 = vpop.permute.xlu0 %1722  ;;  %2693 = vmatpush.msrb.mxu0 %v5406_v36 }
 0x33d   : > { %1731 = vst.msk [vmem:[#allocation3 + $0x50] sm:$0xff] %vm1668_vm10, %v1723_v52  ;;  %v1759_v8 = vld [vmem:[#allocation3 + $0x38] sm:$0xff]  ;;  %3476 = vmatpush.msra.mxu3 %v5055_v37  ;;  %v2760_v37 = vsub.f32 %v5463_v57, %v2759_v49  ;;  %2275 = vmatpush.msrb.mxu2 %v5221_v27 }
 0x33e   : > { %1747 = vst.msk [vmem:[#allocation3 + $0x50] sm:$0xff] %vm1689_vm1, %v1739_v4  ;;  %v5466_v31 = vand.u32 4294901760, %v1759_v8  ;;  %2695 = vmatpush.msrb.mxu0 %v5423_v32  ;;  %2750 = vmatpush.msrb.mxu1 %v2749_v40  ;;  %v1757_v40 = vld [vmem:[#allocation3 + $0x28] sm:$0xff] }
 0x33f   : > { %3477 = vmatpush.msra.mxu3 %v5072_v0  ;;  %2277 = vmatpush.msrb.mxu2 %v5241_v45 }
 0x340   : > { %2045 = vmatmul.f32.gmra.mxu2 %v5274_v21  ;;  %2106 = vmatmul.f32.gmra.mxu3 %v1862_v48  ;;  %v5482_v52 = vsub.f32 %v1759_v8, %v5466_v31  ;;  %v2754_v21 = vsub.f32 %v5451_v60, %v5803_v39  ;;  %v1754_v48 = vld [vmem:[#allocation3 + $0x10] sm:$0xff]  ;;  %v2765_v8 = vand.u32 4294901760, %v5476_v13 }
 0x341   : > { %v1801_v39 = vsel %vm1630_vm5, %v1754_v48, 0  ;;  %3478 = vmatpush.msra.mxu3 %v5075_v1  ;;  %v2761_v1 = vand.u32 4294901760, %v2760_v37  ;;  %2697 = vmatpush.msrb.mxu0 %v5444_v5 }
 0x342   : > { %2484 = vmatmul.f32.gmra.mxu0 %v5482_v52  ;;  %v5805_v4 = vand.u32 4294901760, %v5482_v52  ;;  %v2755_v61 = vand.u32 4294901760, %v2754_v21  ;;  %v2766_v0 = vsub.f32 %v5476_v13, %v2765_v8  ;;  %3460 = vmatpush.msra.mxu2 %v5224_v33 }
 0x343   : > { %3479 = vmatpush.msra.mxu3 %v5088_v43  ;;  %2699 = vmatpush.msrb.mxu0 %v5455_v7  ;;  %v1804_v43 = vsel %vm1630_vm5, %v1757_v40, 0 }
 0x344   : > { %2540 = vmatmul.f32.gmra.mxu1 %v5805_v4  ;;  %v5519_v4 = vand.u32 4294901760, %v1801_v39  ;;  %3461 = vmatpush.msra.mxu2 %v5238_v16  ;;  %v2281_v16 = vsub.f32 %v5385_v47, %v2280_v6 }
 0x345   : > { %v1762_v14 = vld [vmem:[#allocation3 + $0x50] sm:$0xff]  ;;  %2756 = vmatpush.msrb.mxu1 %v2755_v61  ;;  %3480 = vmatpush.msra.mxu3 %v5095_v54  ;;  %v5540_v54 = vand.u32 4294901760, %v1804_v43 }
 0x346   : > { %v5505_v58 = vand.u32 4294901760, %v1762_v14  ;;  %3462 = vmatpush.msra.mxu2 %v5261_v50  ;;  %v2282_v47 = vand.u32 4294901760, %v2281_v16 }
 0x347   : > { %2762 = vmatpush.msrb.mxu1 %v2761_v1  ;;  %3481 = vmatpush.msra.mxu3 %v5117_v20  ;;  %v1760_v20 = vld [vmem:[#allocation3 + $0x40] sm:$0xff]  ;;  %v5555_v50 = vsub.f32 %v1804_v43, %v5540_v54 }
 0x348   : > { %2050 = vmatmul.f32.gmra.mxu2 %v5309_v46  ;;  %2112 = vmatmul.f32.gmra.mxu3 %v1870_v2  ;;  %v5517_v48 = vsub.f32 %v1762_v14, %v5505_v58  ;;  %v2767_v46 = vand.u32 4294901760, %v2766_v0  ;;  %v5531_v2 = vsub.f32 %v1801_v39, %v5519_v4 }
 0x349   : > { %3482 = vmatpush.msra.mxu3 %v5119_v53  ;;  %3463 = vmatpush.msra.mxu2 %v5272_v63  ;;  %v5826_v53 = vand.u32 4294901760, %v5432_v9  ;;  %v1807_v63 = vsel %vm1630_vm5, %v1760_v20, 0 }
 0x34a   : > { %2489 = vmatmul.f32.gmra.mxu0 %v5517_v48  ;;  %v2304_v21 = vand.u32 4294901760, %v5517_v48  ;;  %2768 = vmatpush.msrb.mxu1 %v2767_v46  ;;  %v2702_v33 = vand.u32 4294901760, %v5531_v2  ;;  %v5569_v6 = vand.u32 4294901760, %v1807_v63 }
 0x34b   : > { %3483 = vmatpush.msra.mxu3 %v5137_v59  ;;  %3464 = vmatpush.msra.mxu2 %v5279_v23  ;;  %v5827_v59 = vand.u32 4294901760, %v5451_v60  ;;  %v2710_v23 = vand.u32 4294901760, %v5555_v50 }
 0x34c   : > { %2546 = vmatmul.f32.gmra.mxu1 %v2304_v21 }
 0x34d   : > { %3484 = vmatpush.msra.mxu3 %v5143_v3  ;;  %3465 = vmatpush.msra.mxu2 %v5296_v51  ;;  %v5828_v3 = vand.u32 4294901760, %v5438_v15  ;;  %v1763_v51 = vld [vmem:[#allocation3 + $0x58] sm:$0xff] }
 0x34f   : > { %3485 = vmatpush.msra.mxu3 %v5167_v30  ;;  %3466 = vmatpush.msra.mxu2 %v5307_v11  ;;  %v2289_v14 = vsub.f32 %v5438_v15, %v5828_v3  ;;  %v2711_v30 = vsub.f32 %v5555_v50, %v2710_v23  ;;  %v1810_v11 = vsel %vm1630_vm5, %v1763_v51, 0 }
 0x350   : > { %2055 = vmatmul.f32.gmra.mxu2 %v5342_v55  ;;  %2408 = vmatmul.f32.vlgmr.msrb.gmra.mxu3 %v5372_v22  ;;  %v2703_v55 = vsub.f32 %v5531_v2, %v2702_v33  ;;  %v5598_v15 = vand.u32 4294901760, %v1810_v11 }
 0x351   : > { %3486 = vmatpush.msra.mxu3 %v5169_v10  ;;  %3467 = vmatpush.msra.mxu2 %v5312_v56  ;;  %v5584_v10 = vsub.f32 %v1807_v63, %v5569_v6  ;;  %v2290_v56 = vand.u32 4294901760, %v2289_v14 }
 0x352   : > { %2615 = vmatmul.f32.vlgmr.msra.gmra.mxu0 %v5372_v22 }
 0x353   : > { %2891 = vmatpush.msra.mxu0 %v5826_v53  ;;  %3487 = vmatpush.msra.mxu3 %v5188_v17  ;;  %v2712_v17 = vand.u32 4294901760, %v2711_v30 }
 0x354   : > { %2664 = vmatmul.f32.vlgmr.msra.gmra.mxu1 %v5372_v22  ;;  %v2704_v22 = vand.u32 4294901760, %v2703_v55  ;;  %3468 = vmatpush.msra.mxu2 %v5328_v34  ;;  %v2718_v34 = vand.u32 4294901760, %v5584_v10 }
 0x355   : > { %2895 = vmatpush.msra.mxu0 %v5827_v59  ;;  %2934 = vmatpush.msra.mxu1 %v5406_v36 }
 0x356   : > { %3488 = vmatpush.msra.mxu3 %v5194_v24  ;;  %3469 = vmatpush.msra.mxu2 %v5338_v12  ;;  %v5829_v24 = vand.u32 4294901760, %v5482_v52  ;;  %v5613_v12 = vsub.f32 %v1810_v11, %v5598_v15 }
 0x357   : > { %2936 = vmatpush.msra.mxu1 %v5423_v32  ;;  %2899 = vmatpush.msra.mxu0 %v2759_v49 }
 0x358   : > { %2283 = vmatmul.f32.vlgmr.msrb.gmra.mxu2 %v2282_v47  ;;  %2412 = vmatmul.f32.gmra.mxu3 %v5419_v28  ;;  %v2297_v39 = vsub.f32 %v5482_v52, %v5829_v24 }
 0x359   : > { %2903 = vmatpush.msra.mxu0 %v2765_v8  ;;  %2938 = vmatpush.msra.mxu1 %v5444_v5 }
 0x35a   : > { %2705 = vmatmul.f32.vlgmr.msrb.gmra.mxu0 %v2704_v22  ;;  %3489 = vmatpush.msra.mxu3 %v5219_v25  ;;  %v2719_v25 = vsub.f32 %v5584_v10, %v2718_v34 }
 0x35b   : > { %3470 = vmatpush.msra.mxu2 %v5345_v19  ;;  %2940 = vmatpush.msra.mxu1 %v5455_v7  ;;  %v2726_v19 = vand.u32 4294901760, %v5613_v12 }
 0x35c   : > { %2770 = vmatmul.f32.vlgmr.msrb.gmra.mxu1 %v5519_v4  ;;  %3490 = vmatpush.msra.mxu3 %v5221_v27  ;;  %v2298_v27 = vand.u32 4294901760, %v2297_v39 }
 0x35d   : > { %3471 = vmatpush.msra.mxu2 %v5353_v42  ;;  %v2305_v42 = vsub.f32 %v5517_v48, %v2304_v21 }
 0x35e   : > { %3491 = vmatpush.msra.mxu3 %v5241_v45  ;;  %v2720_v45 = vand.u32 4294901760, %v2719_v25 }
 0x35f   : > { %3472 = vmatpush.msra.mxu2 %v5364_v44  ;;  %v2727_v44 = vsub.f32 %v5613_v12, %v2726_v19 }
 0x360   : > { %2291 = vmatmul.f32.gmra.mxu2 %v2290_v56  ;;  %2416 = vmatmul.f32.gmra.mxu3 %v5466_v31 }
 0x361   : > { %2844 = vmatpush.msrb.mxu3 %v5406_v36  ;;  %3473 = vmatpush.msra.mxu2 %v5376_v35  ;;  %v2306_v35 = vand.u32 4294901760, %v2305_v42 }
 0x362   : > { %2713 = vmatmul.f32.gmra.mxu0 %v2712_v17 }
 0x363   : > { %2846 = vmatpush.msrb.mxu3 %v5423_v32  ;;  %3474 = vmatpush.msra.mxu2 %v5388_v18  ;;  %v2728_v18 = vand.u32 4294901760, %v2727_v44 }
 0x364   : > { %2774 = vmatmul.f32.gmra.mxu1 %v5540_v54 }
 0x365   : > { %2848 = vmatpush.msrb.mxu3 %v5444_v5  ;;  %3475 = vmatpush.msra.mxu2 %v5401_v26  ;;  %v2958_v26 = vld [vmem:[%s5799_s4] sm:$0xff] }
 0x366   : > { %v2986_v36 = vand.u32 4294901760, %v2958_v26 }
 0x367   : > { %2850 = vmatpush.msrb.mxu3 %v5455_v7  ;;  %2800 = vmatpush.msrb.mxu2 %v5432_v9 }
 0x368   : > { %2299 = vmatmul.f32.gmra.mxu2 %v2298_v27  ;;  %2420 = vmatmul.f32.gmra.mxu3 %v5505_v58  ;;  %v3037_v32 = vsub.f32 %v2958_v26, %v2986_v36 }
 0x369   : > { %2803 = vmatpush.msrb.mxu2 %v5451_v60  ;;  %3114 = vmatpush.msrb.mxu1 %v2986_v36 }
 0x36a   : > { %2721 = vmatmul.f32.gmra.mxu0 %v2720_v45  ;;  %v3038_v9 = vand.u32 4294901760, %v3037_v32 }
 0x36b   : > { %2806 = vmatpush.msrb.mxu2 %v5463_v57  ;;  %3076 = vmatpush.msrb.mxu0 %v3037_v32 }
 0x36c   : > { %2778 = vmatmul.f32.gmra.mxu1 %v5569_v6  ;;  %v3039_v5 = vsub.f32 %v3037_v32, %v3038_v9 }
 0x36d   : > { %2809 = vmatpush.msrb.mxu2 %v5476_v13 }
 0x36e   : > { %v3040_v60 = vand.u32 4294901760, %v3039_v5 }
 0x370   : > { %2307 = vmatmul.f32.gmra.mxu2 %v2306_v35  ;;  %2668 = vmatmul.f32.vlgmr.msra.gmra.mxu3 %v5419_v28 }
 0x371   : > { %3041 = vmatpush.msra.mxu3 %v3040_v60 }
 0x372   : > { %2729 = vmatmul.f32.gmra.mxu0 %v2728_v18 }
 0x374   : > { %2782 = vmatmul.f32.gmra.mxu1 %v5598_v15 }
 0x378   : > { %2619 = vmatmul.f32.vlgmr.msra.gmra.mxu2 %v5419_v28  ;;  %2672 = vmatmul.f32.gmra.mxu3 %v5466_v31  ;;  %v2960_v28 = vsel %vm270_vm0, %v4054_v38, 0 }
 0x379   : > { %2987 = vmatpush.msra.mxu2 %v2986_v36  ;;  %v5660_v7 = vand.u32 4294901760, %v2960_v28 }
 0x37a   : > { %2905 = vmatmul.f32.vlgmr.msra.gmra.mxu0 %v5519_v4 }
 0x37b   : > { %v2989_v57 = vsub.f32 %v2960_v28, %v5660_v7 }
 0x37c   : > { %2942 = vmatmul.f32.vlgmr.msra.gmra.mxu1 %v5519_v4 }
 0x37d   : > { %v2990_v52 = vand.u32 4294901760, %v2989_v57 }
 0x380   : > { %2623 = vmatmul.f32.gmra.mxu2 %v5466_v31  ;;  %2676 = vmatmul.f32.gmra.mxu3 %v5505_v58  ;;  %v2963_v31 = vsel %vm270_vm0, %v4086_v62, 0  ;;  %v2966_v62 = vsel %vm270_vm0, %v4121_v29, 0  ;;  %v2969_v29 = vsel %vm270_vm0, %v4138_v41, 0  ;;  %vm3235_vm0 = vcmask 1041409  }
 0x381   : > { %v5669_v49 = vand.u32 4294901760, %v2963_v31  ;;  %v5677_v48 = vand.u32 4294901760, %v2966_v62  ;;  %v5684_v16 = vand.u32 4294901760, %v2969_v29 }
 0x382   : > { %2909 = vmatmul.f32.gmra.mxu0 %v5540_v54 }
 0x383   : > { %v2997_v61 = vsub.f32 %v2963_v31, %v5669_v49  ;;  %v3005_v43 = vsub.f32 %v2966_v62, %v5677_v48  ;;  %v3013_v47 = vsub.f32 %v2969_v29, %v5684_v16 }
 0x384   : > { %2946 = vmatmul.f32.gmra.mxu1 %v5540_v54  ;;  %v2991_v54 = vsub.f32 %v2989_v57, %v2990_v52 }
 0x385   : > { %v2998_v0 = vand.u32 4294901760, %v2997_v61  ;;  %v3014_v41 = vand.u32 4294901760, %v3013_v47 }
 0x386   : > { %v2992_v63 = vand.u32 4294901760, %v2991_v54 }
 0x387   : > { %v2999_v22 = vsub.f32 %v2997_v61, %v2998_v0 }
 0x388   : > { %2627 = vmatmul.f32.gmra.mxu2 %v5505_v58  ;;  %2854 = vmatmul.f32.vlgmr.msrb.gmra.mxu3 %v2702_v33  ;;  %v3006_v33 = vand.u32 4294901760, %v3005_v43 }
 0x389   : > { %3192 = vmatpush.msrb.mxu3 %v2986_v36  ;;  %v3000_v14 = vand.u32 4294901760, %v2999_v22 }
 0x38a   : > { %2913 = vmatmul.f32.gmra.mxu0 %v5569_v6 }
 0x38b   : > { %v2182_v38 = vpop.f32.mrf.mxu0 }
 0x38c   : > { %2950 = vmatmul.f32.gmra.mxu1 %v5569_v6  ;;  %v2231_v37 = vpop.f32.mrf.mxu1 }
 0x390   : > { %2812 = vmatmul.f32.vlgmr.msrb.gmra.mxu2 %v5531_v2  ;;  %2860 = vmatmul.f32.gmra.mxu3 %v2710_v23 }
 0x391   : > { %3158 = vmatpush.msrb.mxu2 %v3038_v9  ;;  %v1975_v58 = vpop.f32.mrf.mxu3 }
 0x392   : > { %2917 = vmatmul.f32.gmra.mxu0 %v5598_v15 }
 0x394   : > { %2954 = vmatmul.f32.gmra.mxu1 %v5598_v15 }
 0x395   : > { %v2186_v40 = vpop.f32.mrf.mxu0 }
 0x396   : > { %v2235_v2 = vpop.f32.mrf.mxu1 }
 0x398   : > { %2817 = vmatmul.f32.gmra.mxu2 %v5555_v50  ;;  %2866 = vmatmul.f32.gmra.mxu3 %v2718_v34 }
 0x399   : > { %v1850_v13 = vpop.f32.mrf.mxu2 }
 0x39a   : > { %3079 = vmatmul.f32.vlgmr.msrb.gmra.mxu0 %v2989_v57  ;;  %v1976_v4 = vadd.f32 %v1975_v58, %v1850_v13 }
 0x39b   : > { %v1979_v8 = vpop.f32.mrf.mxu3 }
 0x39c   : > { %3118 = vmatmul.f32.vlgmr.msrb.gmra.mxu1 %v2990_v52 }
 0x39e   : > { %v2190_v53 = vpop.f32.mrf.mxu0  ;;  %v2239_v59 = vpop.f32.mrf.mxu1 }
 0x3a0   : > { %2822 = vmatmul.f32.gmra.mxu2 %v5584_v10  ;;  %2872 = vmatmul.f32.gmra.mxu3 %v2726_v19  ;;  %v3007_v10 = vsub.f32 %v3005_v43, %v3006_v33 }
 0x3a2   : > { %3084 = vmatmul.f32.gmra.mxu0 %v2997_v61  ;;  %v3008_v15 = vand.u32 4294901760, %v3007_v10 }
 0x3a3   : > { %v1858_v1 = vpop.f32.mrf.mxu2  ;;  %v1983_v21 = vpop.f32.mrf.mxu3 }
 0x3a4   : > { %v1980_v46 = vadd.f32 %v1979_v8, %v1858_v1  ;;  %3124 = vmatmul.f32.gmra.mxu1 %v2998_v0 }
 0x3a6   : > { %v2194_v51 = vpop.f32.mrf.mxu0  ;;  %v2243_v30 = vpop.f32.mrf.mxu1 }
 0x3a8   : > { %2827 = vmatmul.f32.gmra.mxu2 %v5613_v12  ;;  %3043 = vmatmul.f32.vlgmr.msra.gmra.mxu3 %v5660_v7  ;;  %v3015_v12 = vsub.f32 %v3013_v47, %v3014_v41 }
 0x3aa   : > { %3089 = vmatmul.f32.gmra.mxu0 %v3005_v43  ;;  %v3016_v35 = vand.u32 4294901760, %v3015_v12 }
 0x3ab   : > { %v1866_v20 = vpop.f32.mrf.mxu2  ;;  %v1987_v55 = vpop.f32.mrf.mxu3 }
 0x3ac   : > { %v1984_v50 = vadd.f32 %v1983_v21, %v1866_v20  ;;  %3130 = vmatmul.f32.gmra.mxu1 %v3006_v33 }
 0x3af   : > { %v2475_v24 = vpop.f32.mrf.mxu0 }
 0x3b0   : > { %2993 = vmatmul.f32.vlgmr.msra.gmra.mxu2 %v2992_v63  ;;  %3047 = vmatmul.f32.gmra.mxu3 %v5669_v49 }
 0x3b1   : > { %v2529_v25 = vpop.f32.mrf.mxu1 }
 0x3b2   : > { %3094 = vmatmul.f32.gmra.mxu0 %v3013_v47 }
 0x3b3   : > { %v1874_v23 = vpop.f32.mrf.mxu2  ;;  %v2095_v6 = vpop.f32.mrf.mxu3 }
 0x3b4   : > { %v1988_v3 = vadd.f32 %v1987_v55, %v1874_v23  ;;  %3136 = vmatmul.f32.gmra.mxu1 %v3014_v41 }
 0x3b7   : > { %v2480_v26 = vpop.f32.mrf.mxu0 }
 0x3b8   : > { %3001 = vmatmul.f32.gmra.mxu2 %v3000_v14  ;;  %3051 = vmatmul.f32.gmra.mxu3 %v5677_v48 }
 0x3b9   : > { %v2535_v5 = vpop.f32.mrf.mxu1 }
 0x3bb   : > { %v2041_v11 = vpop.f32.mrf.mxu2  ;;  %v2101_v56 = vpop.f32.mrf.mxu3 }
 0x3bc   : > { %v2042_v17 = vadd.f32 %v2041_v11, %v1976_v4 }
 0x3be   : > { %v2096_v34 = vadd.f32 %v2095_v6, %v2042_v17 }
 0x3bf   : > { %v2485_v13 = vpop.f32.mrf.mxu0 }
 0x3c0   : > { %3009 = vmatmul.f32.gmra.mxu2 %v3008_v15  ;;  %3055 = vmatmul.f32.gmra.mxu3 %v5684_v16  ;;  %v2183_v39 = vadd.f32 %v2182_v38, %v2096_v34 }
 0x3c1   : > { %v2541_v4 = vpop.f32.mrf.mxu1 }
 0x3c2   : > { %v2232_v27 = vadd.f32 %v2231_v37, %v2183_v39 }
 0x3c3   : > { %v2046_v45 = vpop.f32.mrf.mxu2  ;;  %v2107_v19 = vpop.f32.mrf.mxu3 }
 0x3c4   : > { %v2047_v42 = vadd.f32 %v2046_v45, %v1980_v46 }
 0x3c6   : > { %v2102_v44 = vadd.f32 %v2101_v56, %v2047_v42 }
 0x3c8   : > { %3017 = vmatmul.f32.gmra.mxu2 %v3016_v35  ;;  %3194 = vmatmul.f32.vlgmr.msrb.gmra.mxu3 %v5660_v7  ;;  %v2187_v18 = vadd.f32 %v2186_v40, %v2102_v44 }
 0x3c9   : > { %v2547_v40 = vpop.f32.mrf.mxu1 }
 0x3ca   : > { %v2236_v36 = vadd.f32 %v2235_v2, %v2187_v18 }
 0x3cb   : > { %v2051_v32 = vpop.f32.mrf.mxu2  ;;  %v2113_v9 = vpop.f32.mrf.mxu3 }
 0x3cc   : > { %v2052_v60 = vadd.f32 %v2051_v32, %v1984_v50 }
 0x3ce   : > { %v2108_v28 = vadd.f32 %v2107_v19, %v2052_v60 }
 0x3d0   : > { %3160 = vmatmul.f32.vlgmr.msrb.gmra.mxu2 %v5660_v7  ;;  %3198 = vmatmul.f32.gmra.mxu3 %v5669_v49  ;;  %v2191_v58 = vadd.f32 %v2190_v53, %v2108_v28  ;;  %v2490_v7 = vpop.f32.mrf.mxu0 }
 0x3d1   : > { %v2665_v55 = vpop.f32.mrf.mxu1 }
 0x3d2   : > { %v2240_v57 = vadd.f32 %v2239_v59, %v2191_v58 }
 0x3d3   : > { %v2056_v31 = vpop.f32.mrf.mxu2  ;;  %v2409_v38 = vpop.f32.mrf.mxu3 }
 0x3d4   : > { %v2057_v52 = vadd.f32 %v2056_v31, %v1988_v3 }
 0x3d6   : > { %v2114_v8 = vadd.f32 %v2113_v9, %v2057_v52 }
 0x3d8   : > { %3164 = vmatmul.f32.gmra.mxu2 %v5669_v49  ;;  %3202 = vmatmul.f32.gmra.mxu3 %v5677_v48  ;;  %v2195_v37 = vadd.f32 %v2194_v51, %v2114_v8  ;;  %v2616_v54 = vpop.f32.mrf.mxu0 }
 0x3da   : > { %v2244_v61 = vadd.f32 %v2243_v30, %v2195_v37  ;;  %v2771_v30 = vpop.f32.mrf.mxu1 }
 0x3db   : > { %v2284_v62 = vpop.f32.mrf.mxu2  ;;  %v2413_v0 = vpop.f32.mrf.mxu3 }
 0x3dc   : > { %v2285_v1 = vadd.f32 %v2284_v62, %v2232_v27 }
 0x3de   : > { %v2410_v21 = vadd.f32 %v2409_v38, %v2285_v1 }
 0x3e0   : > { %v2476_v46 = vadd.f32 %v2475_v24, %v2410_v21  ;;  %3168 = vmatmul.f32.gmra.mxu2 %v5677_v48  ;;  %3206 = vmatmul.f32.gmra.mxu3 %v5684_v16  ;;  %v2706_v48 = vpop.f32.mrf.mxu0 }
 0x3e2   : > { %v2530_v2 = vadd.f32 %v2529_v25, %v2476_v46  ;;  %v2775_v12 = vpop.f32.mrf.mxu1 }
 0x3e3   : > { %v2292_v43 = vpop.f32.mrf.mxu2  ;;  %v2417_v29 = vpop.f32.mrf.mxu3 }
 0x3e4   : > { %v2293_v33 = vadd.f32 %v2292_v43, %v2236_v36  ;;  %v2617_v22 = vadd.f32 %v2616_v54, %v2530_v2 }
 0x3e6   : > { %v2414_v49 = vadd.f32 %v2413_v0, %v2293_v33  ;;  %v2666_v14 = vadd.f32 %v2665_v55, %v2617_v22 }
 0x3e8   : > { %3172 = vmatmul.f32.gmra.mxu2 %v5684_v16  ;;  %v2481_v20 = vadd.f32 %v2480_v26, %v2414_v49  ;;  %v2707_v10 = vadd.f32 %v2706_v48, %v2666_v14  ;;  %v2714_v39 = vpop.f32.mrf.mxu0 }
 0x3ea   : > { %v2536_v50 = vadd.f32 %v2535_v5, %v2481_v20  ;;  %v2772_v56 = vadd.f32 %v2771_v30, %v2707_v10  ;;  %v2779_v36 = vpop.f32.mrf.mxu1 }
 0x3eb   : > { %v2300_v53 = vpop.f32.mrf.mxu2  ;;  %v2421_v63 = vpop.f32.mrf.mxu3 }
 0x3ec   : > { %v2301_v47 = vadd.f32 %v2300_v53, %v2240_v57 }
 0x3ee   : > { %v2418_v59 = vadd.f32 %v2417_v29, %v2301_v47 }
 0x3f0   : > { %v2486_v41 = vadd.f32 %v2485_v13, %v2418_v59  ;;  %v2722_v18 = vpop.f32.mrf.mxu0 }
 0x3f2   : > { %v2542_v23 = vadd.f32 %v2541_v4, %v2486_v41  ;;  %v2783_v52 = vpop.f32.mrf.mxu1 }
 0x3f3   : > { %v2308_v6 = vpop.f32.mrf.mxu2  ;;  %v2669_v3 = vpop.f32.mrf.mxu3 }
 0x3f4   : > { %v2309_v51 = vadd.f32 %v2308_v6, %v2244_v61 }
 0x3f6   : > { %v2422_v11 = vadd.f32 %v2421_v63, %v2309_v51 }
 0x3f8   : > { %v2491_v16 = vadd.f32 %v2490_v7, %v2422_v11  ;;  %v2730_v58 = vpop.f32.mrf.mxu0 }
 0x3fa   : > { %v2548_v17 = vadd.f32 %v2547_v40, %v2491_v16  ;;  %v2943_v0 = vpop.f32.mrf.mxu1 }
 0x3fb   : > { %v2620_v34 = vpop.f32.mrf.mxu2  ;;  %v2673_v15 = vpop.f32.mrf.mxu3 }
 0x3fc   : > { %v2621_v24 = vadd.f32 %v2620_v34, %v2536_v50 }
 0x3fe   : > { %v2670_v25 = vadd.f32 %v2669_v3, %v2621_v24 }
 0x400   : > { %v2715_v27 = vadd.f32 %v2714_v39, %v2670_v25  ;;  %v2906_v37 = vpop.f32.mrf.mxu0 }
 0x402   : > { %v2776_v45 = vadd.f32 %v2775_v12, %v2715_v27  ;;  %v2947_v29 = vpop.f32.mrf.mxu1 }
 0x403   : > { %v2624_v19 = vpop.f32.mrf.mxu2  ;;  %v2677_v42 = vpop.f32.mrf.mxu3 }
 0x404   : > { %v2625_v44 = vadd.f32 %v2624_v19, %v2542_v23 }
 0x406   : > { %v2674_v35 = vadd.f32 %v2673_v15, %v2625_v44 }
 0x408   : > { %v2723_v26 = vadd.f32 %v2722_v18, %v2674_v35  ;;  %v2910_v40 = vpop.f32.mrf.mxu0 }
 0x40a   : > { %v2780_v32 = vadd.f32 %v2779_v36, %v2723_v26  ;;  %v2951_v20 = vpop.f32.mrf.mxu1 }
 0x40b   : > { %v2628_v9 = vpop.f32.mrf.mxu2  ;;  %v2855_v5 = vpop.f32.mrf.mxu3 }
 0x40c   : > { %v2629_v60 = vadd.f32 %v2628_v9, %v2548_v17 }
 0x40e   : > { %v2678_v28 = vadd.f32 %v2677_v42, %v2629_v60 }
 0x410   : > { %v2914_v33 = vpop.f32.mrf.mxu0  ;;  %v2731_v34 = vadd.f32 %v2730_v58, %v2678_v28 }
 0x412   : > { %v5698_v63 = vpop.f32.mrf.mxu1  ;;  %v2784_v27 = vadd.f32 %v2783_v52, %v2731_v34 }
 0x413   : > { %v2813_v57 = vpop.f32.mrf.mxu2  ;;  %v2861_v31 = vpop.f32.mrf.mxu3 }
 0x414   : > { %v2814_v38 = vadd.f32 %v2813_v57, %v2772_v56 }
 0x416   : > { %v2856_v13 = vadd.f32 %v2855_v5, %v2814_v38 }
 0x418   : > { %v2918_v55 = vpop.f32.mrf.mxu0  ;;  %v2907_v51 = vadd.f32 %v2906_v37, %v2856_v13 }
 0x41a   : > { %v3119_v48 = vpop.f32.mrf.mxu1  ;;  %v2944_v16 = vadd.f32 %v2943_v0, %v2907_v51 }
 0x41b   : > { %v2818_v4 = vpop.f32.mrf.mxu2  ;;  %v2867_v8 = vpop.f32.mrf.mxu3 }
 0x41c   : > { %v2819_v61 = vadd.f32 %v2818_v4, %v2776_v45  ;;  %v3214_v45 = vmul.f32 0.3939193, %v2944_v16 }
 0x41e   : > { %v2862_v62 = vadd.f32 %v2861_v31, %v2819_v61 }
 0x420   : > { %v3080_v59 = vpop.f32.mrf.mxu0  ;;  %v2911_v39 = vadd.f32 %v2910_v40, %v2862_v62 }
 0x422   : > { %v3125_v17 = vpop.f32.mrf.mxu1  ;;  %v2948_v36 = vadd.f32 %v2947_v29, %v2911_v39 }
 0x423   : > { %v2823_v1 = vpop.f32.mrf.mxu2  ;;  %v2873_v7 = vpop.f32.mrf.mxu3 }
 0x424   : > { %v2824_v21 = vadd.f32 %v2823_v1, %v2780_v32  ;;  %v3215_v13 = vmul.f32 0.3939193, %v2948_v36 }
 0x426   : > { %v2868_v46 = vadd.f32 %v2867_v8, %v2824_v21 }
 0x428   : > { %v3085_v6 = vpop.f32.mrf.mxu0  ;;  %v2915_v9 = vadd.f32 %v2914_v33, %v2868_v46 }
 0x42a   : > { %v3131_v57 = vpop.f32.mrf.mxu1  ;;  %v2952_v52 = vadd.f32 %v2951_v20, %v2915_v9 }
 0x42b   : > { %v2828_v2 = vpop.f32.mrf.mxu2  ;;  %v3044_v43 = vpop.f32.mrf.mxu3 }
 0x42c   : > { %v2829_v35 = vadd.f32 %v2828_v2, %v2784_v27 }
 0x42e   : > { %v2874_v28 = vadd.f32 %v2873_v7, %v2829_v35 }
 0x430   : > { %v3090_v25 = vpop.f32.mrf.mxu0  ;;  %v2919_v61 = vadd.f32 %v2918_v55, %v2874_v28 }
 0x433   : > { %v2994_v49 = vpop.f32.mrf.mxu2  ;;  %v3048_v54 = vpop.f32.mrf.mxu3 }
 0x434   : > { %v3045_v22 = vadd.f32 %v3044_v43, %v2994_v49 }
 0x436   : > { %v3081_v3 = vadd.f32 %v3080_v59, %v3045_v22 }
 0x438   : > { %v3120_v10 = vadd.f32 %v3119_v48, %v3081_v3  ;;  %v3095_v4 = vpop.f32.mrf.mxu0  ;;  %v3216_v48 = vmul.f32 0.3939193, %v2952_v52  ;;  %v3137_v3 = vpop.f32.mrf.mxu1 }
 0x43b   : > { %v3002_v50 = vpop.f32.mrf.mxu2  ;;  %v3052_v53 = vpop.f32.mrf.mxu3 }
 0x43c   : > { %v3049_v30 = vadd.f32 %v3048_v54, %v3002_v50 }
 0x43e   : > { %v3086_v15 = vadd.f32 %v3085_v6, %v3049_v30 }
 0x440   : > { %v3126_v44 = vadd.f32 %v3125_v17, %v3086_v15  ;;  %v2956_v17 = vadd.f32 %v5698_v63, %v2919_v61 }
 0x443   : > { %v3010_v47 = vpop.f32.mrf.mxu2  ;;  %v3056_v41 = vpop.f32.mrf.mxu3 }
 0x444   : > { %v3053_v42 = vadd.f32 %v3052_v53, %v3010_v47 }
 0x446   : > { %v3091_v5 = vadd.f32 %v3090_v25, %v3053_v42 }
 0x448   : > { %v3132_v37 = vadd.f32 %v3131_v57, %v3091_v5 }
 0x44b   : > { %v3018_v23 = vpop.f32.mrf.mxu2  ;;  %v3195_v14 = vpop.f32.mrf.mxu3 }
 0x44c   : > { %v3057_v58 = vadd.f32 %v3056_v41, %v3018_v23 }
 0x44e   : > { %v3096_v62 = vadd.f32 %v3095_v4, %v3057_v58 }
 0x453   : > { %v3161_v11 = vpop.f32.mrf.mxu2  ;;  %v3199_v19 = vpop.f32.mrf.mxu3 }
 0x454   : > { %v3162_v56 = vadd.f32 %v3161_v11, %v3120_v10 }
 0x456   : > { %v3196_v24 = vadd.f32 %v3195_v14, %v3162_v56  ;;  %v3138_v56 = vadd.f32 %v3137_v3, %v3096_v62 }
 0x458   : > { %v3210_v12 = vmul.f32 0.91914505, %v3196_v24 }
 0x45a   : > { %v3218_v18 = vadd.f32 %v3214_v45, %v3210_v12 }
 0x45b   : > { %v3165_v26 = vpop.f32.mrf.mxu2  ;;  %v3203_v0 = vpop.f32.mrf.mxu3 }
 0x45c   : > { %v3166_v32 = vadd.f32 %v3165_v26, %v3126_v44  ;;  %v5700_v31 = vclamps-f32 %v3218_v18, 256.0  ;;  %v3217_v18 = vmul.f32 0.3939193, %v2956_v17 }
 0x45e   : > { %v3200_v60 = vadd.f32 %v3199_v19, %v3166_v32  ;;  %v3262_v21 = vrot.slane %v5700_v31, 3  ;;  %v3253_v7 = vrot.slane %v5700_v31, 2  ;;  %v3244_v2 = vrot.slane %v5700_v31, 1 }
 0x45f   : > { %v3291_v43 = vrot.slane %v5700_v31, 6  ;;  %v3281_v29 = vrot.slane %v5700_v31, 5  ;;  %v3271_v33 = vrot.slane %v5700_v31, 4  ;;  %v3301_v49 = vrot.slane %v5700_v31, 7 }
 0x460   : > { %v3211_v38 = vmul.f32 0.91914505, %v3200_v60 }
 0x462   : > { %v3219_v8 = vadd.f32 %v3215_v13, %v3211_v38 }
 0x463   : > { %v3169_v1 = vpop.f32.mrf.mxu2  ;;  %v3207_v24 = vpop.f32.mrf.mxu3 }
 0x464   : > { %v5703_v40 = vclamps-f32 %v3219_v8, 256.0  ;;  %v3170_v46 = vadd.f32 %v3169_v1, %v3132_v37 }
 0x466   : > { %v3204_v54 = vadd.f32 %v3203_v0, %v3170_v46  ;;  %v3263_v20 = vrot.slane %v5703_v40, 2  ;;  %v3254_v55 = vrot.slane %v5703_v40, 1  ;;  %v3245_v50 = vsel %vm3235_vm0, %v5703_v40, %v3244_v2 }
 0x467   : > { %v3292_v53 = vrot.slane %v5703_v40, 5  ;;  %v3282_v47 = vrot.slane %v5703_v40, 4  ;;  %v3272_v59 = vrot.slane %v5703_v40, 3  ;;  %v3302_v41 = vrot.slane %v5703_v40, 6 }
 0x468   : > { %v3212_v22 = vmul.f32 0.91914505, %v3204_v54  ;;  %v3264_v23 = vsel %vm3235_vm0, %v3263_v20, %v3262_v21  ;;  %v3255_v6 = vsel %vm3235_vm0, %v3254_v55, %v3253_v7  ;;  %v3234_v28 = vrot.slane %v5703_v40, 7 }
 0x469   : > { %v3293_v14 = vsel %vm3235_vm0, %v3292_v53, %v3291_v43  ;;  %v3283_v51 = vsel %vm3235_vm0, %v3282_v47, %v3281_v29  ;;  %v3273_v30 = vsel %vm3235_vm0, %v3272_v59, %v3271_v33  ;;  %v3303_v10 = vsel %vm3235_vm0, %v3302_v41, %v3301_v49 }
 0x46a   : > { %v3220_v11 = vadd.f32 %v3216_v48, %v3212_v22  ;;  %v3236_v61 = vsel %vm3235_vm0, %v3234_v28, %v5700_v31 }
 0x46b   : > { %v3173_v16 = vpop.f32.mrf.mxu2 }
 0x46c   : > { %v3452_v34 = vclamps-f32 %v3220_v11, 256.0  ;;  %v3174_v15 = vadd.f32 %v3173_v16, %v3138_v56 }
 0x46e   : > { %v3208_v39 = vadd.f32 %v3207_v24, %v3174_v15  ;;  %v3265_v25 = vrot.slane %v3452_v34, 1  ;;  %v3256_v12 = vsel %vm3238_vm2, %v3452_v34, %v3255_v6  ;;  %v3246_v27 = vrot.slane %v3452_v34, 7 }
 0x46f   : > { %v3294_v45 = vrot.slane %v3452_v34, 4  ;;  %v3284_v19 = vrot.slane %v3452_v34, 3  ;;  %v3274_v42 = vrot.slane %v3452_v34, 2  ;;  %v3304_v44 = vrot.slane %v3452_v34, 5 }
 0x470   : > { %v3213_v35 = vmul.f32 0.91914505, %v3208_v39  ;;  %v3266_v26 = vsel %vm3238_vm2, %v3265_v25, %v3264_v23  ;;  %v3247_v36 = vsel %vm3238_vm2, %v3246_v27, %v3245_v50  ;;  %v3237_v7 = vrot.slane %v3452_v34, 6 }
 0x471   : > { %v3295_v63 = vsel %vm3238_vm2, %v3294_v45, %v3293_v14  ;;  %v3285_v32 = vsel %vm3238_vm2, %v3284_v19, %v3283_v51  ;;  %v3275_v9 = vsel %vm3238_vm2, %v3274_v42, %v3273_v30  ;;  %v3305_v5 = vsel %vm3238_vm2, %v3304_v44, %v3303_v10 }
 0x472   : > { %v3221_v60 = vadd.f32 %v3217_v18, %v3213_v35  ;;  %v3239_v31 = vsel %vm3238_vm2, %v3237_v7, %v3236_v61 }
 0x474   : > { %v3453_v57 = vclamps-f32 %v3221_v60, 256.0 }
 0x476   : > { %v3267_v58 = vsel %vm3241_vm3, %v3453_v57, %v3266_v26  ;;  %v3257_v38 = vrot.slane %v3453_v57, 7  ;;  %v3248_v13 = vrot.slane %v3453_v57, 6  ;;  %v3296_v52 = vrot.slane %v3453_v57, 3 }
 0x477   : > { %3268 = vrot.lane.b32.xlu2 %v3267_v58, %s3768_s15  ;;  %v3286_v4 = vrot.slane %v3453_v57, 2  ;;  %v3276_v8 = vrot.slane %v3453_v57, 1  ;;  %v3306_v37 = vrot.slane %v3453_v57, 4  ;;  %s3771_s15 = smov 80   ;;  %v3240_v2 = vrot.slane %v3453_v57, 5 }
 0x478   : > { %v3258_v62 = vsel %vm3241_vm3, %v3257_v38, %v3256_v12  ;;  %v3249_v0 = vsel %vm3241_vm3, %v3248_v13, %v3247_v36  ;;  %v3297_v1 = vsel %vm3241_vm3, %v3296_v52, %v3295_v63 }
 0x479   : > { %3259 = vrot.lane.b32.xlu0 %v3258_v62, %s3763_s8  ;;  %3250 = vrot.lane.b32.xlu1 %v3249_v0, %s5830_s26  ;;  %v3287_v21 = vsel %vm3241_vm3, %v3286_v4, %v3285_v32  ;;  %v3277_v40 = vsel %vm3241_vm3, %v3276_v8, %v3275_v9  ;;  %v3307_v46 = vsel %vm3241_vm3, %v3306_v37, %v3305_v5  ;;  %s3772_s8 = smov 112   ;;  %s3326_s26 = scalar_lea.sflag [#allocation5], %s240_s10 }
 0x47a   : > { %v3242_v43 = vsel %vm3241_vm3, %v3240_v2, %v3239_v31 }
 0x47f   : > { %3298 = vrot.lane.b32.xlu2 %v3297_v1, %s3770_s13  ;;  %s3431_s13 = sshll.u32 %s240_s10, 2 }
 0x480   : > { %s242_s22 = scalar_lea.vmem [#allocation4], %s3431_s13  ;;  %s3685_s13 = scalar_lea.hbm %s5800_s5, 16 }
 0x481   : > { %3288 = vrot.lane.b32.xlu0 %v3287_v21, %s3771_s15  ;;  %3278 = vrot.lane.b32.xlu1 %v3277_v40, %s3767_s14  ;;  %s3340_s21 = sshll.u32 %s242_s22, 4  ;;  %s3679_s15 = sshra.s32 %s3343_s17, 4  ;;  %s3341_s21 = int_to_ptr.vmem [resolvable:$true] %s3340_s21  ;;  %s3680_s15 = int_to_ptr.hbm [resolvable:$true] %s3679_s15 }
 0x482   : > { %p3686_p2 = scmp.lt.s32.totalorder %s3680_s15, %s5800_s5 }
 0x489   : > { %3308 = vrot.lane.b32.xlu1 %v3307_v46, %s3772_s8  ;;  %s3681_s8 = scalar_lea.hbm %s3680_s15, 4 }
 0x48a   : > { %p3682_p13 = scmp.ne.s32.totalorder %s3680_s15, %s3681_s8  ;;  %p3687_p4 = scmp.lt.s32.totalorder %s3685_s13, %s3681_s8 }
 0x48c   : > { %p3683_p0 = pnand %p3682_p13, %p3854_p3  ;;  %p3688_p5 = por %p3687_p4, %p3686_p2 }
 0x48e   : > { %p3684_p1 = pneg %p3683_p0 }
 0x490   : > { %p3689_p6 = pnand %p3688_p5, %p3684_p1 }
 0x4d1   : > { %v3269_v54 = vpop.permute.xlu2 %3268 }
 0x4d9   : > { %v3299_v41 = vpop.permute.xlu2 %3298 }
 0x4eb   : > { %v3260_v29 = vpop.permute.xlu0 %3259  ;;  %v3251_v33 = vpop.permute.xlu1 %3250 }
 0x4ec   : > { %v3312_v49 = vsel %vm3311_vm4, %v3242_v43, %v3251_v33 }
 0x4ed   : > { %v3313_v20 = vsel %vm1630_vm5, %v3312_v49, %v3260_v29  ;;  %vm3322_vm5 = vcmask 916480  }
 0x4ee   : > { %v3315_v50 = vsel %vm3314_vm6, %v3313_v20, %v3269_v54 }
 0x4f3   : > { %v3279_v55 = vpop.permute.xlu1 %3278  ;;  %v3289_v53 = vpop.permute.xlu0 %3288 }
 0x4f4   : > { %v3317_v47 = vsel %vm3316_vm7, %v3315_v50, %v3279_v55 }
 0x4f5   : > { %v3319_v59 = vsel %vm3318_vm8, %v3317_v47, %v3289_v53 }
 0x4f6   : > { %v3321_v48 = vsel %vm3320_vm9, %v3319_v59, %v3299_v41 }
 0x4fb   : > { %v3309_v22 = vpop.permute.xlu1 %3308 }
 0x4fc   : > { %v3323_v23 = vsel %vm3322_vm5, %v3321_v48, %v3309_v22 }
 0x4fd   : > { %3324 = vst [vmem:[%s242_s22] sm:$0xf] %v3323_v23 }
 0x4fe   : > { %3692 = shalt.err (!%p3689_p6)
}
 0x4ff   : > { %3493 = dma.vmem_to_hbm [thread:$0]  (%p3854_p3), %s3341_s21, 64, %s3343_s17, %s3326_s26  }
 0x500 PF: > { %p3499_p7 = scmp.ge.s32.totalorder %s3759_s25, 2  ;;  %s3354_s10 = sand.u32 1, %s3731_s18  }
 0x501   : > { %s3355_s9 = scalar_lea.sflag [#allocation5], %s3354_s10 }
 0x502   : > { %p3496_p9 = pnand %p3499_p7, %p3863_p8 }
 0x504   : > { %p3497_p10 = pneg %p3496_p9 }
 0x506   : > { %3726 = dma.done.wait (%p3497_p10), %s3355_s9, 64  }
 0x507   : > { %3728 = vsyncadd (%p3497_p10), %s3355_s9, 4294967232  ;;  %s18_s25 = sadd.s32 1, %s3759_s25   ;;  %s5831_s18 = smov %s3735_s19 }
 0x508   : > { %p15_p11 = scmp.ge.s32.totalorder %s18_s25, 6   ;;  %s5832_s19 = smov %s3739_s20 }
 0x509   : > { %s5833_s20 = smov %s3872_s11  ;;  %s5834_s21 = smov %s3751_s23 }
 0x50a   : > { %s5835_s22 = smov %s3755_s24  ;;  %s5836_s23 = smov %s5839_s28 }
 0x50b   : > { %s5837_s24 = smov %s5843_s29  ;;  %17 = sbr.rel (!%p15_p11) target bundleno = 5 (0x5), region = 79 }
 0x510   :  { %3361 = vsyncpa [#allocation5], 1 }
 0x511   :  { %3363 = vsyncpa [#allocation5 + $0x1], 1 }

// kernel: tpu_custom_call.1
= control target key start
LH: loop header
LB: loop body
LE: loop exit
PB: predicated region body
PF: predicated region fallthrough
CT: control target
= control target key end

     0   :  { %10 = vsyncpa [#allocation5], 0  ;;  %s5795_s0 = inlined_call_operand.vmem [shape: f32[2,12,8,8], index: 0, kind: input, shape index: {}]   ;;  %s5796_s1 = inlined_call_operand.vmem [shape: f32[2,1,32], index: 1, kind: input, shape index: {}]   ;;  %s5797_s2 = inlined_call_operand.vmem [shape: f32[72,32], index: 2, kind: input, shape index: {}]   ;;  %s5798_s3 = inlined_call_operand.vmem [shape: f32[288,16], index: 3, kind: input, shape index: {}]   ;;  %s5799_s4 = inlined_call_operand.vmem [shape: f32[8,16], index: 4, kind: input, shape index: {}]   ;;  %s5800_s5 = inlined_call_operand.hbm [shape: f32[2,2,4,128], index: 5, kind: output, shape index: {}]  }
   0x1   :  { %12 = vsyncpa [#allocation5 + $0x1], 0  ;;  %s3803_s18 = smov 0   ;;  %s3805_s19 = smov 0  }
   0x2   :  { %s3807_s20 = smov 0   ;;  %s3809_s21 = smov 0  }
   0x3   :  { %s3811_s22 = smov 0   ;;  %s3813_s23 = smov 0  }
   0x4   :  { %s3815_s24 = smov 0   ;;  %s3817_s25 = smov 0  }
   0x5 LB: > { %s3426_s26 = sadd.s32 4294967295, %s3759_s25   ;;  %s3427_s27 = sadd.s32 4294967294, %s3759_s25   ;;  %s3759_s25 = sphi %s3817_s25, %s18_s25   ;;  %s3755_s24 = sphi %s3815_s24, %s5837_s24   ;;  %s3751_s23 = sphi %s3813_s23, %s5836_s23   ;;  %s3747_s22 = sphi %s3811_s22, %s5835_s22   ;;  %s3743_s21 = sphi %s3809_s21, %s5834_s21   ;;  %s3739_s20 = sphi %s3807_s20, %s5833_s20   ;;  %s3735_s19 = sphi %s3805_s19, %s5832_s19   ;;  %s3731_s18 = sphi %s3803_s18, %s5831_s18  }
   0x6   : > { %s27_s28 = sadd.s32 1, %s3751_s23  ;;  %s30_s29 = sadd.s32 1, %s3755_s24 }
   0x7   : > { %p28_p0 = scmp.ge.s32.totalorder %s27_s28, 2  ;;  %p164_p1 = scmp.ne.s32.totalorder %s3739_s20, %s3735_s19 }
   0x8   : > { %p165_p2 = scmp.eq.s32.totalorder %s3426_s26, 3  ;;  %p170_p5 = scmp.ne.s32.totalorder %s3735_s19, %s3731_s18 }
   0x9   : > { %s5839_s28 = smov (%p28_p0, %s27_s28), 0  ;;  %s5841_s29 = smov (!%p28_p0, %s30_s29), %s3755_s24 }
   0xa   : > { %s150_s30 = ssub.s32 %s3751_s23, %s5839_s28  ;;  %p3854_p3 = por %p165_p2, %p164_p1 }
   0xb   : > { %p32_p4 = scmp.ge.s32.totalorder %s5841_s29, 2  ;;  %p171_p6 = scmp.eq.s32.totalorder %s3427_s27, 3 }
   0xc   : > { %p3430_p7 = scmp.ge.s32.totalorder %s3759_s25, 1  ;;  %p212_p9 = scmp.lt.s32.totalorder %s3759_s25, 5 }
   0xd   : > { %s5843_s29 = smov (%p32_p4, %s5841_s29), 0  ;;  %p3863_p8 = por %p171_p6, %p170_p5 }
   0xe   : > { %s149_s8 = ssub.s32 %s3755_s24, %s5843_s29  ;;  %s154_s9 = sadd.s32 1, %s3739_s20 }
   0xf   : > { %s151_s10 = sor.u32 %s150_s30, %s149_s8  ;;  %p213_p10 = pnand %p3430_p7, %p212_p9 }
  0x10   : > { %p152_p11 = scmp.eq.s32.totalorder %s151_s10, 0  ;;  %p243_p12 = scmp.lt.s32.totalorder (!%p213_p10), %s3747_s22, 1 }
  0x11   : > { %216 = sbr.rel (%p213_p10) target bundleno = 1280 (0x500), region = 40  ;;  %s3459_s14 = sshll.u32 (!%p213_p10), %s3743_s21, 5 }
  0x12   : > { %s3872_s11 = scalar_select %p152_p11, %s3739_s20, %s154_s9  }
  0x13   : > { %s3761_s27 = smov (!%p213_p10), 56   ;;  %s3762_s30 = smov (!%p213_p10), 8  }
  0x14   : > { %s3763_s8 = smov (!%p213_p10), 32   ;;  %s5801_s9 = smov (!%p213_p10), 16  }
  0x15   : > { %s3765_s10 = smov (!%p213_p10), 24   ;;  %s3768_s15 = smov (!%p213_p10), 48  }
  0x16   : > { %s3876_s12 = scalar_select %p243_p12, %s3747_s22, 1  ;;  %vm270_vm0 = vcmask 64512  }
  0x18   : > { %s3492_s13 = smul.u32 96, %s3876_s12 }
  0x1a   : > { %s247_s17 = scalar_lea.vmem %s5795_s0, %s3492_s13  ;;  %s3766_s13 = smov 40  }
  0x1b   : > { %s253_s26 = scalar_lea.vmem %s247_s17, %s3459_s14  ;;  %s3767_s14 = smov 64  }
  0x1c   : > { %v3883_v0 = vld [vmem:[%s253_s26 + $0x20] sm:$0xff]  ;;  %v3885_v1 = vld [vmem:[%s253_s26 + $0x10] sm:$0xff]  ;;  %v3895_v6 = vld [vmem:[%s253_s26 + $0x28] sm:$0xff] }
  0x1d   : > { %v3887_v2 = vld [vmem:[%s253_s26] sm:$0xff]  ;;  %v266_v3 = vmul.f32 %v3883_v0, %v3883_v0  ;;  %v264_v4 = vmul.f32 %v3885_v1, %v3885_v1  ;;  %v3897_v7 = vld [vmem:[%s253_s26 + $0x18] sm:$0xff]  ;;  %v3902_v11 = vld [vmem:[%s253_s26 + $0x8] sm:$0xff]  ;;  %v267_v12 = vmul.f32 %v3895_v6, %v3895_v6 }
  0x1e   : > { %v262_v5 = vmul.f32 %v3887_v2, %v3887_v2  ;;  %v265_v13 = vmul.f32 %v3897_v7, %v3897_v7  ;;  %v263_v14 = vmul.f32 %v3902_v11, %v3902_v11  ;;  %v3913_v18 = vld [vmem:[%s253_s26 + $0x38] sm:$0xff]  ;;  %v3915_v19 = vld [vmem:[%s253_s26 + $0x30] sm:$0xff]  ;;  %s5830_s26 = smov 16  }
  0x1f   : > { %v283_v8 = vsel %vm270_vm0, %v266_v3, 0.0  ;;  %v277_v9 = vsel %vm270_vm0, %v264_v4, 0.0  ;;  %v286_v15 = vsel %vm270_vm0, %v267_v12, 0.0  ;;  %v269_v20 = vmul.f32 %v3913_v18, %v3913_v18 }
  0x20   : > { %v271_v10 = vsel %vm270_vm0, %v262_v5, 0.0  ;;  %284 = vadd.xlane.f32.xlu2 %v283_v8  ;;  %278 = vadd.xlane.f32.xlu1 %v277_v9  ;;  %v280_v16 = vsel %vm270_vm0, %v265_v13, 0.0  ;;  %v274_v17 = vsel %vm270_vm0, %v263_v14, 0.0  ;;  %v268_v21 = vmul.f32 %v3915_v19, %v3915_v19 }
  0x21   : > { %272 = vadd.xlane.f32.xlu0 %v271_v10  ;;  %v292_v22 = vsel %vm270_vm0, %v269_v20, 0.0 }
  0x22   : > { %v289_v23 = vsel %vm270_vm0, %v268_v21, 0.0 }
  0x28   : > { %287 = vadd.xlane.f32.xlu2 %v286_v15  ;;  %281 = vadd.xlane.f32.xlu1 %v280_v16 }
  0x29   : > { %275 = vadd.xlane.f32.xlu0 %v274_v17 }
  0x30   : > { %293 = vadd.xlane.f32.xlu1 %v292_v22 }
  0x31   : > { %290 = vadd.xlane.f32.xlu0 %v289_v23 }
  0x93   : > { %v3923_v24 = vpop.xlane.xlu2 %284  ;;  %v3925_v25 = vpop.xlane.xlu1 %278 }
  0x94   : > { %3577 = vrsqrt.f32 %v3923_v24  ;;  %v3928_v26 = vpop.xlane.xlu0 %272  ;;  %vm350_vm1 = vcmp.eq.f32.partialorder %v3923_v24, inf  ;;  %v353_v42 = vand.u32 2147483648, %v3923_v24  ;;  %vm326_vm2 = vcmp.eq.f32.partialorder %v3925_v25, inf }
  0x95   : > { %3579 = vrsqrt.f32 %v3925_v25  ;;  %vm352_vm3 = vcmp.eq.f32.partialorder %v3923_v24, 0.0  ;;  %vm328_vm4 = vcmp.eq.f32.partialorder %v3925_v25, 0.0  ;;  %v329_v46 = vand.u32 2147483648, %v3925_v25 }
  0x96   : > { %3581 = vrsqrt.f32 %v3928_v26  ;;  %vm302_vm5 = vcmp.eq.f32.partialorder %v3928_v26, inf  ;;  %vm304_vm6 = vcmp.eq.f32.partialorder %v3928_v26, 0.0  ;;  %v305_v53 = vand.u32 2147483648, %v3928_v26 }
  0x9a   : > { %v3578_v27 = vpop.eup %3577 }
  0x9b   : > { %v3580_v28 = vpop.eup %3579  ;;  %v344_v29 = vmul.f32 %v3578_v27, %v3923_v24  ;;  %v3933_v30 = vpop.xlane.xlu2 %287 }
  0x9c   : > { %v3935_v31 = vpop.xlane.xlu1 %281  ;;  %v3582_v32 = vpop.eup %3581  ;;  %v320_v33 = vmul.f32 %v3580_v28, %v3925_v25  ;;  %3583 = vrsqrt.f32 %v3933_v30  ;;  %vm362_vm7 = vcmp.eq.f32.partialorder %v3933_v30, inf  ;;  %vm364_vm8 = vcmp.eq.f32.partialorder %v3933_v30, 0.0 }
  0x9d   : > { %v3939_v34 = vpop.xlane.xlu0 %275  ;;  %v345_v35 = vmul.f32 %v3578_v27, %v344_v29  ;;  %v296_v36 = vmul.f32 %v3582_v32, %v3928_v26  ;;  %3585 = vrsqrt.f32 %v3935_v31  ;;  %v365_v4 = vand.u32 2147483648, %v3933_v30 }
  0x9e   : > { %v321_v37 = vmul.f32 %v3580_v28, %v320_v33  ;;  %3587 = vrsqrt.f32 %v3939_v34  ;;  %vm338_vm9 = vcmp.eq.f32.partialorder %v3935_v31, inf  ;;  %vm340_vm10 = vcmp.eq.f32.partialorder %v3935_v31, 0.0 }
  0x9f   : > { %v346_v38 = vmul.f32 0.5, %v345_v35  ;;  %v297_v39 = vmul.f32 %v3582_v32, %v296_v36  ;;  %v341_v15 = vand.u32 2147483648, %v3935_v31  ;;  %vm314_vm11 = vcmp.eq.f32.partialorder %v3939_v34, inf }
  0xa0   : > { %v322_v40 = vmul.f32 0.5, %v321_v37  ;;  %v317_v37 = vand.u32 2147483648, %v3939_v34  ;;  %vm316_vm12 = vcmp.eq.f32.partialorder %v3939_v34, 0.0 }
  0xa1   : > { %v347_v41 = vsub.f32 1.5, %v346_v38  ;;  %v298_v43 = vmul.f32 0.5, %v297_v39 }
  0xa2   : > { %v3584_v44 = vpop.eup %3583  ;;  %v323_v45 = vsub.f32 1.5, %v322_v40 }
  0xa3   : > { %v3586_v47 = vpop.eup %3585  ;;  %v348_v48 = vmul.f32 %v3578_v27, %v347_v41  ;;  %v299_v49 = vsub.f32 1.5, %v298_v43  ;;  %v356_v50 = vmul.f32 %v3584_v44, %v3933_v30 }
  0xa4   : > { %v3953_v51 = vpop.xlane.xlu1 %293  ;;  %v324_v52 = vmul.f32 %v3580_v28, %v323_v45  ;;  %v332_v54 = vmul.f32 %v3586_v47, %v3935_v31  ;;  %v3588_v56 = vpop.eup %3587 }
  0xa5   : > { %v3957_v55 = vpop.xlane.xlu0 %290  ;;  %3589 = vrsqrt.f32 %v3953_v51  ;;  %v349_v57 = vmul.f32 %v348_v48, %v3923_v24  ;;  %v300_v58 = vmul.f32 %v3582_v32, %v299_v49  ;;  %v357_v59 = vmul.f32 %v3584_v44, %v356_v50 }
  0xa6   : > { %3591 = vrsqrt.f32 %v3957_v55  ;;  %v325_v60 = vmul.f32 %v324_v52, %v3925_v25  ;;  %v333_v61 = vmul.f32 %v3586_v47, %v332_v54  ;;  %v308_v62 = vmul.f32 %v3588_v56, %v3939_v34 }
  0xa7   : > { %v301_v63 = vmul.f32 %v300_v58, %v3928_v26  ;;  %v358_v3 = vmul.f32 0.5, %v357_v59  ;;  %v351_v5 = vsel %vm350_vm1, %v3923_v24, %v349_v57  ;;  %vm374_vm13 = vcmp.eq.f32.partialorder %v3957_v55, inf }
  0xa8   : > { %v327_v8 = vsel %vm326_vm2, %v3925_v25, %v325_v60  ;;  %v334_v9 = vmul.f32 0.5, %v333_v61  ;;  %v309_v10 = vmul.f32 %v3588_v56, %v308_v62  ;;  %v354_v25 = vsel %vm352_vm3, %v353_v42, %v351_v5 }
  0xa9   : > { %v330_v12 = vsel %vm328_vm4, %v329_v46, %v327_v8  ;;  %v303_v13 = vsel %vm302_vm5, %v3928_v26, %v301_v63  ;;  %v359_v14 = vsub.f32 1.5, %v358_v3  ;;  %v395_v41 = vmul.f32 0.35355338, %v354_v25 }
  0xaa   : > { %v393_v17 = vmul.f32 0.35355338, %v330_v12  ;;  %v306_v20 = vsel %vm304_vm6, %v305_v53, %v303_v13  ;;  %v335_v21 = vsub.f32 1.5, %v334_v9  ;;  %v310_v22 = vmul.f32 0.5, %v309_v10 }
  0xab   : > { %v3982_v16 = vpop.eup %3589  ;;  %v391_v27 = vmul.f32 0.35355338, %v306_v20  ;;  %v360_v28 = vmul.f32 %v3584_v44, %v359_v14  ;;  %v4017_v53 = vadd.f32 0.0001, %v395_v41  ;;  %vm376_vm14 = vcmp.eq.f32.partialorder %v3957_v55, 0.0 }
  0xac   : > { %v3592_v23 = vpop.eup %3591  ;;  %v3989_v29 = vadd.f32 0.0001, %v393_v17  ;;  %v336_v32 = vmul.f32 %v3586_v47, %v335_v21  ;;  %v311_v33 = vsub.f32 1.5, %v310_v22  ;;  %v380_v24 = vmul.f32 %v3982_v16, %v3953_v51 }
  0xad   : > { %v368_v35 = vmul.f32 %v3592_v23, %v3957_v55  ;;  %v3992_v36 = vadd.f32 0.0001, %v391_v27  ;;  %v361_v26 = vmul.f32 %v360_v28, %v3933_v30  ;;  %v377_v61 = vand.u32 2147483648, %v3957_v55 }
  0xae   : > { %3593 = vrcp.f32 %v3989_v29  ;;  %v337_v38 = vmul.f32 %v336_v32, %v3935_v31  ;;  %v312_v39 = vmul.f32 %v3588_v56, %v311_v33  ;;  %v381_v43 = vmul.f32 %v3982_v16, %v380_v24 }
  0xaf   : > { %v369_v40 = vmul.f32 %v3592_v23, %v368_v35  ;;  %3595 = vrcp.f32 %v3992_v36  ;;  %v363_v42 = vsel %vm362_vm7, %v3933_v30, %v361_v26  ;;  %v444_v10 = vand.u32 2147483647, %v3989_v29 }
  0xb0   : > { %v366_v44 = vsel %vm364_vm8, %v365_v4, %v363_v42  ;;  %v339_v45 = vsel %vm338_vm9, %v3935_v31, %v337_v38  ;;  %v313_v46 = vmul.f32 %v312_v39, %v3939_v34  ;;  %v382_v56 = vmul.f32 0.5, %v381_v43 }
  0xb1   : > { %v370_v47 = vmul.f32 0.5, %v369_v40  ;;  %v342_v48 = vsel %vm340_vm10, %v341_v15, %v339_v45  ;;  %v396_v49 = vmul.f32 0.35355338, %v366_v44  ;;  %v446_v12 = vand.u32 2147483648, %v3989_v29 }
  0xb2   : > { %v394_v50 = vmul.f32 0.35355338, %v342_v48  ;;  %v315_v52 = vsel %vm314_vm11, %v3939_v34, %v313_v46  ;;  %v383_v4 = vsub.f32 1.5, %v382_v56  ;;  %vm440_vm1 = vweird.f32 %v3989_v29 }
  0xb3   : > { %v371_v30 = vsub.f32 1.5, %v370_v47  ;;  %v318_v54 = vsel %vm316_vm12, %v317_v37, %v315_v52  ;;  %v4025_v34 = vadd.f32 0.0001, %v396_v49  ;;  %v418_v20 = vand.u32 2147483648, %v3992_v36 }
  0xb4   : > { %v3594_v57 = vpop.eup %3593  ;;  %v4019_v58 = vadd.f32 0.0001, %v394_v50  ;;  %v392_v59 = vmul.f32 0.35355338, %v318_v54  ;;  %v4044_v27 = vmul.f32 %v3982_v16, %v383_v4  ;;  %vm445_vm4 = vcmp.eq.f32.partialorder %v444_v10, 8.507059e+37 }
  0xb5   : > { %v372_v60 = vmul.f32 %v3592_v23, %v371_v30  ;;  %v3596_v31 = vpop.eup %3595  ;;  %v436_v62 = vmul.f32 %v3594_v57, %v3989_v29  ;;  %vm441_vm15 = vweird.f32 %v3594_v57  ;;  %v447_v28 = vor.u32 1.1754944e-38, %v446_v12 }
  0xb6   : > { %3597 = vrcp.f32 %v4019_v58  ;;  %v4028_v63 = vadd.f32 0.0001, %v392_v59  ;;  %v408_v8 = vmul.f32 %v3596_v31, %v3992_v36  ;;  %vm413_vm2 = vweird.f32 %v3596_v31  ;;  %vm442_vm3 = vmor %vm440_vm1, %vm441_vm15 }
  0xb7   : > { %v373_v3 = vmul.f32 %v372_v60, %v3957_v55  ;;  %3599 = vrcp.f32 %v4017_v53  ;;  %v437_v5 = vsub.f32 1.0, %v436_v62  ;;  %vm412_vm5 = vweird.f32 %v3992_v36 }
  0xb8   : > { %3601 = vrcp.f32 %v4028_v63  ;;  %v409_v15 = vsub.f32 1.0, %v408_v8  ;;  %vm414_vm6 = vmor %vm412_vm5, %vm413_vm2  ;;  %v419_v24 = vor.u32 1.1754944e-38, %v418_v20  ;;  %vm454_vm7 = vweird.f32 %v4019_v58 }
  0xb9   : > { %v375_v9 = vsel %vm374_vm13, %v3957_v55, %v373_v3  ;;  %v438_v14 = vmul.f32 %v3594_v57, %v437_v5  ;;  %3603 = vrcp.f32 %v4025_v34  ;;  %v416_v55 = vand.u32 2147483647, %v3992_v36 }
  0xba   : > { %v378_v13 = vsel %vm376_vm14, %v377_v61, %v375_v9  ;;  %v410_v22 = vmul.f32 %v3596_v31, %v409_v15  ;;  %v458_v16 = vand.u32 2147483647, %v4019_v58  ;;  %v460_v42 = vand.u32 2147483648, %v4019_v58 }
  0xbb   : > { %v397_v17 = vmul.f32 0.35355338, %v378_v13  ;;  %v439_v21 = vadd.f32 %v3594_v57, %v438_v14  ;;  %vm417_vm8 = vcmp.eq.f32.partialorder %v416_v55, 8.507059e+37  ;;  %vm426_vm11 = vweird.f32 %v4028_v63 }
  0xbc   : > { %v3598_v23 = vpop.eup %3597  ;;  %v411_v29 = vadd.f32 %v3596_v31, %v410_v22  ;;  %vm4065_vm10 = vcmp.eq.f32.partialorder %v458_v16, 8.507059e+37  ;;  %v432_v48 = vand.u32 2147483648, %v4028_v63  ;;  %vm386_vm12 = vcmp.eq.f32.partialorder %v3953_v51, inf }
  0xbd   : > { %v4041_v25 = vadd.f32 0.0001, %v397_v17  ;;  %v4046_v32 = vpop.eup %3599  ;;  %v443_v33 = vsel %vm442_vm3, %v3594_v57, %v439_v21  ;;  %v450_v35 = vmul.f32 %v3598_v23, %v4019_v58  ;;  %vm455_vm9 = vweird.f32 %v3598_v23 }
  0xbe   : > { %v3602_v26 = vpop.eup %3601  ;;  %v448_v37 = vsel %vm445_vm4, %v447_v28, %v443_v33  ;;  %v415_v39 = vsel %vm414_vm6, %v3596_v31, %v411_v29  ;;  %vm456_vm13 = vmor %vm454_vm7, %vm455_vm9  ;;  %v461_v52 = vor.u32 1.1754944e-38, %v460_v42  ;;  %v430_v54 = vand.u32 2147483647, %v4028_v63 }
  0xbf   : > { %v4054_v38 = vmul.f32 %v448_v37, %v3885_v1  ;;  %v451_v40 = vsub.f32 1.0, %v450_v35  ;;  %v4056_v41 = vpop.eup %3603  ;;  %3605 = vrcp.f32 %v4041_v25  ;;  %v420_v36 = vsel %vm417_vm8, %v419_v24, %v415_v39 }
  0xc0   : > { %v422_v43 = vmul.f32 %v3602_v26, %v4028_v63  ;;  %v4063_v45 = vmul.f32 %v420_v36, %v3887_v2  ;;  %v464_v2 = vmul.f32 %v4046_v32, %v4017_v53  ;;  %vm427_vm14 = vweird.f32 %v3602_v26 }
  0xc1   : > { %v3437_v44 = vmul.f32 -1.442695, %v4054_v38  ;;  %v452_v46 = vmul.f32 %v3598_v23, %v451_v40  ;;  %v433_v57 = vor.u32 1.1754944e-38, %v432_v48  ;;  %vm388_vm15 = vcmp.eq.f32.partialorder %v3953_v51, 0.0  ;;  %vm428_vm2 = vmor %vm426_vm11, %vm427_vm14 }
  0xc2   : > { %v423_v47 = vsub.f32 1.0, %v422_v43  ;;  %v3435_v49 = vmul.f32 -1.442695, %v4063_v45  ;;  %v465_v59 = vsub.f32 1.0, %v464_v2  ;;  %vm469_vm1 = vweird.f32 %v4046_v32 }
  0xc3   : > { %3607 = vpow2.f32 %v3437_v44  ;;  %v453_v50 = vadd.f32 %v3598_v23, %v452_v46  ;;  %v472_v58 = vand.u32 2147483647, %v4017_v53  ;;  %v474_v4 = vand.u32 2147483648, %v4017_v53 }
  0xc4   : > { %v424_v30 = vmul.f32 %v3602_v26, %v423_v47  ;;  %3609 = vpow2.f32 %v3435_v49  ;;  %v466_v3 = vmul.f32 %v4046_v32, %v465_v59  ;;  %v478_v5 = vmul.f32 %v4056_v41, %v4025_v34 }
  0xc5   : > { %v457_v56 = vsel %vm456_vm13, %v3598_v23, %v453_v50  ;;  %v4078_v60 = vpop.eup %3605  ;;  %v389_v8 = vand.u32 2147483648, %v3953_v51  ;;  %vm431_vm3 = vcmp.eq.f32.partialorder %v430_v54, 8.507059e+37  ;;  %vm468_vm4 = vweird.f32 %v4017_v53 }
  0xc6   : > { %v462_v31 = vsel %vm4065_vm10, %v461_v52, %v457_v56  ;;  %v425_v61 = vadd.f32 %v3602_v26, %v424_v30  ;;  %v467_v63 = vadd.f32 %v4046_v32, %v466_v3  ;;  %v479_v13 = vsub.f32 1.0, %v478_v5  ;;  %vm470_vm5 = vmor %vm468_vm4, %vm469_vm1 }
  0xc7   : > { %v4086_v62 = vmul.f32 %v462_v31, %v3897_v7  ;;  %v385_v14 = vmul.f32 %v4044_v27, %v3953_v51  ;;  %vm473_vm6 = vcmp.eq.f32.partialorder %v472_v58, 8.507059e+37  ;;  %v475_v21 = vor.u32 1.1754944e-38, %v474_v4 }
  0xc8   : > { %v429_v9 = vsel %vm428_vm2, %v3602_v26, %v425_v61  ;;  %v471_v20 = vsel %vm470_vm5, %v4046_v32, %v467_v63  ;;  %v480_v22 = vmul.f32 %v4056_v41, %v479_v13  ;;  %vm483_vm7 = vweird.f32 %v4056_v41 }
  0xc9   : > { %v3608_v10 = vpop.eup %3607  ;;  %v3438_v7 = vmul.f32 -1.442695, %v4086_v62  ;;  %v434_v12 = vsel %vm431_vm3, %v433_v57, %v429_v9  ;;  %v486_v55 = vand.u32 2147483647, %v4025_v34  ;;  %v476_v28 = vsel %vm473_vm6, %v475_v21, %v471_v20 }
  0xca   : > { %v4100_v15 = vadd.f32 1.0, %v3608_v10  ;;  %v4103_v17 = vmul.f32 %v434_v12, %v3902_v11  ;;  %v3610_v53 = vpop.eup %3609  ;;  %v488_v11 = vand.u32 2147483648, %v4025_v34  ;;  %v481_v33 = vadd.f32 %v4056_v41, %v480_v22 }
  0xcb   : > { %3611 = vpow2.f32 %v3438_v7  ;;  %v4113_v23 = vadd.f32 1.0, %v3610_v53  ;;  %v387_v32 = vsel %vm386_vm12, %v3953_v51, %v385_v14  ;;  %v4121_v29 = vmul.f32 %v476_v28, %v3883_v0 }
  0xcc   : > { %3613 = vrcp.f32 %v4100_v15  ;;  %v3436_v27 = vmul.f32 -1.442695, %v4103_v17  ;;  %vm482_vm8 = vweird.f32 %v4025_v34  ;;  %v492_v35 = vmul.f32 %v4078_v60, %v4041_v25 }
  0xcd   : > { %v598_v26 = vand.u32 2147483647, %v4100_v15  ;;  %3615 = vrcp.f32 %v4113_v23  ;;  %vm484_vm9 = vmor %vm482_vm8, %vm483_vm7  ;;  %v3439_v37 = vmul.f32 -1.442695, %v4121_v29  ;;  %v489_v16 = vor.u32 1.1754944e-38, %v488_v11 }
  0xce   : > { %3617 = vpow2.f32 %v3436_v27  ;;  %v485_v24 = vsel %vm484_vm9, %v4056_v41, %v481_v33  ;;  %v390_v0 = vsel %vm388_vm15, %v389_v8, %v387_v32  ;;  %v600_v34 = vand.u32 2147483648, %v4100_v15 }
  0xcf   : > { %v568_v40 = vand.u32 2147483647, %v4113_v23  ;;  %vm487_vm10 = vcmp.eq.f32.partialorder %v486_v55, 8.507059e+37  ;;  %3619 = vpow2.f32 %v3439_v37  ;;  %v493_v44 = vsub.f32 1.0, %v492_v35 }
  0xd0   : > { %v490_v43 = vsel %vm487_vm10, %v489_v16, %v485_v24  ;;  %v4140_v1 = vmul.f32 0.35355338, %v390_v0  ;;  %vm594_vm11 = vweird.f32 %v4100_v15  ;;  %vm4143_vm12 = vcmp.eq.f32.partialorder %v598_v26, 8.507059e+37 }
  0xd1   : > { %v3612_v39 = vpop.eup %3611  ;;  %v4138_v41 = vmul.f32 %v490_v43, %v3895_v6  ;;  %v601_v49 = vor.u32 1.1754944e-38, %v600_v34  ;;  %v570_v50 = vand.u32 2147483648, %v4113_v23  ;;  %vm564_vm13 = vweird.f32 %v4113_v23 }
  0xd2   : > { %v3614_v36 = vpop.eup %3613  ;;  %v4134_v42 = vadd.f32 1.0, %v3612_v39  ;;  %vm4152_vm14 = vcmp.eq.f32.partialorder %v568_v40, 8.507059e+37  ;;  %v494_v54 = vmul.f32 %v4078_v60, %v493_v44  ;;  %vm496_vm1 = vweird.f32 %v4041_v25 }
  0xd3   : > { %v590_v46 = vmul.f32 %v3614_v36, %v4100_v15  ;;  %v3616_v47 = vpop.eup %3615  ;;  %v3440_v2 = vmul.f32 -1.442695, %v4138_v41  ;;  %vm595_vm15 = vweird.f32 %v3614_v36  ;;  %vm497_vm2 = vweird.f32 %v4078_v60 }
  0xd4   : > { %3621 = vrcp.f32 %v4134_v42  ;;  %v3618_v52 = vpop.eup %3617  ;;  %v560_v6 = vmul.f32 %v3616_v47, %v4113_v23  ;;  %v613_v61 = vand.u32 2147483647, %v4134_v42  ;;  %v571_v3 = vor.u32 1.1754944e-38, %v570_v50  ;;  %vm596_vm3 = vmor %vm594_vm11, %vm595_vm15 }
  0xd5   : > { %v591_v48 = vsub.f32 1.0, %v590_v46  ;;  %v4157_v57 = vadd.f32 1.0, %v3618_v52  ;;  %3623 = vpow2.f32 %v3440_v2  ;;  %v3620_v59 = vpop.eup %3619  ;;  %v615_v4 = vand.u32 2147483648, %v4134_v42  ;;  %vm4175_vm6 = vmor %vm496_vm1, %vm497_vm2 }
  0xd6   : > { %v561_v31 = vsub.f32 1.0, %v560_v6  ;;  %vm565_vm4 = vweird.f32 %v3616_v47  ;;  %v4166_v9 = vadd.f32 1.0, %v3620_v59  ;;  %v4169_v10 = vadd.f32 %v4078_v60, %v494_v54 }
  0xd7   : > { %v592_v56 = vmul.f32 %v3614_v36, %v591_v48  ;;  %3625 = vrcp.f32 %v4157_v57  ;;  %vm609_vm5 = vweird.f32 %v4134_v42  ;;  %v500_v13 = vand.u32 2147483647, %v4041_v25  ;;  %vm566_vm8 = vmor %vm564_vm13, %vm565_vm4 }
  0xd8   : > { %v562_v8 = vmul.f32 %v3616_v47, %v561_v31  ;;  %vm4182_vm7 = vcmp.eq.f32.partialorder %v613_v61, 8.507059e+37  ;;  %3627 = vrcp.f32 %v4166_v9  ;;  %v616_v55 = vor.u32 1.1754944e-38, %v615_v4 }
  0xd9   : > { %v593_v58 = vadd.f32 %v3614_v36, %v592_v56  ;;  %v583_v11 = vand.u32 2147483647, %v4157_v57  ;;  %v585_v28 = vand.u32 2147483648, %v4157_v57  ;;  %v499_v32 = vsel %vm4175_vm6, %v4078_v60, %v4169_v10 }
  0xda   : > { %v3622_v5 = vpop.eup %3621  ;;  %v563_v15 = vadd.f32 %v3616_v47, %v562_v8  ;;  %vm4202_vm10 = vcmp.eq.f32.partialorder %v500_v13, 8.507059e+37  ;;  %vm579_vm11 = vweird.f32 %v4157_v57  ;;  %v502_v0 = vand.u32 2147483648, %v4041_v25 }
  0xdb   : > { %v597_v7 = vsel %vm596_vm3, %v3614_v36, %v593_v58  ;;  %v605_v12 = vmul.f32 %v3622_v5, %v4134_v42  ;;  %v3624_v20 = vpop.eup %3623  ;;  %vm610_vm9 = vweird.f32 %v3622_v5  ;;  %v586_v44 = vor.u32 1.1754944e-38, %v585_v28 }
  0xdc   : > { %v602_v14 = vsel %vm4143_vm12, %v601_v49, %v597_v7  ;;  %v567_v27 = vsel %vm566_vm8, %v3616_v47, %v563_v15  ;;  %v4192_v33 = vadd.f32 1.0, %v3624_v20  ;;  %vm4214_vm12 = vcmp.eq.f32.partialorder %v583_v11, 8.507059e+37  ;;  %vm611_vm13 = vmor %vm609_vm5, %vm610_vm9 }
  0xdd   : > { %v681_v21 = vmul.f32 %v602_v14, %v4054_v38  ;;  %v606_v22 = vsub.f32 1.0, %v605_v12  ;;  %v3626_v35 = vpop.eup %3625  ;;  %v572_v23 = vsel %vm4152_vm14, %v571_v3, %v567_v27  ;;  %vm624_vm14 = vweird.f32 %v4166_v9 }
  0xde   : > { %v679_v16 = vmul.f32 %v572_v23, %v4063_v45  ;;  %v575_v39 = vmul.f32 %v3626_v35, %v4157_v57  ;;  %v628_v45 = vand.u32 2147483647, %v4166_v9  ;;  %3629 = vrcp.f32 %v4192_v33  ;;  %v3628_v36 = vpop.eup %3627 }
  0xdf   : > { %v4198_v26 = vmul.f32 1.6778524, %v681_v21  ;;  %v607_v37 = vmul.f32 %v3622_v5, %v606_v22  ;;  %v620_v51 = vmul.f32 %v3628_v36, %v4166_v9  ;;  %v630_v47 = vand.u32 2147483648, %v4166_v9 }
  0xe0   : > { %v4220_v43 = vmul.f32 1.6778524, %v679_v16  ;;  %v576_v25 = vsub.f32 1.0, %v575_v39  ;;  %vm735_vm15 = vcmask 1040384   ;;  %vm580_vm1 = vweird.f32 %v3626_v35 }
  0xe1   : > { %923 = vrot.lane.b32.xlu1 %v4198_v26, %s3761_s27  ;;  %763 = vrot.lane.b32.xlu0 %v4198_v26, %s3762_s30  ;;  %v608_v34 = vadd.f32 %v3622_v5, %v607_v37  ;;  %v705_v42 = vrot.slane %v4198_v26, 1  ;;  %v621_v2 = vsub.f32 1.0, %v620_v51  ;;  %vm4234_vm2 = vcmp.eq.f32.partialorder %v628_v45, 8.507059e+37  ;;  %vm581_vm3 = vmor %vm579_vm11, %vm580_vm1 }
  0xe2   : > { %759 = vrot.lane.b32.xlu2 %v4220_v43, %s3762_s30  ;;  %v577_v49 = vmul.f32 %v3626_v35, %v576_v25  ;;  %v721_v6 = vrot.slane %v4198_v26, 7  ;;  %v703_v54 = vrot.slane %v4220_v43, 1  ;;  %v719_v56 = vrot.slane %v4220_v43, 7 }
  0xe3   : > { %v612_v46 = vsel %vm611_vm13, %v3622_v5, %v608_v34  ;;  %v503_v59 = vor.u32 1.1754944e-38, %v502_v0  ;;  %v622_v58 = vmul.f32 %v3628_v36, %v621_v2  ;;  %vm625_vm4 = vweird.f32 %v3628_v36 }
  0xe4   : > { %v617_v48 = vsel %vm4182_vm7, %v616_v55, %v612_v46  ;;  %v578_v30 = vadd.f32 %v3626_v35, %v577_v49  ;;  %v3630_v31 = vpop.eup %3629  ;;  %v631_v3 = vor.u32 1.1754944e-38, %v630_v47  ;;  %v643_v8 = vand.u32 2147483647, %v4192_v33  ;;  %vm626_vm5 = vmor %vm624_vm14, %vm625_vm4 }
  0xe5   : > { %v682_v50 = vmul.f32 %v617_v48, %v4086_v62  ;;  %v635_v5 = vmul.f32 %v3630_v31, %v4192_v33  ;;  %v4252_v7 = vsel %vm735_vm15, %v705_v42, %v721_v6  ;;  %v623_v12 = vadd.f32 %v3628_v36, %v622_v58 }
  0xe6   : > { %v582_v4 = vsel %vm581_vm3, %v3626_v35, %v578_v30  ;;  %755 = vst.msk [vmem:[#allocation2 + $0x10] sm:$0xff] %vm270_vm0, %v4252_v7  ;;  %v504_v20 = vsel %vm4202_vm10, %v503_v59, %v499_v32  ;;  %v736_v21 = vsel %vm735_vm15, %v703_v54, %v719_v56  ;;  %v645_v22 = vand.u32 2147483648, %v4192_v33 }
  0xe7   : > { %v4241_v61 = vmul.f32 1.6778524, %v682_v50  ;;  %v587_v57 = vsel %vm4214_vm12, %v586_v44, %v582_v4  ;;  %v636_v53 = vsub.f32 1.0, %v635_v5  ;;  %v4282_v9 = vmul.f32 %v504_v20, %v3915_v19  ;;  %753 = vst.msk [vmem:[#allocation2] sm:$0xff] %vm270_vm0, %v736_v21 }
  0xe8   : > { %v680_v15 = vmul.f32 %v587_v57, %v4103_v17  ;;  %v627_v17 = vsel %vm626_vm5, %v3628_v36, %v623_v12  ;;  %vm640_vm6 = vweird.f32 %v3630_v31  ;;  %v4299_v19 = vadd.f32 0.0001, %v4140_v1 }
  0xe9   : > { %765 = vrot.lane.b32.xlu1 %v4241_v61, %s3762_s30  ;;  %850 = vrot.lane.b32.xlu0 %v4241_v61, %s3763_s8  ;;  %v706_v13 = vrot.slane %v4241_v61, 1  ;;  %v722_v14 = vrot.slane %v4241_v61, 7  ;;  %v632_v63 = vsel %vm4234_vm2, %v631_v3, %v627_v17  ;;  %v637_v55 = vmul.f32 %v3630_v31, %v636_v53 }
  0xea   : > { %v4292_v10 = vmul.f32 1.6778524, %v680_v15  ;;  %v683_v11 = vmul.f32 %v632_v63, %v4121_v29  ;;  %v3441_v27 = vmul.f32 -1.442695, %v4282_v9  ;;  %vm639_vm7 = vweird.f32 %v4192_v33 }
  0xeb   : > { %v4289_v60 = vsel %vm735_vm15, %v706_v13, %v722_v14  ;;  %v638_v28 = vadd.f32 %v3630_v31, %v637_v55  ;;  %vm641_vm8 = vmor %vm639_vm7, %vm640_vm6  ;;  %v646_v37 = vor.u32 1.1754944e-38, %v645_v22  ;;  %vm644_vm9 = vcmp.eq.f32.partialorder %v643_v8, 8.507059e+37 }
  0xec   : > { %756 = vst.msk [vmem:[#allocation2 + $0x18] sm:$0xff] %vm270_vm0, %v4289_v60  ;;  %846 = vrot.lane.b32.xlu2 %v4292_v10, %s3763_s8  ;;  %v704_v32 = vrot.slane %v4292_v10, 1  ;;  %v720_v35 = vrot.slane %v4292_v10, 7  ;;  %v4308_v23 = vmul.f32 1.6778524, %v683_v11  ;;  %3631 = vpow2.f32 %v3441_v27 }
  0xed   : > { %v642_v1 = vsel %vm641_vm8, %v3630_v31, %v638_v28  ;;  %3633 = vrcp.f32 %v4299_v19  ;;  %vm744_vm10 = vcmask 1046528   ;;  %vm510_vm11 = vweird.f32 %v4299_v19 }
  0xee   : > { %v737_v24 = vsel %vm735_vm15, %v704_v32, %v720_v35  ;;  %v647_v33 = vsel %vm644_vm9, %v646_v37, %v642_v1  ;;  %v707_v16 = vrot.slane %v4308_v23, 1  ;;  %v723_v39 = vrot.slane %v4308_v23, 7 }
  0xef   : > { %754 = vst.msk [vmem:[#allocation2 + $0x8] sm:$0xff] %vm270_vm0, %v737_v24  ;;  %v684_v0 = vmul.f32 %v647_v33, %v4138_v41  ;;  %v745_v2 = vsel %vm744_vm10, %v703_v54, %v719_v56  ;;  %v516_v59 = vand.u32 2147483648, %v4299_v19  ;;  %v514_v54 = vand.u32 2147483647, %v4299_v19 }
  0xf0   : > { %v4325_v34 = vsel %vm735_vm15, %v707_v16, %v723_v39  ;;  %v746_v56 = vsel %vm744_vm10, %v704_v32, %v720_v35  ;;  %v747_v15 = vsel %vm744_vm10, %v705_v42, %v721_v6  ;;  %vm777_vm8 = vcmask 130112  }
  0xf1   : > { %852 = vrot.lane.b32.xlu1 %v4308_v23, %s3763_s8  ;;  %927 = vrot.lane.b32.xlu0 %v4308_v23, %s3761_s27  ;;  %v692_v40 = vmul.f32 1.6778524, %v684_v0  ;;  %757 = vst.msk [vmem:[#allocation2 + $0x20] sm:$0xff] %vm270_vm0, %v4325_v34  ;;  %v517_v58 = vor.u32 1.1754944e-38, %v516_v59  ;;  %vm515_vm14 = vcmp.eq.f32.partialorder %v514_v54, 8.507059e+37 }
  0xf2   : > { %v3632_v45 = vpop.eup %3631 }
  0xf3   : > { %v557_v36 = vadd.f32 1.0, %v3632_v45  ;;  %v708_v25 = vrot.slane %v692_v40, 1  ;;  %v724_v44 = vrot.slane %v692_v40, 7  ;;  %v3634_v46 = vpop.eup %3633 }
  0xf4   : > { %761 = vrot.lane.b32.xlu2 %v4292_v10, %s3762_s30  ;;  %v506_v48 = vmul.f32 %v3634_v46, %v4299_v19  ;;  %vm511_vm12 = vweird.f32 %v3634_v46 }
  0xf5   : > { %3635 = vrcp.f32 %v557_v36  ;;  %v4334_v51 = vsel %vm744_vm10, %v708_v25, %v724_v44  ;;  %v4337_v47 = vsel %vm735_vm15, %v708_v25, %v724_v44  ;;  %vm512_vm13 = vmor %vm510_vm11, %vm511_vm12  ;;  %vm654_vm1 = vweird.f32 %v557_v36 }
  0xf6   : > { %758 = vst.msk [vmem:[#allocation2 + $0x28] sm:$0xff] %vm270_vm0, %v4337_v47  ;;  %v507_v49 = vsub.f32 1.0, %v506_v48  ;;  %v660_v5 = vand.u32 2147483648, %v557_v36  ;;  %v658_v12 = vand.u32 2147483647, %v557_v36  ;;  %v986_v48 = vld [vmem:[%s5797_s2 + $0x30] sm:$0xff] }
  0xf7   : > { %vm808_vm11 = vcmask 195712   ;;  %vm839_vm12 = vcmask 261312  }
  0xf8   : > { %v508_v30 = vmul.f32 %v3634_v46, %v507_v49  ;;  %v661_v20 = vor.u32 1.1754944e-38, %v660_v5  ;;  %vm659_vm4 = vcmp.eq.f32.partialorder %v658_v12, 8.507059e+37  ;;  %v985_v12 = vld [vmem:[%s5797_s2 + $0x28] sm:$0xff] }
  0xf9   : > { %929 = vrot.lane.b32.xlu1 %v692_v40, %s3761_s27  ;;  %769 = vrot.lane.b32.xlu0 %v692_v40, %s3762_s30 }
  0xfa   : > { %v509_v43 = vadd.f32 %v3634_v46, %v508_v30 }
  0xfb   : > { %v3636_v50 = vpop.eup %3635 }
  0xfc   : > { %848 = vrot.lane.b32.xlu2 %v4198_v26, %s3763_s8  ;;  %v650_v52 = vmul.f32 %v3636_v50, %v557_v36  ;;  %v513_v4 = vsel %vm512_vm13, %v3634_v46, %v509_v43  ;;  %vm655_vm2 = vweird.f32 %v3636_v50  ;;  %v748_v26 = vsel %vm744_vm10, %v706_v13, %v722_v14 }
  0xfd   : > { %v518_v8 = vsel %vm515_vm14, %v517_v58, %v513_v4  ;;  %vm656_vm3 = vmor %vm654_vm1, %vm655_vm2  ;;  %vm864_vm13 = vcmask 326912   ;;  %vm890_vm14 = vcmask 392512   ;;  %vm916_vm1 = vcmask 458112  }
  0xfe   : > { %v651_v31 = vsub.f32 1.0, %v650_v52  ;;  %v526_v53 = vmul.f32 %v518_v8, %v3913_v18  ;;  %vm941_vm2 = vcmask 523712  }
 0x100   : > { %v652_v3 = vmul.f32 %v3636_v50, %v651_v31  ;;  %v3442_v17 = vmul.f32 -1.442695, %v526_v53 }
 0x101   : > { %790 = vrot.lane.b32.xlu0 %v745_v2, %s5801_s9  ;;  %821 = vrot.lane.b32.xlu1 %v737_v24, %s3765_s10  ;;  %v4448_v2 = vand.u32 4294901760, %v986_v48 }
 0x102   : > { %v653_v57 = vadd.f32 %v3636_v50, %v652_v3  ;;  %3637 = vpow2.f32 %v3442_v17  ;;  %v4495_v17 = vand.u32 4294901760, %v985_v12 }
 0x103   : > { %v4461_v43 = vsub.f32 %v986_v48, %v4448_v2 }
 0x104   : > { %925 = vrot.lane.b32.xlu2 %v4241_v61, %s3761_s27  ;;  %v657_v21 = vsel %vm656_vm3, %v3636_v50, %v653_v57  ;;  %vm967_vm3 = vcmask 589312  }
 0x105   : > { %v662_v22 = vsel %vm659_vm4, %v661_v20, %v657_v21  ;;  %v1103_v3 = vand.u32 4294901760, %v4461_v43  ;;  %vm989_vm4 = vcmask 588800  }
 0x106   : > { %v685_v18 = vmul.f32 %v662_v22, %v4282_v9  ;;  %v749_v9 = vsel %vm744_vm10, %v707_v16, %v723_v39  ;;  %v982_v22 = vld [vmem:[%s5797_s2 + $0x10] sm:$0xff] }
 0x107   : > { %v1104_v57 = vsub.f32 %v4461_v43, %v1103_v3 }
 0x108   : > { %v693_v42 = vmul.f32 1.6778524, %v685_v18  ;;  %v3638_v6 = vpop.eup %3637 }
 0x109   : > { %872 = vrot.lane.b32.xlu0 %v746_v56, %s3766_s13  ;;  %792 = vrot.lane.b32.xlu1 %v746_v56, %s5801_s9  ;;  %v558_v61 = vadd.f32 1.0, %v3638_v6 }
 0x10a   : > { %v709_v19 = vrot.slane %v693_v42, 1  ;;  %v725_v11 = vrot.slane %v693_v42, 7 }
 0x10b   : > { %3639 = vrcp.f32 %v558_v61  ;;  %vm669_vm5 = vweird.f32 %v558_v61  ;;  %v675_v10 = vand.u32 2147483648, %v558_v61  ;;  %v673_v55 = vand.u32 2147483647, %v558_v61 }
 0x10c   : > { %767 = vrot.lane.b32.xlu2 %v4308_v23, %s3762_s30  ;;  %v751_v35 = vsel %vm744_vm10, %v709_v19, %v725_v11  ;;  %v742_v24 = vsel %vm735_vm15, %v709_v19, %v725_v11  ;;  %s250_s30 = scalar_lea.vmem %s5796_s1, %s3876_s12  ;;  %s3433_s12 = sshll.u32 %s3743_s21, 2 }
 0x10d   : > { %v676_v27 = vor.u32 1.1754944e-38, %v675_v10  ;;  %vm674_vm9 = vcmp.eq.f32.partialorder %v673_v55, 8.507059e+37 }
 0x111   : > { %949 = vrot.lane.b32.xlu0 %v747_v15, %s3767_s14  ;;  %874 = vrot.lane.b32.xlu1 %v747_v15, %s3766_s13  ;;  %v3640_v13 = vpop.eup %3639 }
 0x112   : > { %v665_v14 = vmul.f32 %v3640_v13, %v558_v61  ;;  %vm670_vm6 = vweird.f32 %v3640_v13  ;;  %v4507_v61 = vand.u32 4294901760, %v982_v22 }
 0x113   : > { %vm671_vm7 = vmor %vm669_vm5, %vm670_vm6 }
 0x114   : > { %854 = vrot.lane.b32.xlu2 %v692_v40, %s3763_s8 }
 0x119   : > { %823 = vrot.lane.b32.xlu0 %v4252_v7, %s3765_s10  ;;  %951 = vrot.lane.b32.xlu1 %v748_v26, %s3767_s14 }
 0x11c   : > { %931 = vrot.lane.b32.xlu2 %v693_v42, %s3761_s27 }
 0x121   : > { %900 = vrot.lane.b32.xlu0 %v4289_v60, %s3768_s15  ;;  %825 = vrot.lane.b32.xlu1 %v4289_v60, %s3765_s10 }
 0x124   : > { %898 = vrot.lane.b32.xlu2 %v4252_v7, %s3768_s15  ;;  %v666_v7 = vsub.f32 1.0, %v665_v14  ;;  %v4511_v14 = vsub.f32 %v985_v12, %v4495_v17 }
 0x126   : > { %v667_v60 = vmul.f32 %v3640_v13, %v666_v7  ;;  %v1109_v10 = vand.u32 4294901760, %v4511_v14 }
 0x128   : > { %v668_v63 = vadd.f32 %v3640_v13, %v667_v60  ;;  %v4521_v60 = vsub.f32 %v982_v22, %v4507_v61 }
 0x129   : > { %796 = vrot.lane.b32.xlu0 %v748_v26, %s5801_s9  ;;  %902 = vrot.lane.b32.xlu1 %v4325_v34, %s3768_s15 }
 0x12a   : > { %v672_v32 = vsel %vm671_vm7, %v3640_v13, %v668_v63  ;;  %v1105_v13 = vand.u32 4294901760, %v1104_v57  ;;  %v1127_v19 = vand.u32 4294901760, %v4521_v60 }
 0x12b   : > { %v677_v23 = vsel %vm674_vm9, %v676_v27, %v672_v32  ;;  %v1110_v27 = vsub.f32 %v4511_v14, %v1109_v10  ;;  %v980_v32 = vld [vmem:[%s5797_s2] sm:$0xff] }
 0x12c   : > { %794 = vrot.lane.b32.xlu2 %v747_v15, %s5801_s9  ;;  %v686_v37 = vmul.f32 %v677_v23, %v526_v53  ;;  %v984_v15 = vld [vmem:[%s5797_s2 + $0x20] sm:$0xff]  ;;  %v983_v53 = vld [vmem:[%s5797_s2 + $0x18] sm:$0xff] }
 0x12d   : > { %v4505_v6 = vand.u32 4294901760, %v983_v53 }
 0x12e   : > { %v694_v33 = vmul.f32 1.6778524, %v686_v37 }
 0x12f   : > { %v4518_v7 = vsub.f32 %v983_v53, %v4505_v6 }
 0x130   : > { %v710_v16 = vrot.slane %v694_v33, 1  ;;  %v726_v39 = vrot.slane %v694_v33, 7 }
 0x131   : > { %878 = vrot.lane.b32.xlu0 %v749_v9, %s3766_s13  ;;  %798 = vrot.lane.b32.xlu1 %v749_v9, %s5801_s9  ;;  %v1121_v55 = vand.u32 4294901760, %v4518_v7 }
 0x132   : > { %v743_v40 = vsel %vm735_vm15, %v710_v16, %v726_v39  ;;  %v752_v54 = vsel %vm744_vm10, %v710_v16, %v726_v39  ;;  %v4557_v16 = vand.u32 4294901760, %v980_v32 }
 0x133   : > { %v1122_v23 = vsub.f32 %v4518_v7, %v1121_v55 }
 0x134   : > { %876 = vrot.lane.b32.xlu2 %v748_v26, %s3766_s13 }
 0x139   : > { %955 = vrot.lane.b32.xlu0 %v4334_v51, %s3767_s14  ;;  %880 = vrot.lane.b32.xlu1 %v4334_v51, %s3766_s13 }
 0x13c   : > { %953 = vrot.lane.b32.xlu2 %v749_v9, %s3767_s14  ;;  %v760_v28 = vpop.permute.xlu2 %759 }
 0x13d   : > { %778 = vst.msk [vmem:[#allocation2] sm:$0xff] %vm777_vm8, %v760_v28  ;;  %v981_v28 = vld [vmem:[%s5797_s2 + $0x8] sm:$0xff] }
 0x13e   : > { %v4549_v37 = vand.u32 4294901760, %v981_v28 }
 0x141   : > { %829 = vrot.lane.b32.xlu0 %v4337_v47, %s3765_s10  ;;  %957 = vrot.lane.b32.xlu1 %v751_v35, %s3767_s14 }
 0x144   : > { %827 = vrot.lane.b32.xlu2 %v4325_v34, %s3765_s10 }
 0x146   : > { %v4410_v1 = vpop.permute.xlu2 %846 }
 0x149   : > { %831 = vrot.lane.b32.xlu1 %v742_v24, %s3765_s10  ;;  %906 = vrot.lane.b32.xlu0 %v742_v24, %s3768_s15  ;;  %v1111_v24 = vand.u32 4294901760, %v1110_v27  ;;  %s240_s10 = sand.u32 1, %s3735_s19  }
 0x14c   : > { %904 = vrot.lane.b32.xlu2 %v4337_v47, %s3768_s15  ;;  %v988_v47 = vld [vmem:[%s5797_s2 + $0x40] sm:$0xff] }
 0x14d   : > { %v4444_v49 = vand.u32 4294901760, %v988_v47 }
 0x14e   : > { %v762_v0 = vpop.permute.xlu2 %761 }
 0x14f   : > { %779 = vst.msk [vmem:[#allocation2 + $0x8] sm:$0xff] %vm777_vm8, %v762_v0  ;;  %v4455_v59 = vsub.f32 %v988_v47, %v4444_v49  ;;  %1241 = vmatpush.msra.mxu3 %v4444_v49  ;;  %1016 = vmatpush.msra.mxu0 %v4444_v49  ;;  %v1138_v47 = vsub.f32 %v980_v32, %v4557_v16 }
 0x151   : > { %908 = vrot.lane.b32.xlu1 %v743_v40, %s3768_s15  ;;  %856 = vrot.lane.b32.xlu0 %v693_v42, %s3763_s8  ;;  %v1091_v56 = vand.u32 4294901760, %v4455_v59  ;;  %v4503_v42 = vand.u32 4294901760, %v984_v15 }
 0x152   : > { %1177 = vmatpush.msra.mxu2 %v4455_v59 }
 0x153   : > { %v4421_v34 = vpop.permute.xlu1 %923  ;;  %v764_v45 = vpop.permute.xlu0 %763  ;;  %v1092_v5 = vsub.f32 %v4455_v59, %v1091_v56  ;;  %v4515_v9 = vsub.f32 %v984_v15, %v4503_v42 }
 0x154   : > { %780 = vst.msk [vmem:[#allocation2 + $0x10] sm:$0xff] %vm777_vm8, %v764_v45  ;;  %800 = vrot.lane.b32.xlu2 %v4334_v51, %s5801_s9  ;;  %v987_v51 = vld [vmem:[%s5797_s2 + $0x38] sm:$0xff]  ;;  %v1132_v45 = vsub.f32 %v981_v28, %v4549_v37  ;;  %s3449_s9 = sadd.s32 4294967295, %s3433_s12 }
 0x155   : > { %v4446_v50 = vand.u32 4294901760, %v987_v51  ;;  %v1093_v20 = vand.u32 4294901760, %v1092_v5  ;;  %v1115_v63 = vand.u32 4294901760, %v4515_v9 }
 0x156   : > { %v4426_v36 = vpop.permute.xlu2 %848 }
 0x157   : > { %v4458_v31 = vsub.f32 %v987_v51, %v4446_v50  ;;  %1243 = vmatpush.msra.mxu3 %v4446_v50  ;;  %1018 = vmatpush.msra.mxu0 %v4446_v50  ;;  %v1133_v51 = vand.u32 4294901760, %v1132_v45 }
 0x158   : > { %1094 = vmatpush.msra.mxu1 %v1093_v20 }
 0x159   : > { %933 = vrot.lane.b32.xlu0 %v694_v33, %s3761_s27  ;;  %v1097_v58 = vand.u32 4294901760, %v4458_v31  ;;  %1180 = vmatpush.msra.mxu2 %v4458_v31  ;;  %v1128_v33 = vsub.f32 %v4521_v60, %v1127_v19 }
 0x15a   : > { %1245 = vmatpush.msra.mxu3 %v4448_v2  ;;  %1020 = vmatpush.msra.mxu0 %v4448_v2 }
 0x15b   : > { %v766_v25 = vpop.permute.xlu1 %765  ;;  %v4429_v44 = vpop.permute.xlu0 %850  ;;  %v1098_v8 = vsub.f32 %v4458_v31, %v1097_v58  ;;  %1183 = vmatpush.msra.mxu2 %v4461_v43  ;;  %v1129_v48 = vand.u32 4294901760, %v1128_v33 }
 0x15c   : > { %781 = vst.msk [vmem:[#allocation2 + $0x18] sm:$0xff] %vm777_vm8, %v766_v25  ;;  %882 = vrot.lane.b32.xlu2 %v751_v35, %s3766_s13  ;;  %1247 = vmatpush.msra.mxu3 %v4495_v17  ;;  %v1116_v35 = vsub.f32 %v4515_v9, %v1115_v63  ;;  %v1123_v25 = vand.u32 4294901760, %v1122_v23  ;;  %s3770_s13 = smov 96  }
 0x15d   : > { %v1099_v21 = vand.u32 4294901760, %v1098_v8  ;;  %1022 = vmatpush.msra.mxu0 %v4495_v17  ;;  %1186 = vmatpush.msra.mxu2 %v4511_v14 }
 0x15e   : > { %v4433_v46 = vpop.permute.xlu2 %925  ;;  %1249 = vmatpush.msra.mxu3 %v4503_v42  ;;  %v1117_v40 = vand.u32 4294901760, %v1116_v35 }
 0x15f   : > { %1100 = vmatpush.msra.mxu1 %v1099_v21  ;;  %1024 = vmatpush.msra.mxu0 %v4503_v42 }
 0x160   : > { %1189 = vmatpush.msra.mxu2 %v4515_v9  ;;  %1251 = vmatpush.msra.mxu3 %v4505_v6 }
 0x161   : > { %1106 = vmatpush.msra.mxu1 %v1105_v13  ;;  %1026 = vmatpush.msra.mxu0 %v4505_v6 }
 0x162   : > { %1192 = vmatpush.msra.mxu2 %v4518_v7  ;;  %1253 = vmatpush.msra.mxu3 %v4507_v61 }
 0x163   : > { %v4450_v52 = vpop.permute.xlu1 %852  ;;  %v4452_v30 = vpop.permute.xlu0 %927  ;;  %1028 = vmatpush.msra.mxu0 %v4507_v61  ;;  %1112 = vmatpush.msra.mxu1 %v1111_v24 }
 0x164   : > { %959 = vrot.lane.b32.xlu2 %v752_v54, %s3767_s14  ;;  %1195 = vmatpush.msra.mxu2 %v4521_v60  ;;  %v1139_v54 = vand.u32 4294901760, %v1138_v47 }
 0x165   : > { %1255 = vmatpush.msra.mxu3 %v4549_v37  ;;  %1030 = vmatpush.msra.mxu0 %v4549_v37 }
 0x166   : > { %v768_v4 = vpop.permute.xlu2 %767  ;;  %1118 = vmatpush.msra.mxu1 %v1117_v40  ;;  %1198 = vmatpush.msra.mxu2 %v1132_v45  ;;  %v1140_v8 = vsub.f32 %v1138_v47, %v1139_v54 }
 0x167   : > { %782 = vst.msk [vmem:[#allocation2 + $0x20] sm:$0xff] %vm777_vm8, %v768_v4  ;;  %v1134_v4 = vsub.f32 %v1132_v45, %v1133_v51  ;;  %1257 = vmatpush.msra.mxu3 %v4557_v16  ;;  %1032 = vmatpush.msra.mxu0 %v4557_v16 }
 0x168   : > { %1124 = vmatpush.msra.mxu1 %v1123_v25  ;;  %1201 = vmatpush.msra.mxu2 %v1138_v47 }
 0x169   : > { %v1135_v57 = vand.u32 4294901760, %v1134_v4  ;;  %1305 = vmatpush.msrb.mxu0 %v1091_v56 }
 0x16a   : > { %1130 = vmatpush.msra.mxu1 %v1129_v48 }
 0x16b   : > { %v4501_v26 = vpop.permute.xlu1 %929  ;;  %v770_v18 = vpop.permute.xlu0 %769  ;;  %1309 = vmatpush.msrb.mxu0 %v1097_v58 }
 0x16c   : > { %783 = vst.msk [vmem:[#allocation2 + $0x28] sm:$0xff] %vm777_vm8, %v770_v18  ;;  %1136 = vmatpush.msra.mxu1 %v1135_v57 }
 0x16d   : > { %1313 = vmatpush.msrb.mxu0 %v1103_v3 }
 0x16e   : > { %v4531_v11 = vpop.permute.xlu2 %854 }
 0x16f   : > { %1317 = vmatpush.msrb.mxu0 %v1109_v10 }
 0x171   : > { %1321 = vmatpush.msrb.mxu0 %v1115_v63 }
 0x173   : > { %v822_v39 = vpop.permute.xlu1 %821  ;;  %v791_v0 = vpop.permute.xlu0 %790  ;;  %1325 = vmatpush.msrb.mxu0 %v1121_v55 }
 0x174   : > { %809 = vst.msk [vmem:[#allocation2] sm:$0xff] %vm808_vm11, %v791_v0 }
 0x175   : > { %840 = vst.msk [vmem:[#allocation2] sm:$0xff] %vm839_vm12, %v822_v39  ;;  %1329 = vmatpush.msrb.mxu0 %v1127_v19 }
 0x176   : > { %865 = vst.msk [vmem:[#allocation2] sm:$0xff] %vm864_vm13, %v4410_v1  ;;  %v4572_v5 = vpop.permute.xlu2 %931  ;;  %v1141_v1 = vand.u32 4294901760, %v1140_v8 }
 0x177   : > { %1333 = vmatpush.msrb.mxu0 %v1133_v51 }
 0x178   : > { %1142 = vmatpush.msra.mxu1 %v1141_v1 }
 0x179   : > { %1337 = vmatpush.msrb.mxu0 %v1139_v54 }
 0x17a   : > { %1371 = vmatpush.msrb.mxu1 %v4444_v49 }
 0x17b   : > { %v793_v12 = vpop.permute.xlu1 %792  ;;  %v873_v15 = vpop.permute.xlu0 %872 }
 0x17c   : > { %810 = vst.msk [vmem:[#allocation2 + $0x8] sm:$0xff] %vm808_vm11, %v793_v12  ;;  %1373 = vmatpush.msrb.mxu1 %v4446_v50 }
 0x17d   : > { %891 = vst.msk [vmem:[#allocation2] sm:$0xff] %vm890_vm14, %v873_v15 }
 0x17e   : > { %v899_v59 = vpop.permute.xlu2 %898  ;;  %1375 = vmatpush.msrb.mxu1 %v4448_v2 }
 0x17f   : > { %917 = vst.msk [vmem:[#allocation2] sm:$0xff] %vm916_vm1, %v899_v59 }
 0x180   : > { %942 = vst.msk [vmem:[#allocation2] sm:$0xff] %vm941_vm2, %v4421_v34  ;;  %1377 = vmatpush.msrb.mxu1 %v4495_v17 }
 0x182   : > { %1379 = vmatpush.msrb.mxu1 %v4503_v42 }
 0x183   : > { %v875_v31 = vpop.permute.xlu1 %874  ;;  %v950_v43 = vpop.permute.xlu0 %949 }
 0x184   : > { %968 = vst.msk [vmem:[#allocation2] sm:$0xff] %vm967_vm3, %v950_v43  ;;  %1381 = vmatpush.msrb.mxu1 %v4505_v6 }
 0x186   : > { %v795_v49 = vpop.permute.xlu2 %794  ;;  %1383 = vmatpush.msrb.mxu1 %v4507_v61 }
 0x187   : > { %811 = vst.msk [vmem:[#allocation2 + $0x10] sm:$0xff] %vm808_vm11, %v795_v49 }
 0x188   : > { %1385 = vmatpush.msrb.mxu1 %v4549_v37 }
 0x18a   : > { %1387 = vmatpush.msrb.mxu1 %v4557_v16 }
 0x18b   : > { %v952_v34 = vpop.permute.xlu1 %951  ;;  %v824_v50 = vpop.permute.xlu0 %823  ;;  %v974_v2 = vld [vmem:[#allocation2] sm:$0xff] }
 0x18c   : > { %841 = vst.msk [vmem:[#allocation2 + $0x8] sm:$0xff] %vm839_vm12, %v824_v50  ;;  %v991_v56 = vsel %vm989_vm4, %v974_v2, 0 }
 0x18d   : > { %866 = vst.msk [vmem:[#allocation2 + $0x8] sm:$0xff] %vm864_vm13, %v4426_v36  ;;  %v4606_v58 = vand.u32 4294901760, %v991_v56 }
 0x18e   : > { %892 = vst.msk [vmem:[#allocation2 + $0x8] sm:$0xff] %vm890_vm14, %v875_v31  ;;  %v877_v53 = vpop.permute.xlu2 %876 }
 0x18f   : > { %1144 = vmatmul.f32.vlgmr.msra.gmra.mxu1 %v4606_v58  ;;  %v1034_v3 = vsub.f32 %v991_v56, %v4606_v58 }
 0x191   : > { %1204 = vmatmul.f32.vlgmr.msra.gmra.mxu2 %v1034_v3  ;;  %v1035_v20 = vand.u32 4294901760, %v1034_v3 }
 0x193   : > { %v826_v21 = vpop.permute.xlu1 %825  ;;  %1261 = vmatmul.f32.vlgmr.msra.gmra.mxu3 %v1035_v20  ;;  %v901_v17 = vpop.permute.xlu0 %900  ;;  %v1036_v22 = vsub.f32 %v1034_v3, %v1035_v20 }
 0x194   : > { %842 = vst.msk [vmem:[#allocation2 + $0x10] sm:$0xff] %vm839_vm12, %v826_v21 }
 0x195   : > { %867 = vst.msk [vmem:[#allocation2 + $0x10] sm:$0xff] %vm864_vm13, %v4429_v44  ;;  %v1037_v36 = vand.u32 4294901760, %v1036_v22 }
 0x196   : > { %893 = vst.msk [vmem:[#allocation2 + $0x10] sm:$0xff] %vm890_vm14, %v877_v53  ;;  %v954_v18 = vpop.permute.xlu2 %953 }
 0x197   : > { %918 = vst.msk [vmem:[#allocation2 + $0x8] sm:$0xff] %vm916_vm1, %v901_v17  ;;  %1038 = vmatmul.f32.vlgmr.msra.gmra.mxu0 %v1037_v36 }
 0x198   : > { %943 = vst.msk [vmem:[#allocation2 + $0x8] sm:$0xff] %vm941_vm2, %v4433_v46 }
 0x199   : > { %969 = vst.msk [vmem:[#allocation2 + $0x8] sm:$0xff] %vm967_vm3, %v952_v34 }
 0x19b   : > { %v903_v42 = vpop.permute.xlu1 %902  ;;  %v797_v6 = vpop.permute.xlu0 %796 }
 0x19c   : > { %919 = vst.msk [vmem:[#allocation2 + $0x10] sm:$0xff] %vm916_vm1, %v903_v42 }
 0x19d   : > { %944 = vst.msk [vmem:[#allocation2 + $0x10] sm:$0xff] %vm941_vm2, %v4452_v30 }
 0x19e   : > { %970 = vst.msk [vmem:[#allocation2 + $0x10] sm:$0xff] %vm967_vm3, %v954_v18  ;;  %v828_v44 = vpop.permute.xlu2 %827 }
 0x19f   : > { %812 = vst.msk [vmem:[#allocation2 + $0x18] sm:$0xff] %vm808_vm11, %v797_v6 }
 0x1a0   : > { %v975_v61 = vld [vmem:[#allocation2 + $0x8] sm:$0xff]  ;;  %843 = vst.msk [vmem:[#allocation2 + $0x18] sm:$0xff] %vm839_vm12, %v828_v44 }
 0x1a1   : > { %v994_v13 = vsel %vm989_vm4, %v975_v61, 0  ;;  %868 = vst.msk [vmem:[#allocation2 + $0x18] sm:$0xff] %vm864_vm13, %v4450_v52 }
 0x1a2   : > { %v4630_v46 = vand.u32 4294901760, %v994_v13 }
 0x1a3   : > { %v799_v14 = vpop.permute.xlu1 %798  ;;  %v879_v9 = vpop.permute.xlu0 %878 }
 0x1a4   : > { %1148 = vmatmul.f32.gmra.mxu1 %v4630_v46  ;;  %813 = vst.msk [vmem:[#allocation2 + $0x20] sm:$0xff] %vm808_vm11, %v799_v14  ;;  %v1042_v30 = vsub.f32 %v994_v13, %v4630_v46 }
 0x1a5   : > { %894 = vst.msk [vmem:[#allocation2 + $0x18] sm:$0xff] %vm890_vm14, %v879_v9  ;;  %v976_v7 = vld [vmem:[#allocation2 + $0x10] sm:$0xff] }
 0x1a6   : > { %1209 = vmatmul.f32.gmra.mxu2 %v1042_v30  ;;  %v1043_v60 = vand.u32 4294901760, %v1042_v30  ;;  %v997_v10 = vsel %vm989_vm4, %v976_v7, 0  ;;  %v905_v52 = vpop.permute.xlu2 %904 }
 0x1a7   : > { %v4637_v63 = vand.u32 4294901760, %v997_v10  ;;  %920 = vst.msk [vmem:[#allocation2 + $0x18] sm:$0xff] %vm916_vm1, %v905_v52 }
 0x1a8   : > { %1267 = vmatmul.f32.gmra.mxu3 %v1043_v60  ;;  %v1044_v55 = vsub.f32 %v1042_v30, %v1043_v60  ;;  %945 = vst.msk [vmem:[#allocation2 + $0x18] sm:$0xff] %vm941_vm2, %v4501_v26 }
 0x1a9   : > { %v1050_v19 = vsub.f32 %v997_v10, %v4637_v63 }
 0x1aa   : > { %v1045_v27 = vand.u32 4294901760, %v1044_v55 }
 0x1ab   : > { %v881_v28 = vpop.permute.xlu1 %880  ;;  %v956_v32 = vpop.permute.xlu0 %955  ;;  %v1051_v35 = vand.u32 4294901760, %v1050_v19 }
 0x1ac   : > { %1046 = vmatmul.f32.gmra.mxu0 %v1045_v27  ;;  %1152 = vmatmul.f32.gmra.mxu1 %v4637_v63  ;;  %971 = vst.msk [vmem:[#allocation2 + $0x18] sm:$0xff] %vm967_vm3, %v956_v32 }
 0x1ad   : > { %v1052_v23 = vsub.f32 %v1050_v19, %v1051_v35 }
 0x1ae   : > { %1214 = vmatmul.f32.gmra.mxu2 %v1050_v19  ;;  %v801_v37 = vpop.permute.xlu2 %800  ;;  %v4682_v19 = vld [vmem:[%s250_s30] ss:$0 sm:$0xff]  ;;  %s3455_s30 = sshll.u32 %s3747_s22, 1 }
 0x1af   : > { %v1053_v24 = vand.u32 4294901760, %v1052_v23  ;;  %814 = vst.msk [vmem:[#allocation2 + $0x28] sm:$0xff] %vm808_vm11, %v801_v37  ;;  %s3336_s27 = sadd.s32 %s3743_s21, %s3455_s30 }
 0x1b0   : > { %1273 = vmatmul.f32.gmra.mxu3 %v1051_v35  ;;  %s3456_s12 = sshll.u32 %s3336_s27, 2 }
 0x1b1   : > { %s3338_s16 = scalar_lea.hbm %s5800_s5, %s3456_s12 }
 0x1b2   : > { %s3342_s17 = sshll.u32 %s3338_s16, 4  ;;  %s3343_s17 = int_to_ptr.hbm [resolvable:$true] %s3342_s17 }
 0x1b3   : > { %v958_v33 = vpop.permute.xlu1 %957  ;;  %v830_v16 = vpop.permute.xlu0 %829  ;;  %v977_v39 = vld [vmem:[#allocation2 + $0x18] sm:$0xff] }
 0x1b4   : > { %1054 = vmatmul.f32.gmra.mxu0 %v1053_v24  ;;  %844 = vst.msk [vmem:[#allocation2 + $0x20] sm:$0xff] %vm839_vm12, %v830_v16  ;;  %v1000_v26 = vsel %vm989_vm4, %v977_v39, 0 }
 0x1b5   : > { %869 = vst.msk [vmem:[#allocation2 + $0x20] sm:$0xff] %vm864_vm13, %v4531_v11  ;;  %v1057_v0 = vand.u32 4294901760, %v1000_v26 }
 0x1b6   : > { %895 = vst.msk [vmem:[#allocation2 + $0x20] sm:$0xff] %vm890_vm14, %v881_v28  ;;  %v883_v11 = vpop.permute.xlu2 %882 }
 0x1b7   : > { %1156 = vmatmul.f32.gmra.mxu1 %v1057_v0  ;;  %v1058_v40 = vsub.f32 %v1000_v26, %v1057_v0 }
 0x1b9   : > { %1219 = vmatmul.f32.gmra.mxu2 %v1058_v40  ;;  %v1059_v45 = vand.u32 4294901760, %v1058_v40 }
 0x1bb   : > { %v832_v25 = vpop.permute.xlu1 %831  ;;  %1279 = vmatmul.f32.gmra.mxu3 %v1059_v45  ;;  %v907_v47 = vpop.permute.xlu0 %906  ;;  %v1060_v51 = vsub.f32 %v1058_v40, %v1059_v45 }
 0x1bc   : > { %845 = vst.msk [vmem:[#allocation2 + $0x28] sm:$0xff] %vm839_vm12, %v832_v25 }
 0x1bd   : > { %921 = vst.msk [vmem:[#allocation2 + $0x20] sm:$0xff] %vm916_vm1, %v907_v47  ;;  %v1061_v48 = vand.u32 4294901760, %v1060_v51 }
 0x1be   : > { %946 = vst.msk [vmem:[#allocation2 + $0x20] sm:$0xff] %vm941_vm2, %v4572_v5  ;;  %v960_v5 = vpop.permute.xlu2 %959 }
 0x1bf   : > { %972 = vst.msk [vmem:[#allocation2 + $0x20] sm:$0xff] %vm967_vm3, %v958_v33  ;;  %1062 = vmatmul.f32.gmra.mxu0 %v1061_v48 }
 0x1c3   : > { %v857_v54 = vpop.permute.xlu0 %856  ;;  %v909_v4 = vpop.permute.xlu1 %908 }
 0x1c4   : > { %870 = vst.msk [vmem:[#allocation2 + $0x28] sm:$0xff] %vm864_vm13, %v857_v54 }
 0x1c5   : > { %896 = vst.msk [vmem:[#allocation2 + $0x28] sm:$0xff] %vm890_vm14, %v883_v11 }
 0x1c6   : > { %922 = vst.msk [vmem:[#allocation2 + $0x28] sm:$0xff] %vm916_vm1, %v909_v4  ;;  %v978_v8 = vld [vmem:[#allocation2 + $0x20] sm:$0xff] }
 0x1c7   : > { %v1003_v57 = vsel %vm989_vm4, %v978_v8, 0 }
 0x1c8   : > { %v1065_v1 = vand.u32 4294901760, %v1003_v57 }
 0x1ca   : > { %1160 = vmatmul.f32.gmra.mxu1 %v1065_v1  ;;  %v1066_v12 = vsub.f32 %v1003_v57, %v1065_v1 }
 0x1cb   : > { %v934_v15 = vpop.permute.xlu0 %933 }
 0x1cc   : > { %1224 = vmatmul.f32.gmra.mxu2 %v1066_v12  ;;  %947 = vst.msk [vmem:[#allocation2 + $0x28] sm:$0xff] %vm941_vm2, %v934_v15  ;;  %v1067_v59 = vand.u32 4294901760, %v1066_v12 }
 0x1cd   : > { %973 = vst.msk [vmem:[#allocation2 + $0x28] sm:$0xff] %vm967_vm3, %v960_v5 }
 0x1ce   : > { %1285 = vmatmul.f32.gmra.mxu3 %v1067_v59  ;;  %v1068_v31 = vsub.f32 %v1066_v12, %v1067_v59 }
 0x1d0   : > { %v1069_v43 = vand.u32 4294901760, %v1068_v31 }
 0x1d2   : > { %1070 = vmatmul.f32.gmra.mxu0 %v1069_v43 }
 0x1d4   : > { %v979_v49 = vld [vmem:[#allocation2 + $0x28] sm:$0xff] }
 0x1d5   : > { %v1006_v34 = vsel %vm989_vm4, %v979_v49, 0 }
 0x1d6   : > { %v1073_v50 = vand.u32 4294901760, %v1006_v34 }
 0x1d8   : > { %1164 = vmatmul.f32.gmra.mxu1 %v1073_v50  ;;  %v1074_v2 = vsub.f32 %v1006_v34, %v1073_v50 }
 0x1da   : > { %1229 = vmatmul.f32.gmra.mxu2 %v1074_v2  ;;  %v1075_v56 = vand.u32 4294901760, %v1074_v2 }
 0x1dc   : > { %1291 = vmatmul.f32.gmra.mxu3 %v1075_v56  ;;  %v1076_v3 = vsub.f32 %v1074_v2, %v1075_v56  ;;  %v1549_v2 = vlaneseq }
 0x1de   : > { %v1077_v53 = vand.u32 4294901760, %v1076_v3 }
 0x1e0   : > { %1078 = vmatmul.f32.gmra.mxu0 %v1077_v53  ;;  %1389 = vmatmul.f32.vlgmr.msrb.gmra.mxu1 %v4606_v58 }
 0x1e8   : > { %1339 = vmatmul.f32.vlgmr.msrb.gmra.mxu0 %v4606_v58  ;;  %1393 = vmatmul.f32.gmra.mxu1 %v4630_v46 }
 0x1f0   : > { %1343 = vmatmul.f32.gmra.mxu0 %v4630_v46  ;;  %1397 = vmatmul.f32.gmra.mxu1 %v4637_v63 }
 0x1f8   : > { %1347 = vmatmul.f32.gmra.mxu0 %v4637_v63  ;;  %1401 = vmatmul.f32.gmra.mxu1 %v1057_v0 }
 0x200   : > { %1351 = vmatmul.f32.gmra.mxu0 %v1057_v0  ;;  %1405 = vmatmul.f32.gmra.mxu1 %v1065_v1 }
 0x208   : > { %1355 = vmatmul.f32.gmra.mxu0 %v1065_v1  ;;  %1409 = vmatmul.f32.gmra.mxu1 %v1073_v50 }
 0x20c   : > { %v1145_v20 = vpop.f32.mrf.mxu1 }
 0x210   : > { %1359 = vmatmul.f32.gmra.mxu0 %v1073_v50 }
 0x214   : > { %v1039_v21 = vpop.f32.mrf.mxu0  ;;  %v1205_v46 = vpop.f32.mrf.mxu2 }
 0x215   : > { %v1146_v13 = vadd.f32 %v1145_v20, %v1039_v21 }
 0x216   : > { %v1262_v7 = vpop.f32.mrf.mxu3 }
 0x217   : > { %v1206_v30 = vadd.f32 %v1205_v46, %v1146_v13 }
 0x219   : > { %v1263_v60 = vadd.f32 %v1262_v7, %v1206_v30 }
 0x221   : > { %v1149_v17 = vpop.f32.mrf.mxu1 }
 0x229   : > { %v1047_v22 = vpop.f32.mrf.mxu0  ;;  %v1153_v36 = vpop.f32.mrf.mxu1 }
 0x22a   : > { %v1150_v10 = vadd.f32 %v1149_v17, %v1047_v22  ;;  %v1210_v63 = vpop.f32.mrf.mxu2  ;;  %v1550_v17 = vshrl.u32 %v1549_v2, 7 }
 0x22b   : > { %v1268_v32 = vpop.f32.mrf.mxu3 }
 0x22c   : > { %v1211_v28 = vadd.f32 %v1210_v63, %v1150_v10 }
 0x22e   : > { %v1269_v37 = vadd.f32 %v1268_v32, %v1211_v28 }
 0x231   : > { %v1055_v58 = vpop.f32.mrf.mxu0 }
 0x232   : > { %v1154_v24 = vadd.f32 %v1153_v36, %v1055_v58  ;;  %v1215_v39 = vpop.f32.mrf.mxu2  ;;  %v1552_v58 = vstv %s3449_s9 }
 0x233   : > { %v1274_v25 = vpop.f32.mrf.mxu3 }
 0x234   : > { %v1157_v18 = vpop.f32.mrf.mxu1  ;;  %v1216_v0 = vadd.f32 %v1215_v39, %v1154_v24 }
 0x236   : > { %v1275_v48 = vadd.f32 %v1274_v25, %v1216_v0 }
 0x23c   : > { %v1063_v42 = vpop.f32.mrf.mxu0  ;;  %v1220_v57 = vpop.f32.mrf.mxu2 }
 0x23d   : > { %v1158_v11 = vadd.f32 %v1157_v18, %v1063_v42  ;;  %v1553_v42 = vadd.s32 %v1552_v58, %v1550_v17 }
 0x23e   : > { %v1280_v5 = vpop.f32.mrf.mxu3 }
 0x23f   : > { %v1221_v12 = vadd.f32 %v1220_v57, %v1158_v11  ;;  %vm1554_vm6 = vcmp.ge.s32.totalorder %v1553_v42, 0  ;;  %vm1555_vm7 = vcmp.lt.s32.totalorder %v1553_v42, 8 }
 0x240   : > { %vm1556_vm8 = vmand %vm1554_vm6, %vm1555_vm7 }
 0x241   : > { %v1281_v34 = vadd.f32 %v1280_v5, %v1221_v12 }
 0x247   : > { %v1161_v6 = vpop.f32.mrf.mxu1 }
 0x24f   : > { %v1071_v44 = vpop.f32.mrf.mxu0  ;;  %v1225_v20 = vpop.f32.mrf.mxu2 }
 0x250   : > { %v1162_v31 = vadd.f32 %v1161_v6, %v1071_v44 }
 0x251   : > { %v1286_v13 = vpop.f32.mrf.mxu3 }
 0x252   : > { %v1226_v36 = vadd.f32 %v1225_v20, %v1162_v31 }
 0x254   : > { %v1287_v30 = vadd.f32 %v1286_v13, %v1226_v36 }
 0x255   : > { %v4673_v61 = vpop.f32.mrf.mxu1 }
 0x25d   : > { %v4675_v14 = vpop.f32.mrf.mxu0  ;;  %v1390_v9 = vpop.f32.mrf.mxu1 }
 0x25e   : > { %v1166_v7 = vadd.f32 %v4673_v61, %v4675_v14  ;;  %v1230_v39 = vpop.f32.mrf.mxu2 }
 0x265   : > { %v1340_v52 = vpop.f32.mrf.mxu0  ;;  %v1394_v27 = vpop.f32.mrf.mxu1 }
 0x266   : > { %v1341_v55 = vadd.f32 %v1340_v52, %v1263_v60  ;;  %v3769_v52 = vmov 0  }
 0x268   : > { %v1391_v35 = vadd.f32 %v1390_v9, %v1341_v55  ;;  %v4706_v55 = vsel %vm1556_vm8, 1, %v3769_v52 }
 0x269   : > { %v1558_v61 = vperm.slane %v4706_v55, 0 }
 0x26a   : > { %v4685_v23 = vmul.f32 %v4682_v19, %v1391_v35 }
 0x26b   : > { %vm1564_vm13 = vcmp.ne.s32.totalorder %v1558_v61, 0 }
 0x26c   : > { %v3443_v33 = vmul.f32 -1.442695, %v4685_v23 }
 0x26d   : > { %v1344_v16 = vpop.f32.mrf.mxu0  ;;  %v1398_v45 = vpop.f32.mrf.mxu1 }
 0x26e   : > { %3641 = vpow2.f32 %v3443_v33  ;;  %v1345_v26 = vadd.f32 %v1344_v16, %v1269_v37 }
 0x270   : > { %v1395_v40 = vadd.f32 %v1394_v27, %v1345_v26  ;;  %v1231_v26 = vadd.f32 %v1230_v39, %v1166_v7 }
 0x272   : > { %v4689_v47 = vmul.f32 %v4682_v19, %v1395_v40 }
 0x274   : > { %v3642_v51 = vpop.eup %3641  ;;  %v3444_v54 = vmul.f32 -1.442695, %v4689_v47 }
 0x275   : > { %v1441_v4 = vadd.f32 1.0, %v3642_v51  ;;  %v1348_v8 = vpop.f32.mrf.mxu0  ;;  %v1402_v43 = vpop.f32.mrf.mxu1 }
 0x276   : > { %3643 = vpow2.f32 %v3444_v54  ;;  %v1349_v1 = vadd.f32 %v1348_v8, %v1275_v48  ;;  %v1292_v54 = vpop.f32.mrf.mxu3 }
 0x277   : > { %3645 = vrcp.f32 %v1441_v4  ;;  %v1458_v44 = vand.u32 2147483648, %v1441_v4  ;;  %v1456_v60 = vand.u32 2147483647, %v1441_v4  ;;  %vm1452_vm9 = vweird.f32 %v1441_v4 }
 0x278   : > { %v1399_v15 = vadd.f32 %v1398_v45, %v1349_v1  ;;  %v1293_v1 = vadd.f32 %v1292_v54, %v1231_v26 }
 0x279   : > { %v1459_v24 = vor.u32 1.1754944e-38, %v1458_v44  ;;  %vm1457_vm12 = vcmp.eq.f32.partialorder %v1456_v60, 8.507059e+37 }
 0x27a   : > { %v4694_v59 = vmul.f32 %v4682_v19, %v1399_v15 }
 0x27c   : > { %v3644_v49 = vpop.eup %3643  ;;  %v3445_v50 = vmul.f32 -1.442695, %v4694_v59 }
 0x27d   : > { %v3646_v56 = vpop.eup %3645  ;;  %v4697_v3 = vadd.f32 1.0, %v3644_v49  ;;  %v1352_v53 = vpop.f32.mrf.mxu0 }
 0x27e   : > { %3647 = vpow2.f32 %v3445_v50  ;;  %v1353_v21 = vadd.f32 %v1352_v53, %v1281_v34  ;;  %v1448_v22 = vmul.f32 %v3646_v56, %v1441_v4  ;;  %vm1453_vm5 = vweird.f32 %v3646_v56  ;;  %v1406_v35 = vpop.f32.mrf.mxu1 }
 0x27f   : > { %3649 = vrcp.f32 %v4697_v3  ;;  %vm1454_vm11 = vmor %vm1452_vm9, %vm1453_vm5  ;;  %v1471_v11 = vand.u32 2147483647, %v4697_v3  ;;  %v1473_v8 = vand.u32 2147483648, %v4697_v3  ;;  %vm1467_vm14 = vweird.f32 %v4697_v3 }
 0x280   : > { %v1403_v18 = vadd.f32 %v1402_v43, %v1353_v21  ;;  %v1449_v6 = vsub.f32 1.0, %v1448_v22  ;;  %vm1630_vm5 = vcmask 261120  }
 0x281   : > { %vm4726_vm2 = vcmp.eq.f32.partialorder %v1471_v11, 8.507059e+37  ;;  %v1474_v20 = vor.u32 1.1754944e-38, %v1473_v8 }
 0x282   : > { %v4701_v46 = vmul.f32 %v4682_v19, %v1403_v18  ;;  %v1450_v9 = vmul.f32 %v3646_v56, %v1449_v6  ;;  %v1559_v18 = vperm.slane %v4706_v55, 1 }
 0x284   : > { %v3648_v10 = vpop.eup %3647  ;;  %v3446_v63 = vmul.f32 -1.442695, %v4701_v46  ;;  %v1451_v27 = vadd.f32 %v3646_v56, %v1450_v9  ;;  %vm1565_vm8 = vcmp.ne.s32.totalorder %v1559_v18, 0 }
 0x285   : > { %v3650_v28 = vpop.eup %3649  ;;  %v4708_v32 = vadd.f32 1.0, %v3648_v10  ;;  %v1356_v37 = vpop.f32.mrf.mxu0 }
 0x286   : > { %3651 = vpow2.f32 %v3446_v63  ;;  %v1357_v14 = vadd.f32 %v1356_v37, %v1287_v30  ;;  %v1455_v33 = vsel %vm1454_vm11, %v3646_v56, %v1451_v27  ;;  %v1463_v16 = vmul.f32 %v3650_v28, %v4697_v3  ;;  %v1410_v53 = vpop.f32.mrf.mxu1 }
 0x287   : > { %3653 = vrcp.f32 %v4708_v32  ;;  %v1460_v40 = vsel %vm1457_vm12, %v1459_v24, %v1455_v33  ;;  %vm1468_vm1 = vweird.f32 %v3650_v28  ;;  %v1486_v2 = vand.u32 2147483647, %v4708_v32 }
 0x288   : > { %v1407_v0 = vadd.f32 %v1406_v35, %v1357_v14  ;;  %v1464_v45 = vsub.f32 1.0, %v1463_v16  ;;  %v1537_v25 = vmul.f32 %v1460_v40, %v4685_v23  ;;  %v1488_v56 = vand.u32 2147483648, %v4708_v32  ;;  %vm1469_vm3 = vmor %vm1467_vm14, %vm1468_vm1 }
 0x289   : > { %vm1482_vm6 = vweird.f32 %v4708_v32  ;;  %vm1487_vm9 = vcmp.eq.f32.partialorder %v1486_v2, 8.507059e+37 }
 0x28a   : > { %v4716_v51 = vmul.f32 %v4682_v19, %v1407_v0  ;;  %v1465_v48 = vmul.f32 %v3650_v28, %v1464_v45  ;;  %v1543_v4 = vmul.f32 1.6778524, %v1537_v25  ;;  %v1489_v60 = vor.u32 1.1754944e-38, %v1488_v56 }
 0x28c   : > { %v3652_v57 = vpop.eup %3651  ;;  %v3447_v12 = vmul.f32 -1.442695, %v4716_v51  ;;  %v1582_v31 = vsel %vm1564_vm13, %v1543_v4, 0.0  ;;  %v1466_v43 = vadd.f32 %v3650_v28, %v1465_v48 }
 0x28d   : > { %v3654_v15 = vpop.eup %3653  ;;  %v4722_v5 = vadd.f32 1.0, %v3652_v57  ;;  %v1360_v23 = vpop.f32.mrf.mxu0  ;;  %1635 = vrot.lane.b32.xlu1 %v1582_v31, %s3763_s8  ;;  %v1594_v22 = vrot.slane %v1582_v31, 1  ;;  %v1606_v36 = vrot.slane %v1582_v31, 7  ;;  %v1561_v57 = vperm.slane %v4706_v55, 3 }
 0x28e   : > { %v1478_v49 = vmul.f32 %v3654_v15, %v4708_v32  ;;  %3655 = vpow2.f32 %v3447_v12  ;;  %v1361_v34 = vadd.f32 %v1360_v23, %v1293_v1  ;;  %vm1483_vm4 = vweird.f32 %v3654_v15 }
 0x28f   : > { %3657 = vrcp.f32 %v4722_v5  ;;  %v1470_v58 = vsel %vm1469_vm3, %v3650_v28, %v1466_v43  ;;  %v1624_v44 = vsel %vm744_vm10, %v1594_v22, %v1606_v36  ;;  %v1618_v3 = vsel %vm735_vm15, %v1594_v22, %v1606_v36  ;;  %vm1484_vm7 = vmor %vm1482_vm6, %vm1483_vm4 }
 0x290   : > { %v1479_v21 = vsub.f32 1.0, %v1478_v49  ;;  %v1411_v17 = vadd.f32 %v1410_v53, %v1361_v34  ;;  %v1475_v13 = vsel %vm4726_vm2, %v1474_v20, %v1470_v58  ;;  %1656 = vrot.lane.b32.xlu0 %v1624_v44, %s3767_s14  ;;  %1631 = vst.msk [vmem:[#allocation3] sm:$0xff] %vm1630_vm5, %v1618_v3  ;;  %v1503_v24 = vand.u32 2147483648, %v4722_v5 }
 0x291   : > { %v1538_v9 = vmul.f32 %v1475_v13, %v4689_v47  ;;  %v1560_v47 = vperm.slane %v4706_v55, 2  ;;  %v1501_v39 = vand.u32 2147483647, %v4722_v5  ;;  %vm1497_vm13 = vweird.f32 %v4722_v5 }
 0x292   : > { %v1480_v42 = vmul.f32 %v3654_v15, %v1479_v21  ;;  %v4738_v6 = vmul.f32 %v4682_v19, %v1411_v17  ;;  %v1504_v25 = vor.u32 1.1754944e-38, %v1503_v24  ;;  %vm1567_vm2 = vcmp.ne.s32.totalorder %v1561_v57, 0 }
 0x293   : > { %v1544_v52 = vmul.f32 1.6778524, %v1538_v9  ;;  %vm1566_vm11 = vcmp.ne.s32.totalorder %v1560_v47, 0  ;;  %vm1502_vm1 = vcmp.eq.f32.partialorder %v1501_v39, 8.507059e+37  ;;  %v1562_v21 = vperm.slane %v4706_v55, 4 }
 0x294   : > { %v3656_v30 = vpop.eup %3655  ;;  %v1481_v7 = vadd.f32 %v3654_v15, %v1480_v42  ;;  %v3448_v10 = vmul.f32 -1.442695, %v4738_v6  ;;  %v1563_v47 = vperm.slane %v4706_v55, 5 }
 0x295   : > { %v3658_v19 = vpop.eup %3657  ;;  %v4750_v63 = vadd.f32 1.0, %v3656_v30  ;;  %v1583_v61 = vsel %vm1565_vm8, %v1544_v52, 0.0  ;;  %vm1568_vm8 = vcmp.ne.s32.totalorder %v1562_v21, 0 }
 0x296   : > { %v1485_v27 = vsel %vm1484_vm7, %v3654_v15, %v1481_v7  ;;  %v1493_v28 = vmul.f32 %v3658_v19, %v4722_v5  ;;  %3659 = vpow2.f32 %v3448_v10  ;;  %1637 = vrot.lane.b32.xlu1 %v1583_v61, %s3763_s8  ;;  %v1595_v14 = vrot.slane %v1583_v61, 1  ;;  %1694 = vst.msk [vmem:[#allocation3 + $0x8] sm:$0xff] %vm1630_vm5, %v1583_v61 }
 0x297   : > { %v1490_v32 = vsel %vm1487_vm9, %v1489_v60, %v1485_v27  ;;  %3661 = vrcp.f32 %v4750_v63  ;;  %v1607_v33 = vrot.slane %v1583_v61, 7  ;;  %vm1498_vm12 = vweird.f32 %v3658_v19  ;;  %v1779_v61 = vld [vmem:[%s5798_s3 + $0x78] sm:$0xff] }
 0x298   : > { %v1539_v35 = vmul.f32 %v1490_v32, %v4694_v59  ;;  %v1494_v37 = vsub.f32 1.0, %v1493_v28  ;;  %vm1499_vm14 = vmor %vm1497_vm13, %vm1498_vm12  ;;  %v1518_v43 = vand.u32 2147483648, %v4750_v63  ;;  %v1516_v2 = vand.u32 2147483647, %v4750_v63 }
 0x299   : > { %v1619_v0 = vsel %vm735_vm15, %v1595_v14, %v1607_v33  ;;  %v4762_v59 = vsel %vm744_vm10, %v1595_v14, %v1607_v33  ;;  %vm1512_vm4 = vweird.f32 %v4750_v63 }
 0x29a   : > { %v1495_v16 = vmul.f32 %v3658_v19, %v1494_v37  ;;  %v1545_v26 = vmul.f32 1.6778524, %v1539_v35  ;;  %1677 = vrot.lane.b32.xlu2 %v1619_v0, %s3770_s13  ;;  %1632 = vst.msk [vmem:[#allocation3 + $0x18] sm:$0xff] %vm1630_vm5, %v1619_v0  ;;  %1658 = vrot.lane.b32.xlu0 %v4762_v59, %s3767_s14  ;;  %v1519_v20 = vor.u32 1.1754944e-38, %v1518_v43  ;;  %vm1517_vm7 = vcmp.eq.f32.partialorder %v1516_v2, 8.507059e+37  ;;  %v1776_v0 = vld [vmem:[%s5798_s3 + $0x60] sm:$0xff] }
 0x29c   : > { %v3660_v40 = vpop.eup %3659  ;;  %v1496_v45 = vadd.f32 %v3658_v19, %v1495_v16  ;;  %v4769_v48 = vsel %vm1566_vm11, %v1545_v26, 0.0  ;;  %v4849_v16 = vand.u32 4294901760, %v1779_v61  ;;  %v1777_v26 = vld [vmem:[%s5798_s3 + $0x68] sm:$0xff] }
 0x29d   : > { %v3662_v11 = vpop.eup %3661  ;;  %v4772_v54 = vadd.f32 1.0, %v3660_v40  ;;  %1695 = vst.msk [vmem:[#allocation3 + $0x20] sm:$0xff] %vm1630_vm5, %v4769_v48  ;;  %v1596_v4 = vrot.slane %v4769_v48, 1  ;;  %v1608_v8 = vrot.slane %v4769_v48, 7  ;;  %v4861_v40 = vand.u32 4294901760, %v1776_v0 }
 0x29e   : > { %v1500_v1 = vsel %vm1499_vm14, %v3658_v19, %v1496_v45  ;;  %v1508_v12 = vmul.f32 %v3662_v11, %v4750_v63  ;;  %1639 = vrot.lane.b32.xlu1 %v4769_v48, %s3763_s8  ;;  %vm1513_vm3 = vweird.f32 %v3662_v11  ;;  %vm1569_vm14 = vcmp.ne.s32.totalorder %v1563_v47, 0  ;;  %1813 = vmatpush.msrb.mxu2 %v4849_v16  ;;  %v1770_v47 = vld [vmem:[%s5798_s3 + $0x30] sm:$0xff] }
 0x29f   : > { %v1505_v15 = vsel %vm1502_vm1, %v1504_v25, %v1500_v1  ;;  %3663 = vrcp.f32 %v4772_v54  ;;  %v1620_v31 = vsel %vm735_vm15, %v1596_v4, %v1608_v8  ;;  %v4788_v49 = vsel %vm744_vm10, %v1596_v4, %v1608_v8  ;;  %vm1514_vm6 = vmor %vm1512_vm4, %vm1513_vm3  ;;  %2198 = vmatpush.msra.mxu1 %v4849_v16 }
 0x2a0   : > { %v1540_v5 = vmul.f32 %v1505_v15, %v4701_v46  ;;  %v1509_v23 = vsub.f32 1.0, %v1508_v12  ;;  %1633 = vst.msk [vmem:[#allocation3 + $0x30] sm:$0xff] %vm1630_vm5, %v1620_v31  ;;  %v1533_v3 = vand.u32 2147483648, %v4772_v54  ;;  %v1531_v60 = vand.u32 2147483647, %v4772_v54  ;;  %v1775_v15 = vld [vmem:[%s5798_s3 + $0x58] sm:$0xff] }
 0x2a1   : > { %1748 = vst.msk [vmem:[#allocation3 + $0x10] sm:$0xff] %vm1630_vm5, %v4788_v49  ;;  %vm1527_vm11 = vweird.f32 %v4772_v54  ;;  %v4866_v25 = vsub.f32 %v1779_v61, %v4849_v16  ;;  %v4877_v4 = vsub.f32 %v1776_v0, %v4861_v40  ;;  %vm1689_vm1 = vcmask 1048320  }
 0x2a2   : > { %v1546_v34 = vmul.f32 1.6778524, %v1540_v5  ;;  %v1510_v50 = vmul.f32 %v3662_v11, %v1509_v23  ;;  %1679 = vrot.lane.b32.xlu2 %v1620_v31, %s3770_s13  ;;  %1660 = vrot.lane.b32.xlu0 %v4788_v49, %s3767_s14  ;;  %v1534_v19 = vor.u32 1.1754944e-38, %v1533_v3  ;;  %vm1532_vm13 = vcmp.eq.f32.partialorder %v1531_v60, 8.507059e+37 }
 0x2a3   : > { %v1879_v8 = vand.u32 4294901760, %v4866_v25  ;;  %v1897_v12 = vand.u32 4294901760, %v4877_v4  ;;  %vm3241_vm3 = vcmask 1043459   ;;  %vm3311_vm4 = vcmask 130048  }
 0x2a4   : > { %v1511_v46 = vadd.f32 %v3662_v11, %v1510_v50  ;;  %v4797_v56 = vsel %vm1567_vm2, %v1546_v34, 0.0  ;;  %v4900_v50 = vand.u32 4294901760, %v1775_v15  ;;  %vm3238_vm2 = vcmask 1042434  }
 0x2a5   : > { %v3664_v53 = vpop.eup %3663  ;;  %1696 = vst.msk [vmem:[#allocation3 + $0x38] sm:$0xff] %vm1630_vm5, %v4797_v56  ;;  %v1597_v17 = vrot.slane %v4797_v56, 1  ;;  %v1609_v22 = vrot.slane %v4797_v56, 7  ;;  %v1880_v5 = vsub.f32 %v4866_v25, %v1879_v8  ;;  %2119 = vmatpush.msra.mxu0 %v1879_v8  ;;  %v1898_v34 = vsub.f32 %v4877_v4, %v1897_v12 }
 0x2a6   : > { %v1515_v36 = vsel %vm1514_vm6, %v3662_v11, %v1511_v46  ;;  %v1523_v58 = vmul.f32 %v3664_v53, %v4772_v54  ;;  %1641 = vrot.lane.b32.xlu1 %v4797_v56, %s3763_s8  ;;  %vm1528_vm9 = vweird.f32 %v3664_v53  ;;  %vm3314_vm6 = vcmask 392192  }
 0x2a7   : > { %v1520_v18 = vsel %vm1517_vm7, %v1519_v20, %v1515_v36  ;;  %v4806_v42 = vsel %vm735_vm15, %v1597_v17, %v1609_v22  ;;  %v4809_v44 = vsel %vm744_vm10, %v1597_v17, %v1609_v22  ;;  %vm1529_vm12 = vmor %vm1527_vm11, %vm1528_vm9  ;;  %v1881_v43 = vand.u32 4294901760, %v1880_v5  ;;  %v1773_v20 = vld [vmem:[%s5798_s3 + $0x48] sm:$0xff] }
 0x2a8   : > { %v1541_v13 = vmul.f32 %v1520_v18, %v4716_v51  ;;  %v1524_v9 = vsub.f32 1.0, %v1523_v58  ;;  %1634 = vst.msk [vmem:[#allocation3 + $0x48] sm:$0xff] %vm1630_vm5, %v4806_v42  ;;  %v4929_v17 = vand.u32 4294901760, %v1773_v20  ;;  %vm3316_vm7 = vcmask 523264  }
 0x2a9   : > { %1749 = vst.msk [vmem:[#allocation3 + $0x28] sm:$0xff] %vm1630_vm5, %v4809_v44  ;;  %1882 = vmatpush.msrb.mxu3 %v1881_v43  ;;  %vm3320_vm9 = vcmask 785408  }
 0x2aa   : > { %v1547_v30 = vmul.f32 1.6778524, %v1541_v13  ;;  %v1525_v7 = vmul.f32 %v3664_v53, %v1524_v9  ;;  %1681 = vrot.lane.b32.xlu2 %v4806_v42, %s3770_s13  ;;  %1662 = vrot.lane.b32.xlu0 %v4809_v44, %s3767_s14  ;;  %v4938_v58 = vsub.f32 %v1773_v20, %v4929_v17 }
 0x2ac   : > { %v4820_v10 = vsel %vm1568_vm8, %v1547_v30, 0.0  ;;  %v1526_v51 = vadd.f32 %v3664_v53, %v1525_v7  ;;  %v1772_v30 = vld [vmem:[%s5798_s3 + $0x40] sm:$0xff]  ;;  %v1771_v7 = vld [vmem:[%s5798_s3 + $0x38] sm:$0xff]  ;;  %vm3318_vm8 = vcmask 654336  }
 0x2ad   : > { %1697 = vst.msk [vmem:[#allocation3 + $0x50] sm:$0xff] %vm1630_vm5, %v4820_v10  ;;  %v1598_v63 = vrot.slane %v4820_v10, 1  ;;  %v1610_v52 = vrot.slane %v4820_v10, 7 }
 0x2ae   : > { %v1530_v27 = vsel %vm1529_vm12, %v3664_v53, %v1526_v51  ;;  %1699 = vrot.lane.b32.xlu1 %v4762_v59, %s3763_s8  ;;  %v4859_v59 = vand.u32 4294901760, %v1777_v26  ;;  %v4919_v53 = vsub.f32 %v1775_v15, %v4900_v50  ;;  %v4953_v51 = vand.u32 4294901760, %v1772_v30 }
 0x2af   : > { %v1535_v28 = vsel %vm1532_vm13, %v1534_v19, %v1530_v27  ;;  %v4833_v32 = vsel %vm744_vm10, %v1598_v63, %v1610_v52  ;;  %v1622_v37 = vsel %vm735_vm15, %v1598_v63, %v1610_v52  ;;  %v4955_v19 = vand.u32 4294901760, %v1771_v7 }
 0x2b0   : > { %v1542_v35 = vmul.f32 %v1535_v28, %v4738_v6  ;;  %1750 = vst.msk [vmem:[#allocation3 + $0x40] sm:$0xff] %vm1630_vm5, %v4833_v32  ;;  %v1778_v6 = vld [vmem:[%s5798_s3 + $0x70] sm:$0xff]  ;;  %v4873_v54 = vsub.f32 %v1777_v26, %v4859_v59  ;;  %v1903_v22 = vand.u32 4294901760, %v4919_v53  ;;  %v4959_v63 = vsub.f32 %v1772_v30, %v4953_v51  ;;  %v1767_v26 = vld [vmem:[%s5798_s3 + $0x18] sm:$0xff] }
 0x2b1   : > { %v4851_v39 = vand.u32 4294901760, %v1778_v6  ;;  %v4962_v52 = vsub.f32 %v1771_v7, %v4955_v19  ;;  %v4968_v27 = vand.u32 4294901760, %v1770_v47 }
 0x2b2   : > { %v1548_v24 = vmul.f32 1.6778524, %v1542_v35  ;;  %1683 = vrot.lane.b32.xlu2 %v1622_v37, %s3770_s13  ;;  %1716 = vrot.lane.b32.xlu0 %v1620_v31, %s3767_s14  ;;  %v1891_v1 = vand.u32 4294901760, %v4873_v54  ;;  %v1904_v18 = vsub.f32 %v4919_v53, %v1903_v22  ;;  %v1921_v28 = vand.u32 4294901760, %v4959_v63 }
 0x2b3   : > { %v4869_v11 = vsub.f32 %v1778_v6, %v4851_v39  ;;  %1815 = vmatpush.msrb.mxu2 %v4851_v39  ;;  %2200 = vmatpush.msra.mxu1 %v4851_v39  ;;  %v4975_v35 = vsub.f32 %v1770_v47, %v4968_v27 }
 0x2b4   : > { %v1587_v55 = vsel %vm1569_vm14, %v1548_v24, 0.0  ;;  %v1892_v31 = vsub.f32 %v4873_v54, %v1891_v1  ;;  %v1905_v13 = vand.u32 4294901760, %v1904_v18  ;;  %v1765_v18 = vld [vmem:[%s5798_s3 + $0x8] sm:$0xff] }
 0x2b5   : > { %v1599_v14 = vrot.slane %v1587_v55, 1  ;;  %v1611_v33 = vrot.slane %v1587_v55, 7  ;;  %v1885_v57 = vand.u32 4294901760, %v4869_v11  ;;  %1817 = vmatpush.msrb.mxu2 %v4859_v59  ;;  %2202 = vmatpush.msra.mxu1 %v4859_v59 }
 0x2b6   : > { %1701 = vrot.lane.b32.xlu1 %v4788_v49, %s3763_s8  ;;  %v1893_v2 = vand.u32 4294901760, %v1892_v31 }
 0x2b7   : > { %v1629_v45 = vsel %vm744_vm10, %v1599_v14, %v1611_v33  ;;  %v1886_v23 = vsub.f32 %v4869_v11, %v1885_v57  ;;  %1819 = vmatpush.msrb.mxu2 %v4861_v40  ;;  %2123 = vmatpush.msra.mxu0 %v1885_v57  ;;  %v1623_v46 = vsel %vm735_vm15, %v1599_v14, %v1611_v33  ;;  %v1769_v14 = vld [vmem:[%s5798_s3 + $0x28] sm:$0xff]  ;;  %v1768_v33 = vld [vmem:[%s5798_s3 + $0x20] sm:$0xff]  ;;  %v4996_v57 = vand.u32 4294901760, %v1767_v26 }
 0x2b8   : > { %1751 = vst.msk [vmem:[#allocation3 + $0x58] sm:$0xff] %vm1630_vm5, %v1629_v45  ;;  %2204 = vmatpush.msra.mxu1 %v4861_v40  ;;  %v4992_v45 = vand.u32 4294901760, %v1769_v14  ;;  %v4994_v8 = vand.u32 4294901760, %v1768_v33  ;;  %vm1647_vm15 = vcmask 523520   ;;  %vm1668_vm10 = vcmask 785920  }
 0x2b9   : > { %v1887_v49 = vand.u32 4294901760, %v1886_v23  ;;  %1821 = vmatpush.msrb.mxu2 %v4900_v50  ;;  %2127 = vmatpush.msra.mxu0 %v1891_v1  ;;  %v5007_v5 = vsub.f32 %v1767_v26, %v4996_v57 }
 0x2ba   : > { %1732 = vrot.lane.b32.xlu2 %v4769_v48, %s3770_s13  ;;  %1718 = vrot.lane.b32.xlu0 %v4806_v42, %s3767_s14  ;;  %v1899_v48 = vand.u32 4294901760, %v1898_v34  ;;  %v5004_v15 = vsub.f32 %v1768_v33, %v4994_v8 }
 0x2bb   : > { %1888 = vmatpush.msrb.mxu3 %v1887_v49  ;;  %2131 = vmatpush.msra.mxu0 %v1897_v12  ;;  %v4999_v12 = vsub.f32 %v1769_v14, %v4992_v45  ;;  %v1951_v43 = vand.u32 4294901760, %v5007_v5  ;;  %v1766_v49 = vld [vmem:[%s5798_s3 + $0x10] sm:$0xff]  ;;  %v1793_v14 = vld [vmem:[%s5798_s3 + $0xe8] sm:$0xff] }
 0x2bc   : > { %2206 = vmatpush.msra.mxu1 %v4900_v50  ;;  %v1945_v31 = vand.u32 4294901760, %v5004_v15  ;;  %v5017_v34 = vand.u32 4294901760, %v1766_v49 }
 0x2bd   : > { %1894 = vmatpush.msrb.mxu3 %v1893_v2  ;;  %2135 = vmatpush.msra.mxu0 %v1903_v22  ;;  %v1939_v23 = vand.u32 4294901760, %v4999_v12 }
 0x2be   : > { %1703 = vrot.lane.b32.xlu1 %v4809_v44, %s3763_s8  ;;  %v1915_v44 = vand.u32 4294901760, %v4938_v58 }
 0x2bf   : > { %1900 = vmatpush.msrb.mxu3 %v1899_v48  ;;  %v1940_v2 = vsub.f32 %v4999_v12, %v1939_v23  ;;  %v1946_v48 = vsub.f32 %v5004_v15, %v1945_v31 }
 0x2c0   : > { %v1916_v3 = vsub.f32 %v4938_v58, %v1915_v44 }
 0x2c1   : > { %1906 = vmatpush.msrb.mxu3 %v1905_v13  ;;  %v1941_v20 = vand.u32 4294901760, %v1940_v2  ;;  %v1947_v22 = vand.u32 4294901760, %v1946_v48  ;;  %v5035_v13 = vand.u32 4294901760, %v1765_v18 }
 0x2c2   : > { %1734 = vrot.lane.b32.xlu2 %v4797_v56, %s3770_s13  ;;  %1720 = vrot.lane.b32.xlu0 %v1622_v37, %s3767_s14  ;;  %v1774_v56 = vld [vmem:[%s5798_s3 + $0x50] sm:$0xff]  ;;  %v1922_v37 = vsub.f32 %v4959_v63, %v1921_v28 }
 0x2c3   : > { %v4927_v21 = vand.u32 4294901760, %v1774_v56  ;;  %v5042_v7 = vsub.f32 %v1765_v18, %v5035_v13 }
 0x2c4   : > { %v1923_v61 = vand.u32 4294901760, %v1922_v37 }
 0x2c5   : > { %1823 = vmatpush.msrb.mxu2 %v4927_v21  ;;  %v4934_v36 = vsub.f32 %v1774_v56, %v4927_v21  ;;  %2208 = vmatpush.msra.mxu1 %v4927_v21  ;;  %v5024_v56 = vsub.f32 %v1766_v49, %v5017_v34  ;;  %v1791_v49 = vld [vmem:[%s5798_s3 + $0xd8] sm:$0xff] }
 0x2c6   : > { %1705 = vrot.lane.b32.xlu1 %v4833_v32, %s3763_s8  ;;  %v1927_v32 = vand.u32 4294901760, %v4962_v52 }
 0x2c7   : > { %v1909_v42 = vand.u32 4294901760, %v4934_v36  ;;  %1825 = vmatpush.msrb.mxu2 %v4929_v17  ;;  %2210 = vmatpush.msra.mxu1 %v4929_v17 }
 0x2c8   : > { %v1928_v24 = vsub.f32 %v4962_v52, %v1927_v32 }
 0x2c9   : > { %v1910_v9 = vsub.f32 %v4934_v36, %v1909_v42  ;;  %2139 = vmatpush.msra.mxu0 %v1909_v42  ;;  %1827 = vmatpush.msrb.mxu2 %v4953_v51  ;;  %v1764_v42 = vld [vmem:[%s5798_s3] sm:$0xff] }
 0x2ca   : > { %1736 = vrot.lane.b32.xlu2 %v4820_v10, %s3770_s13  ;;  %1722 = vrot.lane.b32.xlu0 %v1623_v46, %s3767_s14  ;;  %v1917_v10 = vand.u32 4294901760, %v1916_v3  ;;  %v1929_v6 = vand.u32 4294901760, %v1928_v24  ;;  %v1952_v46 = vsub.f32 %v5007_v5, %v1951_v43 }
 0x2cb   : > { %v1911_v60 = vand.u32 4294901760, %v1910_v9  ;;  %2143 = vmatpush.msra.mxu0 %v1915_v44  ;;  %2212 = vmatpush.msra.mxu1 %v4953_v51  ;;  %v1957_v44 = vand.u32 4294901760, %v5024_v56  ;;  %v5038_v9 = vand.u32 4294901760, %v1764_v42 }
 0x2cc   : > { %1829 = vmatpush.msrb.mxu2 %v4955_v19  ;;  %v1953_v3 = vand.u32 4294901760, %v1952_v46  ;;  %v1789_v46 = vld [vmem:[%s5798_s3 + $0xc8] sm:$0xff] }
 0x2cd   : > { %1912 = vmatpush.msrb.mxu3 %v1911_v60  ;;  %2214 = vmatpush.msra.mxu1 %v4955_v19  ;;  %v1958_v30 = vsub.f32 %v5024_v56, %v1957_v44  ;;  %v5046_v60 = vsub.f32 %v1764_v42, %v5038_v9  ;;  %v1788_v42 = vld [vmem:[%s5798_s3 + $0xc0] sm:$0xff] }
 0x2ce   : > { %2147 = vmatpush.msra.mxu0 %v1921_v28  ;;  %1831 = vmatpush.msrb.mxu2 %v4968_v27  ;;  %v1963_v28 = vand.u32 4294901760, %v5042_v7 }
 0x2cf   : > { %1918 = vmatpush.msrb.mxu3 %v1917_v10  ;;  %2216 = vmatpush.msra.mxu1 %v4968_v27  ;;  %v1795_v10 = vld [vmem:[%s5798_s3 + $0xf8] sm:$0xff]  ;;  %v1959_v47 = vand.u32 4294901760, %v1958_v30 }
 0x2d0   : > { %2151 = vmatpush.msra.mxu0 %v1927_v32  ;;  %1833 = vmatpush.msrb.mxu2 %v4992_v45  ;;  %v1969_v32 = vand.u32 4294901760, %v5046_v60  ;;  %v5055_v37 = vand.u32 4294901760, %v1795_v10  ;;  %v1964_v24 = vsub.f32 %v5042_v7, %v1963_v28 }
 0x2d1   : > { %1924 = vmatpush.msrb.mxu3 %v1923_v61  ;;  %2218 = vmatpush.msra.mxu1 %v4992_v45 }
 0x2d2   : > { %1738 = vrot.lane.b32.xlu2 %v1587_v55, %s3770_s13  ;;  %v1933_v55 = vand.u32 4294901760, %v4975_v35  ;;  %1835 = vmatpush.msrb.mxu2 %v4994_v8  ;;  %v5062_v61 = vsub.f32 %v1795_v10, %v5055_v37  ;;  %v1965_v33 = vand.u32 4294901760, %v1964_v24 }
 0x2d3   : > { %1930 = vmatpush.msrb.mxu3 %v1929_v6  ;;  %2220 = vmatpush.msra.mxu1 %v4994_v8  ;;  %v1794_v6 = vld [vmem:[%s5798_s3 + $0xf0] sm:$0xff] }
 0x2d4   : > { %v1934_v0 = vsub.f32 %v4975_v35, %v1933_v55  ;;  %2155 = vmatpush.msra.mxu0 %v1933_v55  ;;  %1837 = vmatpush.msrb.mxu2 %v4996_v57  ;;  %v1970_v55 = vsub.f32 %v5046_v60, %v1969_v32 }
 0x2d5   : > { %2222 = vmatpush.msra.mxu1 %v4996_v57 }
 0x2d6   : > { %v1935_v1 = vand.u32 4294901760, %v1934_v0  ;;  %2159 = vmatpush.msra.mxu0 %v1939_v23  ;;  %1839 = vmatpush.msrb.mxu2 %v5017_v34  ;;  %v1971_v26 = vand.u32 4294901760, %v1970_v55  ;;  %v5072_v0 = vand.u32 4294901760, %v1794_v6 }
 0x2d7   : > { %2224 = vmatpush.msra.mxu1 %v5017_v34 }
 0x2d8   : > { %1936 = vmatpush.msrb.mxu3 %v1935_v1  ;;  %2163 = vmatpush.msra.mxu0 %v1945_v31  ;;  %v5075_v1 = vand.u32 4294901760, %v1793_v14  ;;  %v5079_v23 = vsub.f32 %v1794_v6, %v5072_v0 }
 0x2d9   : > { %2226 = vmatpush.msra.mxu1 %v5035_v13  ;;  %1841 = vmatpush.msrb.mxu2 %v5035_v13 }
 0x2da   : > { %1942 = vmatpush.msrb.mxu3 %v1941_v20  ;;  %2167 = vmatpush.msra.mxu0 %v1951_v43  ;;  %v5086_v31 = vsub.f32 %v1793_v14, %v5075_v1 }
 0x2db   : > { %2228 = vmatpush.msra.mxu1 %v5038_v9  ;;  %1843 = vmatpush.msrb.mxu2 %v5038_v9 }
 0x2dc   : > { %1948 = vmatpush.msrb.mxu3 %v1947_v22  ;;  %2171 = vmatpush.msra.mxu0 %v1957_v44 }
 0x2dd   : > { %1992 = vmatpush.msra.mxu2 %v4866_v25  ;;  %2494 = vmatpush.msrb.mxu1 %v5055_v37 }
 0x2de   : > { %1954 = vmatpush.msrb.mxu3 %v1953_v3  ;;  %2175 = vmatpush.msra.mxu0 %v1963_v28  ;;  %v1784_v28 = vld [vmem:[%s5798_s3 + $0xa0] sm:$0xff] }
 0x2df   : > { %1995 = vmatpush.msra.mxu2 %v4869_v11  ;;  %2496 = vmatpush.msrb.mxu1 %v5072_v0  ;;  %v1792_v11 = vld [vmem:[%s5798_s3 + $0xe0] sm:$0xff] }
 0x2e0   : > { %1960 = vmatpush.msrb.mxu3 %v1959_v47  ;;  %2179 = vmatpush.msra.mxu0 %v1969_v32  ;;  %v5088_v43 = vand.u32 4294901760, %v1792_v11 }
 0x2e1   : > { %1998 = vmatpush.msra.mxu2 %v4873_v54  ;;  %v5095_v54 = vand.u32 4294901760, %v1791_v49  ;;  %2498 = vmatpush.msrb.mxu1 %v5075_v1 }
 0x2e2   : > { %2426 = vmatpush.msrb.mxu0 %v5062_v61  ;;  %1966 = vmatpush.msrb.mxu3 %v1965_v33  ;;  %v5099_v2 = vsub.f32 %v1792_v11, %v5088_v43  ;;  %v5224_v33 = vand.u32 4294901760, %v5062_v61 }
 0x2e3   : > { %2001 = vmatpush.msra.mxu2 %v4877_v4  ;;  %v5104_v48 = vsub.f32 %v1791_v49, %v5095_v54  ;;  %2500 = vmatpush.msrb.mxu1 %v5088_v43 }
 0x2e4   : > { %1972 = vmatpush.msrb.mxu3 %v1971_v26  ;;  %2429 = vmatpush.msrb.mxu0 %v5079_v23  ;;  %v1780_v26 = vld [vmem:[%s5798_s3 + $0x80] sm:$0xff] }
 0x2e5   : > { %2004 = vmatpush.msra.mxu2 %v4919_v53  ;;  %v5119_v53 = vand.u32 4294901760, %v1789_v46  ;;  %2502 = vmatpush.msrb.mxu1 %v5095_v54 }
 0x2e6   : > { %2060 = vmatpush.msra.mxu3 %v4849_v16  ;;  %2432 = vmatpush.msrb.mxu0 %v5086_v31  ;;  %v1790_v16 = vld [vmem:[%s5798_s3 + $0xd0] sm:$0xff] }
 0x2e7   : > { %v5117_v20 = vand.u32 4294901760, %v1790_v16  ;;  %2007 = vmatpush.msra.mxu2 %v4934_v36  ;;  %v5129_v18 = vsub.f32 %v1789_v46, %v5119_v53  ;;  %v1787_v36 = vld [vmem:[%s5798_s3 + $0xb8] sm:$0xff] }
 0x2e8   : > { %2062 = vmatpush.msra.mxu3 %v4851_v39  ;;  %2435 = vmatpush.msrb.mxu0 %v5099_v2  ;;  %v5143_v3 = vand.u32 4294901760, %v1787_v36 }
 0x2e9   : > { %v5126_v22 = vsub.f32 %v1790_v16, %v5117_v20  ;;  %2010 = vmatpush.msra.mxu2 %v4938_v58  ;;  %2504 = vmatpush.msrb.mxu1 %v5117_v20  ;;  %v5238_v16 = vand.u32 4294901760, %v5079_v23 }
 0x2ea   : > { %2064 = vmatpush.msra.mxu3 %v4859_v59  ;;  %2438 = vmatpush.msrb.mxu0 %v5104_v48  ;;  %v5137_v59 = vand.u32 4294901760, %v1788_v42  ;;  %v5155_v58 = vsub.f32 %v1787_v36, %v5143_v3 }
 0x2eb   : > { %2013 = vmatpush.msra.mxu2 %v4959_v63  ;;  %2506 = vmatpush.msrb.mxu1 %v5119_v53  ;;  %v1785_v63 = vld [vmem:[%s5798_s3 + $0xa8] sm:$0xff] }
 0x2ec   : > { %2066 = vmatpush.msra.mxu3 %v4861_v40  ;;  %2441 = vmatpush.msrb.mxu0 %v5126_v22  ;;  %v5149_v40 = vsub.f32 %v1788_v42, %v5137_v59  ;;  %v5169_v10 = vand.u32 4294901760, %v1785_v63 }
 0x2ed   : > { %2016 = vmatpush.msra.mxu2 %v4962_v52  ;;  %2508 = vmatpush.msrb.mxu1 %v5137_v59 }
 0x2ee   : > { %2068 = vmatpush.msra.mxu3 %v4900_v50  ;;  %2444 = vmatpush.msrb.mxu0 %v5129_v18  ;;  %v1786_v50 = vld [vmem:[%s5798_s3 + $0xb0] sm:$0xff]  ;;  %v5179_v47 = vsub.f32 %v1785_v63, %v5169_v10  ;;  %v5272_v63 = vand.u32 4294901760, %v5099_v2 }
 0x2ef   : > { %v5167_v30 = vand.u32 4294901760, %v1786_v50  ;;  %2019 = vmatpush.msra.mxu2 %v4975_v35  ;;  %2510 = vmatpush.msrb.mxu1 %v5143_v3  ;;  %v1783_v35 = vld [vmem:[%s5798_s3 + $0x98] sm:$0xff] }
 0x2f0   : > { %2070 = vmatpush.msra.mxu3 %v4927_v21  ;;  %2447 = vmatpush.msrb.mxu0 %v5149_v40  ;;  %v5194_v24 = vand.u32 4294901760, %v1783_v35 }
 0x2f1   : > { %v5176_v52 = vsub.f32 %v1786_v50, %v5167_v30  ;;  %2022 = vmatpush.msra.mxu2 %v4999_v12  ;;  %2512 = vmatpush.msrb.mxu1 %v5167_v30  ;;  %v5261_v50 = vand.u32 4294901760, %v5086_v31 }
 0x2f2   : > { %2072 = vmatpush.msra.mxu3 %v4929_v17  ;;  %2450 = vmatpush.msrb.mxu0 %v5155_v58  ;;  %v5188_v17 = vand.u32 4294901760, %v1784_v28 }
 0x2f3   : > { %2025 = vmatpush.msra.mxu2 %v5004_v15  ;;  %2514 = vmatpush.msrb.mxu1 %v5169_v10  ;;  %v1781_v15 = vld [vmem:[%s5798_s3 + $0x88] sm:$0xff] }
 0x2f4   : > { %v1678_v25 = vpop.permute.xlu2 %1677  ;;  %2074 = vmatpush.msra.mxu3 %v4953_v51  ;;  %2453 = vmatpush.msrb.mxu0 %v5176_v52  ;;  %v5202_v6 = vsub.f32 %v1784_v28, %v5188_v17 }
 0x2f5   : > { %2028 = vmatpush.msra.mxu2 %v5007_v5  ;;  %2516 = vmatpush.msrb.mxu1 %v5188_v17  ;;  %v5217_v5 = vsub.f32 %v1783_v35, %v5194_v24 }
 0x2f6   : > { %2076 = vmatpush.msra.mxu3 %v4955_v19  ;;  %2456 = vmatpush.msrb.mxu0 %v5179_v47  ;;  %v1782_v19 = vld [vmem:[%s5798_s3 + $0x90] sm:$0xff] }
 0x2f7   : > { %2518 = vmatpush.msrb.mxu1 %v5194_v24  ;;  %2031 = vmatpush.msra.mxu2 %v5024_v56 }
 0x2f8   : > { %2078 = vmatpush.msra.mxu3 %v4968_v27  ;;  %v5221_v27 = vand.u32 4294901760, %v1781_v15  ;;  %2459 = vmatpush.msrb.mxu0 %v5202_v6 }
 0x2f9   : > { %2034 = vmatpush.msra.mxu2 %v5042_v7  ;;  %v2320_v7 = vsub.f32 %v5079_v23, %v5238_v16  ;;  %v5279_v23 = vand.u32 4294901760, %v5104_v48 }
 0x2fa   : > { %2080 = vmatpush.msra.mxu3 %v4992_v45  ;;  %v5241_v45 = vand.u32 4294901760, %v1780_v26  ;;  %2462 = vmatpush.msrb.mxu0 %v5217_v5 }
 0x2fb   : > { %2037 = vmatpush.msra.mxu2 %v5046_v60  ;;  %v2321_v35 = vand.u32 4294901760, %v2320_v7 }
 0x2fc   : > { %v1680_v39 = vpop.permute.xlu2 %1679  ;;  %2082 = vmatpush.msra.mxu3 %v4994_v8  ;;  %v2314_v8 = vsub.f32 %v5062_v61, %v5224_v33  ;;  %v5265_v61 = vsub.f32 %v1780_v26, %v5241_v45 }
 0x2fe   : > { %2084 = vmatpush.msra.mxu3 %v4996_v57  ;;  %v2315_v28 = vand.u32 4294901760, %v2314_v8 }
 0x2ff   : > { %v1636_v4 = vpop.permute.xlu1 %1635 }
 0x300   : > { %1648 = vst.msk [vmem:[#allocation3] sm:$0xff] %vm1647_vm15, %v1636_v4  ;;  %2086 = vmatpush.msra.mxu3 %v5017_v34 }
 0x302   : > { %v1657_v44 = vpop.permute.xlu0 %1656  ;;  %2088 = vmatpush.msra.mxu3 %v5035_v13 }
 0x303   : > { %1669 = vst.msk [vmem:[#allocation3] sm:$0xff] %vm1668_vm10, %v1657_v44 }
 0x304   : > { %1690 = vst.msk [vmem:[#allocation3] sm:$0xff] %vm1689_vm1, %v1678_v25  ;;  %v1682_v32 = vpop.permute.xlu2 %1681  ;;  %v5219_v25 = vand.u32 4294901760, %v1782_v19  ;;  %2090 = vmatpush.msra.mxu3 %v5038_v9 }
 0x306   : > { %v5233_v4 = vsub.f32 %v1782_v19, %v5219_v25  ;;  %2520 = vmatpush.msrb.mxu1 %v5219_v25 }
 0x308   : > { %v1638_v21 = vpop.permute.xlu1 %1637  ;;  %2465 = vmatpush.msrb.mxu0 %v5233_v4  ;;  %2522 = vmatpush.msrb.mxu1 %v5221_v27 }
 0x309   : > { %1649 = vst.msk [vmem:[#allocation3 + $0x18] sm:$0xff] %vm1647_vm15, %v1638_v21 }
 0x30a   : > { %2524 = vmatpush.msrb.mxu1 %v5241_v45 }
 0x30b   : > { %v1752_v55 = vld [vmem:[#allocation3] sm:$0xff] }
 0x30c   : > { %v1659_v12 = vpop.permute.xlu0 %1658  ;;  %v1844_v51 = vand.u32 4294901760, %v1752_v55  ;;  %v1684_v56 = vpop.permute.xlu2 %1683 }
 0x30d   : > { %1670 = vst.msk [vmem:[#allocation3 + $0x18] sm:$0xff] %vm1668_vm10, %v1659_v12 }
 0x30e   : > { %1691 = vst.msk [vmem:[#allocation3 + $0x18] sm:$0xff] %vm1689_vm1, %v1680_v39  ;;  %1974 = vmatmul.f32.vlgmr.msrb.gmra.mxu3 %v1844_v51  ;;  %2181 = vmatmul.f32.vlgmr.msra.gmra.mxu0 %v1844_v51  ;;  %v5214_v14 = vsub.f32 %v1752_v55, %v1844_v51  ;;  %v5249_v39 = vsub.f32 %v1781_v15, %v5221_v27 }
 0x30f   : > { %2230 = vmatmul.f32.vlgmr.msra.gmra.mxu1 %v1844_v51  ;;  %2316 = vmatpush.msrb.mxu3 %v2315_v28  ;;  %v2332_v55 = vsub.f32 %v5099_v2, %v5272_v63  ;;  %v5296_v51 = vand.u32 4294901760, %v5126_v22  ;;  %v2338_v2 = vsub.f32 %v5104_v48, %v5279_v23 }
 0x310   : > { %v1640_v11 = vpop.permute.xlu1 %1639  ;;  %v1846_v49 = vand.u32 4294901760, %v5214_v14  ;;  %2468 = vmatpush.msrb.mxu0 %v5249_v39  ;;  %2632 = vmatpush.msra.mxu1 %v5055_v37 }
 0x311   : > { %1650 = vst.msk [vmem:[#allocation3 + $0x30] sm:$0xff] %vm1647_vm15, %v1640_v11  ;;  %2322 = vmatpush.msrb.mxu3 %v2321_v35  ;;  %v5307_v11 = vand.u32 4294901760, %v5129_v18 }
 0x312   : > { %v1847_v46 = vsub.f32 %v5214_v14, %v1846_v49  ;;  %2471 = vmatpush.msrb.mxu0 %v5265_v61  ;;  %2634 = vmatpush.msra.mxu1 %v5072_v0 }
 0x313   : > { %v2350_v28 = vsub.f32 %v5129_v18, %v5307_v11 }
 0x314   : > { %v1661_v42 = vpop.permute.xlu0 %1660  ;;  %v1848_v36 = vand.u32 4294901760, %v1847_v46  ;;  %2553 = vmatpush.msra.mxu0 %v5224_v33  ;;  %v1733_v26 = vpop.permute.xlu2 %1732  ;;  %2636 = vmatpush.msra.mxu1 %v5075_v1 }
 0x315   : > { %1671 = vst.msk [vmem:[#allocation3 + $0x30] sm:$0xff] %vm1668_vm10, %v1661_v42  ;;  %v1755_v44 = vld [vmem:[#allocation3 + $0x18] sm:$0xff]  ;;  %v2333_v42 = vand.u32 4294901760, %v2332_v55 }
 0x316   : > { %1692 = vst.msk [vmem:[#allocation3 + $0x30] sm:$0xff] %vm1689_vm1, %v1682_v32  ;;  %v1852_v57 = vand.u32 4294901760, %v1755_v44  ;;  %1849 = vmatmul.f32.vlgmr.msrb.gmra.mxu2 %v1848_v36  ;;  %v2326_v32 = vsub.f32 %v5086_v31, %v5261_v50  ;;  %2557 = vmatpush.msra.mxu0 %v5238_v16  ;;  %v2339_v36 = vand.u32 4294901760, %v2338_v2 }
 0x317   : > { %2247 = vmatpush.msrb.mxu2 %v5055_v37  ;;  %2638 = vmatpush.msra.mxu1 %v5088_v43 }
 0x318   : > { %1978 = vmatmul.f32.gmra.mxu3 %v1852_v57  ;;  %2185 = vmatmul.f32.gmra.mxu0 %v1852_v57  ;;  %v5274_v21 = vsub.f32 %v1755_v44, %v1852_v57  ;;  %v1642_v34 = vpop.permute.xlu1 %1641  ;;  %v2327_v15 = vand.u32 4294901760, %v2326_v32  ;;  %v2344_v44 = vsub.f32 %v5126_v22, %v5296_v51 }
 0x319   : > { %2234 = vmatmul.f32.gmra.mxu1 %v1852_v57  ;;  %1651 = vst.msk [vmem:[#allocation3 + $0x48] sm:$0xff] %vm1647_vm15, %v1642_v34  ;;  %2561 = vmatpush.msra.mxu0 %v5261_v50  ;;  %v5328_v34 = vand.u32 4294901760, %v5155_v58 }
 0x31a   : > { %v1854_v60 = vand.u32 4294901760, %v5274_v21  ;;  %2249 = vmatpush.msrb.mxu2 %v5072_v0  ;;  %2328 = vmatpush.msrb.mxu3 %v2327_v15 }
 0x31b   : > { %2565 = vmatpush.msra.mxu0 %v5272_v63  ;;  %2640 = vmatpush.msra.mxu1 %v5095_v54 }
 0x31c   : > { %v1663_v13 = vpop.permute.xlu0 %1662  ;;  %v1855_v12 = vsub.f32 %v5274_v21, %v1854_v60  ;;  %2251 = vmatpush.msrb.mxu2 %v5075_v1  ;;  %2334 = vmatpush.msrb.mxu3 %v2333_v42  ;;  %v5353_v42 = vand.u32 4294901760, %v5202_v6 }
 0x31d   : > { %1672 = vst.msk [vmem:[#allocation3 + $0x48] sm:$0xff] %vm1668_vm10, %v1663_v13  ;;  %v1758_v31 = vld [vmem:[#allocation3 + $0x30] sm:$0xff]  ;;  %2569 = vmatpush.msra.mxu0 %v5279_v23  ;;  %v2345_v13 = vand.u32 4294901760, %v2344_v44  ;;  %2642 = vmatpush.msra.mxu1 %v5117_v20  ;;  %v5364_v44 = vand.u32 4294901760, %v5217_v5 }
 0x31e   : > { %1693 = vst.msk [vmem:[#allocation3 + $0x48] sm:$0xff] %vm1689_vm1, %v1684_v56  ;;  %v1856_v9 = vand.u32 4294901760, %v1855_v12  ;;  %v1860_v19 = vand.u32 4294901760, %v1758_v31  ;;  %v5312_v56 = vand.u32 4294901760, %v5149_v40  ;;  %2253 = vmatpush.msrb.mxu2 %v5088_v43  ;;  %2340 = vmatpush.msrb.mxu3 %v2339_v36  ;;  %v5338_v12 = vand.u32 4294901760, %v5176_v52 }
 0x31f   : > { %2573 = vmatpush.msra.mxu0 %v5296_v51  ;;  %2644 = vmatpush.msra.mxu1 %v5119_v53 }
 0x320   : > { %1857 = vmatmul.f32.gmra.mxu2 %v1856_v9  ;;  %1982 = vmatmul.f32.gmra.mxu3 %v1860_v19  ;;  %v5309_v46 = vsub.f32 %v1758_v31, %v1860_v19  ;;  %v1700_v8 = vpop.permute.xlu1 %1699  ;;  %v2356_v18 = vsub.f32 %v5149_v40, %v5312_v56  ;;  %v2351_v31 = vand.u32 4294901760, %v2350_v28  ;;  %v1735_v9 = vpop.permute.xlu2 %1734  ;;  %v2362_v40 = vsub.f32 %v5155_v58, %v5328_v34 }
 0x321   : > { %2189 = vmatmul.f32.gmra.mxu0 %v1860_v19  ;;  %2238 = vmatmul.f32.gmra.mxu1 %v1860_v19  ;;  %1711 = vst.msk [vmem:[#allocation3 + $0x8] sm:$0xff] %vm1647_vm15, %v1700_v8  ;;  %v5345_v19 = vand.u32 4294901760, %v5179_v47  ;;  %v2368_v8 = vsub.f32 %v5176_v52, %v5338_v12 }
 0x322   : > { %v1862_v48 = vand.u32 4294901760, %v5309_v46  ;;  %2255 = vmatpush.msrb.mxu2 %v5095_v54  ;;  %2346 = vmatpush.msrb.mxu3 %v2345_v13  ;;  %v2380_v13 = vsub.f32 %v5202_v6, %v5353_v42 }
 0x323   : > { %2577 = vmatpush.msra.mxu0 %v5307_v11  ;;  %v2374_v52 = vsub.f32 %v5179_v47, %v5345_v19  ;;  %2646 = vmatpush.msra.mxu1 %v5137_v59 }
 0x324   : > { %v1717_v57 = vpop.permute.xlu0 %1716  ;;  %v1863_v7 = vsub.f32 %v5309_v46, %v1862_v48  ;;  %2257 = vmatpush.msrb.mxu2 %v5117_v20  ;;  %2352 = vmatpush.msrb.mxu3 %v2351_v31 }
 0x325   : > { %1728 = vst.msk [vmem:[#allocation3 + $0x8] sm:$0xff] %vm1668_vm10, %v1717_v57  ;;  %v1761_v22 = vld [vmem:[#allocation3 + $0x48] sm:$0xff]  ;;  %2581 = vmatpush.msra.mxu0 %v5312_v56  ;;  %2648 = vmatpush.msra.mxu1 %v5143_v3 }
 0x326   : > { %1744 = vst.msk [vmem:[#allocation3 + $0x8] sm:$0xff] %vm1689_vm1, %v1733_v26  ;;  %v1864_v35 = vand.u32 4294901760, %v1863_v7  ;;  %v1868_v32 = vand.u32 4294901760, %v1761_v22  ;;  %v2357_v26 = vand.u32 4294901760, %v2356_v18  ;;  %v2363_v7 = vand.u32 4294901760, %v2362_v40  ;;  %2259 = vmatpush.msrb.mxu2 %v5119_v53 }
 0x327   : > { %2585 = vmatpush.msra.mxu0 %v5328_v34  ;;  %v5388_v18 = vand.u32 4294901760, %v5249_v39  ;;  %2650 = vmatpush.msra.mxu1 %v5167_v30 }
 0x328   : > { %1865 = vmatmul.f32.gmra.mxu2 %v1864_v35  ;;  %1986 = vmatmul.f32.gmra.mxu3 %v1868_v32  ;;  %v5342_v55 = vsub.f32 %v1761_v22, %v1868_v32  ;;  %v1702_v15 = vpop.permute.xlu1 %1701  ;;  %v5376_v35 = vand.u32 4294901760, %v5233_v4  ;;  %v1737_v40 = vpop.permute.xlu2 %1736 }
 0x329   : > { %2193 = vmatmul.f32.gmra.mxu0 %v1868_v32  ;;  %2242 = vmatmul.f32.gmra.mxu1 %v1868_v32  ;;  %1712 = vst.msk [vmem:[#allocation3 + $0x20] sm:$0xff] %vm1647_vm15, %v1702_v15  ;;  %v2369_v32 = vand.u32 4294901760, %v2368_v8  ;;  %v2386_v15 = vsub.f32 %v5217_v5, %v5364_v44  ;;  %v2381_v8 = vand.u32 4294901760, %v2380_v13  ;;  %v1797_v13 = vld [vmem:[%s5798_s3 + $0x108] sm:$0xff] }
 0x32a   : > { %v1870_v2 = vand.u32 4294901760, %v5342_v55  ;;  %2358 = vmatpush.msrb.mxu3 %v2357_v26  ;;  %2261 = vmatpush.msrb.mxu2 %v5137_v59  ;;  %v5401_v26 = vand.u32 4294901760, %v5265_v61  ;;  %v2392_v5 = vsub.f32 %v5233_v4, %v5376_v35  ;;  %v2398_v4 = vsub.f32 %v5249_v39, %v5388_v18 }
 0x32b   : > { %2589 = vmatpush.msra.mxu0 %v5338_v12  ;;  %2652 = vmatpush.msra.mxu1 %v5169_v10 }
 0x32c   : > { %v1719_v36 = vpop.permute.xlu0 %1718  ;;  %v1871_v58 = vsub.f32 %v5342_v55, %v1870_v2  ;;  %2364 = vmatpush.msrb.mxu3 %v2363_v7  ;;  %2263 = vmatpush.msrb.mxu2 %v5143_v3  ;;  %v2404_v39 = vsub.f32 %v5265_v61, %v5401_v26  ;;  %v2399_v61 = vand.u32 4294901760, %v2398_v4 }
 0x32d   : > { %1729 = vst.msk [vmem:[#allocation3 + $0x20] sm:$0xff] %vm1668_vm10, %v1719_v36  ;;  %v1753_v57 = vld [vmem:[#allocation3 + $0x8] sm:$0xff]  ;;  %2593 = vmatpush.msra.mxu0 %v5345_v19  ;;  %2654 = vmatpush.msra.mxu1 %v5188_v17 }
 0x32e   : > { %1745 = vst.msk [vmem:[#allocation3 + $0x20] sm:$0xff] %vm1689_vm1, %v1735_v9  ;;  %v1872_v28 = vand.u32 4294901760, %v1871_v58  ;;  %v5372_v22 = vand.u32 4294901760, %v1753_v57  ;;  %v2375_v9 = vand.u32 4294901760, %v2374_v52  ;;  %2370 = vmatpush.msrb.mxu3 %v2369_v32  ;;  %v2387_v52 = vand.u32 4294901760, %v2386_v15  ;;  %2265 = vmatpush.msrb.mxu2 %v5167_v30 }
 0x32f   : > { %2597 = vmatpush.msra.mxu0 %v5353_v42  ;;  %2656 = vmatpush.msra.mxu1 %v5194_v24 }
 0x330   : > { %1873 = vmatmul.f32.gmra.mxu2 %v1872_v28  ;;  %2094 = vmatmul.f32.vlgmr.msra.gmra.mxu3 %v1846_v49  ;;  %v5385_v47 = vsub.f32 %v1753_v57, %v5372_v22  ;;  %v1704_v31 = vpop.permute.xlu1 %1703  ;;  %v1799_v49 = vld [vmem:[%s5798_s3 + $0x118] sm:$0xff]  ;;  %v1798_v57 = vld [vmem:[%s5798_s3 + $0x110] sm:$0xff]  ;;  %v1739_v4 = vpop.permute.xlu2 %1738 }
 0x331   : > { %1713 = vst.msk [vmem:[#allocation3 + $0x38] sm:$0xff] %vm1647_vm15, %v1704_v31  ;;  %v5406_v36 = vand.u32 4294901760, %v1799_v49  ;;  %2376 = vmatpush.msrb.mxu3 %v2375_v9  ;;  %v5423_v32 = vand.u32 4294901760, %v1798_v57  ;;  %v2393_v31 = vand.u32 4294901760, %v2392_v5  ;;  %2601 = vmatpush.msra.mxu0 %v5364_v44  ;;  %v5444_v5 = vand.u32 4294901760, %v1797_v13 }
 0x332   : > { %2474 = vmatmul.f32.vlgmr.msrb.gmra.mxu0 %v5385_v47  ;;  %v2280_v6 = vand.u32 4294901760, %v5385_v47  ;;  %2267 = vmatpush.msrb.mxu2 %v5169_v10 }
 0x333   : > { %2382 = vmatpush.msrb.mxu3 %v2381_v8  ;;  %v5432_v9 = vsub.f32 %v1799_v49, %v5406_v36  ;;  %v2405_v49 = vand.u32 4294901760, %v2404_v39  ;;  %2605 = vmatpush.msra.mxu0 %v5376_v35 }
 0x334   : > { %v1721_v58 = vpop.permute.xlu0 %1720  ;;  %2528 = vmatmul.f32.vlgmr.msrb.gmra.mxu1 %v2280_v6  ;;  %2269 = vmatpush.msrb.mxu2 %v5188_v17 }
 0x335   : > { %1730 = vst.msk [vmem:[#allocation3 + $0x38] sm:$0xff] %vm1668_vm10, %v1721_v58  ;;  %v1756_v7 = vld [vmem:[#allocation3 + $0x20] sm:$0xff]  ;;  %2388 = vmatpush.msrb.mxu3 %v2387_v52  ;;  %v5804_v58 = vand.u32 4294901760, %v5432_v9  ;;  %2609 = vmatpush.msra.mxu0 %v5388_v18 }
 0x336   : > { %1746 = vst.msk [vmem:[#allocation3 + $0x38] sm:$0xff] %vm1689_vm1, %v1737_v40  ;;  %v5419_v28 = vand.u32 4294901760, %v1756_v7  ;;  %v1796_v40 = vld [vmem:[%s5798_s3 + $0x100] sm:$0xff]  ;;  %2658 = vmatpush.msra.mxu1 %v5219_v25  ;;  %2271 = vmatpush.msrb.mxu2 %v5194_v24 }
 0x337   : > { %2394 = vmatpush.msrb.mxu3 %v2393_v31  ;;  %2613 = vmatpush.msra.mxu0 %v5401_v26 }
 0x338   : > { %2040 = vmatmul.f32.vlgmr.msra.gmra.mxu2 %v5214_v14  ;;  %2100 = vmatmul.f32.gmra.mxu3 %v1854_v60  ;;  %v5438_v15 = vsub.f32 %v1756_v7, %v5419_v28  ;;  %v1706_v8 = vpop.permute.xlu1 %1705  ;;  %v5451_v60 = vsub.f32 %v1798_v57, %v5423_v32  ;;  %v5455_v7 = vand.u32 4294901760, %v1796_v40  ;;  %v5463_v57 = vsub.f32 %v1797_v13, %v5444_v5 }
 0x339   : > { %1714 = vst.msk [vmem:[#allocation3 + $0x50] sm:$0xff] %vm1647_vm15, %v1706_v8  ;;  %2400 = vmatpush.msrb.mxu3 %v2399_v61  ;;  %v2748_v61 = vsub.f32 %v5432_v9, %v5804_v58  ;;  %2660 = vmatpush.msra.mxu1 %v5221_v27 }
 0x33a   : > { %2479 = vmatmul.f32.gmra.mxu0 %v5438_v15  ;;  %v5802_v14 = vand.u32 4294901760, %v5438_v15  ;;  %v5803_v39 = vand.u32 4294901760, %v5451_v60  ;;  %v5476_v13 = vsub.f32 %v1796_v40, %v5455_v7  ;;  %2273 = vmatpush.msrb.mxu2 %v5219_v25 }
 0x33b   : > { %2406 = vmatpush.msrb.mxu3 %v2405_v49  ;;  %v2759_v49 = vand.u32 4294901760, %v5463_v57  ;;  %v2749_v40 = vand.u32 4294901760, %v2748_v61  ;;  %2662 = vmatpush.msra.mxu1 %v5241_v45 }
 0x33c   : > { %2534 = vmatmul.f32.gmra.mxu1 %v5802_v14  ;;  %v1723_v52 = vpop.permute.xlu0 %1722  ;;  %2693 = vmatpush.msrb.mxu0 %v5406_v36 }
 0x33d   : > { %1731 = vst.msk [vmem:[#allocation3 + $0x50] sm:$0xff] %vm1668_vm10, %v1723_v52  ;;  %v1759_v8 = vld [vmem:[#allocation3 + $0x38] sm:$0xff]  ;;  %3476 = vmatpush.msra.mxu3 %v5055_v37  ;;  %v2760_v37 = vsub.f32 %v5463_v57, %v2759_v49  ;;  %2275 = vmatpush.msrb.mxu2 %v5221_v27 }
 0x33e   : > { %1747 = vst.msk [vmem:[#allocation3 + $0x50] sm:$0xff] %vm1689_vm1, %v1739_v4  ;;  %v5466_v31 = vand.u32 4294901760, %v1759_v8  ;;  %2695 = vmatpush.msrb.mxu0 %v5423_v32  ;;  %2750 = vmatpush.msrb.mxu1 %v2749_v40  ;;  %v1757_v40 = vld [vmem:[#allocation3 + $0x28] sm:$0xff] }
 0x33f   : > { %3477 = vmatpush.msra.mxu3 %v5072_v0  ;;  %2277 = vmatpush.msrb.mxu2 %v5241_v45 }
 0x340   : > { %2045 = vmatmul.f32.gmra.mxu2 %v5274_v21  ;;  %2106 = vmatmul.f32.gmra.mxu3 %v1862_v48  ;;  %v5482_v52 = vsub.f32 %v1759_v8, %v5466_v31  ;;  %v2754_v21 = vsub.f32 %v5451_v60, %v5803_v39  ;;  %v1754_v48 = vld [vmem:[#allocation3 + $0x10] sm:$0xff]  ;;  %v2765_v8 = vand.u32 4294901760, %v5476_v13 }
 0x341   : > { %v1801_v39 = vsel %vm1630_vm5, %v1754_v48, 0  ;;  %3478 = vmatpush.msra.mxu3 %v5075_v1  ;;  %v2761_v1 = vand.u32 4294901760, %v2760_v37  ;;  %2697 = vmatpush.msrb.mxu0 %v5444_v5 }
 0x342   : > { %2484 = vmatmul.f32.gmra.mxu0 %v5482_v52  ;;  %v5805_v4 = vand.u32 4294901760, %v5482_v52  ;;  %v2755_v61 = vand.u32 4294901760, %v2754_v21  ;;  %v2766_v0 = vsub.f32 %v5476_v13, %v2765_v8  ;;  %3460 = vmatpush.msra.mxu2 %v5224_v33 }
 0x343   : > { %3479 = vmatpush.msra.mxu3 %v5088_v43  ;;  %2699 = vmatpush.msrb.mxu0 %v5455_v7  ;;  %v1804_v43 = vsel %vm1630_vm5, %v1757_v40, 0 }
 0x344   : > { %2540 = vmatmul.f32.gmra.mxu1 %v5805_v4  ;;  %v5519_v4 = vand.u32 4294901760, %v1801_v39  ;;  %3461 = vmatpush.msra.mxu2 %v5238_v16  ;;  %v2281_v16 = vsub.f32 %v5385_v47, %v2280_v6 }
 0x345   : > { %v1762_v14 = vld [vmem:[#allocation3 + $0x50] sm:$0xff]  ;;  %2756 = vmatpush.msrb.mxu1 %v2755_v61  ;;  %3480 = vmatpush.msra.mxu3 %v5095_v54  ;;  %v5540_v54 = vand.u32 4294901760, %v1804_v43 }
 0x346   : > { %v5505_v58 = vand.u32 4294901760, %v1762_v14  ;;  %3462 = vmatpush.msra.mxu2 %v5261_v50  ;;  %v2282_v47 = vand.u32 4294901760, %v2281_v16 }
 0x347   : > { %2762 = vmatpush.msrb.mxu1 %v2761_v1  ;;  %3481 = vmatpush.msra.mxu3 %v5117_v20  ;;  %v1760_v20 = vld [vmem:[#allocation3 + $0x40] sm:$0xff]  ;;  %v5555_v50 = vsub.f32 %v1804_v43, %v5540_v54 }
 0x348   : > { %2050 = vmatmul.f32.gmra.mxu2 %v5309_v46  ;;  %2112 = vmatmul.f32.gmra.mxu3 %v1870_v2  ;;  %v5517_v48 = vsub.f32 %v1762_v14, %v5505_v58  ;;  %v2767_v46 = vand.u32 4294901760, %v2766_v0  ;;  %v5531_v2 = vsub.f32 %v1801_v39, %v5519_v4 }
 0x349   : > { %3482 = vmatpush.msra.mxu3 %v5119_v53  ;;  %3463 = vmatpush.msra.mxu2 %v5272_v63  ;;  %v5826_v53 = vand.u32 4294901760, %v5432_v9  ;;  %v1807_v63 = vsel %vm1630_vm5, %v1760_v20, 0 }
 0x34a   : > { %2489 = vmatmul.f32.gmra.mxu0 %v5517_v48  ;;  %v2304_v21 = vand.u32 4294901760, %v5517_v48  ;;  %2768 = vmatpush.msrb.mxu1 %v2767_v46  ;;  %v2702_v33 = vand.u32 4294901760, %v5531_v2  ;;  %v5569_v6 = vand.u32 4294901760, %v1807_v63 }
 0x34b   : > { %3483 = vmatpush.msra.mxu3 %v5137_v59  ;;  %3464 = vmatpush.msra.mxu2 %v5279_v23  ;;  %v5827_v59 = vand.u32 4294901760, %v5451_v60  ;;  %v2710_v23 = vand.u32 4294901760, %v5555_v50 }
 0x34c   : > { %2546 = vmatmul.f32.gmra.mxu1 %v2304_v21 }
 0x34d   : > { %3484 = vmatpush.msra.mxu3 %v5143_v3  ;;  %3465 = vmatpush.msra.mxu2 %v5296_v51  ;;  %v5828_v3 = vand.u32 4294901760, %v5438_v15  ;;  %v1763_v51 = vld [vmem:[#allocation3 + $0x58] sm:$0xff] }
 0x34f   : > { %3485 = vmatpush.msra.mxu3 %v5167_v30  ;;  %3466 = vmatpush.msra.mxu2 %v5307_v11  ;;  %v2289_v14 = vsub.f32 %v5438_v15, %v5828_v3  ;;  %v2711_v30 = vsub.f32 %v5555_v50, %v2710_v23  ;;  %v1810_v11 = vsel %vm1630_vm5, %v1763_v51, 0 }
 0x350   : > { %2055 = vmatmul.f32.gmra.mxu2 %v5342_v55  ;;  %2408 = vmatmul.f32.vlgmr.msrb.gmra.mxu3 %v5372_v22  ;;  %v2703_v55 = vsub.f32 %v5531_v2, %v2702_v33  ;;  %v5598_v15 = vand.u32 4294901760, %v1810_v11 }
 0x351   : > { %3486 = vmatpush.msra.mxu3 %v5169_v10  ;;  %3467 = vmatpush.msra.mxu2 %v5312_v56  ;;  %v5584_v10 = vsub.f32 %v1807_v63, %v5569_v6  ;;  %v2290_v56 = vand.u32 4294901760, %v2289_v14 }
 0x352   : > { %2615 = vmatmul.f32.vlgmr.msra.gmra.mxu0 %v5372_v22 }
 0x353   : > { %2891 = vmatpush.msra.mxu0 %v5826_v53  ;;  %3487 = vmatpush.msra.mxu3 %v5188_v17  ;;  %v2712_v17 = vand.u32 4294901760, %v2711_v30 }
 0x354   : > { %2664 = vmatmul.f32.vlgmr.msra.gmra.mxu1 %v5372_v22  ;;  %v2704_v22 = vand.u32 4294901760, %v2703_v55  ;;  %3468 = vmatpush.msra.mxu2 %v5328_v34  ;;  %v2718_v34 = vand.u32 4294901760, %v5584_v10 }
 0x355   : > { %2895 = vmatpush.msra.mxu0 %v5827_v59  ;;  %2934 = vmatpush.msra.mxu1 %v5406_v36 }
 0x356   : > { %3488 = vmatpush.msra.mxu3 %v5194_v24  ;;  %3469 = vmatpush.msra.mxu2 %v5338_v12  ;;  %v5829_v24 = vand.u32 4294901760, %v5482_v52  ;;  %v5613_v12 = vsub.f32 %v1810_v11, %v5598_v15 }
 0x357   : > { %2936 = vmatpush.msra.mxu1 %v5423_v32  ;;  %2899 = vmatpush.msra.mxu0 %v2759_v49 }
 0x358   : > { %2283 = vmatmul.f32.vlgmr.msrb.gmra.mxu2 %v2282_v47  ;;  %2412 = vmatmul.f32.gmra.mxu3 %v5419_v28  ;;  %v2297_v39 = vsub.f32 %v5482_v52, %v5829_v24 }
 0x359   : > { %2903 = vmatpush.msra.mxu0 %v2765_v8  ;;  %2938 = vmatpush.msra.mxu1 %v5444_v5 }
 0x35a   : > { %2705 = vmatmul.f32.vlgmr.msrb.gmra.mxu0 %v2704_v22  ;;  %3489 = vmatpush.msra.mxu3 %v5219_v25  ;;  %v2719_v25 = vsub.f32 %v5584_v10, %v2718_v34 }
 0x35b   : > { %3470 = vmatpush.msra.mxu2 %v5345_v19  ;;  %2940 = vmatpush.msra.mxu1 %v5455_v7  ;;  %v2726_v19 = vand.u32 4294901760, %v5613_v12 }
 0x35c   : > { %2770 = vmatmul.f32.vlgmr.msrb.gmra.mxu1 %v5519_v4  ;;  %3490 = vmatpush.msra.mxu3 %v5221_v27  ;;  %v2298_v27 = vand.u32 4294901760, %v2297_v39 }
 0x35d   : > { %3471 = vmatpush.msra.mxu2 %v5353_v42  ;;  %v2305_v42 = vsub.f32 %v5517_v48, %v2304_v21 }
 0x35e   : > { %3491 = vmatpush.msra.mxu3 %v5241_v45  ;;  %v2720_v45 = vand.u32 4294901760, %v2719_v25 }
 0x35f   : > { %3472 = vmatpush.msra.mxu2 %v5364_v44  ;;  %v2727_v44 = vsub.f32 %v5613_v12, %v2726_v19 }
 0x360   : > { %2291 = vmatmul.f32.gmra.mxu2 %v2290_v56  ;;  %2416 = vmatmul.f32.gmra.mxu3 %v5466_v31 }
 0x361   : > { %2844 = vmatpush.msrb.mxu3 %v5406_v36  ;;  %3473 = vmatpush.msra.mxu2 %v5376_v35  ;;  %v2306_v35 = vand.u32 4294901760, %v2305_v42 }
 0x362   : > { %2713 = vmatmul.f32.gmra.mxu0 %v2712_v17 }
 0x363   : > { %2846 = vmatpush.msrb.mxu3 %v5423_v32  ;;  %3474 = vmatpush.msra.mxu2 %v5388_v18  ;;  %v2728_v18 = vand.u32 4294901760, %v2727_v44 }
 0x364   : > { %2774 = vmatmul.f32.gmra.mxu1 %v5540_v54 }
 0x365   : > { %2848 = vmatpush.msrb.mxu3 %v5444_v5  ;;  %3475 = vmatpush.msra.mxu2 %v5401_v26  ;;  %v2958_v26 = vld [vmem:[%s5799_s4] sm:$0xff] }
 0x366   : > { %v2986_v36 = vand.u32 4294901760, %v2958_v26 }
 0x367   : > { %2850 = vmatpush.msrb.mxu3 %v5455_v7  ;;  %2800 = vmatpush.msrb.mxu2 %v5432_v9 }
 0x368   : > { %2299 = vmatmul.f32.gmra.mxu2 %v2298_v27  ;;  %2420 = vmatmul.f32.gmra.mxu3 %v5505_v58  ;;  %v3037_v32 = vsub.f32 %v2958_v26, %v2986_v36 }
 0x369   : > { %2803 = vmatpush.msrb.mxu2 %v5451_v60  ;;  %3114 = vmatpush.msrb.mxu1 %v2986_v36 }
 0x36a   : > { %2721 = vmatmul.f32.gmra.mxu0 %v2720_v45  ;;  %v3038_v9 = vand.u32 4294901760, %v3037_v32 }
 0x36b   : > { %2806 = vmatpush.msrb.mxu2 %v5463_v57  ;;  %3076 = vmatpush.msrb.mxu0 %v3037_v32 }
 0x36c   : > { %2778 = vmatmul.f32.gmra.mxu1 %v5569_v6  ;;  %v3039_v5 = vsub.f32 %v3037_v32, %v3038_v9 }
 0x36d   : > { %2809 = vmatpush.msrb.mxu2 %v5476_v13 }
 0x36e   : > { %v3040_v60 = vand.u32 4294901760, %v3039_v5 }
 0x370   : > { %2307 = vmatmul.f32.gmra.mxu2 %v2306_v35  ;;  %2668 = vmatmul.f32.vlgmr.msra.gmra.mxu3 %v5419_v28 }
 0x371   : > { %3041 = vmatpush.msra.mxu3 %v3040_v60 }
 0x372   : > { %2729 = vmatmul.f32.gmra.mxu0 %v2728_v18 }
 0x374   : > { %2782 = vmatmul.f32.gmra.mxu1 %v5598_v15 }
 0x378   : > { %2619 = vmatmul.f32.vlgmr.msra.gmra.mxu2 %v5419_v28  ;;  %2672 = vmatmul.f32.gmra.mxu3 %v5466_v31  ;;  %v2960_v28 = vsel %vm270_vm0, %v4054_v38, 0 }
 0x379   : > { %2987 = vmatpush.msra.mxu2 %v2986_v36  ;;  %v5660_v7 = vand.u32 4294901760, %v2960_v28 }
 0x37a   : > { %2905 = vmatmul.f32.vlgmr.msra.gmra.mxu0 %v5519_v4 }
 0x37b   : > { %v2989_v57 = vsub.f32 %v2960_v28, %v5660_v7 }
 0x37c   : > { %2942 = vmatmul.f32.vlgmr.msra.gmra.mxu1 %v5519_v4 }
 0x37d   : > { %v2990_v52 = vand.u32 4294901760, %v2989_v57 }
 0x380   : > { %2623 = vmatmul.f32.gmra.mxu2 %v5466_v31  ;;  %2676 = vmatmul.f32.gmra.mxu3 %v5505_v58  ;;  %v2963_v31 = vsel %vm270_vm0, %v4086_v62, 0  ;;  %v2966_v62 = vsel %vm270_vm0, %v4121_v29, 0  ;;  %v2969_v29 = vsel %vm270_vm0, %v4138_v41, 0  ;;  %vm3235_vm0 = vcmask 1041409  }
 0x381   : > { %v5669_v49 = vand.u32 4294901760, %v2963_v31  ;;  %v5677_v48 = vand.u32 4294901760, %v2966_v62  ;;  %v5684_v16 = vand.u32 4294901760, %v2969_v29 }
 0x382   : > { %2909 = vmatmul.f32.gmra.mxu0 %v5540_v54 }
 0x383   : > { %v2997_v61 = vsub.f32 %v2963_v31, %v5669_v49  ;;  %v3005_v43 = vsub.f32 %v2966_v62, %v5677_v48  ;;  %v3013_v47 = vsub.f32 %v2969_v29, %v5684_v16 }
 0x384   : > { %2946 = vmatmul.f32.gmra.mxu1 %v5540_v54  ;;  %v2991_v54 = vsub.f32 %v2989_v57, %v2990_v52 }
 0x385   : > { %v2998_v0 = vand.u32 4294901760, %v2997_v61  ;;  %v3014_v41 = vand.u32 4294901760, %v3013_v47 }
 0x386   : > { %v2992_v63 = vand.u32 4294901760, %v2991_v54 }
 0x387   : > { %v2999_v22 = vsub.f32 %v2997_v61, %v2998_v0 }
 0x388   : > { %2627 = vmatmul.f32.gmra.mxu2 %v5505_v58  ;;  %2854 = vmatmul.f32.vlgmr.msrb.gmra.mxu3 %v2702_v33  ;;  %v3006_v33 = vand.u32 4294901760, %v3005_v43 }
 0x389   : > { %3192 = vmatpush.msrb.mxu3 %v2986_v36  ;;  %v3000_v14 = vand.u32 4294901760, %v2999_v22 }
 0x38a   : > { %2913 = vmatmul.f32.gmra.mxu0 %v5569_v6 }
 0x38b   : > { %v2182_v38 = vpop.f32.mrf.mxu0 }
 0x38c   : > { %2950 = vmatmul.f32.gmra.mxu1 %v5569_v6  ;;  %v2231_v37 = vpop.f32.mrf.mxu1 }
 0x390   : > { %2812 = vmatmul.f32.vlgmr.msrb.gmra.mxu2 %v5531_v2  ;;  %2860 = vmatmul.f32.gmra.mxu3 %v2710_v23 }
 0x391   : > { %3158 = vmatpush.msrb.mxu2 %v3038_v9  ;;  %v1975_v58 = vpop.f32.mrf.mxu3 }
 0x392   : > { %2917 = vmatmul.f32.gmra.mxu0 %v5598_v15 }
 0x394   : > { %2954 = vmatmul.f32.gmra.mxu1 %v5598_v15 }
 0x395   : > { %v2186_v40 = vpop.f32.mrf.mxu0 }
 0x396   : > { %v2235_v2 = vpop.f32.mrf.mxu1 }
 0x398   : > { %2817 = vmatmul.f32.gmra.mxu2 %v5555_v50  ;;  %2866 = vmatmul.f32.gmra.mxu3 %v2718_v34 }
 0x399   : > { %v1850_v13 = vpop.f32.mrf.mxu2 }
 0x39a   : > { %3079 = vmatmul.f32.vlgmr.msrb.gmra.mxu0 %v2989_v57  ;;  %v1976_v4 = vadd.f32 %v1975_v58, %v1850_v13 }
 0x39b   : > { %v1979_v8 = vpop.f32.mrf.mxu3 }
 0x39c   : > { %3118 = vmatmul.f32.vlgmr.msrb.gmra.mxu1 %v2990_v52 }
 0x39e   : > { %v2190_v53 = vpop.f32.mrf.mxu0  ;;  %v2239_v59 = vpop.f32.mrf.mxu1 }
 0x3a0   : > { %2822 = vmatmul.f32.gmra.mxu2 %v5584_v10  ;;  %2872 = vmatmul.f32.gmra.mxu3 %v2726_v19  ;;  %v3007_v10 = vsub.f32 %v3005_v43, %v3006_v33 }
 0x3a2   : > { %3084 = vmatmul.f32.gmra.mxu0 %v2997_v61  ;;  %v3008_v15 = vand.u32 4294901760, %v3007_v10 }
 0x3a3   : > { %v1858_v1 = vpop.f32.mrf.mxu2  ;;  %v1983_v21 = vpop.f32.mrf.mxu3 }
 0x3a4   : > { %v1980_v46 = vadd.f32 %v1979_v8, %v1858_v1  ;;  %3124 = vmatmul.f32.gmra.mxu1 %v2998_v0 }
 0x3a6   : > { %v2194_v51 = vpop.f32.mrf.mxu0  ;;  %v2243_v30 = vpop.f32.mrf.mxu1 }
 0x3a8   : > { %2827 = vmatmul.f32.gmra.mxu2 %v5613_v12  ;;  %3043 = vmatmul.f32.vlgmr.msra.gmra.mxu3 %v5660_v7  ;;  %v3015_v12 = vsub.f32 %v3013_v47, %v3014_v41 }
 0x3aa   : > { %3089 = vmatmul.f32.gmra.mxu0 %v3005_v43  ;;  %v3016_v35 = vand.u32 4294901760, %v3015_v12 }
 0x3ab   : > { %v1866_v20 = vpop.f32.mrf.mxu2  ;;  %v1987_v55 = vpop.f32.mrf.mxu3 }
 0x3ac   : > { %v1984_v50 = vadd.f32 %v1983_v21, %v1866_v20  ;;  %3130 = vmatmul.f32.gmra.mxu1 %v3006_v33 }
 0x3af   : > { %v2475_v24 = vpop.f32.mrf.mxu0 }
 0x3b0   : > { %2993 = vmatmul.f32.vlgmr.msra.gmra.mxu2 %v2992_v63  ;;  %3047 = vmatmul.f32.gmra.mxu3 %v5669_v49 }
 0x3b1   : > { %v2529_v25 = vpop.f32.mrf.mxu1 }
 0x3b2   : > { %3094 = vmatmul.f32.gmra.mxu0 %v3013_v47 }
 0x3b3   : > { %v1874_v23 = vpop.f32.mrf.mxu2  ;;  %v2095_v6 = vpop.f32.mrf.mxu3 }
 0x3b4   : > { %v1988_v3 = vadd.f32 %v1987_v55, %v1874_v23  ;;  %3136 = vmatmul.f32.gmra.mxu1 %v3014_v41 }
 0x3b7   : > { %v2480_v26 = vpop.f32.mrf.mxu0 }
 0x3b8   : > { %3001 = vmatmul.f32.gmra.mxu2 %v3000_v14  ;;  %3051 = vmatmul.f32.gmra.mxu3 %v5677_v48 }
 0x3b9   : > { %v2535_v5 = vpop.f32.mrf.mxu1 }
 0x3bb   : > { %v2041_v11 = vpop.f32.mrf.mxu2  ;;  %v2101_v56 = vpop.f32.mrf.mxu3 }
 0x3bc   : > { %v2042_v17 = vadd.f32 %v2041_v11, %v1976_v4 }
 0x3be   : > { %v2096_v34 = vadd.f32 %v2095_v6, %v2042_v17 }
 0x3bf   : > { %v2485_v13 = vpop.f32.mrf.mxu0 }
 0x3c0   : > { %3009 = vmatmul.f32.gmra.mxu2 %v3008_v15  ;;  %3055 = vmatmul.f32.gmra.mxu3 %v5684_v16  ;;  %v2183_v39 = vadd.f32 %v2182_v38, %v2096_v34 }
 0x3c1   : > { %v2541_v4 = vpop.f32.mrf.mxu1 }
 0x3c2   : > { %v2232_v27 = vadd.f32 %v2231_v37, %v2183_v39 }
 0x3c3   : > { %v2046_v45 = vpop.f32.mrf.mxu2  ;;  %v2107_v19 = vpop.f32.mrf.mxu3 }
 0x3c4   : > { %v2047_v42 = vadd.f32 %v2046_v45, %v1980_v46 }
 0x3c6   : > { %v2102_v44 = vadd.f32 %v2101_v56, %v2047_v42 }
 0x3c8   : > { %3017 = vmatmul.f32.gmra.mxu2 %v3016_v35  ;;  %3194 = vmatmul.f32.vlgmr.msrb.gmra.mxu3 %v5660_v7  ;;  %v2187_v18 = vadd.f32 %v2186_v40, %v2102_v44 }
 0x3c9   : > { %v2547_v40 = vpop.f32.mrf.mxu1 }
 0x3ca   : > { %v2236_v36 = vadd.f32 %v2235_v2, %v2187_v18 }
 0x3cb   : > { %v2051_v32 = vpop.f32.mrf.mxu2  ;;  %v2113_v9 = vpop.f32.mrf.mxu3 }
 0x3cc   : > { %v2052_v60 = vadd.f32 %v2051_v32, %v1984_v50 }
 0x3ce   : > { %v2108_v28 = vadd.f32 %v2107_v19, %v2052_v60 }
 0x3d0   : > { %3160 = vmatmul.f32.vlgmr.msrb.gmra.mxu2 %v5660_v7  ;;  %3198 = vmatmul.f32.gmra.mxu3 %v5669_v49  ;;  %v2191_v58 = vadd.f32 %v2190_v53, %v2108_v28  ;;  %v2490_v7 = vpop.f32.mrf.mxu0 }
 0x3d1   : > { %v2665_v55 = vpop.f32.mrf.mxu1 }
 0x3d2   : > { %v2240_v57 = vadd.f32 %v2239_v59, %v2191_v58 }
 0x3d3   : > { %v2056_v31 = vpop.f32.mrf.mxu2  ;;  %v2409_v38 = vpop.f32.mrf.mxu3 }
 0x3d4   : > { %v2057_v52 = vadd.f32 %v2056_v31, %v1988_v3 }
 0x3d6   : > { %v2114_v8 = vadd.f32 %v2113_v9, %v2057_v52 }
 0x3d8   : > { %3164 = vmatmul.f32.gmra.mxu2 %v5669_v49  ;;  %3202 = vmatmul.f32.gmra.mxu3 %v5677_v48  ;;  %v2195_v37 = vadd.f32 %v2194_v51, %v2114_v8  ;;  %v2616_v54 = vpop.f32.mrf.mxu0 }
 0x3da   : > { %v2244_v61 = vadd.f32 %v2243_v30, %v2195_v37  ;;  %v2771_v30 = vpop.f32.mrf.mxu1 }
 0x3db   : > { %v2284_v62 = vpop.f32.mrf.mxu2  ;;  %v2413_v0 = vpop.f32.mrf.mxu3 }
 0x3dc   : > { %v2285_v1 = vadd.f32 %v2284_v62, %v2232_v27 }
 0x3de   : > { %v2410_v21 = vadd.f32 %v2409_v38, %v2285_v1 }
 0x3e0   : > { %v2476_v46 = vadd.f32 %v2475_v24, %v2410_v21  ;;  %3168 = vmatmul.f32.gmra.mxu2 %v5677_v48  ;;  %3206 = vmatmul.f32.gmra.mxu3 %v5684_v16  ;;  %v2706_v48 = vpop.f32.mrf.mxu0 }
 0x3e2   : > { %v2530_v2 = vadd.f32 %v2529_v25, %v2476_v46  ;;  %v2775_v12 = vpop.f32.mrf.mxu1 }
 0x3e3   : > { %v2292_v43 = vpop.f32.mrf.mxu2  ;;  %v2417_v29 = vpop.f32.mrf.mxu3 }
 0x3e4   : > { %v2293_v33 = vadd.f32 %v2292_v43, %v2236_v36  ;;  %v2617_v22 = vadd.f32 %v2616_v54, %v2530_v2 }
 0x3e6   : > { %v2414_v49 = vadd.f32 %v2413_v0, %v2293_v33  ;;  %v2666_v14 = vadd.f32 %v2665_v55, %v2617_v22 }
 0x3e8   : > { %3172 = vmatmul.f32.gmra.mxu2 %v5684_v16  ;;  %v2481_v20 = vadd.f32 %v2480_v26, %v2414_v49  ;;  %v2707_v10 = vadd.f32 %v2706_v48, %v2666_v14  ;;  %v2714_v39 = vpop.f32.mrf.mxu0 }
 0x3ea   : > { %v2536_v50 = vadd.f32 %v2535_v5, %v2481_v20  ;;  %v2772_v56 = vadd.f32 %v2771_v30, %v2707_v10  ;;  %v2779_v36 = vpop.f32.mrf.mxu1 }
 0x3eb   : > { %v2300_v53 = vpop.f32.mrf.mxu2  ;;  %v2421_v63 = vpop.f32.mrf.mxu3 }
 0x3ec   : > { %v2301_v47 = vadd.f32 %v2300_v53, %v2240_v57 }
 0x3ee   : > { %v2418_v59 = vadd.f32 %v2417_v29, %v2301_v47 }
 0x3f0   : > { %v2486_v41 = vadd.f32 %v2485_v13, %v2418_v59  ;;  %v2722_v18 = vpop.f32.mrf.mxu0 }
 0x3f2   : > { %v2542_v23 = vadd.f32 %v2541_v4, %v2486_v41  ;;  %v2783_v52 = vpop.f32.mrf.mxu1 }
 0x3f3   : > { %v2308_v6 = vpop.f32.mrf.mxu2  ;;  %v2669_v3 = vpop.f32.mrf.mxu3 }
 0x3f4   : > { %v2309_v51 = vadd.f32 %v2308_v6, %v2244_v61 }
 0x3f6   : > { %v2422_v11 = vadd.f32 %v2421_v63, %v2309_v51 }
 0x3f8   : > { %v2491_v16 = vadd.f32 %v2490_v7, %v2422_v11  ;;  %v2730_v58 = vpop.f32.mrf.mxu0 }
 0x3fa   : > { %v2548_v17 = vadd.f32 %v2547_v40, %v2491_v16  ;;  %v2943_v0 = vpop.f32.mrf.mxu1 }
 0x3fb   : > { %v2620_v34 = vpop.f32.mrf.mxu2  ;;  %v2673_v15 = vpop.f32.mrf.mxu3 }
 0x3fc   : > { %v2621_v24 = vadd.f32 %v2620_v34, %v2536_v50 }
 0x3fe   : > { %v2670_v25 = vadd.f32 %v2669_v3, %v2621_v24 }
 0x400   : > { %v2715_v27 = vadd.f32 %v2714_v39, %v2670_v25  ;;  %v2906_v37 = vpop.f32.mrf.mxu0 }
 0x402   : > { %v2776_v45 = vadd.f32 %v2775_v12, %v2715_v27  ;;  %v2947_v29 = vpop.f32.mrf.mxu1 }
 0x403   : > { %v2624_v19 = vpop.f32.mrf.mxu2  ;;  %v2677_v42 = vpop.f32.mrf.mxu3 }
 0x404   : > { %v2625_v44 = vadd.f32 %v2624_v19, %v2542_v23 }
 0x406   : > { %v2674_v35 = vadd.f32 %v2673_v15, %v2625_v44 }
 0x408   : > { %v2723_v26 = vadd.f32 %v2722_v18, %v2674_v35  ;;  %v2910_v40 = vpop.f32.mrf.mxu0 }
 0x40a   : > { %v2780_v32 = vadd.f32 %v2779_v36, %v2723_v26  ;;  %v2951_v20 = vpop.f32.mrf.mxu1 }
 0x40b   : > { %v2628_v9 = vpop.f32.mrf.mxu2  ;;  %v2855_v5 = vpop.f32.mrf.mxu3 }
 0x40c   : > { %v2629_v60 = vadd.f32 %v2628_v9, %v2548_v17 }
 0x40e   : > { %v2678_v28 = vadd.f32 %v2677_v42, %v2629_v60 }
 0x410   : > { %v2914_v33 = vpop.f32.mrf.mxu0  ;;  %v2731_v34 = vadd.f32 %v2730_v58, %v2678_v28 }
 0x412   : > { %v5698_v63 = vpop.f32.mrf.mxu1  ;;  %v2784_v27 = vadd.f32 %v2783_v52, %v2731_v34 }
 0x413   : > { %v2813_v57 = vpop.f32.mrf.mxu2  ;;  %v2861_v31 = vpop.f32.mrf.mxu3 }
 0x414   : > { %v2814_v38 = vadd.f32 %v2813_v57, %v2772_v56 }
 0x416   : > { %v2856_v13 = vadd.f32 %v2855_v5, %v2814_v38 }
 0x418   : > { %v2918_v55 = vpop.f32.mrf.mxu0  ;;  %v2907_v51 = vadd.f32 %v2906_v37, %v2856_v13 }
 0x41a   : > { %v3119_v48 = vpop.f32.mrf.mxu1  ;;  %v2944_v16 = vadd.f32 %v2943_v0, %v2907_v51 }
 0x41b   : > { %v2818_v4 = vpop.f32.mrf.mxu2  ;;  %v2867_v8 = vpop.f32.mrf.mxu3 }
 0x41c   : > { %v2819_v61 = vadd.f32 %v2818_v4, %v2776_v45  ;;  %v3214_v45 = vmul.f32 0.3939193, %v2944_v16 }
 0x41e   : > { %v2862_v62 = vadd.f32 %v2861_v31, %v2819_v61 }
 0x420   : > { %v3080_v59 = vpop.f32.mrf.mxu0  ;;  %v2911_v39 = vadd.f32 %v2910_v40, %v2862_v62 }
 0x422   : > { %v3125_v17 = vpop.f32.mrf.mxu1  ;;  %v2948_v36 = vadd.f32 %v2947_v29, %v2911_v39 }
 0x423   : > { %v2823_v1 = vpop.f32.mrf.mxu2  ;;  %v2873_v7 = vpop.f32.mrf.mxu3 }
 0x424   : > { %v2824_v21 = vadd.f32 %v2823_v1, %v2780_v32  ;;  %v3215_v13 = vmul.f32 0.3939193, %v2948_v36 }
 0x426   : > { %v2868_v46 = vadd.f32 %v2867_v8, %v2824_v21 }
 0x428   : > { %v3085_v6 = vpop.f32.mrf.mxu0  ;;  %v2915_v9 = vadd.f32 %v2914_v33, %v2868_v46 }
 0x42a   : > { %v3131_v57 = vpop.f32.mrf.mxu1  ;;  %v2952_v52 = vadd.f32 %v2951_v20, %v2915_v9 }
 0x42b   : > { %v2828_v2 = vpop.f32.mrf.mxu2  ;;  %v3044_v43 = vpop.f32.mrf.mxu3 }
 0x42c   : > { %v2829_v35 = vadd.f32 %v2828_v2, %v2784_v27 }
 0x42e   : > { %v2874_v28 = vadd.f32 %v2873_v7, %v2829_v35 }
 0x430   : > { %v3090_v25 = vpop.f32.mrf.mxu0  ;;  %v2919_v61 = vadd.f32 %v2918_v55, %v2874_v28 }
 0x433   : > { %v2994_v49 = vpop.f32.mrf.mxu2  ;;  %v3048_v54 = vpop.f32.mrf.mxu3 }
 0x434   : > { %v3045_v22 = vadd.f32 %v3044_v43, %v2994_v49 }
 0x436   : > { %v3081_v3 = vadd.f32 %v3080_v59, %v3045_v22 }
 0x438   : > { %v3120_v10 = vadd.f32 %v3119_v48, %v3081_v3  ;;  %v3095_v4 = vpop.f32.mrf.mxu0  ;;  %v3216_v48 = vmul.f32 0.3939193, %v2952_v52  ;;  %v3137_v3 = vpop.f32.mrf.mxu1 }
 0x43b   : > { %v3002_v50 = vpop.f32.mrf.mxu2  ;;  %v3052_v53 = vpop.f32.mrf.mxu3 }
 0x43c   : > { %v3049_v30 = vadd.f32 %v3048_v54, %v3002_v50 }
 0x43e   : > { %v3086_v15 = vadd.f32 %v3085_v6, %v3049_v30 }
 0x440   : > { %v3126_v44 = vadd.f32 %v3125_v17, %v3086_v15  ;;  %v2956_v17 = vadd.f32 %v5698_v63, %v2919_v61 }
 0x443   : > { %v3010_v47 = vpop.f32.mrf.mxu2  ;;  %v3056_v41 = vpop.f32.mrf.mxu3 }
 0x444   : > { %v3053_v42 = vadd.f32 %v3052_v53, %v3010_v47 }
 0x446   : > { %v3091_v5 = vadd.f32 %v3090_v25, %v3053_v42 }
 0x448   : > { %v3132_v37 = vadd.f32 %v3131_v57, %v3091_v5 }
 0x44b   : > { %v3018_v23 = vpop.f32.mrf.mxu2  ;;  %v3195_v14 = vpop.f32.mrf.mxu3 }
 0x44c   : > { %v3057_v58 = vadd.f32 %v3056_v41, %v3018_v23 }
 0x44e   : > { %v3096_v62 = vadd.f32 %v3095_v4, %v3057_v58 }
 0x453   : > { %v3161_v11 = vpop.f32.mrf.mxu2  ;;  %v3199_v19 = vpop.f32.mrf.mxu3 }
 0x454   : > { %v3162_v56 = vadd.f32 %v3161_v11, %v3120_v10 }
 0x456   : > { %v3196_v24 = vadd.f32 %v3195_v14, %v3162_v56  ;;  %v3138_v56 = vadd.f32 %v3137_v3, %v3096_v62 }
 0x458   : > { %v3210_v12 = vmul.f32 0.91914505, %v3196_v24 }
 0x45a   : > { %v3218_v18 = vadd.f32 %v3214_v45, %v3210_v12 }
 0x45b   : > { %v3165_v26 = vpop.f32.mrf.mxu2  ;;  %v3203_v0 = vpop.f32.mrf.mxu3 }
 0x45c   : > { %v3166_v32 = vadd.f32 %v3165_v26, %v3126_v44  ;;  %v5700_v31 = vclamps-f32 %v3218_v18, 256.0  ;;  %v3217_v18 = vmul.f32 0.3939193, %v2956_v17 }
 0x45e   : > { %v3200_v60 = vadd.f32 %v3199_v19, %v3166_v32  ;;  %v3262_v21 = vrot.slane %v5700_v31, 3  ;;  %v3253_v7 = vrot.slane %v5700_v31, 2  ;;  %v3244_v2 = vrot.slane %v5700_v31, 1 }
 0x45f   : > { %v3291_v43 = vrot.slane %v5700_v31, 6  ;;  %v3281_v29 = vrot.slane %v5700_v31, 5  ;;  %v3271_v33 = vrot.slane %v5700_v31, 4  ;;  %v3301_v49 = vrot.slane %v5700_v31, 7 }
 0x460   : > { %v3211_v38 = vmul.f32 0.91914505, %v3200_v60 }
 0x462   : > { %v3219_v8 = vadd.f32 %v3215_v13, %v3211_v38 }
 0x463   : > { %v3169_v1 = vpop.f32.mrf.mxu2  ;;  %v3207_v24 = vpop.f32.mrf.mxu3 }
 0x464   : > { %v5703_v40 = vclamps-f32 %v3219_v8, 256.0  ;;  %v3170_v46 = vadd.f32 %v3169_v1, %v3132_v37 }
 0x466   : > { %v3204_v54 = vadd.f32 %v3203_v0, %v3170_v46  ;;  %v3263_v20 = vrot.slane %v5703_v40, 2  ;;  %v3254_v55 = vrot.slane %v5703_v40, 1  ;;  %v3245_v50 = vsel %vm3235_vm0, %v5703_v40, %v3244_v2 }
 0x467   : > { %v3292_v53 = vrot.slane %v5703_v40, 5  ;;  %v3282_v47 = vrot.slane %v5703_v40, 4  ;;  %v3272_v59 = vrot.slane %v5703_v40, 3  ;;  %v3302_v41 = vrot.slane %v5703_v40, 6 }
 0x468   : > { %v3212_v22 = vmul.f32 0.91914505, %v3204_v54  ;;  %v3264_v23 = vsel %vm3235_vm0, %v3263_v20, %v3262_v21  ;;  %v3255_v6 = vsel %vm3235_vm0, %v3254_v55, %v3253_v7  ;;  %v3234_v28 = vrot.slane %v5703_v40, 7 }
 0x469   : > { %v3293_v14 = vsel %vm3235_vm0, %v3292_v53, %v3291_v43  ;;  %v3283_v51 = vsel %vm3235_vm0, %v3282_v47, %v3281_v29  ;;  %v3273_v30 = vsel %vm3235_vm0, %v3272_v59, %v3271_v33  ;;  %v3303_v10 = vsel %vm3235_vm0, %v3302_v41, %v3301_v49 }
 0x46a   : > { %v3220_v11 = vadd.f32 %v3216_v48, %v3212_v22  ;;  %v3236_v61 = vsel %vm3235_vm0, %v3234_v28, %v5700_v31 }
 0x46b   : > { %v3173_v16 = vpop.f32.mrf.mxu2 }
 0x46c   : > { %v3452_v34 = vclamps-f32 %v3220_v11, 256.0  ;;  %v3174_v15 = vadd.f32 %v3173_v16, %v3138_v56 }
 0x46e   : > { %v3208_v39 = vadd.f32 %v3207_v24, %v3174_v15  ;;  %v3265_v25 = vrot.slane %v3452_v34, 1  ;;  %v3256_v12 = vsel %vm3238_vm2, %v3452_v34, %v3255_v6  ;;  %v3246_v27 = vrot.slane %v3452_v34, 7 }
 0x46f   : > { %v3294_v45 = vrot.slane %v3452_v34, 4  ;;  %v3284_v19 = vrot.slane %v3452_v34, 3  ;;  %v3274_v42 = vrot.slane %v3452_v34, 2  ;;  %v3304_v44 = vrot.slane %v3452_v34, 5 }
 0x470   : > { %v3213_v35 = vmul.f32 0.91914505, %v3208_v39  ;;  %v3266_v26 = vsel %vm3238_vm2, %v3265_v25, %v3264_v23  ;;  %v3247_v36 = vsel %vm3238_vm2, %v3246_v27, %v3245_v50  ;;  %v3237_v7 = vrot.slane %v3452_v34, 6 }
 0x471   : > { %v3295_v63 = vsel %vm3238_vm2, %v3294_v45, %v3293_v14  ;;  %v3285_v32 = vsel %vm3238_vm2, %v3284_v19, %v3283_v51  ;;  %v3275_v9 = vsel %vm3238_vm2, %v3274_v42, %v3273_v30  ;;  %v3305_v5 = vsel %vm3238_vm2, %v3304_v44, %v3303_v10 }
 0x472   : > { %v3221_v60 = vadd.f32 %v3217_v18, %v3213_v35  ;;  %v3239_v31 = vsel %vm3238_vm2, %v3237_v7, %v3236_v61 }
 0x474   : > { %v3453_v57 = vclamps-f32 %v3221_v60, 256.0 }
 0x476   : > { %v3267_v58 = vsel %vm3241_vm3, %v3453_v57, %v3266_v26  ;;  %v3257_v38 = vrot.slane %v3453_v57, 7  ;;  %v3248_v13 = vrot.slane %v3453_v57, 6  ;;  %v3296_v52 = vrot.slane %v3453_v57, 3 }
 0x477   : > { %3268 = vrot.lane.b32.xlu2 %v3267_v58, %s3768_s15  ;;  %v3286_v4 = vrot.slane %v3453_v57, 2  ;;  %v3276_v8 = vrot.slane %v3453_v57, 1  ;;  %v3306_v37 = vrot.slane %v3453_v57, 4  ;;  %s3771_s15 = smov 80   ;;  %v3240_v2 = vrot.slane %v3453_v57, 5 }
 0x478   : > { %v3258_v62 = vsel %vm3241_vm3, %v3257_v38, %v3256_v12  ;;  %v3249_v0 = vsel %vm3241_vm3, %v3248_v13, %v3247_v36  ;;  %v3297_v1 = vsel %vm3241_vm3, %v3296_v52, %v3295_v63 }
 0x479   : > { %3259 = vrot.lane.b32.xlu0 %v3258_v62, %s3763_s8  ;;  %3250 = vrot.lane.b32.xlu1 %v3249_v0, %s5830_s26  ;;  %v3287_v21 = vsel %vm3241_vm3, %v3286_v4, %v3285_v32  ;;  %v3277_v40 = vsel %vm3241_vm3, %v3276_v8, %v3275_v9  ;;  %v3307_v46 = vsel %vm3241_vm3, %v3306_v37, %v3305_v5  ;;  %s3772_s8 = smov 112   ;;  %s3326_s26 = scalar_lea.sflag [#allocation5], %s240_s10 }
 0x47a   : > { %v3242_v43 = vsel %vm3241_vm3, %v3240_v2, %v3239_v31 }
 0x47f   : > { %3298 = vrot.lane.b32.xlu2 %v3297_v1, %s3770_s13  ;;  %s3431_s13 = sshll.u32 %s240_s10, 2 }
 0x480   : > { %s242_s22 = scalar_lea.vmem [#allocation4], %s3431_s13  ;;  %s3685_s13 = scalar_lea.hbm %s5800_s5, 16 }
 0x481   : > { %3288 = vrot.lane.b32.xlu0 %v3287_v21, %s3771_s15  ;;  %3278 = vrot.lane.b32.xlu1 %v3277_v40, %s3767_s14  ;;  %s3340_s21 = sshll.u32 %s242_s22, 4  ;;  %s3679_s15 = sshra.s32 %s3343_s17, 4  ;;  %s3341_s21 = int_to_ptr.vmem [resolvable:$true] %s3340_s21  ;;  %s3680_s15 = int_to_ptr.hbm [resolvable:$true] %s3679_s15 }
 0x482   : > { %p3686_p2 = scmp.lt.s32.totalorder %s3680_s15, %s5800_s5 }
 0x489   : > { %3308 = vrot.lane.b32.xlu1 %v3307_v46, %s3772_s8  ;;  %s3681_s8 = scalar_lea.hbm %s3680_s15, 4 }
 0x48a   : > { %p3682_p13 = scmp.ne.s32.totalorder %s3680_s15, %s3681_s8  ;;  %p3687_p4 = scmp.lt.s32.totalorder %s3685_s13, %s3681_s8 }
 0x48c   : > { %p3683_p0 = pnand %p3682_p13, %p3854_p3  ;;  %p3688_p5 = por %p3687_p4, %p3686_p2 }
 0x48e   : > { %p3684_p1 = pneg %p3683_p0 }
 0x490   : > { %p3689_p6 = pnand %p3688_p5, %p3684_p1 }
 0x4d1   : > { %v3269_v54 = vpop.permute.xlu2 %3268 }
 0x4d9   : > { %v3299_v41 = vpop.permute.xlu2 %3298 }
 0x4eb   : > { %v3260_v29 = vpop.permute.xlu0 %3259  ;;  %v3251_v33 = vpop.permute.xlu1 %3250 }
 0x4ec   : > { %v3312_v49 = vsel %vm3311_vm4, %v3242_v43, %v3251_v33 }
 0x4ed   : > { %v3313_v20 = vsel %vm1630_vm5, %v3312_v49, %v3260_v29  ;;  %vm3322_vm5 = vcmask 916480  }
 0x4ee   : > { %v3315_v50 = vsel %vm3314_vm6, %v3313_v20, %v3269_v54 }
 0x4f3   : > { %v3279_v55 = vpop.permute.xlu1 %3278  ;;  %v3289_v53 = vpop.permute.xlu0 %3288 }
 0x4f4   : > { %v3317_v47 = vsel %vm3316_vm7, %v3315_v50, %v3279_v55 }
 0x4f5   : > { %v3319_v59 = vsel %vm3318_vm8, %v3317_v47, %v3289_v53 }
 0x4f6   : > { %v3321_v48 = vsel %vm3320_vm9, %v3319_v59, %v3299_v41 }
 0x4fb   : > { %v3309_v22 = vpop.permute.xlu1 %3308 }
 0x4fc   : > { %v3323_v23 = vsel %vm3322_vm5, %v3321_v48, %v3309_v22 }
 0x4fd   : > { %3324 = vst [vmem:[%s242_s22] sm:$0xf] %v3323_v23 }
 0x4fe   : > { %3692 = shalt.err (!%p3689_p6)
}
 0x4ff   : > { %3493 = dma.vmem_to_hbm [thread:$0]  (%p3854_p3), %s3341_s21, 64, %s3343_s17, %s3326_s26  }
 0x500 PF: > { %p3499_p7 = scmp.ge.s32.totalorder %s3759_s25, 2  ;;  %s3354_s10 = sand.u32 1, %s3731_s18  }
 0x501   : > { %s3355_s9 = scalar_lea.sflag [#allocation5], %s3354_s10 }
 0x502   : > { %p3496_p9 = pnand %p3499_p7, %p3863_p8 }
 0x504   : > { %p3497_p10 = pneg %p3496_p9 }
 0x506   : > { %3726 = dma.done.wait (%p3497_p10), %s3355_s9, 64  }
 0x507   : > { %3728 = vsyncadd (%p3497_p10), %s3355_s9, 4294967232  ;;  %s18_s25 = sadd.s32 1, %s3759_s25   ;;  %s5831_s18 = smov %s3735_s19 }
 0x508   : > { %p15_p11 = scmp.ge.s32.totalorder %s18_s25, 6   ;;  %s5832_s19 = smov %s3739_s20 }
 0x509   : > { %s5833_s20 = smov %s3872_s11  ;;  %s5834_s21 = smov %s3751_s23 }
 0x50a   : > { %s5835_s22 = smov %s3755_s24  ;;  %s5836_s23 = smov %s5839_s28 }
 0x50b   : > { %s5837_s24 = smov %s5843_s29  ;;  %17 = sbr.rel (!%p15_p11) target bundleno = 5 (0x5), region = 79 }
 0x510   :  { %3361 = vsyncpa [#allocation5], 1 }
 0x511   :  { %3363 = vsyncpa [#allocation5 + $0x1], 1 }

</bundles_post_ra>
